<compile_context>
chip_gen: v7x
topology: tpu7x:2x2x1
jax: 0.10.0
libtpu: 0.0.40
codegen_flags: <defaults>
</compile_context>

<pallas_src>
import functools
import math

import numpy as np
import jax
import jax.numpy as jnp
from jax import lax
from jax.experimental import pallas as pl
from jax.experimental.pallas import tpu as pltpu


# ----------------------------------------------------------------------------
# Host-side helpers (replicate Pyraformer's get_mask / refer_points / pos-emb)
# ----------------------------------------------------------------------------
def get_mask(input_size, window_size, inner_size):
    all_size = [input_size]
    for ws in window_size:
        all_size.append(math.floor(all_size[-1] / ws))
    seq_length = sum(all_size)
    mask = np.zeros((seq_length, seq_length), dtype=np.float32)

    inner_window = inner_size // 2
    for layer_idx in range(len(all_size)):
        start = sum(all_size[:layer_idx])
        for i in range(start, start + all_size[layer_idx]):
            left = max(i - inner_window, start)
            right = min(i + inner_window + 1, start + all_size[layer_idx])
            mask[i, left:right] = 1

    for layer_idx in range(1, len(all_size)):
        start = sum(all_size[:layer_idx])
        for i in range(start, start + all_size[layer_idx]):
            left = (start - all_size[layer_idx - 1]) + (i - start) * window_size[layer_idx - 1]
            if i == (start + all_size[layer_idx] - 1):
                right = start
            else:
                right = (start - all_size[layer_idx - 1]) + (i - start + 1) * window_size[layer_idx - 1]
            mask[i, left:right] = 1
            mask[left:right, i] = 1

    mask = 1.0 - mask  # 1.0 == masked (torch: True == masked)
    return mask, all_size


def refer_points(all_sizes, window_size):
    input_size = all_sizes[0]
    indexes = np.zeros((input_size, len(all_sizes)), dtype=np.int32)
    for i in range(input_size):
        indexes[i, 0] = i
        former_index = i
        for j in range(1, len(all_sizes)):
            start = sum(all_sizes[:j])
            inner_layer_idx = former_index - (start - all_sizes[j - 1])
            former_index = start + min(inner_layer_idx // window_size[j - 1], all_sizes[j] - 1)
            indexes[i, j] = former_index
    return indexes  # (input_size, n_levels)


def positional_embedding(max_len, d_model):
    pe = np.zeros((max_len, d_model), dtype=np.float32)
    position = np.arange(0, max_len, dtype=np.float32)[:, None]
    div_term = np.exp(np.arange(0, d_model, 2, dtype=np.float32) * -(math.log(10000.0) / d_model))
    pe[:, 0::2] = np.sin(position * div_term)
    pe[:, 1::2] = np.cos(position * div_term)
    return pe


# ----------------------------------------------------------------------------
# In-kernel helper math (traced inside the Pallas kernel)
# ----------------------------------------------------------------------------
def _layer_norm(x, g, b, eps):
    mu = jnp.mean(x, axis=-1, keepdims=True)
    xc = x - mu
    var = jnp.mean(xc * xc, axis=-1, keepdims=True)
    return xc * lax.rsqrt(var + eps) * g + b


def _gelu(x):  # exact (erf) GELU == torch.nn.functional.gelu default
    return 0.5 * x * (1.0 + lax.erf(x * np.float32(1.0 / np.sqrt(2.0))))


def _elu(x):   # nn.ELU(alpha=1); exp on clamped arg to avoid inf in unselected lane
    return jnp.where(x > 0, x, jnp.exp(jnp.minimum(x, 0.0)) - 1.0)


# ----------------------------------------------------------------------------
# The fused encoder kernel (one grid step == TB batch elements)
# ----------------------------------------------------------------------------
def _encoder_kernel(*refs, TB, L0, all_size, window_size, d_bot, d_model, d_inner,
                    H, dk, dv, n_layer, offs, out_pad):
    f32 = jnp.float32
    n_lvl = len(window_size)
    n_pyr = len(all_size)
    Ltot = int(sum(all_size))
    Lf = TB * Ltot                       # folded pyramid length (all TB samples, level-major)
    R0 = TB * L0                         # folded input length

    x_ref, xm_ref, mask_ref, gmat_ref = refs[:4]
    sel_refs = refs[4:4 + n_lvl]
    (wmisc_ref, w16_ref, vecs_ref, wqkv_ref, fcw_ref,
     w1_ref, w2_ref, o_ref) = refs[4 + n_lvl:]

    # Small packed tables: load once, slice as plain array slices.
    wmisc = wmisc_ref[...]               # (emb_rows + L0 + d_bot, d_model)
    vecs = vecs_ref[...]                 # (n_vec_rows, VEC_W) zero-padded rows

    def vec(row, width):                 # (1, width) bias / LN row
        return vecs[row:row + 1, :width]

    emb_rows = offs["emb_rows"]
    emb_w = wmisc[offs["emb"]:offs["emb"] + emb_rows, :]
    pe = wmisc[offs["pe"]:offs["pe"] + L0, :]
    up_w = wmisc[offs["up"]:offs["up"] + d_bot, :]

    # ---- DataEmbedding: circular k=3 token conv + time linear + PE, all fused in ONE matmul ----
    x2 = x_ref[...]                      # (TB*L0, enc_in)  batch folded into rows
    xm2 = xm_ref[...]                    # (TB*L0, ntf)
    xp_chunks, xn_chunks = [], []
    for b in range(TB):                  # circular shift within each sample (static slice + concat)
        blk = x2[b * L0:(b + 1) * L0, :]
        xp_chunks.append(jnp.concatenate([blk[L0 - 1:, :], blk[:L0 - 1, :]], axis=0))  # x[t-1]
        xn_chunks.append(jnp.concatenate([blk[1:, :], blk[:1, :]], axis=0))            # x[t+1]
    x_prev = jnp.concatenate(xp_chunks, axis=0)
    x_next = jnp.concatenate(xn_chunks, axis=0)
    x_all = jnp.concatenate([x_prev, x2, x_next, xm2], axis=-1)   # (R0, 3*enc_in + ntf)
    seq0 = jnp.dot(x_all, emb_w, preferred_element_type=f32)
    seq0 = seq0 + jnp.concatenate([pe] * TB, axis=0)              # (R0, d_model)

    # ---- Bottleneck_Construct (CSCM): down -> strided convs (kernel==stride) -> up -> LN ----
    cur = jnp.dot(seq0, w16_ref[0], preferred_element_type=f32) + vec(0, d_bot)   # (R0, d_bot)
    lvl_outs = []
    lin = L0
    for li, ws in enumerate(window_size):
        lout = lin // ws
        # host-precomputed selection matrix: rows = [tau0 rows ; tau1 rows ; ...] (per sample, folded)
        sel = jnp.dot(sel_refs[li][...], cur, preferred_element_type=f32)          # (ws*TB*lout, d_bot)
        taps = [sel[t * TB * lout:(t + 1) * TB * lout, :] for t in range(ws)]
        z = jnp.concatenate(taps, axis=-1)                                         # (TB*lout, ws*d_bot)
        cur = _elu(jnp.dot(z, w16_ref[1 + li], preferred_element_type=f32) + vec(1 + li, d_bot))
        lvl_outs.append(cur)
        lin = lout
    up = (jnp.dot(jnp.concatenate(lvl_outs, axis=0), up_w, preferred_element_type=f32)
          + vec(1 + n_lvl, d_model))
    seq = jnp.concatenate([seq0, up], axis=0)                                      # (Lf, d_model)
    seq = _layer_norm(seq, vec(2 + n_lvl, d_model), vec(3 + n_lvl, d_model), 1e-5)

    # ---- EncoderLayer stack (post-norm MHA + post-norm FFN), heads batched ----
    # Block-diagonal additive mask (cross-sample entries = -1e9) makes the folded attention exact.
    mask3 = jnp.broadcast_to(mask_ref[...], (H, Lf, Lf))          # hoisted out of the layer loop
    for li in range(n_layer):
        base = 4 + n_lvl + li * 7
        residual = seq
        qkv = jnp.dot(seq, wqkv_ref[li], preferred_element_type=f32)   # (Lf, H*(2dk+dv)), q pre-scaled
        q = jnp.stack([qkv[:, h * dk:(h + 1) * dk] for h in range(H)], axis=0)                    # (H,Lf,dk)
        k = jnp.stack([qkv[:, H * dk + h * dk:H * dk + (h + 1) * dk] for h in range(H)], axis=0)  # (H,Lf,dk)
        v = jnp.stack([qkv[:, 2 * H * dk + h * dv:2 * H * dk + (h + 1) * dv] for h in range(H)],
                      axis=0)                                                                      # (H,Lf,dv)
        s = jnp.einsum('hqd,hkd->hqk', q, k, preferred_element_type=f32) + mask3
        s = s - jnp.max(s, axis=-1, keepdims=True)
        p = jnp.exp(s)
        p = p * pl.reciprocal(jnp.sum(p, axis=-1, keepdims=True), approx=True)
        heads = jnp.einsum('hqk,hkd->hqd', p, v, preferred_element_type=f32)       # (H, Lf, dv)
        headcat = jnp.concatenate([heads[h] for h in range(H)], axis=-1)            # (Lf, H*dv)
        attn = jnp.dot(headcat, fcw_ref[li], preferred_element_type=f32) + vec(base + 0, d_model)
        seq = _layer_norm(attn + residual, vec(base + 1, d_model), vec(base + 2, d_model), 1e-6)

        residual = seq
        h1 = _gelu(jnp.dot(seq, w1_ref[li], preferred_element_type=f32) + vec(base + 3, d_inner))
        h2 = jnp.dot(h1, w2_ref[li], preferred_element_type=f32) + vec(base + 4, d_model)
        seq = _layer_norm(h2 + residual, vec(base + 5, d_model), vec(base + 6, d_model), 1e-6)

    # ---- FC decoder: pyramid gather (one matmul per pyramid level) + single lane-dense store ----
    parts = [jnp.dot(gmat_ref[j], seq, preferred_element_type=f32) for j in range(n_pyr)]
    if out_pad:
        parts.append(jnp.zeros((R0, out_pad), f32))
    o_ref[...] = jnp.concatenate(parts, axis=-1)                   # (R0, 128) unmasked store


# ----------------------------------------------------------------------------
# Wrapper
# ----------------------------------------------------------------------------
def encoder_forward(params, x_enc, x_mark_enc, cfg):
    TB = params["TB"]
    B, L0, enc_in = x_enc.shape
    ntf = x_mark_enc.shape[-1]
    assert B % TB == 0, "batch must be divisible by TB"
    assert (TB * L0) % 8 == 0, "folded rows must be sublane-aligned"

    d_model = cfg["d_model"]
    d_bot = cfg["d_bottleneck"]
    d_inner = cfg["d_inner_hid"]
    H, dk, dv = cfg["n_head"], cfg["d_k"], cfg["d_v"]
    n_layer = cfg["n_layer"]
    window_size = tuple(cfg["window_size"])
    all_size = tuple(cfg["all_size"])
    n_pyr = len(all_size)

    out_w = n_pyr * d_model
    out_wp = int(pl.cdiv(out_w, 128)) * 128          # pad output lanes to 128 for a dense store
    out_pad = out_wp - out_w

    kern = functools.partial(
        _encoder_kernel, TB=TB, L0=L0, all_size=all_size, window_size=window_size,
        d_bot=d_bot, d_model=d_model, d_inner=d_inner, H=H, dk=dk, dv=dv,
        n_layer=n_layer, offs=params["offs"], out_pad=out_pad)

    # Fold batch into rows host-side (free reshapes) so the kernel is purely 2D on activations.
    x2 = x_enc.reshape(B * L0, enc_in)
    xm2 = x_mark_enc.reshape(B * L0, ntf)

    inputs = [x2, xm2, params["mask"], params["gmat"], *params["sel"],
              params["wmisc"], params["w16"], params["vecs"], params["wqkv"],
              params["fcw"], params["w1"], params["w2"]]

    def shared_spec(a):
        nd = a.ndim
        return pl.BlockSpec(a.shape, lambda g, _nd=nd: (0,) * _nd)

    in_specs = [pl.BlockSpec((TB * L0, enc_in), lambda g: (g, 0)),
                pl.BlockSpec((TB * L0, ntf), lambda g: (g, 0))]
    in_specs += [shared_spec(a) for a in inputs[2:]]

    out_shape = jax.ShapeDtypeStruct((B * L0, out_wp), jnp.float32)
    out_spec = pl.BlockSpec((TB * L0, out_wp), lambda g: (g, 0))

    out2d = pl.pallas_call(
        kern,
        out_shape=out_shape,
        grid=(B // TB,),
        in_specs=in_specs,
        out_specs=out_spec,
        compiler_params=pltpu.CompilerParams(dimension_semantics=("parallel",)),
    )(*inputs)

    return out2d[:, :out_w].reshape(B, L0, out_w)


# ----------------------------------------------------------------------------
# Parameter init (deterministic, synthetic) — packed into "kernel layout"
# ----------------------------------------------------------------------------
def init_params(key, cfg, mask_np, indexes_np, all_size, TB):
    d_model, enc_in, ntf = cfg["d_model"], cfg["enc_in"], cfg["num_time_features"]
    d_bot, d_inner = cfg["d_bottleneck"], cfg["d_inner_hid"]
    H, dk, dv = cfg["n_head"], cfg["d_k"], cfg["d_v"]
    ws_list, n_layer = cfg["window_size"], cfg["n_layer"]
    L0 = all_size[0]
    Ltot = int(sum(all_size))
    n_pyr = len(all_size)
    n_lvl = len(ws_list)
    Lf = TB * Ltot

    assert all(ws * d_bot == d_model for ws in ws_list), "w16 packing assumes ws*d_bot == d_model"

    keys = iter(jax.random.split(key, 64))
    nrm = lambda k, shape: 0.02 * jax.random.normal(k, shape, dtype=jnp.float32)

    p = {"TB": TB}

    # ---- DataEmbedding: fused [x[t-1] | x[t] | x[t+1] | mark] @ emb_w (token conv has no bias) ----
    tok = nrm(next(keys), (d_model, enc_in, 3))              # Conv1d weight (out, in, k), circular pad
    tok_taps = jnp.transpose(tok, (2, 1, 0)).reshape(3 * enc_in, d_model)   # tap0|tap1|tap2 row blocks
    time_w = nrm(next(keys), (ntf, d_model))
    emb_w = jnp.concatenate([tok_taps, time_w], axis=0)      # (3*enc_in + ntf, d_model)
    pe = jnp.asarray(positional_embedding(L0, d_model))      # (L0, d_model)
    up_w = nrm(next(keys), (d_bot, d_model))
    emb_rows = 3 * enc_in + ntf
    p["offs"] = {"emb": 0, "emb_rows": emb_rows, "pe": emb_rows, "up": emb_rows + L0}
    p["wmisc"] = jnp.concatenate([emb_w, pe, up_w], axis=0)  # packed 32-lane table

    # ---- Bottleneck_Construct weights (eval BatchNorm1d, default stats, folded into conv) ----
    down_w = nrm(next(keys), (d_model, d_bot))
    bn_scale = float(1.0 / np.sqrt(1.0 + 1e-5))
    conv_fulls, conv_bs = [], []
    for ws in ws_list:
        w = nrm(next(keys), (d_bot, d_bot, ws))              # Conv1d weight (out, in, k), k == stride
        b = nrm(next(keys), (d_bot,))
        conv_fulls.append(jnp.transpose(w, (2, 1, 0)).reshape(ws * d_bot, d_bot) * bn_scale)
        conv_bs.append(np.asarray(b) * bn_scale)
    p["w16"] = jnp.stack([down_w] + conv_fulls)              # (1+n_lvl, d_model, d_bot)

    # ---- Encoder layers: fused QKV (1/temperature folded into Wq), stacked across layers ----
    inv_temp = 1.0 / float(np.sqrt(dk))
    wqkv, fcw, w1, w2 = [], [], [], []
    for _ in range(n_layer):
        wq = nrm(next(keys), (d_model, H * dk)) * inv_temp
        wk = nrm(next(keys), (d_model, H * dk))
        wv = nrm(next(keys), (d_model, H * dv))
        wqkv.append(jnp.concatenate([wq, wk, wv], axis=1))   # (d_model, H*(2dk+dv))
        fcw.append(nrm(next(keys), (H * dv, d_model)))
        w1.append(nrm(next(keys), (d_model, d_inner)))
        w2.append(nrm(next(keys), (d_inner, d_model)))
    p["wqkv"] = jnp.stack(wqkv)
    p["fcw"] = jnp.stack(fcw)
    p["w1"] = jnp.stack(w1)
    p["w2"] = jnp.stack(w2)

    # ---- Packed bias / LayerNorm vector table (rows zero-padded to VEC_W lanes) ----
    VEC_W = max(d_model, d_inner, d_bot)

    def row(v):
        v = np.asarray(v, np.float32).reshape(-1)
        out = np.zeros((VEC_W,), np.float32)
        out[:v.shape[0]] = v
        return out

    rows = [row(np.zeros(d_bot))]                            # 0: down bias
    for cb in conv_bs:
        rows.append(row(cb))                                 # 1..n_lvl: conv biases (BN-folded)
    rows.append(row(np.zeros(d_model)))                      # up bias
    rows.append(row(np.ones(d_model)))                       # CSCM LN gamma
    rows.append(row(np.zeros(d_model)))                      # CSCM LN beta
    for _ in range(n_layer):
        rows.append(row(np.zeros(d_model)))                  # attn fc bias (structurally present)
        rows.append(row(np.ones(d_model)))                   # LN1 gamma
        rows.append(row(np.zeros(d_model)))                  # LN1 beta
        rows.append(row(np.zeros(d_inner)))                  # FFN b1
        rows.append(row(np.zeros(d_model)))                  # FFN b2
        rows.append(row(np.ones(d_model)))                   # LN2 gamma
        rows.append(row(np.zeros(d_model)))                  # LN2 beta
    p["vecs"] = jnp.asarray(np.stack(rows))

    # ---- Folded (level-major, then sample) attention mask bias ----
    mask_bias = mask_np.astype(np.float32) * np.float32(-1e9)   # (Ltot, Ltot): 0 keep, -1e9 masked
    fold_orig = np.zeros(Lf, np.int64)
    fold_samp = np.zeros(Lf, np.int64)
    r = 0
    for l, sz in enumerate(all_size):
        st = int(sum(all_size[:l]))
        for b in range(TB):
            for i in range(sz):
                fold_orig[r] = st + i
                fold_samp[r] = b
                r += 1
    mask_f = np.full((Lf, Lf), np.float32(-1e9), np.float32)
    same = fold_samp[:, None] == fold_samp[None, :]
    gathered = mask_bias[fold_orig[:, None], fold_orig[None, :]]
    mask_f[same] = gathered[same]
    p["mask"] = jnp.asarray(mask_f)

    # ---- Pyramid gather (torch.gather dim=1) as per-level one-hot matrices over folded rows ----
    orig_to_fold = np.zeros((TB, Ltot), np.int64)
    for rr in range(Lf):
        orig_to_fold[fold_samp[rr], fold_orig[rr]] = rr
    gm = np.zeros((n_pyr, TB * L0, Lf), np.float32)
    for b in range(TB):
        for i in range(L0):
            for j in range(n_pyr):
                gm[j, b * L0 + i, orig_to_fold[b, indexes_np[i, j]]] = 1.0
    p["gmat"] = jnp.asarray(gm)

    # ---- Strided down-conv selection matrices (kernel==stride), folded over TB samples ----
    sels = []
    lin = L0
    for ws in ws_list:
        lout = lin // ws
        S = np.zeros((ws * TB * lout, TB * lin), np.float32)
        for tau in range(ws):
            for b in range(TB):
                for t in range(lout):
                    S[tau * TB * lout + b * lout + t, b * lin + t * ws + tau] = 1.0
        sels.append(jnp.asarray(S))
        lin = lout
    p["sel"] = sels
    return p


# ----------------------------------------------------------------------------
if __name__ == "__main__":
    model_args = {
        "d_model": 32,
        "window_size": "[2, 2]",
        "truncate": False,
        "input_size": 16,
        "decoder": "FC",
        "enc_in": 4,
        "inner_size": 3,
        "d_inner_hid": 64,
        "n_head": 4,
        "d_k": 8,
        "d_v": 8,
        "dropout": 0.1,            # eval mode -> identity
        "n_layer": 2,
        "embed_type": "DataEmbedding",
        "num_time_features": 3,
        "d_bottleneck": 16,
        "use_tvm": False,
        "CSCM": "Bottleneck_Construct",
    }
    window_size = eval(model_args["window_size"])
    cfg = dict(model_args)
    cfg["window_size"] = window_size

    # Mask built from the actual encoder sequence length (input_size). The surrounding Pyraformer
    # Model appends a predict token for the FC decoder (the "+1"); here the standalone encoder
    # consumes exactly input_size tokens, so sizes stay consistent.
    mask_np, all_size = get_mask(cfg["input_size"], window_size, cfg["inner_size"])
    cfg["all_size"] = all_size
    indexes_np = refer_points(all_size, window_size)

    B = 4
    TB = 2   # 2 samples per grid step -> grid=(2,), both v7x TensorCores get work; rows well filled.

    key = jax.random.PRNGKey(0)
    kp, kx, km = jax.random.split(key, 3)
    params = init_params(kp, cfg, mask_np, indexes_np, all_size, TB)

    x_enc = jax.random.normal(kx, (B, cfg["input_size"], cfg["enc_in"]), dtype=jnp.float32)
    x_mark_enc = jax.random.normal(km, (B, cfg["input_size"], cfg["num_time_features"]),
                                   dtype=jnp.float32)

    out = encoder_forward(params, x_enc, x_mark_enc, cfg)
    out = jax.block_until_ready(out)
    assert out.shape == (B, all_size[0], len(all_size) * cfg["d_model"]), out.shape
    assert bool(jnp.all(jnp.isfinite(out)))
    print("KERNEL_OK")
</pallas_src>

<mosaic_0001>
module attributes {stable_mosaic.version = 11 : i64} {
  func.func @_encoder_kernel(%arg0: i32, %arg1: memref<32x4xf32, #tpu.memory_space<vmem>>, %arg2: memref<32x3xf32, #tpu.memory_space<vmem>>, %arg3: memref<56x56xf32, #tpu.memory_space<vmem>>, %arg4: memref<3x32x56xf32, #tpu.memory_space<vmem>>, %arg5: memref<32x32xf32, #tpu.memory_space<vmem>>, %arg6: memref<16x16xf32, #tpu.memory_space<vmem>>, %arg7: memref<47x32xf32, #tpu.memory_space<vmem>>, %arg8: memref<3x32x16xf32, #tpu.memory_space<vmem>>, %arg9: memref<20x64xf32, #tpu.memory_space<vmem>>, %arg10: memref<2x32x96xf32, #tpu.memory_space<vmem>>, %arg11: memref<2x32x32xf32, #tpu.memory_space<vmem>>, %arg12: memref<2x32x64xf32, #tpu.memory_space<vmem>>, %arg13: memref<2x64x32xf32, #tpu.memory_space<vmem>>, %arg14: memref<32x128xf32, #tpu.memory_space<vmem>>) attributes {dimension_semantics = [#tpu.dimension_semantics<parallel>], iteration_bounds = array<i64: 2>, scalar_prefetch = 0 : i64, scratch_operands = 0 : i64, tpu.core_type = #tpu.core_type<tc>, window_params = [{transform_indices = @transform_0, window_bounds = array<i64: 32, 4>}, {transform_indices = @transform_1, window_bounds = array<i64: 32, 3>}, {pipeline_mode = #tpu.pipeline_mode<synchronous>, transform_indices = @transform_2, window_bounds = array<i64: 56, 56>}, {pipeline_mode = #tpu.pipeline_mode<synchronous>, transform_indices = @transform_3, window_bounds = array<i64: 3, 32, 56>}, {pipeline_mode = #tpu.pipeline_mode<synchronous>, transform_indices = @transform_4, window_bounds = array<i64: 32, 32>}, {pipeline_mode = #tpu.pipeline_mode<synchronous>, transform_indices = @transform_5, window_bounds = array<i64: 16, 16>}, {pipeline_mode = #tpu.pipeline_mode<synchronous>, transform_indices = @transform_6, window_bounds = array<i64: 47, 32>}, {pipeline_mode = #tpu.pipeline_mode<synchronous>, transform_indices = @transform_7, window_bounds = array<i64: 3, 32, 16>}, {pipeline_mode = #tpu.pipeline_mode<synchronous>, transform_indices = @transform_8, window_bounds = array<i64: 20, 64>}, {pipeline_mode = #tpu.pipeline_mode<synchronous>, transform_indices = @transform_9, window_bounds = array<i64: 2, 32, 96>}, {pipeline_mode = #tpu.pipeline_mode<synchronous>, transform_indices = @transform_10, window_bounds = array<i64: 2, 32, 32>}, {pipeline_mode = #tpu.pipeline_mode<synchronous>, transform_indices = @transform_11, window_bounds = array<i64: 2, 32, 64>}, {pipeline_mode = #tpu.pipeline_mode<synchronous>, transform_indices = @transform_12, window_bounds = array<i64: 2, 64, 32>}, {transform_indices = @transform_13, window_bounds = array<i64: 32, 128>}]} {
    %c0 = arith.constant 0 : index
    %c0_0 = arith.constant 0 : index
    %0 = vector.load %arg7[%c0, %c0_0] : memref<47x32xf32, #tpu.memory_space<vmem>>, vector<47x32xf32>
    %c0_1 = arith.constant 0 : index
    %c0_2 = arith.constant 0 : index
    %1 = vector.load %arg9[%c0_1, %c0_2] : memref<20x64xf32, #tpu.memory_space<vmem>>, vector<20x64xf32>
    %2 = vector.extract_strided_slice %0 {offsets = [0, 0], sizes = [15, 32], strides = [1, 1]} : vector<47x32xf32> to vector<15x32xf32>
    %3 = vector.extract_strided_slice %0 {offsets = [15, 0], sizes = [16, 32], strides = [1, 1]} : vector<47x32xf32> to vector<16x32xf32>
    %4 = vector.extract_strided_slice %0 {offsets = [31, 0], sizes = [16, 32], strides = [1, 1]} : vector<47x32xf32> to vector<16x32xf32>
    %c0_3 = arith.constant 0 : index
    %c0_4 = arith.constant 0 : index
    %5 = vector.load %arg1[%c0_3, %c0_4] : memref<32x4xf32, #tpu.memory_space<vmem>>, vector<32x4xf32>
    %c0_5 = arith.constant 0 : index
    %c0_6 = arith.constant 0 : index
    %6 = vector.load %arg2[%c0_5, %c0_6] : memref<32x3xf32, #tpu.memory_space<vmem>>, vector<32x3xf32>
    %7 = vector.extract_strided_slice %5 {offsets = [0, 0], sizes = [16, 4], strides = [1, 1]} : vector<32x4xf32> to vector<16x4xf32>
    %8 = vector.extract_strided_slice %7 {offsets = [15, 0], sizes = [1, 4], strides = [1, 1]} : vector<16x4xf32> to vector<1x4xf32>
    %9 = vector.extract_strided_slice %7 {offsets = [0, 0], sizes = [15, 4], strides = [1, 1]} : vector<16x4xf32> to vector<15x4xf32>
    %10 = tpu.concatenate %8, %9 in 0 : vector<1x4xf32>, vector<15x4xf32> -> vector<16x4xf32>
    %11 = vector.extract_strided_slice %7 {offsets = [1, 0], sizes = [15, 4], strides = [1, 1]} : vector<16x4xf32> to vector<15x4xf32>
    %12 = vector.extract_strided_slice %7 {offsets = [0, 0], sizes = [1, 4], strides = [1, 1]} : vector<16x4xf32> to vector<1x4xf32>
    %13 = tpu.concatenate %11, %12 in 0 : vector<15x4xf32>, vector<1x4xf32> -> vector<16x4xf32>
    %14 = vector.extract_strided_slice %5 {offsets = [16, 0], sizes = [16, 4], strides = [1, 1]} : vector<32x4xf32> to vector<16x4xf32>
    %15 = vector.extract_strided_slice %14 {offsets = [15, 0], sizes = [1, 4], strides = [1, 1]} : vector<16x4xf32> to vector<1x4xf32>
    %16 = vector.extract_strided_slice %14 {offsets = [0, 0], sizes = [15, 4], strides = [1, 1]} : vector<16x4xf32> to vector<15x4xf32>
    %17 = tpu.concatenate %15, %16 in 0 : vector<1x4xf32>, vector<15x4xf32> -> vector<16x4xf32>
    %18 = vector.extract_strided_slice %14 {offsets = [1, 0], sizes = [15, 4], strides = [1, 1]} : vector<16x4xf32> to vector<15x4xf32>
    %19 = vector.extract_strided_slice %14 {offsets = [0, 0], sizes = [1, 4], strides = [1, 1]} : vector<16x4xf32> to vector<1x4xf32>
    %20 = tpu.concatenate %18, %19 in 0 : vector<15x4xf32>, vector<1x4xf32> -> vector<16x4xf32>
    %21 = tpu.concatenate %10, %17 in 0 : vector<16x4xf32>, vector<16x4xf32> -> vector<32x4xf32>
    %22 = tpu.concatenate %13, %20 in 0 : vector<16x4xf32>, vector<16x4xf32> -> vector<32x4xf32>
    %23 = tpu.concatenate %21, %5, %22, %6 in 1 : vector<32x4xf32>, vector<32x4xf32>, vector<32x4xf32>, vector<32x3xf32> -> vector<32x15xf32>
    %cst = arith.constant dense<0.000000e+00> : vector<32x32xf32>
    %24 = tpu.matmul %23, %2, %cst {dimension_numbers = #tpu.dot_dimension_numbers<[1], [0], [0], [1], [0, 0, 1, 1], [], []>} : vector<32x15xf32>, vector<15x32xf32>, vector<32x32xf32> -> vector<32x32xf32>
    %25 = tpu.concatenate %3, %3 in 0 : vector<16x32xf32>, vector<16x32xf32> -> vector<32x32xf32>
    %26 = arith.addf %24, %25 : vector<32x32xf32>
    %c0_7 = arith.constant 0 : index
    %c0_8 = arith.constant 0 : index
    %c0_9 = arith.constant 0 : index
    %27 = vector.load %arg8[%c0_7, %c0_8, %c0_9] : memref<3x32x16xf32, #tpu.memory_space<vmem>>, vector<1x32x16xf32>
    %28 = vector.shape_cast %27 : vector<1x32x16xf32> to vector<32x16xf32>
    %cst_10 = arith.constant dense<0.000000e+00> : vector<32x16xf32>
    %29 = tpu.matmul %26, %28, %cst_10 {dimension_numbers = #tpu.dot_dimension_numbers<[1], [0], [0], [1], [0, 0, 1, 1], [], []>} : vector<32x32xf32>, vector<32x16xf32>, vector<32x16xf32> -> vector<32x16xf32>
    %30 = vector.extract_strided_slice %1 {offsets = [0, 0], sizes = [1, 16], strides = [1, 1]} : vector<20x64xf32> to vector<1x16xf32>
    %31 = vector.broadcast %30 : vector<1x16xf32> to vector<32x16xf32>
    %32 = arith.addf %29, %31 : vector<32x16xf32>
    %c0_11 = arith.constant 0 : index
    %c0_12 = arith.constant 0 : index
    %33 = vector.load %arg5[%c0_11, %c0_12] : memref<32x32xf32, #tpu.memory_space<vmem>>, vector<32x32xf32>
    %cst_13 = arith.constant dense<0.000000e+00> : vector<32x16xf32>
    %34 = tpu.matmul %33, %32, %cst_13 {dimension_numbers = #tpu.dot_dimension_numbers<[1], [0], [0], [1], [0, 0, 1, 1], [], []>} : vector<32x32xf32>, vector<32x16xf32>, vector<32x16xf32> -> vector<32x16xf32>
    %35 = vector.extract_strided_slice %34 {offsets = [0, 0], sizes = [16, 16], strides = [1, 1]} : vector<32x16xf32> to vector<16x16xf32>
    %36 = vector.extract_strided_slice %34 {offsets = [16, 0], sizes = [16, 16], strides = [1, 1]} : vector<32x16xf32> to vector<16x16xf32>
    %37 = tpu.concatenate %35, %36 in 1 : vector<16x16xf32>, vector<16x16xf32> -> vector<16x32xf32>
    %c1 = arith.constant 1 : index
    %c0_14 = arith.constant 0 : index
    %c0_15 = arith.constant 0 : index
    %38 = vector.load %arg8[%c1, %c0_14, %c0_15] : memref<3x32x16xf32, #tpu.memory_space<vmem>>, vector<1x32x16xf32>
    %39 = vector.shape_cast %38 : vector<1x32x16xf32> to vector<32x16xf32>
    %cst_16 = arith.constant dense<0.000000e+00> : vector<16x16xf32>
    %40 = tpu.matmul %37, %39, %cst_16 {dimension_numbers = #tpu.dot_dimension_numbers<[1], [0], [0], [1], [0, 0, 1, 1], [], []>} : vector<16x32xf32>, vector<32x16xf32>, vector<16x16xf32> -> vector<16x16xf32>
    %41 = vector.extract_strided_slice %1 {offsets = [1, 0], sizes = [1, 16], strides = [1, 1]} : vector<20x64xf32> to vector<1x16xf32>
    %42 = vector.broadcast %41 : vector<1x16xf32> to vector<16x16xf32>
    %43 = arith.addf %40, %42 : vector<16x16xf32>
    %cst_17 = arith.constant 0.000000e+00 : f32
    %44 = vector.broadcast %cst_17 : f32 to vector<16x16xf32>
    %45 = arith.cmpf ogt, %43, %44 : vector<16x16xf32>
    %cst_18 = arith.constant 0.000000e+00 : f32
    %46 = vector.broadcast %cst_18 : f32 to vector<16x16xf32>
    %47 = arith.minimumf %43, %46 : vector<16x16xf32>
    %48 = math.exp %47 : vector<16x16xf32>
    %cst_19 = arith.constant 1.000000e+00 : f32
    %49 = vector.broadcast %cst_19 : f32 to vector<16x16xf32>
    %50 = arith.subf %48, %49 : vector<16x16xf32>
    %51 = arith.select %45, %43, %50 : vector<16x16xi1>, vector<16x16xf32>
    %c0_20 = arith.constant 0 : index
    %c0_21 = arith.constant 0 : index
    %52 = vector.load %arg6[%c0_20, %c0_21] : memref<16x16xf32, #tpu.memory_space<vmem>>, vector<16x16xf32>
    %cst_22 = arith.constant dense<0.000000e+00> : vector<16x16xf32>
    %53 = tpu.matmul %52, %51, %cst_22 {dimension_numbers = #tpu.dot_dimension_numbers<[1], [0], [0], [1], [0, 0, 1, 1], [], []>} : vector<16x16xf32>, vector<16x16xf32>, vector<16x16xf32> -> vector<16x16xf32>
    %54 = vector.extract_strided_slice %53 {offsets = [0, 0], sizes = [8, 16], strides = [1, 1]} : vector<16x16xf32> to vector<8x16xf32>
    %55 = vector.extract_strided_slice %53 {offsets = [8, 0], sizes = [8, 16], strides = [1, 1]} : vector<16x16xf32> to vector<8x16xf32>
    %56 = tpu.concatenate %54, %55 in 1 : vector<8x16xf32>, vector<8x16xf32> -> vector<8x32xf32>
    %c2 = arith.constant 2 : index
    %c0_23 = arith.constant 0 : index
    %c0_24 = arith.constant 0 : index
    %57 = vector.load %arg8[%c2, %c0_23, %c0_24] : memref<3x32x16xf32, #tpu.memory_space<vmem>>, vector<1x32x16xf32>
    %58 = vector.shape_cast %57 : vector<1x32x16xf32> to vector<32x16xf32>
    %cst_25 = arith.constant dense<0.000000e+00> : vector<8x16xf32>
    %59 = tpu.matmul %56, %58, %cst_25 {dimension_numbers = #tpu.dot_dimension_numbers<[1], [0], [0], [1], [0, 0, 1, 1], [], []>} : vector<8x32xf32>, vector<32x16xf32>, vector<8x16xf32> -> vector<8x16xf32>
    %60 = vector.extract_strided_slice %1 {offsets = [2, 0], sizes = [1, 16], strides = [1, 1]} : vector<20x64xf32> to vector<1x16xf32>
    %61 = vector.broadcast %60 : vector<1x16xf32> to vector<8x16xf32>
    %62 = arith.addf %59, %61 : vector<8x16xf32>
    %cst_26 = arith.constant 0.000000e+00 : f32
    %63 = vector.broadcast %cst_26 : f32 to vector<8x16xf32>
    %64 = arith.cmpf ogt, %62, %63 : vector<8x16xf32>
    %cst_27 = arith.constant 0.000000e+00 : f32
    %65 = vector.broadcast %cst_27 : f32 to vector<8x16xf32>
    %66 = arith.minimumf %62, %65 : vector<8x16xf32>
    %67 = math.exp %66 : vector<8x16xf32>
    %cst_28 = arith.constant 1.000000e+00 : f32
    %68 = vector.broadcast %cst_28 : f32 to vector<8x16xf32>
    %69 = arith.subf %67, %68 : vector<8x16xf32>
    %70 = arith.select %64, %62, %69 : vector<8x16xi1>, vector<8x16xf32>
    %71 = tpu.concatenate %51, %70 in 0 : vector<16x16xf32>, vector<8x16xf32> -> vector<24x16xf32>
    %cst_29 = arith.constant dense<0.000000e+00> : vector<24x32xf32>
    %72 = tpu.matmul %71, %4, %cst_29 {dimension_numbers = #tpu.dot_dimension_numbers<[1], [0], [0], [1], [0, 0, 1, 1], [], []>} : vector<24x16xf32>, vector<16x32xf32>, vector<24x32xf32> -> vector<24x32xf32>
    %73 = vector.extract_strided_slice %1 {offsets = [3, 0], sizes = [1, 32], strides = [1, 1]} : vector<20x64xf32> to vector<1x32xf32>
    %74 = vector.broadcast %73 : vector<1x32xf32> to vector<24x32xf32>
    %75 = arith.addf %72, %74 : vector<24x32xf32>
    %76 = tpu.concatenate %26, %75 in 0 : vector<32x32xf32>, vector<24x32xf32> -> vector<56x32xf32>
    %77 = vector.extract_strided_slice %1 {offsets = [4, 0], sizes = [1, 32], strides = [1, 1]} : vector<20x64xf32> to vector<1x32xf32>
    %78 = vector.extract_strided_slice %1 {offsets = [5, 0], sizes = [1, 32], strides = [1, 1]} : vector<20x64xf32> to vector<1x32xf32>
    %cst_30 = arith.constant dense<0.000000e+00> : vector<56xf32>
    %79 = vector.multi_reduction <add>, %76, %cst_30 [1] : vector<56x32xf32> to vector<56xf32>
    %80 = vector.shape_cast %79 : vector<56xf32> to vector<56x1xf32>
    %cst_31 = arith.constant 3.200000e+01 : f32
    %81 = vector.broadcast %cst_31 : f32 to vector<56x1xf32>
    %82 = arith.divf %80, %81 : vector<56x1xf32>
    %83 = vector.broadcast %82 : vector<56x1xf32> to vector<56x32xf32>
    %84 = arith.subf %76, %83 : vector<56x32xf32>
    %85 = arith.mulf %84, %84 : vector<56x32xf32>
    %cst_32 = arith.constant dense<0.000000e+00> : vector<56xf32>
    %86 = vector.multi_reduction <add>, %85, %cst_32 [1] : vector<56x32xf32> to vector<56xf32>
    %87 = vector.shape_cast %86 : vector<56xf32> to vector<56x1xf32>
    %cst_33 = arith.constant 3.200000e+01 : f32
    %88 = vector.broadcast %cst_33 : f32 to vector<56x1xf32>
    %89 = arith.divf %87, %88 : vector<56x1xf32>
    %cst_34 = arith.constant 9.99999974E-6 : f32
    %90 = vector.broadcast %cst_34 : f32 to vector<56x1xf32>
    %91 = arith.addf %89, %90 : vector<56x1xf32>
    %92 = math.rsqrt %91 : vector<56x1xf32>
    %93 = vector.broadcast %92 : vector<56x1xf32> to vector<56x32xf32>
    %94 = arith.mulf %84, %93 : vector<56x32xf32>
    %95 = vector.broadcast %77 : vector<1x32xf32> to vector<56x32xf32>
    %96 = arith.mulf %94, %95 : vector<56x32xf32>
    %97 = vector.broadcast %78 : vector<1x32xf32> to vector<56x32xf32>
    %98 = arith.addf %96, %97 : vector<56x32xf32>
    %c0_35 = arith.constant 0 : index
    %c0_36 = arith.constant 0 : index
    %99 = vector.load %arg3[%c0_35, %c0_36] : memref<56x56xf32, #tpu.memory_space<vmem>>, vector<56x56xf32>
    %100 = vector.shape_cast %99 : vector<56x56xf32> to vector<1x56x56xf32>
    %101 = vector.broadcast %100 : vector<1x56x56xf32> to vector<4x56x56xf32>
    %c0_37 = arith.constant 0 : index
    %c0_38 = arith.constant 0 : index
    %c0_39 = arith.constant 0 : index
    %102 = vector.load %arg10[%c0_37, %c0_38, %c0_39] : memref<2x32x96xf32, #tpu.memory_space<vmem>>, vector<1x32x96xf32>
    %103 = vector.shape_cast %102 : vector<1x32x96xf32> to vector<32x96xf32>
    %cst_40 = arith.constant dense<0.000000e+00> : vector<56x96xf32>
    %104 = tpu.matmul %98, %103, %cst_40 {dimension_numbers = #tpu.dot_dimension_numbers<[1], [0], [0], [1], [0, 0, 1, 1], [], []>} : vector<56x32xf32>, vector<32x96xf32>, vector<56x96xf32> -> vector<56x96xf32>
    %105 = vector.extract_strided_slice %104 {offsets = [0, 0], sizes = [56, 8], strides = [1, 1]} : vector<56x96xf32> to vector<56x8xf32>
    %106 = vector.extract_strided_slice %104 {offsets = [0, 8], sizes = [56, 8], strides = [1, 1]} : vector<56x96xf32> to vector<56x8xf32>
    %107 = vector.extract_strided_slice %104 {offsets = [0, 16], sizes = [56, 8], strides = [1, 1]} : vector<56x96xf32> to vector<56x8xf32>
    %108 = vector.extract_strided_slice %104 {offsets = [0, 24], sizes = [56, 8], strides = [1, 1]} : vector<56x96xf32> to vector<56x8xf32>
    %109 = vector.shape_cast %105 : vector<56x8xf32> to vector<1x56x8xf32>
    %110 = vector.shape_cast %106 : vector<56x8xf32> to vector<1x56x8xf32>
    %111 = vector.shape_cast %107 : vector<56x8xf32> to vector<1x56x8xf32>
    %112 = vector.shape_cast %108 : vector<56x8xf32> to vector<1x56x8xf32>
    %113 = tpu.concatenate %109, %110, %111, %112 in 0 : vector<1x56x8xf32>, vector<1x56x8xf32>, vector<1x56x8xf32>, vector<1x56x8xf32> -> vector<4x56x8xf32>
    %114 = vector.extract_strided_slice %104 {offsets = [0, 32], sizes = [56, 8], strides = [1, 1]} : vector<56x96xf32> to vector<56x8xf32>
    %115 = vector.extract_strided_slice %104 {offsets = [0, 40], sizes = [56, 8], strides = [1, 1]} : vector<56x96xf32> to vector<56x8xf32>
    %116 = vector.extract_strided_slice %104 {offsets = [0, 48], sizes = [56, 8], strides = [1, 1]} : vector<56x96xf32> to vector<56x8xf32>
    %117 = vector.extract_strided_slice %104 {offsets = [0, 56], sizes = [56, 8], strides = [1, 1]} : vector<56x96xf32> to vector<56x8xf32>
    %118 = vector.shape_cast %114 : vector<56x8xf32> to vector<1x56x8xf32>
    %119 = vector.shape_cast %115 : vector<56x8xf32> to vector<1x56x8xf32>
    %120 = vector.shape_cast %116 : vector<56x8xf32> to vector<1x56x8xf32>
    %121 = vector.shape_cast %117 : vector<56x8xf32> to vector<1x56x8xf32>
    %122 = tpu.concatenate %118, %119, %120, %121 in 0 : vector<1x56x8xf32>, vector<1x56x8xf32>, vector<1x56x8xf32>, vector<1x56x8xf32> -> vector<4x56x8xf32>
    %123 = vector.extract_strided_slice %104 {offsets = [0, 64], sizes = [56, 8], strides = [1, 1]} : vector<56x96xf32> to vector<56x8xf32>
    %124 = vector.extract_strided_slice %104 {offsets = [0, 72], sizes = [56, 8], strides = [1, 1]} : vector<56x96xf32> to vector<56x8xf32>
    %125 = vector.extract_strided_slice %104 {offsets = [0, 80], sizes = [56, 8], strides = [1, 1]} : vector<56x96xf32> to vector<56x8xf32>
    %126 = vector.extract_strided_slice %104 {offsets = [0, 88], sizes = [56, 8], strides = [1, 1]} : vector<56x96xf32> to vector<56x8xf32>
    %127 = vector.shape_cast %123 : vector<56x8xf32> to vector<1x56x8xf32>
    %128 = vector.shape_cast %124 : vector<56x8xf32> to vector<1x56x8xf32>
    %129 = vector.shape_cast %125 : vector<56x8xf32> to vector<1x56x8xf32>
    %130 = vector.shape_cast %126 : vector<56x8xf32> to vector<1x56x8xf32>
    %131 = tpu.concatenate %127, %128, %129, %130 in 0 : vector<1x56x8xf32>, vector<1x56x8xf32>, vector<1x56x8xf32>, vector<1x56x8xf32> -> vector<4x56x8xf32>
    "tpu.trace_start"() <{level = 10 : i32, message = "hqd,hkd->hqk"}> : () -> ()
    %cst_41 = arith.constant dense<0.000000e+00> : vector<4x56x56xf32>
    %132 = tpu.matmul %113, %122, %cst_41 {dimension_numbers = #tpu.dot_dimension_numbers<[2], [2], [1], [1], [0, 0, 0, 1, 1, 1], [0], [0]>} : vector<4x56x8xf32>, vector<4x56x8xf32>, vector<4x56x56xf32> -> vector<4x56x56xf32>
    "tpu.trace_stop"() : () -> ()
    %133 = arith.addf %132, %101 : vector<4x56x56xf32>
    %cst_42 = arith.constant dense<0xFF800000> : vector<4x56xf32>
    %134 = vector.multi_reduction <maximumf>, %133, %cst_42 [2] : vector<4x56x56xf32> to vector<4x56xf32>
    %135 = vector.shape_cast %134 : vector<4x56xf32> to vector<4x56x1xf32>
    %136 = vector.broadcast %135 : vector<4x56x1xf32> to vector<4x56x56xf32>
    %137 = arith.subf %133, %136 : vector<4x56x56xf32>
    %138 = math.exp %137 : vector<4x56x56xf32>
    %cst_43 = arith.constant dense<0.000000e+00> : vector<4x56xf32>
    %139 = vector.multi_reduction <add>, %138, %cst_43 [2] : vector<4x56x56xf32> to vector<4x56xf32>
    %140 = vector.shape_cast %139 : vector<4x56xf32> to vector<4x56x1xf32>
    %141 = tpu.reciprocal %140 {approx = true} : vector<4x56x1xf32> -> vector<4x56x1xf32>
    %142 = vector.broadcast %141 : vector<4x56x1xf32> to vector<4x56x56xf32>
    %143 = arith.mulf %138, %142 : vector<4x56x56xf32>
    "tpu.trace_start"() <{level = 10 : i32, message = "hqk,hkd->hqd"}> : () -> ()
    %cst_44 = arith.constant dense<0.000000e+00> : vector<4x56x8xf32>
    %144 = tpu.matmul %143, %131, %cst_44 {dimension_numbers = #tpu.dot_dimension_numbers<[2], [1], [1], [2], [0, 0, 0, 1, 1, 2], [0], [0]>} : vector<4x56x56xf32>, vector<4x56x8xf32>, vector<4x56x8xf32> -> vector<4x56x8xf32>
    "tpu.trace_stop"() : () -> ()
    %145 = vector.extract_strided_slice %144 {offsets = [0, 0, 0], sizes = [1, 56, 8], strides = [1, 1, 1]} : vector<4x56x8xf32> to vector<1x56x8xf32>
    %146 = vector.shape_cast %145 : vector<1x56x8xf32> to vector<56x8xf32>
    %147 = vector.extract_strided_slice %144 {offsets = [1, 0, 0], sizes = [1, 56, 8], strides = [1, 1, 1]} : vector<4x56x8xf32> to vector<1x56x8xf32>
    %148 = vector.shape_cast %147 : vector<1x56x8xf32> to vector<56x8xf32>
    %149 = vector.extract_strided_slice %144 {offsets = [2, 0, 0], sizes = [1, 56, 8], strides = [1, 1, 1]} : vector<4x56x8xf32> to vector<1x56x8xf32>
    %150 = vector.shape_cast %149 : vector<1x56x8xf32> to vector<56x8xf32>
    %151 = vector.extract_strided_slice %144 {offsets = [3, 0, 0], sizes = [1, 56, 8], strides = [1, 1, 1]} : vector<4x56x8xf32> to vector<1x56x8xf32>
    %152 = vector.shape_cast %151 : vector<1x56x8xf32> to vector<56x8xf32>
    %153 = tpu.concatenate %146, %148, %150, %152 in 1 : vector<56x8xf32>, vector<56x8xf32>, vector<56x8xf32>, vector<56x8xf32> -> vector<56x32xf32>
    %c0_45 = arith.constant 0 : index
    %c0_46 = arith.constant 0 : index
    %c0_47 = arith.constant 0 : index
    %154 = vector.load %arg11[%c0_45, %c0_46, %c0_47] : memref<2x32x32xf32, #tpu.memory_space<vmem>>, vector<1x32x32xf32>
    %155 = vector.shape_cast %154 : vector<1x32x32xf32> to vector<32x32xf32>
    %cst_48 = arith.constant dense<0.000000e+00> : vector<56x32xf32>
    %156 = tpu.matmul %153, %155, %cst_48 {dimension_numbers = #tpu.dot_dimension_numbers<[1], [0], [0], [1], [0, 0, 1, 1], [], []>} : vector<56x32xf32>, vector<32x32xf32>, vector<56x32xf32> -> vector<56x32xf32>
    %157 = vector.extract_strided_slice %1 {offsets = [6, 0], sizes = [1, 32], strides = [1, 1]} : vector<20x64xf32> to vector<1x32xf32>
    %158 = vector.broadcast %157 : vector<1x32xf32> to vector<56x32xf32>
    %159 = arith.addf %156, %158 : vector<56x32xf32>
    %160 = arith.addf %159, %98 : vector<56x32xf32>
    %161 = vector.extract_strided_slice %1 {offsets = [7, 0], sizes = [1, 32], strides = [1, 1]} : vector<20x64xf32> to vector<1x32xf32>
    %162 = vector.extract_strided_slice %1 {offsets = [8, 0], sizes = [1, 32], strides = [1, 1]} : vector<20x64xf32> to vector<1x32xf32>
    %cst_49 = arith.constant dense<0.000000e+00> : vector<56xf32>
    %163 = vector.multi_reduction <add>, %160, %cst_49 [1] : vector<56x32xf32> to vector<56xf32>
    %164 = vector.shape_cast %163 : vector<56xf32> to vector<56x1xf32>
    %cst_50 = arith.constant 3.200000e+01 : f32
    %165 = vector.broadcast %cst_50 : f32 to vector<56x1xf32>
    %166 = arith.divf %164, %165 : vector<56x1xf32>
    %167 = vector.broadcast %166 : vector<56x1xf32> to vector<56x32xf32>
    %168 = arith.subf %160, %167 : vector<56x32xf32>
    %169 = arith.mulf %168, %168 : vector<56x32xf32>
    %cst_51 = arith.constant dense<0.000000e+00> : vector<56xf32>
    %170 = vector.multi_reduction <add>, %169, %cst_51 [1] : vector<56x32xf32> to vector<56xf32>
    %171 = vector.shape_cast %170 : vector<56xf32> to vector<56x1xf32>
    %cst_52 = arith.constant 3.200000e+01 : f32
    %172 = vector.broadcast %cst_52 : f32 to vector<56x1xf32>
    %173 = arith.divf %171, %172 : vector<56x1xf32>
    %cst_53 = arith.constant 9.99999997E-7 : f32
    %174 = vector.broadcast %cst_53 : f32 to vector<56x1xf32>
    %175 = arith.addf %173, %174 : vector<56x1xf32>
    %176 = math.rsqrt %175 : vector<56x1xf32>
    %177 = vector.broadcast %176 : vector<56x1xf32> to vector<56x32xf32>
    %178 = arith.mulf %168, %177 : vector<56x32xf32>
    %179 = vector.broadcast %161 : vector<1x32xf32> to vector<56x32xf32>
    %180 = arith.mulf %178, %179 : vector<56x32xf32>
    %181 = vector.broadcast %162 : vector<1x32xf32> to vector<56x32xf32>
    %182 = arith.addf %180, %181 : vector<56x32xf32>
    %c0_54 = arith.constant 0 : index
    %c0_55 = arith.constant 0 : index
    %c0_56 = arith.constant 0 : index
    %183 = vector.load %arg12[%c0_54, %c0_55, %c0_56] : memref<2x32x64xf32, #tpu.memory_space<vmem>>, vector<1x32x64xf32>
    %184 = vector.shape_cast %183 : vector<1x32x64xf32> to vector<32x64xf32>
    %cst_57 = arith.constant dense<0.000000e+00> : vector<56x64xf32>
    %185 = tpu.matmul %182, %184, %cst_57 {dimension_numbers = #tpu.dot_dimension_numbers<[1], [0], [0], [1], [0, 0, 1, 1], [], []>} : vector<56x32xf32>, vector<32x64xf32>, vector<56x64xf32> -> vector<56x64xf32>
    %186 = vector.extract_strided_slice %1 {offsets = [9, 0], sizes = [1, 64], strides = [1, 1]} : vector<20x64xf32> to vector<1x64xf32>
    %187 = vector.broadcast %186 : vector<1x64xf32> to vector<56x64xf32>
    %188 = arith.addf %185, %187 : vector<56x64xf32>
    %cst_58 = arith.constant 5.000000e-01 : f32
    %189 = vector.broadcast %cst_58 : f32 to vector<56x64xf32>
    %190 = arith.mulf %189, %188 : vector<56x64xf32>
    %cst_59 = arith.constant 0.707106769 : f32
    %191 = vector.broadcast %cst_59 : f32 to vector<56x64xf32>
    %192 = arith.mulf %188, %191 : vector<56x64xf32>
    %193 = math.erf %192 : vector<56x64xf32>
    %cst_60 = arith.constant 1.000000e+00 : f32
    %194 = vector.broadcast %cst_60 : f32 to vector<56x64xf32>
    %195 = arith.addf %194, %193 : vector<56x64xf32>
    %196 = arith.mulf %190, %195 : vector<56x64xf32>
    %c0_61 = arith.constant 0 : index
    %c0_62 = arith.constant 0 : index
    %c0_63 = arith.constant 0 : index
    %197 = vector.load %arg13[%c0_61, %c0_62, %c0_63] : memref<2x64x32xf32, #tpu.memory_space<vmem>>, vector<1x64x32xf32>
    %198 = vector.shape_cast %197 : vector<1x64x32xf32> to vector<64x32xf32>
    %cst_64 = arith.constant dense<0.000000e+00> : vector<56x32xf32>
    %199 = tpu.matmul %196, %198, %cst_64 {dimension_numbers = #tpu.dot_dimension_numbers<[1], [0], [0], [1], [0, 0, 1, 1], [], []>} : vector<56x64xf32>, vector<64x32xf32>, vector<56x32xf32> -> vector<56x32xf32>
    %200 = vector.extract_strided_slice %1 {offsets = [10, 0], sizes = [1, 32], strides = [1, 1]} : vector<20x64xf32> to vector<1x32xf32>
    %201 = vector.broadcast %200 : vector<1x32xf32> to vector<56x32xf32>
    %202 = arith.addf %199, %201 : vector<56x32xf32>
    %203 = arith.addf %202, %182 : vector<56x32xf32>
    %204 = vector.extract_strided_slice %1 {offsets = [11, 0], sizes = [1, 32], strides = [1, 1]} : vector<20x64xf32> to vector<1x32xf32>
    %205 = vector.extract_strided_slice %1 {offsets = [12, 0], sizes = [1, 32], strides = [1, 1]} : vector<20x64xf32> to vector<1x32xf32>
    %cst_65 = arith.constant dense<0.000000e+00> : vector<56xf32>
    %206 = vector.multi_reduction <add>, %203, %cst_65 [1] : vector<56x32xf32> to vector<56xf32>
    %207 = vector.shape_cast %206 : vector<56xf32> to vector<56x1xf32>
    %cst_66 = arith.constant 3.200000e+01 : f32
    %208 = vector.broadcast %cst_66 : f32 to vector<56x1xf32>
    %209 = arith.divf %207, %208 : vector<56x1xf32>
    %210 = vector.broadcast %209 : vector<56x1xf32> to vector<56x32xf32>
    %211 = arith.subf %203, %210 : vector<56x32xf32>
    %212 = arith.mulf %211, %211 : vector<56x32xf32>
    %cst_67 = arith.constant dense<0.000000e+00> : vector<56xf32>
    %213 = vector.multi_reduction <add>, %212, %cst_67 [1] : vector<56x32xf32> to vector<56xf32>
    %214 = vector.shape_cast %213 : vector<56xf32> to vector<56x1xf32>
    %cst_68 = arith.constant 3.200000e+01 : f32
    %215 = vector.broadcast %cst_68 : f32 to vector<56x1xf32>
    %216 = arith.divf %214, %215 : vector<56x1xf32>
    %cst_69 = arith.constant 9.99999997E-7 : f32
    %217 = vector.broadcast %cst_69 : f32 to vector<56x1xf32>
    %218 = arith.addf %216, %217 : vector<56x1xf32>
    %219 = math.rsqrt %218 : vector<56x1xf32>
    %220 = vector.broadcast %219 : vector<56x1xf32> to vector<56x32xf32>
    %221 = arith.mulf %211, %220 : vector<56x32xf32>
    %222 = vector.broadcast %204 : vector<1x32xf32> to vector<56x32xf32>
    %223 = arith.mulf %221, %222 : vector<56x32xf32>
    %224 = vector.broadcast %205 : vector<1x32xf32> to vector<56x32xf32>
    %225 = arith.addf %223, %224 : vector<56x32xf32>
    %c1_70 = arith.constant 1 : index
    %c0_71 = arith.constant 0 : index
    %c0_72 = arith.constant 0 : index
    %226 = vector.load %arg10[%c1_70, %c0_71, %c0_72] : memref<2x32x96xf32, #tpu.memory_space<vmem>>, vector<1x32x96xf32>
    %227 = vector.shape_cast %226 : vector<1x32x96xf32> to vector<32x96xf32>
    %cst_73 = arith.constant dense<0.000000e+00> : vector<56x96xf32>
    %228 = tpu.matmul %225, %227, %cst_73 {dimension_numbers = #tpu.dot_dimension_numbers<[1], [0], [0], [1], [0, 0, 1, 1], [], []>} : vector<56x32xf32>, vector<32x96xf32>, vector<56x96xf32> -> vector<56x96xf32>
    %229 = vector.extract_strided_slice %228 {offsets = [0, 0], sizes = [56, 8], strides = [1, 1]} : vector<56x96xf32> to vector<56x8xf32>
    %230 = vector.extract_strided_slice %228 {offsets = [0, 8], sizes = [56, 8], strides = [1, 1]} : vector<56x96xf32> to vector<56x8xf32>
    %231 = vector.extract_strided_slice %228 {offsets = [0, 16], sizes = [56, 8], strides = [1, 1]} : vector<56x96xf32> to vector<56x8xf32>
    %232 = vector.extract_strided_slice %228 {offsets = [0, 24], sizes = [56, 8], strides = [1, 1]} : vector<56x96xf32> to vector<56x8xf32>
    %233 = vector.shape_cast %229 : vector<56x8xf32> to vector<1x56x8xf32>
    %234 = vector.shape_cast %230 : vector<56x8xf32> to vector<1x56x8xf32>
    %235 = vector.shape_cast %231 : vector<56x8xf32> to vector<1x56x8xf32>
    %236 = vector.shape_cast %232 : vector<56x8xf32> to vector<1x56x8xf32>
    %237 = tpu.concatenate %233, %234, %235, %236 in 0 : vector<1x56x8xf32>, vector<1x56x8xf32>, vector<1x56x8xf32>, vector<1x56x8xf32> -> vector<4x56x8xf32>
    %238 = vector.extract_strided_slice %228 {offsets = [0, 32], sizes = [56, 8], strides = [1, 1]} : vector<56x96xf32> to vector<56x8xf32>
    %239 = vector.extract_strided_slice %228 {offsets = [0, 40], sizes = [56, 8], strides = [1, 1]} : vector<56x96xf32> to vector<56x8xf32>
    %240 = vector.extract_strided_slice %228 {offsets = [0, 48], sizes = [56, 8], strides = [1, 1]} : vector<56x96xf32> to vector<56x8xf32>
    %241 = vector.extract_strided_slice %228 {offsets = [0, 56], sizes = [56, 8], strides = [1, 1]} : vector<56x96xf32> to vector<56x8xf32>
    %242 = vector.shape_cast %238 : vector<56x8xf32> to vector<1x56x8xf32>
    %243 = vector.shape_cast %239 : vector<56x8xf32> to vector<1x56x8xf32>
    %244 = vector.shape_cast %240 : vector<56x8xf32> to vector<1x56x8xf32>
    %245 = vector.shape_cast %241 : vector<56x8xf32> to vector<1x56x8xf32>
    %246 = tpu.concatenate %242, %243, %244, %245 in 0 : vector<1x56x8xf32>, vector<1x56x8xf32>, vector<1x56x8xf32>, vector<1x56x8xf32> -> vector<4x56x8xf32>
    %247 = vector.extract_strided_slice %228 {offsets = [0, 64], sizes = [56, 8], strides = [1, 1]} : vector<56x96xf32> to vector<56x8xf32>
    %248 = vector.extract_strided_slice %228 {offsets = [0, 72], sizes = [56, 8], strides = [1, 1]} : vector<56x96xf32> to vector<56x8xf32>
    %249 = vector.extract_strided_slice %228 {offsets = [0, 80], sizes = [56, 8], strides = [1, 1]} : vector<56x96xf32> to vector<56x8xf32>
    %250 = vector.extract_strided_slice %228 {offsets = [0, 88], sizes = [56, 8], strides = [1, 1]} : vector<56x96xf32> to vector<56x8xf32>
    %251 = vector.shape_cast %247 : vector<56x8xf32> to vector<1x56x8xf32>
    %252 = vector.shape_cast %248 : vector<56x8xf32> to vector<1x56x8xf32>
    %253 = vector.shape_cast %249 : vector<56x8xf32> to vector<1x56x8xf32>
    %254 = vector.shape_cast %250 : vector<56x8xf32> to vector<1x56x8xf32>
    %255 = tpu.concatenate %251, %252, %253, %254 in 0 : vector<1x56x8xf32>, vector<1x56x8xf32>, vector<1x56x8xf32>, vector<1x56x8xf32> -> vector<4x56x8xf32>
    "tpu.trace_start"() <{level = 10 : i32, message = "hqd,hkd->hqk"}> : () -> ()
    %cst_74 = arith.constant dense<0.000000e+00> : vector<4x56x56xf32>
    %256 = tpu.matmul %237, %246, %cst_74 {dimension_numbers = #tpu.dot_dimension_numbers<[2], [2], [1], [1], [0, 0, 0, 1, 1, 1], [0], [0]>} : vector<4x56x8xf32>, vector<4x56x8xf32>, vector<4x56x56xf32> -> vector<4x56x56xf32>
    "tpu.trace_stop"() : () -> ()
    %257 = arith.addf %256, %101 : vector<4x56x56xf32>
    %cst_75 = arith.constant dense<0xFF800000> : vector<4x56xf32>
    %258 = vector.multi_reduction <maximumf>, %257, %cst_75 [2] : vector<4x56x56xf32> to vector<4x56xf32>
    %259 = vector.shape_cast %258 : vector<4x56xf32> to vector<4x56x1xf32>
    %260 = vector.broadcast %259 : vector<4x56x1xf32> to vector<4x56x56xf32>
    %261 = arith.subf %257, %260 : vector<4x56x56xf32>
    %262 = math.exp %261 : vector<4x56x56xf32>
    %cst_76 = arith.constant dense<0.000000e+00> : vector<4x56xf32>
    %263 = vector.multi_reduction <add>, %262, %cst_76 [2] : vector<4x56x56xf32> to vector<4x56xf32>
    %264 = vector.shape_cast %263 : vector<4x56xf32> to vector<4x56x1xf32>
    %265 = tpu.reciprocal %264 {approx = true} : vector<4x56x1xf32> -> vector<4x56x1xf32>
    %266 = vector.broadcast %265 : vector<4x56x1xf32> to vector<4x56x56xf32>
    %267 = arith.mulf %262, %266 : vector<4x56x56xf32>
    "tpu.trace_start"() <{level = 10 : i32, message = "hqk,hkd->hqd"}> : () -> ()
    %cst_77 = arith.constant dense<0.000000e+00> : vector<4x56x8xf32>
    %268 = tpu.matmul %267, %255, %cst_77 {dimension_numbers = #tpu.dot_dimension_numbers<[2], [1], [1], [2], [0, 0, 0, 1, 1, 2], [0], [0]>} : vector<4x56x56xf32>, vector<4x56x8xf32>, vector<4x56x8xf32> -> vector<4x56x8xf32>
    "tpu.trace_stop"() : () -> ()
    %269 = vector.extract_strided_slice %268 {offsets = [0, 0, 0], sizes = [1, 56, 8], strides = [1, 1, 1]} : vector<4x56x8xf32> to vector<1x56x8xf32>
    %270 = vector.shape_cast %269 : vector<1x56x8xf32> to vector<56x8xf32>
    %271 = vector.extract_strided_slice %268 {offsets = [1, 0, 0], sizes = [1, 56, 8], strides = [1, 1, 1]} : vector<4x56x8xf32> to vector<1x56x8xf32>
    %272 = vector.shape_cast %271 : vector<1x56x8xf32> to vector<56x8xf32>
    %273 = vector.extract_strided_slice %268 {offsets = [2, 0, 0], sizes = [1, 56, 8], strides = [1, 1, 1]} : vector<4x56x8xf32> to vector<1x56x8xf32>
    %274 = vector.shape_cast %273 : vector<1x56x8xf32> to vector<56x8xf32>
    %275 = vector.extract_strided_slice %268 {offsets = [3, 0, 0], sizes = [1, 56, 8], strides = [1, 1, 1]} : vector<4x56x8xf32> to vector<1x56x8xf32>
    %276 = vector.shape_cast %275 : vector<1x56x8xf32> to vector<56x8xf32>
    %277 = tpu.concatenate %270, %272, %274, %276 in 1 : vector<56x8xf32>, vector<56x8xf32>, vector<56x8xf32>, vector<56x8xf32> -> vector<56x32xf32>
    %c1_78 = arith.constant 1 : index
    %c0_79 = arith.constant 0 : index
    %c0_80 = arith.constant 0 : index
    %278 = vector.load %arg11[%c1_78, %c0_79, %c0_80] : memref<2x32x32xf32, #tpu.memory_space<vmem>>, vector<1x32x32xf32>
    %279 = vector.shape_cast %278 : vector<1x32x32xf32> to vector<32x32xf32>
    %cst_81 = arith.constant dense<0.000000e+00> : vector<56x32xf32>
    %280 = tpu.matmul %277, %279, %cst_81 {dimension_numbers = #tpu.dot_dimension_numbers<[1], [0], [0], [1], [0, 0, 1, 1], [], []>} : vector<56x32xf32>, vector<32x32xf32>, vector<56x32xf32> -> vector<56x32xf32>
    %281 = vector.extract_strided_slice %1 {offsets = [13, 0], sizes = [1, 32], strides = [1, 1]} : vector<20x64xf32> to vector<1x32xf32>
    %282 = vector.broadcast %281 : vector<1x32xf32> to vector<56x32xf32>
    %283 = arith.addf %280, %282 : vector<56x32xf32>
    %284 = arith.addf %283, %225 : vector<56x32xf32>
    %285 = vector.extract_strided_slice %1 {offsets = [14, 0], sizes = [1, 32], strides = [1, 1]} : vector<20x64xf32> to vector<1x32xf32>
    %286 = vector.extract_strided_slice %1 {offsets = [15, 0], sizes = [1, 32], strides = [1, 1]} : vector<20x64xf32> to vector<1x32xf32>
    %cst_82 = arith.constant dense<0.000000e+00> : vector<56xf32>
    %287 = vector.multi_reduction <add>, %284, %cst_82 [1] : vector<56x32xf32> to vector<56xf32>
    %288 = vector.shape_cast %287 : vector<56xf32> to vector<56x1xf32>
    %cst_83 = arith.constant 3.200000e+01 : f32
    %289 = vector.broadcast %cst_83 : f32 to vector<56x1xf32>
    %290 = arith.divf %288, %289 : vector<56x1xf32>
    %291 = vector.broadcast %290 : vector<56x1xf32> to vector<56x32xf32>
    %292 = arith.subf %284, %291 : vector<56x32xf32>
    %293 = arith.mulf %292, %292 : vector<56x32xf32>
    %cst_84 = arith.constant dense<0.000000e+00> : vector<56xf32>
    %294 = vector.multi_reduction <add>, %293, %cst_84 [1] : vector<56x32xf32> to vector<56xf32>
    %295 = vector.shape_cast %294 : vector<56xf32> to vector<56x1xf32>
    %cst_85 = arith.constant 3.200000e+01 : f32
    %296 = vector.broadcast %cst_85 : f32 to vector<56x1xf32>
    %297 = arith.divf %295, %296 : vector<56x1xf32>
    %cst_86 = arith.constant 9.99999997E-7 : f32
    %298 = vector.broadcast %cst_86 : f32 to vector<56x1xf32>
    %299 = arith.addf %297, %298 : vector<56x1xf32>
    %300 = math.rsqrt %299 : vector<56x1xf32>
    %301 = vector.broadcast %300 : vector<56x1xf32> to vector<56x32xf32>
    %302 = arith.mulf %292, %301 : vector<56x32xf32>
    %303 = vector.broadcast %285 : vector<1x32xf32> to vector<56x32xf32>
    %304 = arith.mulf %302, %303 : vector<56x32xf32>
    %305 = vector.broadcast %286 : vector<1x32xf32> to vector<56x32xf32>
    %306 = arith.addf %304, %305 : vector<56x32xf32>
    %c1_87 = arith.constant 1 : index
    %c0_88 = arith.constant 0 : index
    %c0_89 = arith.constant 0 : index
    %307 = vector.load %arg12[%c1_87, %c0_88, %c0_89] : memref<2x32x64xf32, #tpu.memory_space<vmem>>, vector<1x32x64xf32>
    %308 = vector.shape_cast %307 : vector<1x32x64xf32> to vector<32x64xf32>
    %cst_90 = arith.constant dense<0.000000e+00> : vector<56x64xf32>
    %309 = tpu.matmul %306, %308, %cst_90 {dimension_numbers = #tpu.dot_dimension_numbers<[1], [0], [0], [1], [0, 0, 1, 1], [], []>} : vector<56x32xf32>, vector<32x64xf32>, vector<56x64xf32> -> vector<56x64xf32>
    %310 = vector.extract_strided_slice %1 {offsets = [16, 0], sizes = [1, 64], strides = [1, 1]} : vector<20x64xf32> to vector<1x64xf32>
    %311 = vector.broadcast %310 : vector<1x64xf32> to vector<56x64xf32>
    %312 = arith.addf %309, %311 : vector<56x64xf32>
    %cst_91 = arith.constant 5.000000e-01 : f32
    %313 = vector.broadcast %cst_91 : f32 to vector<56x64xf32>
    %314 = arith.mulf %313, %312 : vector<56x64xf32>
    %cst_92 = arith.constant 0.707106769 : f32
    %315 = vector.broadcast %cst_92 : f32 to vector<56x64xf32>
    %316 = arith.mulf %312, %315 : vector<56x64xf32>
    %317 = math.erf %316 : vector<56x64xf32>
    %cst_93 = arith.constant 1.000000e+00 : f32
    %318 = vector.broadcast %cst_93 : f32 to vector<56x64xf32>
    %319 = arith.addf %318, %317 : vector<56x64xf32>
    %320 = arith.mulf %314, %319 : vector<56x64xf32>
    %c1_94 = arith.constant 1 : index
    %c0_95 = arith.constant 0 : index
    %c0_96 = arith.constant 0 : index
    %321 = vector.load %arg13[%c1_94, %c0_95, %c0_96] : memref<2x64x32xf32, #tpu.memory_space<vmem>>, vector<1x64x32xf32>
    %322 = vector.shape_cast %321 : vector<1x64x32xf32> to vector<64x32xf32>
    %cst_97 = arith.constant dense<0.000000e+00> : vector<56x32xf32>
    %323 = tpu.matmul %320, %322, %cst_97 {dimension_numbers = #tpu.dot_dimension_numbers<[1], [0], [0], [1], [0, 0, 1, 1], [], []>} : vector<56x64xf32>, vector<64x32xf32>, vector<56x32xf32> -> vector<56x32xf32>
    %324 = vector.extract_strided_slice %1 {offsets = [17, 0], sizes = [1, 32], strides = [1, 1]} : vector<20x64xf32> to vector<1x32xf32>
    %325 = vector.broadcast %324 : vector<1x32xf32> to vector<56x32xf32>
    %326 = arith.addf %323, %325 : vector<56x32xf32>
    %327 = arith.addf %326, %306 : vector<56x32xf32>
    %328 = vector.extract_strided_slice %1 {offsets = [18, 0], sizes = [1, 32], strides = [1, 1]} : vector<20x64xf32> to vector<1x32xf32>
    %329 = vector.extract_strided_slice %1 {offsets = [19, 0], sizes = [1, 32], strides = [1, 1]} : vector<20x64xf32> to vector<1x32xf32>
    %cst_98 = arith.constant dense<0.000000e+00> : vector<56xf32>
    %330 = vector.multi_reduction <add>, %327, %cst_98 [1] : vector<56x32xf32> to vector<56xf32>
    %331 = vector.shape_cast %330 : vector<56xf32> to vector<56x1xf32>
    %cst_99 = arith.constant 3.200000e+01 : f32
    %332 = vector.broadcast %cst_99 : f32 to vector<56x1xf32>
    %333 = arith.divf %331, %332 : vector<56x1xf32>
    %334 = vector.broadcast %333 : vector<56x1xf32> to vector<56x32xf32>
    %335 = arith.subf %327, %334 : vector<56x32xf32>
    %336 = arith.mulf %335, %335 : vector<56x32xf32>
    %cst_100 = arith.constant dense<0.000000e+00> : vector<56xf32>
    %337 = vector.multi_reduction <add>, %336, %cst_100 [1] : vector<56x32xf32> to vector<56xf32>
    %338 = vector.shape_cast %337 : vector<56xf32> to vector<56x1xf32>
    %cst_101 = arith.constant 3.200000e+01 : f32
    %339 = vector.broadcast %cst_101 : f32 to vector<56x1xf32>
    %340 = arith.divf %338, %339 : vector<56x1xf32>
    %cst_102 = arith.constant 9.99999997E-7 : f32
    %341 = vector.broadcast %cst_102 : f32 to vector<56x1xf32>
    %342 = arith.addf %340, %341 : vector<56x1xf32>
    %343 = math.rsqrt %342 : vector<56x1xf32>
    %344 = vector.broadcast %343 : vector<56x1xf32> to vector<56x32xf32>
    %345 = arith.mulf %335, %344 : vector<56x32xf32>
    %346 = vector.broadcast %328 : vector<1x32xf32> to vector<56x32xf32>
    %347 = arith.mulf %345, %346 : vector<56x32xf32>
    %348 = vector.broadcast %329 : vector<1x32xf32> to vector<56x32xf32>
    %349 = arith.addf %347, %348 : vector<56x32xf32>
    %c0_103 = arith.constant 0 : index
    %c0_104 = arith.constant 0 : index
    %c0_105 = arith.constant 0 : index
    %350 = vector.load %arg4[%c0_103, %c0_104, %c0_105] : memref<3x32x56xf32, #tpu.memory_space<vmem>>, vector<1x32x56xf32>
    %351 = vector.shape_cast %350 : vector<1x32x56xf32> to vector<32x56xf32>
    %cst_106 = arith.constant dense<0.000000e+00> : vector<32x32xf32>
    %352 = tpu.matmul %351, %349, %cst_106 {dimension_numbers = #tpu.dot_dimension_numbers<[1], [0], [0], [1], [0, 0, 1, 1], [], []>} : vector<32x56xf32>, vector<56x32xf32>, vector<32x32xf32> -> vector<32x32xf32>
    %c1_107 = arith.constant 1 : index
    %c0_108 = arith.constant 0 : index
    %c0_109 = arith.constant 0 : index
    %353 = vector.load %arg4[%c1_107, %c0_108, %c0_109] : memref<3x32x56xf32, #tpu.memory_space<vmem>>, vector<1x32x56xf32>
    %354 = vector.shape_cast %353 : vector<1x32x56xf32> to vector<32x56xf32>
    %cst_110 = arith.constant dense<0.000000e+00> : vector<32x32xf32>
    %355 = tpu.matmul %354, %349, %cst_110 {dimension_numbers = #tpu.dot_dimension_numbers<[1], [0], [0], [1], [0, 0, 1, 1], [], []>} : vector<32x56xf32>, vector<56x32xf32>, vector<32x32xf32> -> vector<32x32xf32>
    %c2_111 = arith.constant 2 : index
    %c0_112 = arith.constant 0 : index
    %c0_113 = arith.constant 0 : index
    %356 = vector.load %arg4[%c2_111, %c0_112, %c0_113] : memref<3x32x56xf32, #tpu.memory_space<vmem>>, vector<1x32x56xf32>
    %357 = vector.shape_cast %356 : vector<1x32x56xf32> to vector<32x56xf32>
    %cst_114 = arith.constant dense<0.000000e+00> : vector<32x32xf32>
    %358 = tpu.matmul %357, %349, %cst_114 {dimension_numbers = #tpu.dot_dimension_numbers<[1], [0], [0], [1], [0, 0, 1, 1], [], []>} : vector<32x56xf32>, vector<56x32xf32>, vector<32x32xf32> -> vector<32x32xf32>
    %cst_115 = arith.constant 0.000000e+00 : f32
    %359 = vector.broadcast %cst_115 : f32 to vector<32x32xf32>
    %360 = tpu.concatenate %352, %355, %358, %359 in 1 : vector<32x32xf32>, vector<32x32xf32>, vector<32x32xf32>, vector<32x32xf32> -> vector<32x128xf32>
    %c0_116 = arith.constant 0 : index
    %c0_117 = arith.constant 0 : index
    %361 = vector.load %arg14[%c0_116, %c0_117] : memref<32x128xf32, #tpu.memory_space<vmem>>, vector<32x128xf32>
    tpu.vector_store %arg14[%c0_116, %c0_117], %360 {strides = array<i32>} : memref<32x128xf32, #tpu.memory_space<vmem>>, vector<32x128xf32>,
    return
  }
  func.func @transform_0(%arg0: i32) -> (i32, i32) {
    %c0_i32 = arith.constant 0 : i32
    %c0_i32_0 = arith.constant 0 : i32
    return %arg0, %c0_i32 : i32, i32
  }
  func.func @transform_1(%arg0: i32) -> (i32, i32) {
    %c0_i32 = arith.constant 0 : i32
    %c0_i32_0 = arith.constant 0 : i32
    return %arg0, %c0_i32 : i32, i32
  }
  func.func @transform_2(%arg0: i32) -> (i32, i32) {
    %c0_i32 = arith.constant 0 : i32
    %c0_i32_0 = arith.constant 0 : i32
    %c0_i32_1 = arith.constant 0 : i32
    return %c0_i32, %c0_i32_0 : i32, i32
  }
  func.func @transform_3(%arg0: i32) -> (i32, i32, i32) {
    %c0_i32 = arith.constant 0 : i32
    %c0_i32_0 = arith.constant 0 : i32
    %c0_i32_1 = arith.constant 0 : i32
    %c0_i32_2 = arith.constant 0 : i32
    return %c0_i32, %c0_i32_0, %c0_i32_1 : i32, i32, i32
  }
  func.func @transform_4(%arg0: i32) -> (i32, i32) {
    %c0_i32 = arith.constant 0 : i32
    %c0_i32_0 = arith.constant 0 : i32
    %c0_i32_1 = arith.constant 0 : i32
    return %c0_i32, %c0_i32_0 : i32, i32
  }
  func.func @transform_5(%arg0: i32) -> (i32, i32) {
    %c0_i32 = arith.constant 0 : i32
    %c0_i32_0 = arith.constant 0 : i32
    %c0_i32_1 = arith.constant 0 : i32
    return %c0_i32, %c0_i32_0 : i32, i32
  }
  func.func @transform_6(%arg0: i32) -> (i32, i32) {
    %c0_i32 = arith.constant 0 : i32
    %c0_i32_0 = arith.constant 0 : i32
    %c0_i32_1 = arith.constant 0 : i32
    return %c0_i32, %c0_i32_0 : i32, i32
  }
  func.func @transform_7(%arg0: i32) -> (i32, i32, i32) {
    %c0_i32 = arith.constant 0 : i32
    %c0_i32_0 = arith.constant 0 : i32
    %c0_i32_1 = arith.constant 0 : i32
    %c0_i32_2 = arith.constant 0 : i32
    return %c0_i32, %c0_i32_0, %c0_i32_1 : i32, i32, i32
  }
  func.func @transform_8(%arg0: i32) -> (i32, i32) {
    %c0_i32 = arith.constant 0 : i32
    %c0_i32_0 = arith.constant 0 : i32
    %c0_i32_1 = arith.constant 0 : i32
    return %c0_i32, %c0_i32_0 : i32, i32
  }
  func.func @transform_9(%arg0: i32) -> (i32, i32, i32) {
    %c0_i32 = arith.constant 0 : i32
    %c0_i32_0 = arith.constant 0 : i32
    %c0_i32_1 = arith.constant 0 : i32
    %c0_i32_2 = arith.constant 0 : i32
    return %c0_i32, %c0_i32_0, %c0_i32_1 : i32, i32, i32
  }
  func.func @transform_10(%arg0: i32) -> (i32, i32, i32) {
    %c0_i32 = arith.constant 0 : i32
    %c0_i32_0 = arith.constant 0 : i32
    %c0_i32_1 = arith.constant 0 : i32
    %c0_i32_2 = arith.constant 0 : i32
    return %c0_i32, %c0_i32_0, %c0_i32_1 : i32, i32, i32
  }
  func.func @transform_11(%arg0: i32) -> (i32, i32, i32) {
    %c0_i32 = arith.constant 0 : i32
    %c0_i32_0 = arith.constant 0 : i32
    %c0_i32_1 = arith.constant 0 : i32
    %c0_i32_2 = arith.constant 0 : i32
    return %c0_i32, %c0_i32_0, %c0_i32_1 : i32, i32, i32
  }
  func.func @transform_12(%arg0: i32) -> (i32, i32, i32) {
    %c0_i32 = arith.constant 0 : i32
    %c0_i32_0 = arith.constant 0 : i32
    %c0_i32_1 = arith.constant 0 : i32
    %c0_i32_2 = arith.constant 0 : i32
    return %c0_i32, %c0_i32_0, %c0_i32_1 : i32, i32, i32
  }
  func.func @transform_13(%arg0: i32) -> (i32, i32) {
    %c0_i32 = arith.constant 0 : i32
    %c0_i32_0 = arith.constant 0 : i32
    return %arg0, %c0_i32 : i32, i32
  }
}

</mosaic_0001>

<bundles_post_ra>
// kernel: tpu_custom_call.1
= control target key start
LH: loop header
LB: loop body
LE: loop exit
PB: predicated region body
PF: predicated region fallthrough
CT: control target
= control target key end

     0   :  { %s12251_s0 = inlined_call_operand.vmem [shape: f32[64,4], index: 0, kind: input, shape index: {}]   ;;  %s12252_s1 = inlined_call_operand.vmem [shape: f32[64,3], index: 1, kind: input, shape index: {}]   ;;  %s12253_s2 = inlined_call_operand.vmem [shape: f32[56,56], index: 2, kind: input, shape index: {}]   ;;  %s12254_s3 = inlined_call_operand.vmem [shape: f32[3,32,56], index: 3, kind: input, shape index: {}]   ;;  %s12255_s4 = inlined_call_operand.vmem [shape: f32[32,32], index: 4, kind: input, shape index: {}]   ;;  %s12256_s5 = inlined_call_operand.vmem [shape: f32[16,16], index: 5, kind: input, shape index: {}]   ;;  %s12257_s6 = inlined_call_operand.vmem [shape: f32[47,32], index: 6, kind: input, shape index: {}]   ;;  %s12258_s7 = inlined_call_operand.vmem [shape: f32[3,32,16], index: 7, kind: input, shape index: {}]   ;;  %s12259_s8 = inlined_call_operand.vmem [shape: f32[20,64], index: 8, kind: input, shape index: {}]   ;;  %s12260_s9 = inlined_call_operand.vmem [shape: f32[2,32,96], index: 9, kind: input, shape index: {}]   ;;  %s12261_s10 = inlined_call_operand.vmem [shape: f32[2,32,32], index: 10, kind: input, shape index: {}]   ;;  %s12262_s11 = inlined_call_operand.vmem [shape: f32[2,32,64], index: 11, kind: input, shape index: {}]   ;;  %s12263_s12 = inlined_call_operand.vmem [shape: f32[2,64,32], index: 12, kind: input, shape index: {}]   ;;  %s12264_s13 = inlined_call_operand.hbm [shape: f32[64,128], index: 13, kind: output, shape index: {}]  }
   0x1   :  { %12294 = sst [smem:[#allocation10_spill]] %s12251_s0 }
   0x2   :  { %18 = vsyncpa [#allocation3], 0 }
   0x3   :  { %20 = vsyncpa [#allocation3 + $0x1], 0  ;;  %s9369_s25 = smov 0   ;;  %s9371_s26 = smov 0  }
   0x4   :  { %s9373_s27 = smov 0   ;;  %s9375_s28 = smov 0  }
   0x5 LB: > { %12295 = sst [smem:[#allocation5_spill]] %s9276_s27  ;;  %s9390_s29 = sadd.s32 4294967295, %s9280_s28   ;;  %s9280_s28 = sphi %s9375_s28, %s12326_s28   ;;  %s9276_s27 = sphi %s9373_s27, %s12323_s27   ;;  %s9272_s26 = sphi %s9371_s26, %s12325_s26   ;;  %s9268_s25 = sphi %s9369_s25, %s12324_s25  }
   0x6   : > { %s6625_s30 = sadd.s32 4294967294, %s9280_s28   ;;  %s9394_s14 = sadd.s32 1, %s9280_s28  }
   0x7   : > { %s316_s15 = sadd.s32 1, %s9276_s27  ;;  %s313_s16 = ssub.s32 %s9280_s28, %s9394_s14 }
   0x8   : > { %p326_p0 = scmp.ne.s32.totalorder %s9276_s27, %s9272_s26  ;;  %p314_p1 = scmp.eq.s32.totalorder %s313_s16, 0 }
   0x9   : > { %p327_p2 = scmp.eq.s32.totalorder %s9390_s29, 1  ;;  %p332_p3 = scmp.ne.s32.totalorder %s9272_s26, %s9268_s25 }
   0xa   : > { %p333_p4 = scmp.eq.s32.totalorder %s6625_s30, 1  ;;  %p6628_p7 = scmp.ge.s32.totalorder %s9280_s28, 1 }
   0xb   : > { %s9405_s17 = scalar_select %p314_p1, %s9276_s27, %s316_s15  }
   0xc   : > { %p9407_p5 = por %p327_p2, %p326_p0  ;;  %p9411_p6 = por %p333_p4, %p332_p3 }
   0xd   : > { %12296 = sst [smem:[#allocation6_spill]] %s9405_s17  ;;  %p402_p8 = scmp.lt.s32.totalorder %s9280_s28, 3 }
   0xf   : > { %p403_p9 = pnand %p6628_p7, %p402_p8 }
  0x11   : > { %406 = sbr.rel (%p403_p9) target bundleno = 8094 (0x1f9e), region = 72 }
  0x18   : > { %s6630_s20 = sshll.u32 %s9390_s29, 2  ;;  %vm491_vm0 = vcmask 1046528   ;;  %v464_v0 = vld [vmem:[%s12257_s6] sm:$0xff]  ;;  %v9424_v1 = vld [vmem:[%s12257_s6 + $0x8] sm:$0xff]  ;;  %vm9282_vm1 = vmmov 1   ;;  %s12299_s0 = sld [smem:[#allocation10_spill]] }
  0x19   : > { %p452_p10 = scmp.lt.s32.totalorder %s6630_s20, 7  ;;  %v8279_v2 = vpack.c.bf16 %v9424_v1, %v464_v0  ;;  %vm8280_vm2 = vmpackc.low %vm491_vm0, %vm9282_vm1  ;;  %vm485_vm3 = vcmask 1040384   ;;  %s9283_s24 = smov 12   ;;  %v680_v23 = vld [vmem:[%s12258_s7] sm:$0xff]  ;;  %v681_v24 = vld [vmem:[%s12258_s7 + $0x8] sm:$0xff]  ;;  %vm555_vm4 = vcmask 31744  }
  0x1a   : > { %s9284_s27 = smov 4   ;;  %v8285_v25 = vpack.c.bf16 %v681_v24, %v680_v23  ;;  %vm560_vm5 = vcmask 64512   ;;  %vm565_vm6 = vcmask 97280   ;;  %vm580_vm7 = vcmask 121856   ;;  %v682_v54 = vld [vmem:[%s12258_s7 + $0x10] sm:$0xff]  ;;  %v683_v55 = vld [vmem:[%s12258_s7 + $0x18] sm:$0xff] }
  0x1b   : > { %s12328_s20 = smov (!%p452_p10, %s6630_s20), 7  ;;  %8281 = vmatprep.subr.msk.bf16.mxu1 %vm8280_vm2, %v8279_v2  ;;  %v8289_v56 = vpack.c.bf16 %v683_v55, %v682_v54  ;;  %v466_v57 = vld [vmem:[%s12257_s6 + $0x10] sm:$0xff]  ;;  %v9490_v58 = vld [vmem:[%s12257_s6 + $0x18] sm:$0xff]  ;;  %v573_v59 = vrot.slane %v9424_v1, 7  ;;  %vm688_vm8 = vcmask 261120   ;;  %v787_v24 = vld [vmem:[%s12255_s4 + $0x8] sm:$0xff] }
  0x1c   : > { %s6631_s30 = sshll.u32 %s12328_s20, 3  ;;  %8284 = vmatpush3.bf16.msk.msra.mxu1 %vm8280_vm2, %v8279_v2  ;;  %s12266_s20 = smov 8   ;;  %v574_v60 = vrot.slane %v466_v57, 7  ;;  %v576_v61 = vrot.slane %v9490_v58, 7  ;;  %vm895_vm9 = vcmask 130048   ;;  %vm9288_vm10 = vmmov 0   ;;  %vm9885_vm14 = vmpackc.low %vm560_vm5, %vm560_vm5 }
  0x1d   : > { %s9431_s17 = scalar_lea.vmem %s12252_s1, %s6631_s30  ;;  %8286 = vmatprep.subr.bf16.mxu1 %v8285_v25  ;;  %s9286_s16 = smov 16   ;;  %v469_v57 = vld [vmem:[%s12257_s6 + $0x28] sm:$0x7f]  ;;  %v6657_v58 = vld [vmem:[%s12258_s7 + $0x40] sm:$0xff]  ;;  %vm2140_vm15 = vcmask 457728   ;;  %vm3548_vm1 = vcmask 523264  }
  0x1e   : > { %s455_s23 = scalar_lea.vmem %s12299_s0, %s6631_s30  ;;  %v478_v3 = vld [vmem:[%s9431_s17 + $0x8] sm:$0xff]  ;;  %v477_v18 = vld [vmem:[%s9431_s17] sm:$0xff]  ;;  %v479_v28 = vld [vmem:[%s9431_s17 + $0x10] sm:$0xff]  ;;  %v575_v62 = vsel %vm485_vm3, %v573_v59, %v574_v60  ;;  %v577_v63 = vsel %vm485_vm3, %v574_v60, %v576_v61  ;;  %s12286_s30 = smov 112   ;;  %vm6528_vm2 = vcmask 785408  }
  0x1f   : > { %v473_v4 = vld [vmem:[%s455_s23] sm:$0xff]  ;;  %v474_v5 = vld [vmem:[%s455_s23 + $0x8] sm:$0xff]  ;;  %545 = vrot.lane.b32.xlu1 %v478_v3, %s9283_s24  ;;  %v475_v10 = vld [vmem:[%s455_s23 + $0x10] sm:$0xff]  ;;  %s12284_s15 = smov 104   ;;  %s12280_s21 = smov 64  }
  0x20   : > { %513 = vrot.lane.b32.xlu0 %v473_v4, %s9284_s27  ;;  %v486_v6 = vrot.slane %v473_v4, 7  ;;  %v492_v7 = vrot.slane %v473_v4, 1  ;;  %v482_v8 = vrot.slane %v474_v5, 7  ;;  %v493_v9 = vrot.slane %v474_v5, 1  ;;  %v476_v12 = vld [vmem:[%s455_s23 + $0x18] sm:$0xff]  ;;  %s12307_s22 = smov 8  }
  0x21   : > { %v502_v11 = vrot.slane %v475_v10, 7  ;;  %v499_v14 = vrot.slane %v476_v12, 7  ;;  %v507_v21 = vrot.slane %v475_v10, 1  ;;  %v508_v22 = vrot.slane %v476_v12, 1  ;;  %v480_v29 = vld [vmem:[%s9431_s17 + $0x18] sm:$0xff]  ;;  %s12312_s23 = smov 112  }
  0x22   : > { %v494_v13 = vsel %vm491_vm0, %v492_v7, %v493_v9  ;;  %v490_v15 = vsel %vm485_vm3, %v482_v8, %v486_v6  ;;  %v487_v16 = vsel %vm485_vm3, %v486_v6, %v482_v8  ;;  %v497_v19 = vsel %vm491_vm0, %v493_v9, %v492_v7  ;;  %v786_v8 = vld [vmem:[%s12255_s4] sm:$0xff]  ;;  %s12314_s17 = smov 96  }
  0x23   : > { %527 = vrot.lane.b32.xlu1 %v494_v13, %s12266_s20  ;;  %v506_v17 = vsel %vm485_vm3, %v499_v14, %v502_v11  ;;  %v503_v20 = vsel %vm485_vm3, %v502_v11, %v499_v14  ;;  %v509_v26 = vsel %vm491_vm0, %v507_v21, %v508_v22  ;;  %v512_v27 = vsel %vm491_vm0, %v508_v22, %v507_v21 }
  0x24   : > { %515 = vrot.lane.b32.xlu0 %v474_v5, %s9284_s27  ;;  %7363 = vmatprep.mubr.msk.f32.mxu0 %vm688_vm8, %v786_v8  ;;  %v684_v9 = vlaneseq  ;;  %vm3115_vm0 = vcmask 195584  }
  0x27   : > { %529 = vrot.lane.b32.xlu1 %v497_v19, %s12266_s20 }
  0x28   : > { %543 = vrot.lane.b32.xlu0 %v477_v18, %s9283_s24 }
  0x2b   : > { %519 = vrot.lane.b32.xlu1 %v476_v12, %s9284_s27  ;;  %v9526_v12 = vld [vmem:[%s12259_s8] sm:$0xff] }
  0x2c   : > { %517 = vrot.lane.b32.xlu0 %v475_v10, %s9284_s27  ;;  %v9518_v10 = vshrl.u32 %v684_v9, 7  ;;  %s12313_s27 = smov 104  }
  0x2e   : > { %v9521_v11 = vsub.s32 0, %v9518_v10 }
  0x2f   : > { %533 = vrot.lane.b32.xlu1 %v512_v27, %s12266_s20  ;;  %v6647_v27 = vld [vmem:[%s12258_s7 + $0x20] sm:$0xff] }
  0x30   : > { %531 = vrot.lane.b32.xlu0 %v509_v26, %s12266_s20  ;;  %v687_v13 = vrot.slane %v9526_v12, %v9521_v11  ;;  %v789_v26 = vld [vmem:[%s12255_s4 + $0x18] sm:$0xff]  ;;  %s12282_s20 = smov 96  }
  0x33   : > { %549 = vrot.lane.b32.xlu1 %v480_v29, %s9283_s24  ;;  %v6649_v29 = vld [vmem:[%s12258_s7 + $0x30] sm:$0xff] }
  0x34   : > { %547 = vrot.lane.b32.xlu0 %v479_v28, %s9283_s24  ;;  %v6648_v28 = vld [vmem:[%s12258_s7 + $0x28] sm:$0xff]  ;;  %s12288_s24 = smov 120  }
  0x91   : > { %v546_v30 = vpop.permute.xlu1 %545 }
  0x92   : > { %v514_v31 = vpop.permute.xlu0 %513 }
  0x93   : > { %v556_v34 = vsel %vm555_vm4, %v490_v15, %v514_v31  ;;  %v6650_v31 = vld [vmem:[%s12258_s7 + $0x38] sm:$0xff] }
  0x95   : > { %v528_v33 = vpop.permute.xlu1 %527 }
  0x96   : > { %v516_v32 = vpop.permute.xlu0 %515  ;;  %v561_v36 = vsel %vm560_vm5, %v556_v34, %v528_v33 }
  0x97   : > { %v557_v35 = vsel %vm555_vm4, %v487_v16, %v516_v32  ;;  %v8305_v32 = vpack.c.bf16 %v6650_v31, %v6649_v29 }
  0x99   : > { %v530_v38 = vpop.permute.xlu1 %529 }
  0x9a   : > { %v544_v37 = vpop.permute.xlu0 %543  ;;  %v562_v39 = vsel %vm560_vm5, %v557_v35, %v530_v38 }
  0x9b   : > { %v566_v40 = vsel %vm565_vm6, %v561_v36, %v544_v37  ;;  %v567_v41 = vsel %vm565_vm6, %v562_v39, %v546_v30  ;;  %v8301_v30 = vpack.c.bf16 %v6648_v28, %v6647_v27 }
  0x9c   : > { %7335 = vmatprep.mubr.msk.f32.mxu1 %vm580_vm7, %v566_v40 }
  0x9d   : > { %7336 = vmatmul.mubr.msk.f32.vlgmr.msra.gmra.mrb[0].mxu1 %vm580_vm7, %v567_v41  ;;  %v520_v43 = vpop.permute.xlu1 %519 }
  0x9e   : > { %v518_v42 = vpop.permute.xlu0 %517  ;;  %8288 = vmatpush3.bf16.msra.mxu1 %v8285_v25  ;;  %v559_v47 = vsel %vm555_vm4, %v503_v20, %v520_v43  ;;  %v788_v25 = vld [vmem:[%s12255_s4 + $0x10] sm:$0xff]  ;;  %v1000_v43 = vld [vmem:[%s12256_s5] sm:$0xff] }
  0x9f   : > { %v558_v46 = vsel %vm555_vm4, %v506_v17, %v518_v42  ;;  %8290 = vmatprep.subr.bf16.mxu1 %v8289_v56 }
  0xa1   : > { %v534_v45 = vpop.permute.xlu1 %533 }
  0xa2   : > { %v532_v44 = vpop.permute.xlu0 %531  ;;  %v564_v49 = vsel %vm560_vm5, %v559_v47, %v534_v45  ;;  %8292 = vmatpush3.bf16.msra.mxu1 %v8289_v56  ;;  %v12270_v45 = vmov 0.0   ;;  %v468_v56 = vld [vmem:[%s12257_s6 + $0x20] sm:$0xff] }
  0xa3   : > { %v563_v48 = vsel %vm560_vm5, %v558_v46, %v532_v44  ;;  %8302 = vmatprep.subr.bf16.mxu1 %v8301_v30  ;;  %v12272_v44 = vmov 0.0|0.0   ;;  %v9572_v46 = vsub.s32 1, %v9518_v10 }
  0xa5   : > { %v550_v51 = vpop.permute.xlu1 %549  ;;  %v906_v47 = vrot.slane %v9526_v12, %v9572_v46 }
  0xa6   : > { %v548_v50 = vpop.permute.xlu0 %547  ;;  %v569_v53 = vsel %vm565_vm6, %v564_v49, %v550_v51 }
  0xa7   : > { %v568_v52 = vsel %vm565_vm6, %v563_v48, %v548_v50 }
  0xa8   : > { %7338 = vmatprep.mubr.msk.f32.mxu1 %vm580_vm7, %v568_v52 }
  0xa9   : > { %7339 = vmatmul.mubr.msk.f32.gmra.mrb[2].mxu1 %vm580_vm7, %v569_v53 }
 0x170   : > { %v7337_v0 = vpop.f32.mrb[0].mxu1 }
 0x171   : > { %v661_v2 = vpop.f32.mrb[1].mxu1  ;;  %v9500_v4 = vadd.f32 %v7337_v0, %v577_v63  ;;  %v1184_v0 = vrot.slane %v469_v57, 7 }
 0x172   : > { %v9498_v3 = vadd.f32 %v661_v2, %v575_v62 }
 0x174   : > { %7349 = vmatprep.mubr.msk.f32.mxu1 %vm688_vm8, %v9498_v3  ;;  %v1277_v37 = vsel %vm688_vm8, %v9498_v3, 0.0 }
 0x175   : > { %7350 = vmatmul.mubr.msk.f32.vlgmr.msra.gmra.mrb[4].mxu1 %vm688_vm8, %v9500_v4 }
 0x176   : > { %8304 = vmatpush3.bf16.msra.mxu1 %v8301_v30 }
 0x177   : > { %8306 = vmatprep.subr.bf16.mxu1 %v8305_v32 }
 0x17a   : > { %8308 = vmatpush3.bf16.msra.mxu1 %v8305_v32 }
 0x17b   : > { %8313 = vmatprep.subr.bf16.mxu1 %v12272_v44 }
 0x17c   : > { %v7340_v1 = vpop.f32.mrb[2].mxu1 }
 0x17d   : > { %v671_v5 = vpop.f32.mrb[3].mxu1  ;;  %v9508_v7 = vadd.f32 %v7340_v1, %v577_v63  ;;  %v1182_v63 = vrot.slane %v468_v56, 7 }
 0x17e   : > { %v9506_v6 = vadd.f32 %v671_v5, %v575_v62 }
 0x17f   : > { %v1286_v38 = vsel %vm688_vm8, %v9508_v7, 0.0  ;;  %v1183_v9 = vsel %vm485_vm3, %v576_v61, %v1182_v63  ;;  %v6658_v61 = vld [vmem:[%s12258_s7 + $0x48] sm:$0xff] }
 0x180   : > { %7352 = vmatprep.mubr.msk.f32.mxu1 %vm688_vm8, %v9506_v6 }
 0x181   : > { %7353 = vmatmul.mubr.msk.f32.gmra.mrb[6].mxu1 %vm688_vm8, %v9508_v7 }
 0x248   : > { %v7351_v14 = vpop.f32.mrb[4].mxu1 }
 0x249   : > { %v773_v15 = vadd.f32 %v7351_v14, %v687_v13  ;;  %v767_v16 = vpop.f32.mrb[5].mxu1  ;;  %v1001_v14 = vld [vmem:[%s12256_s5 + $0x8] sm:$0xff] }
 0x24a   : > { %v768_v17 = vadd.f32 %v767_v16, %v687_v13  ;;  %v6659_v16 = vld [vmem:[%s12258_s7 + $0x50] sm:$0xff] }
 0x24c   : > { %v8293_v18 = vpack.c.bf16 %v773_v15, %v768_v17  ;;  %v8314_v17 = vpack.c.bf16 %v6658_v61, %v6657_v58 }
 0x24e   : > { %8294 = vmatprep.subr.bf16.mxu0 %v8293_v18 }
 0x24f   : > { %8296 = vmatpush3.bf16.msra.mxu0 %v8293_v18  ;;  %v6660_v18 = vld [vmem:[%s12258_s7 + $0x58] sm:$0xff] }
 0x254   : > { %v7354_v19 = vpop.f32.mrb[6].mxu1 }
 0x255   : > { %v783_v20 = vadd.f32 %v7354_v19, %v687_v13  ;;  %v777_v21 = vpop.f32.mrb[7].mxu1  ;;  %v8317_v19 = vpack.c.bf16 %v6660_v18, %v6659_v16 }
 0x256   : > { %v778_v22 = vadd.f32 %v777_v21, %v687_v13  ;;  %v1185_v13 = vsel %vm485_vm3, %v1182_v63, %v1184_v0 }
 0x257   : > { %v8320_v15 = vpack.c.bf16 %v1185_v13, %v1183_v9 }
 0x258   : > { %v8297_v23 = vpack.c.bf16 %v783_v20, %v778_v22 }
 0x25a   : > { %8298 = vmatprep.subr.bf16.mxu0 %v8297_v23 }
 0x25b   : > { %8300 = vmatpush3.bf16.msra.mxu0 %v8297_v23 }
 0x25e   : > { %7364 = vmatmul.mubr.msk.f32.vlgmr.msra.gmra.mrb[0].mxu0 %vm688_vm8, %v787_v24  ;;  %v9616_v24 = vsub.s32 3, %v9518_v10 }
 0x25f   : > { %7366 = vmatprep.mubr.msk.f32.mxu0 %vm688_vm8, %v788_v25 }
 0x260   : > { %12300 = vst [vmem:[#allocation7_spill] sm:$0xff] %v9616_v24  ;;  %v9621_v28 = vrot.slane %v9526_v12, %v9616_v24 }
 0x262   : > { %7367 = vmatmul.mubr.msk.f32.gmra.mrb[2].mxu0 %vm688_vm8, %v789_v26 }
 0x263   : > { %7384 = vmatprep.mubr.msk.f32.mxu0 %vm895_vm9, %v1000_v43  ;;  %v1401_v43 = vld [vmem:[%s12260_s9 + $0x18] sm:$0xff] }
 0x331   : > { %v7365_v33 = vpop.f32.mrb[0].mxu0 }
 0x332   : > { %v868_v34 = vpop.f32.mrb[1].mxu0 }
 0x335   : > { %v7368_v35 = vpop.f32.mrb[2].mxu0 }
 0x336   : > { %891 = vrot.lane.b32.xlu1 %v7368_v35, %s9286_s16  ;;  %v878_v36 = vpop.f32.mrb[3].mxu0 }
 0x337   : > { %889 = vrot.lane.b32.xlu0 %v878_v36, %s9286_s16  ;;  %v1283_v36 = vsel %vm688_vm8, %v9506_v6, 0.0 }
 0x35a   : > { %1278 = vadd.xlane.f32.xlu1 %v1277_v37 }
 0x35e   : > { %1287 = vadd.xlane.f32.xlu1 %v1286_v38  ;;  %v1398_v38 = vld [vmem:[%s12260_s9] sm:$0xff] }
 0x3a8   : > { %v892_v39 = vpop.permute.xlu1 %891 }
 0x3a9   : > { %v890_v40 = vpop.permute.xlu0 %889  ;;  %v897_v42 = vsel %vm895_vm9, %v7365_v33, %v892_v39  ;;  %v1399_v39 = vld [vmem:[%s12260_s9 + $0x8] sm:$0xff] }
 0x3aa   : > { %v896_v41 = vsel %vm895_vm9, %v868_v34, %v890_v40  ;;  %v8323_v40 = vpack.c.bf16 %v1399_v39, %v1398_v38 }
 0x3ab   : > { %7377 = vmatprep.mubr.msk.f32.mxu1 %vm688_vm8, %v896_v41 }
 0x3ac   : > { %7378 = vmatmul.mubr.msk.f32.vlgmr.msra.gmra.mrb[8].mxu1 %vm688_vm8, %v897_v42  ;;  %v1400_v42 = vld [vmem:[%s12260_s9 + $0x10] sm:$0xff] }
 0x3ad   : > { %7395 = vmatprep.mubr.msk.f32.mxu1 %vm9288_vm10, %v12270_v45  ;;  %8315 = vmatpush3.bf16.msra.mxu1 %v8314_v17 }
 0x3ae   : > { %8316 = vmatprep.subr.bf16.mxu1 %v12272_v44 }
 0x3b1   : > { %8318 = vmatpush3.bf16.msra.mxu1 %v8317_v19 }
 0x3b2   : > { %8322 = vmatprep.subr.bf16.mxu1 %v12272_v44 }
 0x3e7   : > { %v1279_v20 = vpop.xlane.xlu1 %1278 }
 0x3e8   : > { %v1299_v23 = vmul.f32 0.03125, %v1279_v20 }
 0x3ea   : > { %v1306_v27 = vsub.f32 %v9498_v3, %v1299_v23  ;;  %v1280_v3 = vsel %vm688_vm8, %v9500_v4, 0.0 }
 0x3ec   : > { %v1313_v33 = vmul.f32 %v1306_v27, %v1306_v27 }
 0x3ee   : > { %v1320_v34 = vsel %vm688_vm8, %v1313_v33, 0.0 }
 0x47f   : > { %v7379_v48 = vpop.f32.mrb[8].mxu1 }
 0x480   : > { %v985_v49 = vadd.f32 %v7379_v48, %v906_v47  ;;  %v979_v50 = vpop.f32.mrb[9].mxu1  ;;  %v8326_v48 = vpack.c.bf16 %v1401_v43, %v1400_v42 }
 0x481   : > { %v980_v51 = vadd.f32 %v979_v50, %v906_v47 }
 0x482   : > { %v991_v52 = vmin.f32 %v985_v49, 0.0  ;;  %vm989_vm11 = vcmp.gt.f32.partialorder %v985_v49, 0.0 }
 0x483   : > { %v990_v53 = vmin.f32 %v980_v51, 0.0  ;;  %vm988_vm12 = vcmp.gt.f32.partialorder %v980_v51, 0.0 }
 0x484   : > { %v994_v54 = vmul.f32 1.442695, %v991_v52 }
 0x485   : > { %v992_v55 = vmul.f32 1.442695, %v990_v53 }
 0x486   : > { %8881 = vpow2.f32 %v994_v54  ;;  %v12269_v54 = vsub.s32 4, %v9518_v10 }
 0x487   : > { %8883 = vpow2.f32 %v992_v55  ;;  %v12268_v55 = vsub.s32 5, %v9518_v10 }
 0x488   : > { %v9658_v56 = vrot.slane %v9526_v12, %v12269_v54 }
 0x490   : > { %v8882_v59 = vpop.eup %8881 }
 0x491   : > { %v8884_v60 = vpop.eup %8883  ;;  %v6654_v62 = vadd.f32 -1.0, %v8882_v59 }
 0x492   : > { %v6653_v2 = vadd.f32 -1.0, %v8884_v60 }
 0x493   : > { %v999_v1 = vsel %vm989_vm11, %v985_v49, %v6654_v62  ;;  %v1288_v49 = vpop.xlane.xlu1 %1287  ;;  %v9663_v62 = vrot.slane %v9526_v12, %v12268_v55 }
 0x494   : > { %v998_v5 = vsel %vm988_vm12, %v980_v51, %v6653_v2 }
 0x495   : > { %v8309_v8 = vpack.c.bf16 %v999_v1, %v998_v5 }
 0x497   : > { %8310 = vmatprep.subr.bf16.mxu0 %v8309_v8 }
 0x498   : > { %8312 = vmatpush3.bf16.msra.mxu0 %v8309_v8 }
 0x499   : > { %8319 = vmatprep.subr.bf16.mxu0 %v12272_v44 }
 0x49b   : > { %7385 = vmatmul.mubr.msk.f32.vlgmr.msra.gmra.mrb[4].mxu0 %vm895_vm9, %v1001_v14 }
 0x49c   : > { %8321 = vmatpush3.bf16.msra.mxu0 %v8320_v15  ;;  %7402 = vmatprep.mubr.msk.f32.mxu0 %vm9288_vm10, %v12270_v45 }
 0x49d   : > { %8328 = vmatprep.subr.bf16.mxu0 %v12272_v44 }
 0x49f   : > { %7403 = vmatmul.mubr.msk.f32.vlgmr.msra.gmra.mrb[6].mxu0 %vm895_vm9, %v998_v5 }
 0x4a0   : > { %7405 = vmatprep.mubr.msk.f32.mxu0 %vm9288_vm10, %v12270_v45 }
 0x4a3   : > { %7406 = vmatmul.mubr.msk.f32.gmra.mrb[8].mxu0 %vm895_vm9, %v999_v1 }
 0x4a4   : > { %7408 = vmatprep.mubr.msk.f32.mxu0 %vm9288_vm10, %v12270_v45 }
 0x56e   : > { %v7386_v21 = vpop.f32.mrb[4].mxu0 }
 0x56f   : > { %1084 = vrot.lane.b32.xlu0 %v7386_v21, %s9286_s16  ;;  %v1074_v22 = vpop.f32.mrb[5].mxu0 }
 0x572   : > { %v1263_v25 = vpop.f32.mrb[6].mxu0 }
 0x573   : > { %v7404_v26 = vpop.f32.mrb[7].mxu0  ;;  %v1264_v35 = vadd.f32 %v1263_v25, %v9621_v28 }
 0x575   : > { %v1289_v37 = vsel %vm688_vm8, %v1264_v35, 0.0 }
 0x576   : > { %v1268_v29 = vpop.f32.mrb[8].mxu0 }
 0x577   : > { %v9624_v30 = vadd.f32 %v1268_v29, %v9621_v28  ;;  %v7407_v31 = vpop.f32.mrb[9].mxu0 }
 0x579   : > { %v1292_v32 = vsel %vm688_vm8, %v9624_v30, 0.0 }
 0x57a   : > { %1293 = vadd.xlane.f32.xlu1 %v1292_v32 }
 0x57e   : > { %1321 = vadd.xlane.f32.xlu1 %v1320_v34 }
 0x58e   : > { %1281 = vadd.xlane.f32.xlu0 %v1280_v3 }
 0x592   : > { %1284 = vadd.xlane.f32.xlu0 %v1283_v36 }
 0x596   : > { %1290 = vadd.xlane.f32.xlu0 %v1289_v37 }
 0x5e1   : > { %v1085_v41 = vpop.permute.xlu0 %1084 }
 0x5e2   : > { %v1087_v47 = vsel %vm895_vm9, %v1074_v22, %v1085_v41 }
 0x5e3   : > { %7396 = vmatmul.mubr.msk.f32.vlgmr.msra.gmra.mrb[10].mxu1 %vm688_vm8, %v1087_v47 }
 0x5e4   : > { %8324 = vmatpush3.bf16.msra.mxu1 %v8323_v40  ;;  %7419 = vmatprep.mubr.msk.f32.mxu1 %vm9288_vm10, %v12270_v45 }
 0x5e5   : > { %8325 = vmatprep.subr.bf16.mxu1 %v12272_v44 }
 0x5e8   : > { %8327 = vmatpush3.bf16.msra.mxu1 %v8326_v48 }
 0x5e9   : > { %8340 = vmatprep.subr.bf16.mxu1 %v12272_v44 }
 0x607   : > { %v1294_v50 = vpop.xlane.xlu1 %1293 }
 0x60b   : > { %v1322_v51 = vpop.xlane.xlu1 %1321 }
 0x60c   : > { %v1341_v52 = vmul.f32 0.03125, %v1322_v51 }
 0x60e   : > { %v1348_v53 = vadd.f32 1e-05, %v1341_v52 }
 0x610   : > { %8885 = vrsqrt.f32 %v1348_v53 }
 0x61a   : > { %v8886_v57 = vpop.eup %8885 }
 0x61b   : > { %v1362_v59 = vmul.f32 %v8886_v57, %v1306_v27  ;;  %v1282_v60 = vpop.xlane.xlu0 %1281 }
 0x61c   : > { %v1300_v29 = vmul.f32 0.03125, %v1282_v60 }
 0x61d   : > { %v1373_v63 = vmul.f32 %v9658_v56, %v1362_v59 }
 0x61e   : > { %v1307_v31 = vsub.f32 %v9500_v4, %v1300_v29 }
 0x61f   : > { %v1285_v0 = vpop.xlane.xlu0 %1284  ;;  %v9667_v2 = vadd.f32 %v9663_v62, %v1373_v63 }
 0x620   : > { %v1301_v1 = vmul.f32 0.03125, %v1285_v0  ;;  %v1314_v37 = vmul.f32 %v1307_v31, %v1307_v31 }
 0x621   : > { %7420 = vmatmul.mubr.msk.f32.vlgmr.msra.gmra.mrb[12].mxu1 %vm688_vm8, %v9667_v2 }
 0x622   : > { %v9672_v5 = vsub.f32 %v9506_v6, %v1301_v1  ;;  %7422 = vmatprep.mubr.msk.f32.mxu1 %vm9288_vm10, %v12270_v45  ;;  %v9685_v6 = vsub.s32 2, %v9518_v10  ;;  %v1323_v39 = vsel %vm688_vm8, %v1314_v37, 0.0 }
 0x623   : > { %v1291_v8 = vpop.xlane.xlu0 %1290 }
 0x624   : > { %v1303_v9 = vmul.f32 0.03125, %v1291_v8  ;;  %v1315_v13 = vmul.f32 %v9672_v5, %v9672_v5  ;;  %12301 = vst [vmem:[#allocation8_spill] sm:$0xff] %v9685_v6  ;;  %v1096_v16 = vrot.slane %v9526_v12, %v9685_v6  ;;  %v1302_v12 = vmul.f32 0.03125, %v1288_v49 }
 0x626   : > { %v9678_v14 = vsub.f32 %v1264_v35, %v1303_v9  ;;  %v1326_v15 = vsel %vm688_vm8, %v1315_v13, 0.0  ;;  %v1309_v3 = vsub.f32 %v9508_v7, %v1302_v12  ;;  %v1304_v35 = vmul.f32 0.03125, %v1294_v50 }
 0x627   : > { %1327 = vadd.xlane.f32.xlu1 %v1326_v15 }
 0x628   : > { %v1317_v58 = vmul.f32 %v9678_v14, %v9678_v14  ;;  %v1311_v38 = vsub.f32 %v9624_v30, %v1304_v35  ;;  %v1316_v40 = vmul.f32 %v1309_v3, %v1309_v3 }
 0x62a   : > { %v1332_v61 = vsel %vm688_vm8, %v1317_v58, 0.0  ;;  %v1329_v41 = vsel %vm688_vm8, %v1316_v40, 0.0  ;;  %v1318_v4 = vmul.f32 %v1311_v38, %v1311_v38 }
 0x62b   : > { %1333 = vadd.xlane.f32.xlu1 %v1332_v61 }
 0x6b4   : > { %v1328_v7 = vpop.xlane.xlu1 %1327 }
 0x6b5   : > { %v1343_v42 = vmul.f32 0.03125, %v1328_v7 }
 0x6b6   : > { %v1166_v17 = vpop.f32.mrb[10].mxu1 }
 0x6b7   : > { %v1167_v18 = vadd.f32 %v1166_v17, %v1096_v16  ;;  %v7397_v19 = vpop.f32.mrb[11].mxu1  ;;  %v1350_v30 = vadd.f32 1e-05, %v1343_v42 }
 0x6b8   : > { %v1334_v49 = vpop.xlane.xlu1 %1333 }
 0x6b9   : > { %v1171_v20 = vmin.f32 %v1167_v18, 0.0  ;;  %vm1170_vm13 = vcmp.gt.f32.partialorder %v1167_v18, 0.0  ;;  %v1345_v53 = vmul.f32 0.03125, %v1334_v49 }
 0x6bb   : > { %v1172_v21 = vmul.f32 1.442695, %v1171_v20  ;;  %v1352_v0 = vadd.f32 1e-05, %v1345_v53 }
 0x6bd   : > { %8887 = vpow2.f32 %v1172_v21 }
 0x6be   : > { %8889 = vrsqrt.f32 %v1350_v30 }
 0x6c7   : > { %v8888_v22 = vpop.eup %8887 }
 0x6c8   : > { %v6662_v23 = vadd.f32 -1.0, %v8888_v22  ;;  %v8890_v15 = vpop.eup %8889 }
 0x6c9   : > { %v1364_v16 = vmul.f32 %v8890_v15, %v9672_v5 }
 0x6ca   : > { %v1175_v25 = vsel %vm1170_vm13, %v1167_v18, %v6662_v23 }
 0x6cb   : > { %7409 = vmatmul.mubr.msk.f32.gmra.mrb[10].mxu0 %vm895_vm9, %v1175_v25  ;;  %v1375_v20 = vmul.f32 %v9658_v56, %v1364_v16 }
 0x6cc   : > { %7454 = vmatprep.mubr.msk.f32.mxu0 %vm9288_vm10, %v12270_v45 }
 0x6cd   : > { %v9716_v23 = vadd.f32 %v9663_v62, %v1375_v20 }
 0x6f4   : > { %v9692_v26 = vpop.f32.mrb[12].mxu1 }
 0x6f5   : > { %v7421_v27 = vpop.f32.mrb[13].mxu1 }
 0x79e   : > { %v1273_v32 = vpop.f32.mrb[10].mxu0 }
 0x79f   : > { %v1274_v33 = vadd.f32 %v1273_v32, %v9621_v28  ;;  %v7410_v34 = vpop.f32.mrb[11].mxu0  ;;  %v1335_v28 = vsel %vm688_vm8, %v1318_v4, 0.0 }
 0x7a1   : > { %v1295_v36 = vsel %vm688_vm8, %v1274_v33, 0.0 }
 0x7a2   : > { %1296 = vadd.xlane.f32.xlu0 %v1295_v36 }
 0x7a6   : > { %1324 = vadd.xlane.f32.xlu0 %v1323_v39 }
 0x7aa   : > { %1330 = vadd.xlane.f32.xlu0 %v1329_v41 }
 0x7ae   : > { %1336 = vadd.xlane.f32.xlu0 %v1335_v28 }
 0x7c4   : > { %1530 = vrot.lane.b32.xlu0 %v9692_v26, %s12288_s24 }
 0x82f   : > { %v1297_v43 = vpop.xlane.xlu0 %1296 }
 0x830   : > { %v1305_v47 = vmul.f32 0.03125, %v1297_v43 }
 0x832   : > { %v1312_v48 = vsub.f32 %v1274_v33, %v1305_v47 }
 0x833   : > { %v1325_v50 = vpop.xlane.xlu0 %1324 }
 0x834   : > { %v1342_v51 = vmul.f32 0.03125, %v1325_v50  ;;  %v1319_v52 = vmul.f32 %v1312_v48, %v1312_v48 }
 0x836   : > { %v1349_v57 = vadd.f32 1e-05, %v1342_v51  ;;  %v1338_v59 = vsel %vm688_vm8, %v1319_v52, 0.0 }
 0x837   : > { %1339 = vadd.xlane.f32.xlu1 %v1338_v59  ;;  %v1331_v60 = vpop.xlane.xlu0 %1330 }
 0x838   : > { %8891 = vrsqrt.f32 %v1349_v57  ;;  %v1344_v63 = vmul.f32 0.03125, %v1331_v60 }
 0x83a   : > { %v1351_v1 = vadd.f32 1e-05, %v1344_v63 }
 0x83b   : > { %v1337_v8 = vpop.xlane.xlu0 %1336 }
 0x83c   : > { %8893 = vrsqrt.f32 %v1351_v1  ;;  %v1346_v9 = vmul.f32 0.03125, %v1337_v8 }
 0x83d   : > { %8895 = vrsqrt.f32 %v1352_v0 }
 0x83e   : > { %v1353_v13 = vadd.f32 1e-05, %v1346_v9 }
 0x83f   : > { %v9807_v52 = vpop.permute.xlu0 %1530 }
 0x840   : > { %8897 = vrsqrt.f32 %v1353_v13 }
 0x842   : > { %v8892_v58 = vpop.eup %8891 }
 0x843   : > { %v1363_v61 = vmul.f32 %v8892_v58, %v1307_v31 }
 0x845   : > { %v1374_v17 = vmul.f32 %v9658_v56, %v1363_v61 }
 0x846   : > { %v8894_v18 = vpop.eup %8893 }
 0x847   : > { %v9708_v19 = vadd.f32 %v9663_v62, %v1374_v17  ;;  %v1365_v21 = vmul.f32 %v8894_v18, %v1309_v3  ;;  %v8896_v22 = vpop.eup %8895 }
 0x848   : > { %v1366_v25 = vmul.f32 %v8896_v22, %v9678_v14 }
 0x849   : > { %7423 = vmatmul.mubr.msk.f32.gmra.mrb[14].mxu1 %vm688_vm8, %v9708_v19  ;;  %v1376_v5 = vmul.f32 %v9658_v56, %v1365_v21 }
 0x84a   : > { %7425 = vmatprep.mubr.msk.f32.mxu1 %vm9288_vm10, %v12270_v45  ;;  %v8898_v27 = vpop.eup %8897  ;;  %v1377_v12 = vmul.f32 %v9658_v56, %v1366_v25 }
 0x84b   : > { %v9725_v29 = vadd.f32 %v9663_v62, %v1376_v5  ;;  %v1367_v31 = vmul.f32 %v8898_v27, %v1311_v38 }
 0x84c   : > { %v9733_v14 = vadd.f32 %v9663_v62, %v1377_v12 }
 0x84d   : > { %7426 = vmatmul.mubr.msk.f32.gmra.mrb[16].mxu1 %vm688_vm8, %v9716_v23  ;;  %v1378_v32 = vmul.f32 %v9658_v56, %v1367_v31  ;;  %v12302_v31 = vmov 0 }
 0x84e   : > { %7428 = vmatprep.mubr.msk.f32.mxu1 %vm9288_vm10, %v12270_v45  ;;  %v12303_v31 = vsel %vm9885_vm14, 4294967295, %v12302_v31 }
 0x84f   : > { %v9741_v33 = vadd.f32 %v9663_v62, %v1378_v32  ;;  %12304 = vst [vmem:[#allocation9_spill] sm:$0xff] %v12303_v31 }
 0x851   : > { %7429 = vmatmul.mubr.msk.f32.gmra.mrb[18].mxu1 %vm688_vm8, %v9725_v29 }
 0x852   : > { %7431 = vmatprep.mubr.msk.f32.mxu1 %vm9288_vm10, %v12270_v45 }
 0x855   : > { %7432 = vmatmul.mubr.msk.f32.gmra.mrb[20].mxu1 %vm688_vm8, %v9733_v14 }
 0x856   : > { %7434 = vmatprep.mubr.msk.f32.mxu1 %vm9288_vm10, %v12270_v45 }
 0x859   : > { %7435 = vmatmul.mubr.msk.f32.gmra.mrb[22].mxu1 %vm688_vm8, %v9741_v33 }
 0x85a   : > { %7437 = vmatprep.mubr.msk.f32.mxu1 %vm9288_vm10, %v12270_v45 }
 0x8c4   : > { %v1340_v34 = vpop.xlane.xlu1 %1339 }
 0x8c5   : > { %v1347_v3 = vmul.f32 0.03125, %v1340_v34 }
 0x8c7   : > { %v1354_v35 = vadd.f32 1e-05, %v1347_v3 }
 0x8c9   : > { %8899 = vrsqrt.f32 %v1354_v35 }
 0x8d3   : > { %v8900_v36 = vpop.eup %8899 }
 0x8d4   : > { %v1368_v37 = vmul.f32 %v8900_v36, %v1312_v48 }
 0x8d6   : > { %v1379_v38 = vmul.f32 %v9658_v56, %v1368_v37 }
 0x8d8   : > { %v9749_v39 = vadd.f32 %v9663_v62, %v1379_v38 }
 0x8da   : > { %7438 = vmatmul.mubr.msk.f32.gmra.mrb[24].mxu1 %vm688_vm8, %v9749_v39 }
 0x8db   : > { %7489 = vmatprep.mubr.msk.f32.mxu1 %vm9288_vm10, %v12270_v45 }
 0x91c   : > { %v9755_v40 = vpop.f32.mrb[14].mxu1 }
 0x91d   : > { %1532 = vrot.lane.b32.xlu1 %v9755_v40, %s12288_s24  ;;  %v7424_v41 = vpop.f32.mrb[15].mxu1  ;;  %v9761_v4 = vpack.i.bf16 %v9755_v40, %v9692_v26 }
 0x920   : > { %v9763_v56 = vpop.f32.mrb[16].mxu1 }
 0x921   : > { %1534 = vrot.lane.b32.xlu1 %v9763_v56, %s12288_s24  ;;  %v7427_v62 = vpop.f32.mrb[17].mxu1 }
 0x924   : > { %v9767_v28 = vpop.f32.mrb[18].mxu1 }
 0x925   : > { %1536 = vrot.lane.b32.xlu0 %v9767_v28, %s12288_s24  ;;  %v7430_v7 = vpop.f32.mrb[19].mxu1  ;;  %v9773_v42 = vpack.i.bf16 %v9767_v28, %v9763_v56 }
 0x928   : > { %v9775_v43 = vpop.f32.mrb[20].mxu1 }
 0x929   : > { %1538 = vrot.lane.b32.xlu1 %v9775_v43, %s12288_s24  ;;  %v7433_v47 = vpop.f32.mrb[21].mxu1 }
 0x92c   : > { %v9779_v30 = vpop.f32.mrb[22].mxu1 }
 0x92d   : > { %1546 = vrot.lane.b32.xlu1 %v9755_v40, %s12286_s30  ;;  %1540 = vrot.lane.b32.xlu0 %v9779_v30, %s12288_s24  ;;  %v7436_v48 = vpop.f32.mrb[23].mxu1  ;;  %v9787_v49 = vpack.i.bf16 %v9779_v30, %v9775_v43 }
 0x931   : > { %1544 = vrot.lane.b32.xlu0 %v9692_v26, %s12286_s30 }
 0x935   : > { %1558 = vrot.lane.b32.xlu0 %v9692_v26, %s12284_s15 }
 0x939   : > { %1548 = vrot.lane.b32.xlu0 %v9763_v56, %s12286_s30 }
 0x93d   : > { %1562 = vrot.lane.b32.xlu0 %v9763_v56, %s12284_s15 }
 0x941   : > { %1552 = vrot.lane.b32.xlu0 %v9775_v43, %s12286_s30 }
 0x945   : > { %1566 = vrot.lane.b32.xlu0 %v9775_v43, %s12284_s15 }
 0x98f   : > { %v9809_v53 = vpop.permute.xlu1 %1532 }
 0x990   : > { %v8646_v9 = vpack.i.bf16 %v9809_v53, %v9807_v52 }
 0x993   : > { %v9817_v59 = vpop.permute.xlu1 %1534 }
 0x997   : > { %v9815_v57 = vpop.permute.xlu0 %1536 }
 0x998   : > { %v8656_v13 = vpack.i.bf16 %v9815_v57, %v9817_v59 }
 0x99b   : > { %v9825_v63 = vpop.permute.xlu1 %1538 }
 0x99f   : > { %v9823_v60 = vpop.permute.xlu0 %1540  ;;  %v9837_v1 = vpop.permute.xlu1 %1546 }
 0x9a0   : > { %v9857_v15 = vpack.i.bf16 %v9823_v60, %v9825_v63 }
 0x9a3   : > { %v9831_v0 = vpop.permute.xlu0 %1544 }
 0x9a4   : > { %v9841_v8 = vpack.i.bf16 %v9837_v1, %v9831_v0 }
 0x9a7   : > { %v9861_v58 = vpop.permute.xlu0 %1558 }
 0x9ab   : > { %v9863_v61 = vpop.permute.xlu0 %1548 }
 0x9ad   : > { %v9801_v50 = vpop.f32.mrb[24].mxu1 }
 0x9ae   : > { %1556 = vrot.lane.b32.xlu0 %v9801_v50, %s12286_s30  ;;  %1542 = vrot.lane.b32.xlu1 %v9801_v50, %s12288_s24  ;;  %v7439_v51 = vpop.f32.mrb[25].mxu1  ;;  %s12290_s24 = smov 24  }
 0x9af   : > { %v9865_v16 = vpop.permute.xlu0 %1562 }
 0x9b2   : > { %8642 = vrot.lane.b32.xlu0 %v9761_v4, %s12282_s20  ;;  %1560 = vrot.lane.b32.xlu1 %v9755_v40, %s12284_s15 }
 0x9b3   : > { %v9867_v17 = vpop.permute.xlu0 %1552 }
 0x9b6   : > { %8652 = vrot.lane.b32.xlu0 %v9773_v42, %s12282_s20  ;;  %1550 = vrot.lane.b32.xlu1 %v9767_v28, %s12286_s30 }
 0x9b7   : > { %v9869_v18 = vpop.permute.xlu0 %1566 }
 0x9ba   : > { %8662 = vrot.lane.b32.xlu0 %v9787_v49, %s12282_s20  ;;  %1564 = vrot.lane.b32.xlu1 %v9767_v28, %s12284_s15 }
 0x9be   : > { %1584 = vrot.lane.b32.xlu0 %v9801_v50, %s12282_s20  ;;  %1554 = vrot.lane.b32.xlu1 %v9779_v30, %s12286_s30  ;;  %s12316_s30 = smov 64  }
 0x9c2   : > { %8672 = vrot.lane.b32.xlu0 %v9841_v8, %s12282_s20  ;;  %1568 = vrot.lane.b32.xlu1 %v9779_v30, %s12284_s15 }
 0x9c6   : > { %1570 = vrot.lane.b32.xlu1 %v9801_v50, %s12284_s15 }
 0x9ca   : > { %8647 = vrot.lane.b32.xlu1 %v8646_v9, %s12282_s20 }
 0x9ce   : > { %8657 = vrot.lane.b32.xlu1 %v8656_v13, %s12282_s20 }
 0x9d2   : > { %8667 = vrot.lane.b32.xlu1 %v9857_v15, %s12282_s20 }
 0xa20   : > { %v9871_v20 = vpop.permute.xlu0 %1556  ;;  %v9873_v21 = vpop.permute.xlu1 %1542 }
 0xa21   : > { %1726 = vrot.lane.b32.xlu1 %v9873_v21, %s12282_s20 }
 0xa24   : > { %v8643_v22 = vpop.permute.xlu0 %8642  ;;  %v9877_v5 = vpop.permute.xlu1 %1560 }
 0xa25   : > { %v8645_v25 = vunpack.i.h.bf16 %v8643_v22  ;;  %v8644_v27 = vunpack.i.l.bf16 %v8643_v22  ;;  %v9881_v12 = vpack.i.bf16 %v9877_v5, %v9861_v58 }
 0xa27   : > { %v8329_v32 = vpack.c.bf16 %v8645_v25, %v8644_v27  ;;  %8677 = vrot.lane.b32.xlu1 %v9881_v12, %s12282_s20 }
 0xa28   : > { %v8653_v34 = vpop.permute.xlu0 %8652  ;;  %v9891_v3 = vpop.permute.xlu1 %1550 }
 0xa29   : > { %8331 = vmatpush3.bf16.xpose.msk.msra.mxu0 %vm9885_vm14, %v8329_v32  ;;  %v9897_v35 = vpack.i.bf16 %v9891_v3, %v9863_v61  ;;  %v8655_v36 = vunpack.i.h.bf16 %v8653_v34  ;;  %v8654_v37 = vunpack.i.l.bf16 %v8653_v34 }
 0xa2a   : > { %8332 = vmatprep.subr.bf16.mxu0 %v12272_v44 }
 0xa2b   : > { %8682 = vrot.lane.b32.xlu0 %v9897_v35, %s12282_s20  ;;  %v8333_v62 = vpack.c.bf16 %v8655_v36, %v8654_v37 }
 0xa2c   : > { %v9902_v38 = vpop.permute.xlu1 %1564  ;;  %v8663_v7 = vpop.permute.xlu0 %8662 }
 0xa2d   : > { %v9906_v41 = vpack.i.bf16 %v9902_v38, %v9865_v16  ;;  %v8665_v51 = vunpack.i.h.bf16 %v8663_v7  ;;  %v8664_v22 = vunpack.i.l.bf16 %v8663_v7 }
 0xa2f   : > { %8687 = vrot.lane.b32.xlu1 %v9906_v41, %s12282_s20  ;;  %v8337_v34 = vpack.c.bf16 %v8665_v51, %v8664_v22 }
 0xa30   : > { %v9910_v47 = vpop.permute.xlu1 %1554  ;;  %v1585_v32 = vpop.permute.xlu0 %1584 }
 0xa31   : > { %8335 = vmatpush3.bf16.xpose.msk.msra.mxu0 %vm9885_vm14, %v8333_v62  ;;  %v9916_v48 = vpack.i.bf16 %v9910_v47, %v9867_v17 }
 0xa32   : > { %8336 = vmatprep.subr.bf16.mxu0 %v12272_v44 }
 0xa33   : > { %8692 = vrot.lane.b32.xlu0 %v9916_v48, %s12282_s20 }
 0xa34   : > { %v9921_v25 = vpop.permute.xlu1 %1568  ;;  %v8673_v37 = vpop.permute.xlu0 %8672 }
 0xa35   : > { %v9925_v27 = vpack.i.bf16 %v9921_v25, %v9869_v18  ;;  %v8675_v22 = vunpack.i.h.bf16 %v8673_v37  ;;  %v8674_v55 = vunpack.i.l.bf16 %v8673_v37 }
 0xa37   : > { %1868 = vrot.lane.b32.xlu0 %v9871_v20, %s12282_s20  ;;  %8697 = vrot.lane.b32.xlu1 %v9925_v27, %s12282_s20 }
 0xa38   : > { %v9931_v36 = vpop.permute.xlu1 %1570 }
 0xa39   : > { %8339 = vmatpush3.bf16.xpose.msk.msra.mxu0 %vm9885_vm14, %v8337_v34 }
 0xa3a   : > { %7452 = vmatprep.subr.mxu0 %v12270_v45 }
 0xa3b   : > { %8702 = vrot.lane.b32.xlu0 %v9761_v4, %s12280_s21  ;;  %2010 = vrot.lane.b32.xlu1 %v9931_v36, %s12282_s20  ;;  %v8353_v4 = vpack.c.bf16 %v8675_v22, %v8674_v55 }
 0xa3c   : > { %v8648_v62 = vpop.permute.xlu1 %8647 }
 0xa3d   : > { %v8650_v7 = vunpack.i.h.bf16 %v8648_v62  ;;  %v8649_v51 = vunpack.i.l.bf16 %v8648_v62 }
 0xa3f   : > { %v8341_v54 = vpack.c.bf16 %v8650_v7, %v8649_v51  ;;  %8717 = vrot.lane.b32.xlu0 %v8656_v13, %s12280_s21  ;;  %8707 = vrot.lane.b32.xlu1 %v8646_v9, %s12280_s21 }
 0xa40   : > { %v8658_v34 = vpop.permute.xlu1 %8657 }
 0xa41   : > { %7453 = vmatpush3.xpose.msk.msra.mxu0 %vm560_vm5, %v1585_v32  ;;  %8343 = vmatpush3.bf16.xpose.msk.msra.mxu1 %vm9885_vm14, %v8341_v54  ;;  %v8660_v45 = vunpack.i.h.bf16 %v8658_v34  ;;  %v8659_v62 = vunpack.i.l.bf16 %v8658_v34  ;;  %v12305_v54 = vmov 0.0  }
 0xa42   : > { %8352 = vmatprep.subr.bf16.mxu0 %v12272_v44  ;;  %8344 = vmatprep.subr.bf16.mxu1 %v12272_v44 }
 0xa43   : > { %2461 = vrot.lane.b32.xlu0 %v9801_v50, %s12280_s21  ;;  %8712 = vrot.lane.b32.xlu1 %v9773_v42, %s12280_s21  ;;  %v8345_v55 = vpack.c.bf16 %v8660_v45, %v8659_v62 }
 0xa44   : > { %7455 = vmatmul.mubr.msk.f32.vlgmr.msra.gmra.mrb[12].mxu0 %vm560_vm5, %v9692_v26  ;;  %v8668_v9 = vpop.permute.xlu1 %8667 }
 0xa45   : > { %8355 = vmatpush3.bf16.xpose.msk.msra.mxu0 %vm9885_vm14, %v8353_v4  ;;  %7457 = vmatprep.mubr.msk.f32.mxu0 %vm9288_vm10, %v12305_v54  ;;  %v8670_v26 = vunpack.i.h.bf16 %v8668_v9  ;;  %v8669_v45 = vunpack.i.l.bf16 %v8668_v9 }
 0xa46   : > { %8356 = vmatprep.subr.bf16.mxu0 %v12272_v44 }
 0xa47   : > { %8732 = vrot.lane.b32.xlu0 %v9841_v8, %s12280_s21  ;;  %8722 = vrot.lane.b32.xlu1 %v9787_v49, %s12280_s21 }
 0xa48   : > { %7458 = vmatmul.mubr.msk.f32.gmra.mrb[14].mxu0 %vm560_vm5, %v9755_v40  ;;  %v8349_v40 = vpack.c.bf16 %v8670_v26, %v8669_v45 }
 0xa49   : > { %8347 = vmatpush3.bf16.xpose.msk.msra.mxu1 %vm9885_vm14, %v8345_v55  ;;  %7460 = vmatprep.mubr.msk.f32.mxu0 %vm9288_vm10, %v12305_v54 }
 0xa4a   : > { %8348 = vmatprep.subr.bf16.mxu1 %v12272_v44 }
 0xa4b   : > { %8727 = vrot.lane.b32.xlu1 %v9857_v15, %s12280_s21 }
 0xa4c   : > { %7461 = vmatmul.mubr.msk.f32.gmra.mrb[16].mxu0 %vm560_vm5, %v9763_v56 }
 0xa4d   : > { %7463 = vmatprep.mubr.msk.f32.mxu0 %vm9288_vm10, %v12305_v54 }
 0xa4f   : > { %8737 = vrot.lane.b32.xlu1 %v9881_v12, %s12280_s21 }
 0xa50   : > { %7464 = vmatmul.mubr.msk.f32.gmra.mrb[18].mxu0 %vm560_vm5, %v9767_v28 }
 0xa51   : > { %8351 = vmatpush3.bf16.xpose.msk.msra.mxu1 %vm9885_vm14, %v8349_v40  ;;  %7466 = vmatprep.mubr.msk.f32.mxu0 %vm9288_vm10, %v12305_v54 }
 0xa52   : > { %7487 = vmatprep.subr.mxu1 %v12305_v54 }
 0xa53   : > { %8742 = vrot.lane.b32.xlu1 %v9897_v35, %s12280_s21 }
 0xa54   : > { %7467 = vmatmul.mubr.msk.f32.gmra.mrb[20].mxu0 %vm560_vm5, %v9775_v43 }
 0xa55   : > { %7469 = vmatprep.mubr.msk.f32.mxu0 %vm9288_vm10, %v12305_v54 }
 0xa57   : > { %2603 = vrot.lane.b32.xlu1 %v9873_v21, %s12280_s21 }
 0xa58   : > { %7470 = vmatmul.mubr.msk.f32.gmra.mrb[22].mxu0 %vm560_vm5, %v9779_v30 }
 0xa59   : > { %7472 = vmatprep.mubr.msk.f32.mxu0 %vm9288_vm10, %v12305_v54 }
 0xa5c   : > { %7473 = vmatmul.mubr.msk.f32.gmra.mrb[24].mxu0 %vm560_vm5, %v9801_v50 }
 0xa5d   : > { %7524 = vmatprep.mubr.msk.f32.mxu0 %vm9288_vm10, %v12305_v54 }
 0xa93   : > { %v1727_v56 = vpop.permute.xlu1 %1726 }
 0xa94   : > { %7488 = vmatpush3.xpose.msk.msra.mxu1 %vm560_vm5, %v1727_v56 }
 0xa95   : > { %8364 = vmatprep.subr.bf16.mxu1 %v12272_v44 }
 0xa97   : > { %7490 = vmatmul.mubr.msk.f32.vlgmr.msra.gmra.mrb[26].mxu1 %vm560_vm5, %v9807_v52 }
 0xa98   : > { %7492 = vmatprep.mubr.msk.f32.mxu1 %vm9288_vm10, %v12305_v54 }
 0xa99   : > { %v8678_v28 = vpop.permute.xlu1 %8677 }
 0xa9a   : > { %v8680_v42 = vunpack.i.h.bf16 %v8678_v28  ;;  %v8679_v43 = vunpack.i.l.bf16 %v8678_v28 }
 0xa9b   : > { %7493 = vmatmul.mubr.msk.f32.gmra.mrb[28].mxu1 %vm560_vm5, %v9809_v53 }
 0xa9c   : > { %v8365_v30 = vpack.c.bf16 %v8680_v42, %v8679_v43  ;;  %7495 = vmatprep.mubr.msk.f32.mxu1 %vm9288_vm10, %v12305_v54 }
 0xa9d   : > { %v8683_v49 = vpop.permute.xlu0 %8682 }
 0xa9e   : > { %v8685_v50 = vunpack.i.h.bf16 %v8683_v49  ;;  %v8684_v8 = vunpack.i.l.bf16 %v8683_v49  ;;  %8367 = vmatpush3.bf16.xpose.msk.msra.mxu1 %vm9885_vm14, %v8365_v30 }
 0xa9f   : > { %7496 = vmatmul.mubr.msk.f32.gmra.mrb[30].mxu1 %vm560_vm5, %v9817_v59  ;;  %8368 = vmatprep.subr.bf16.mxu1 %v12272_v44 }
 0xaa0   : > { %v8357_v52 = vpack.c.bf16 %v8685_v50, %v8684_v8  ;;  %7498 = vmatprep.mubr.msk.f32.mxu1 %vm9288_vm10, %v12305_v54 }
 0xaa1   : > { %v8688_v53 = vpop.permute.xlu1 %8687 }
 0xaa2   : > { %v8690_v13 = vunpack.i.h.bf16 %v8688_v53  ;;  %v8689_v15 = vunpack.i.l.bf16 %v8688_v53  ;;  %8359 = vmatpush3.bf16.xpose.msk.msra.mxu0 %vm9885_vm14, %v8357_v52 }
 0xaa3   : > { %7499 = vmatmul.mubr.msk.f32.gmra.mrb[32].mxu1 %vm560_vm5, %v9815_v57  ;;  %8360 = vmatprep.subr.bf16.mxu0 %v12272_v44 }
 0xaa4   : > { %v8369_v12 = vpack.c.bf16 %v8690_v13, %v8689_v15  ;;  %7501 = vmatprep.mubr.msk.f32.mxu1 %vm9288_vm10, %v12305_v54 }
 0xaa5   : > { %v8693_v59 = vpop.permute.xlu0 %8692 }
 0xaa6   : > { %v8695_v35 = vunpack.i.h.bf16 %v8693_v59  ;;  %v8694_v32 = vunpack.i.l.bf16 %v8693_v59  ;;  %8371 = vmatpush3.bf16.xpose.msk.msra.mxu1 %vm9885_vm14, %v8369_v12 }
 0xaa7   : > { %7502 = vmatmul.mubr.msk.f32.gmra.mrb[34].mxu1 %vm560_vm5, %v9825_v63  ;;  %8372 = vmatprep.subr.bf16.mxu1 %v12272_v44 }
 0xaa8   : > { %v8361_v37 = vpack.c.bf16 %v8695_v35, %v8694_v32  ;;  %7504 = vmatprep.mubr.msk.f32.mxu1 %vm9288_vm10, %v12305_v54 }
 0xaa9   : > { %v1869_v57 = vpop.permute.xlu0 %1868  ;;  %v8698_v7 = vpop.permute.xlu1 %8697 }
 0xaaa   : > { %v8700_v51 = vunpack.i.h.bf16 %v8698_v7  ;;  %v8699_v22 = vunpack.i.l.bf16 %v8698_v7  ;;  %8363 = vmatpush3.bf16.xpose.msk.msra.mxu0 %vm9885_vm14, %v8361_v37  ;;  %v10138_v37 = vld [vmem:[%s12253_s2 + $0x10] sm:$0xff] }
 0xaab   : > { %7505 = vmatmul.mubr.msk.f32.gmra.mrb[36].mxu1 %vm560_vm5, %v9823_v60  ;;  %7522 = vmatprep.subr.mxu0 %v12305_v54 }
 0xaac   : > { %v8373_v34 = vpack.c.bf16 %v8700_v51, %v8699_v22  ;;  %7507 = vmatprep.mubr.msk.f32.mxu1 %vm9288_vm10, %v12305_v54 }
 0xaad   : > { %v8703_v63 = vpop.permute.xlu0 %8702  ;;  %v2011_v4 = vpop.permute.xlu1 %2010 }
 0xaae   : > { %8375 = vmatpush3.bf16.xpose.msk.msra.mxu1 %vm9885_vm14, %v8373_v34  ;;  %v8705_v62 = vunpack.i.h.bf16 %v8703_v63  ;;  %v8704_v55 = vunpack.i.l.bf16 %v8703_v63  ;;  %v10148_v34 = vld [vmem:[%s12253_s2 + $0x18] sm:$0xff] }
 0xaaf   : > { %7508 = vmatmul.mubr.msk.f32.gmra.mrb[38].mxu1 %vm560_vm5, %v9873_v21  ;;  %7557 = vmatprep.subr.mxu1 %v12305_v54 }
 0xab0   : > { %7559 = vmatprep.mubr.msk.f32.mxu1 %vm9288_vm10, %v12305_v54  ;;  %v8377_v9 = vpack.c.bf16 %v8705_v62, %v8704_v55 }
 0xab1   : > { %v8708_v60 = vpop.permute.xlu1 %8707  ;;  %v8718_v40 = vpop.permute.xlu0 %8717 }
 0xab2   : > { %7523 = vmatpush3.xpose.msk.msra.mxu0 %vm560_vm5, %v1869_v57  ;;  %v8710_v26 = vunpack.i.h.bf16 %v8708_v60  ;;  %v8709_v45 = vunpack.i.l.bf16 %v8708_v60  ;;  %v8720_v42 = vunpack.i.h.bf16 %v8718_v40  ;;  %v8719_v43 = vunpack.i.l.bf16 %v8718_v40  ;;  %v10158_v60 = vld [vmem:[%s12253_s2 + $0x20] sm:$0xff] }
 0xab3   : > { %8376 = vmatprep.subr.bf16.mxu0 %v12272_v44 }
 0xab4   : > { %v8386_v30 = vpack.c.bf16 %v8710_v26, %v8709_v45  ;;  %v8389_v52 = vpack.c.bf16 %v8720_v42, %v8719_v43 }
 0xab5   : > { %7525 = vmatmul.mubr.msk.f32.vlgmr.msra.gmra.mrb[26].mxu0 %vm560_vm5, %v9831_v0  ;;  %v8713_v21 = vpop.permute.xlu1 %8712 }
 0xab6   : > { %v8715_v56 = vunpack.i.h.bf16 %v8713_v21  ;;  %v8714_v28 = vunpack.i.l.bf16 %v8713_v21  ;;  %7558 = vmatpush3.xpose.msk.msra.mxu1 %vm560_vm5, %v2011_v4  ;;  %8378 = vmatpush3.bf16.msra.mxu0 %v8377_v9  ;;  %v10168_v21 = vld [vmem:[%s12253_s2 + $0x28] sm:$0xff] }
 0xab7   : > { %7527 = vmatprep.mubr.msk.f32.mxu0 %vm9288_vm10, %v12305_v54  ;;  %8379 = vmatprep.subr.bf16.mxu0 %v12272_v44 }
 0xab8   : > { %v8380_v49 = vpack.c.bf16 %v8715_v56, %v8714_v28  ;;  %8385 = vmatprep.subr.bf16.mxu1 %v12272_v44 }
 0xab9   : > { %7528 = vmatmul.mubr.msk.f32.gmra.mrb[28].mxu0 %vm560_vm5, %v9837_v1  ;;  %v8723_v0 = vpop.permute.xlu1 %8722  ;;  %7560 = vmatmul.mubr.msk.f32.vlgmr.msra.gmra.mrb[40].mxu1 %vm560_vm5, %v9861_v58 }
 0xaba   : > { %v8725_v50 = vunpack.i.h.bf16 %v8723_v0  ;;  %v8724_v8 = vunpack.i.l.bf16 %v8723_v0  ;;  %8381 = vmatpush3.bf16.msra.mxu0 %v8380_v49  ;;  %8387 = vmatpush3.bf16.msra.mxu1 %v8386_v30  ;;  %v10178_v30 = vld [vmem:[%s12253_s2 + $0x30] sm:$0xff] }
 0xabb   : > { %7530 = vmatprep.mubr.msk.f32.mxu0 %vm9288_vm10, %v12305_v54  ;;  %7562 = vmatprep.mubr.msk.f32.mxu1 %vm9288_vm10, %v12305_v54 }
 0xabc   : > { %v8383_v53 = vpack.c.bf16 %v8725_v50, %v8724_v8  ;;  %8382 = vmatprep.subr.bf16.mxu0 %v12272_v44  ;;  %8388 = vmatprep.subr.bf16.mxu1 %v12272_v44 }
 0xabd   : > { %7531 = vmatmul.mubr.msk.f32.gmra.mrb[30].mxu0 %vm560_vm5, %v9863_v61  ;;  %v8728_v1 = vpop.permute.xlu1 %8727  ;;  %7563 = vmatmul.mubr.msk.f32.gmra.mrb[42].mxu1 %vm560_vm5, %v9877_v5  ;;  %v2462_v61 = vpop.permute.xlu0 %2461 }
 0xabe   : > { %v8730_v58 = vunpack.i.h.bf16 %v8728_v1  ;;  %v8729_v13 = vunpack.i.l.bf16 %v8728_v1  ;;  %8384 = vmatpush3.bf16.msra.mxu0 %v8383_v53  ;;  %8390 = vmatpush3.bf16.msra.mxu1 %v8389_v52 }
 0xabf   : > { %7533 = vmatprep.mubr.msk.f32.mxu0 %vm9288_vm10, %v12305_v54  ;;  %7565 = vmatprep.mubr.msk.f32.mxu1 %vm9288_vm10, %v12305_v54 }
 0xac0   : > { %v8392_v15 = vpack.c.bf16 %v8730_v58, %v8729_v13  ;;  %7592 = vmatprep.subr.mxu0 %v12305_v54  ;;  %8391 = vmatprep.subr.bf16.mxu1 %v12272_v44 }
 0xac1   : > { %7534 = vmatmul.mubr.msk.f32.gmra.mrb[32].mxu0 %vm560_vm5, %v9891_v3  ;;  %v10076_v5 = vpop.permute.xlu1 %8737  ;;  %7566 = vmatmul.mubr.msk.f32.gmra.mrb[44].mxu1 %vm560_vm5, %v9865_v16 }
 0xac2   : > { %7593 = vmatpush3.msra.mxu0 %v2462_v61  ;;  %8393 = vmatpush3.bf16.msra.mxu1 %v8392_v15 }
 0xac3   : > { %7536 = vmatprep.mubr.msk.f32.mxu0 %vm9288_vm10, %v12305_v54  ;;  %7568 = vmatprep.mubr.msk.f32.mxu1 %vm9288_vm10, %v12305_v54 }
 0xac4   : > { %7627 = vmatprep.subr.mxu1 %v12305_v54  ;;  %8394 = vmatprep.subr.bf16.mxu0 %v12272_v44 }
 0xac5   : > { %7537 = vmatmul.mubr.msk.f32.gmra.mrb[34].mxu0 %vm560_vm5, %v9867_v17  ;;  %v10088_v3 = vpop.permute.xlu1 %8742  ;;  %7569 = vmatmul.mubr.msk.f32.gmra.mrb[46].mxu1 %vm560_vm5, %v9902_v38  ;;  %v10120_v17 = vld [vmem:[%s12253_s2] sm:$0xff] }
 0xac6   : > { %7539 = vmatprep.mubr.msk.f32.mxu0 %vm9288_vm10, %v12305_v54  ;;  %7571 = vmatprep.mubr.msk.f32.mxu1 %vm9288_vm10, %v12305_v54 }
 0xac9   : > { %7540 = vmatmul.mubr.msk.f32.gmra.mrb[36].mxu0 %vm560_vm5, %v9910_v47  ;;  %v2604_v16 = vpop.permute.xlu1 %2603  ;;  %7572 = vmatmul.mubr.msk.f32.gmra.mrb[48].mxu1 %vm560_vm5, %v9869_v18 }
 0xaca   : > { %7628 = vmatpush3.msra.mxu1 %v2604_v16  ;;  %7542 = vmatprep.mubr.msk.f32.mxu0 %vm9288_vm10, %v12305_v54 }
 0xacb   : > { %7574 = vmatprep.mubr.msk.f32.mxu1 %vm9288_vm10, %v12305_v54  ;;  %8403 = vmatprep.subr.bf16.mxu1 %v12272_v44 }
 0xacd   : > { %7543 = vmatmul.mubr.msk.f32.gmra.mrb[38].mxu0 %vm560_vm5, %v9871_v20  ;;  %7575 = vmatmul.mubr.msk.f32.gmra.mrb[50].mxu1 %vm560_vm5, %v9921_v25  ;;  %v10128_v25 = vld [vmem:[%s12253_s2 + $0x8] sm:$0xff] }
 0xace   : > { %7577 = vmatprep.mubr.msk.f32.mxu1 %vm9288_vm10, %v12305_v54  ;;  %7594 = vmatprep.mubr.msk.f32.mxu0 %vm9288_vm10, %v12305_v54 }
 0xad1   : > { %7578 = vmatmul.mubr.msk.f32.gmra.mrb[52].mxu1 %vm560_vm5, %v9931_v36 }
 0xad2   : > { %7629 = vmatprep.mubr.msk.f32.mxu1 %vm9288_vm10, %v12305_v54 }
 0xb17   : > { %v1680_v18 = vpop.f32.mrb[12].mxu0 }
 0xb18   : > { %v10123_v38 = vadd.f32 %v1680_v18, %v10120_v17  ;;  %v7456_v47 = vpop.f32.mrb[13].mxu0 }
 0xb1a   : > { %v2141_v12 = vsel %vm2140_vm15, %v10123_v38, -inf }
 0xb1b   : > { %v1685_v59 = vpop.f32.mrb[14].mxu0  ;;  %2142 = vmax.xlane.f32.xlu0 %v2141_v12 }
 0xb1c   : > { %v10133_v35 = vadd.f32 %v1685_v59, %v10128_v25  ;;  %v7459_v32 = vpop.f32.mrb[15].mxu0 }
 0xb1e   : > { %v2144_v57 = vsel %vm2140_vm15, %v10133_v35, -inf }
 0xb1f   : > { %v1690_v7 = vpop.f32.mrb[16].mxu0  ;;  %2145 = vmax.xlane.f32.xlu0 %v2144_v57 }
 0xb20   : > { %v10143_v51 = vadd.f32 %v1690_v7, %v10138_v37  ;;  %v7462_v22 = vpop.f32.mrb[17].mxu0 }
 0xb22   : > { %v2147_v63 = vsel %vm2140_vm15, %v10143_v51, -inf }
 0xb23   : > { %v1695_v4 = vpop.f32.mrb[18].mxu0  ;;  %2148 = vmax.xlane.f32.xlu1 %v2147_v63 }
 0xb24   : > { %v10153_v62 = vadd.f32 %v1695_v4, %v10148_v34  ;;  %v7465_v55 = vpop.f32.mrb[19].mxu0 }
 0xb26   : > { %v2150_v9 = vsel %vm2140_vm15, %v10153_v62, -inf }
 0xb27   : > { %v1700_v26 = vpop.f32.mrb[20].mxu0  ;;  %2151 = vmax.xlane.f32.xlu1 %v2150_v9 }
 0xb28   : > { %v10163_v45 = vadd.f32 %v1700_v26, %v10158_v60  ;;  %v7468_v40 = vpop.f32.mrb[21].mxu0 }
 0xb2a   : > { %v2153_v56 = vsel %vm2140_vm15, %v10163_v45, -inf }
 0xb2b   : > { %v1705_v28 = vpop.f32.mrb[22].mxu0  ;;  %2154 = vmax.xlane.f32.xlu1 %v2153_v56 }
 0xb2c   : > { %v10173_v42 = vadd.f32 %v1705_v28, %v10168_v21  ;;  %v7471_v43 = vpop.f32.mrb[23].mxu0 }
 0xb2e   : > { %v2156_v49 = vsel %vm2140_vm15, %v10173_v42, -inf }
 0xb2f   : > { %v1710_v0 = vpop.f32.mrb[24].mxu0  ;;  %2157 = vmax.xlane.f32.xlu1 %v2156_v49 }
 0xb30   : > { %v10183_v50 = vadd.f32 %v1710_v0, %v10178_v30  ;;  %v7474_v8 = vpop.f32.mrb[25].mxu0 }
 0xb32   : > { %v2159_v52 = vsel %vm2140_vm15, %v10183_v50, -inf }
 0xb33   : > { %2160 = vmax.xlane.f32.xlu1 %v2159_v52 }
 0xb6a   : > { %v1822_v53 = vpop.f32.mrb[26].mxu1 }
 0xb6b   : > { %v10188_v1 = vadd.f32 %v1822_v53, %v10120_v17  ;;  %v7491_v58 = vpop.f32.mrb[27].mxu1 }
 0xb6d   : > { %v2162_v13 = vsel %vm2140_vm15, %v10188_v1, -inf }
 0xb6e   : > { %2163 = vmax.xlane.f32.xlu1 %v2162_v13  ;;  %v1827_v15 = vpop.f32.mrb[28].mxu1 }
 0xb6f   : > { %v10193_v61 = vadd.f32 %v1827_v15, %v10128_v25  ;;  %v7494_v16 = vpop.f32.mrb[29].mxu1 }
 0xb71   : > { %v2165_v18 = vsel %vm2140_vm15, %v10193_v61, -inf }
 0xb72   : > { %2166 = vmax.xlane.f32.xlu0 %v2165_v18  ;;  %v1832_v47 = vpop.f32.mrb[30].mxu1 }
 0xb73   : > { %v10198_v12 = vadd.f32 %v1832_v47, %v10138_v37  ;;  %v7497_v59 = vpop.f32.mrb[31].mxu1 }
 0xb75   : > { %v2168_v32 = vsel %vm2140_vm15, %v10198_v12, -inf }
 0xb76   : > { %2169 = vmax.xlane.f32.xlu0 %v2168_v32  ;;  %v1837_v57 = vpop.f32.mrb[32].mxu1 }
 0xb77   : > { %v10203_v7 = vadd.f32 %v1837_v57, %v10148_v34  ;;  %v7500_v22 = vpop.f32.mrb[33].mxu1 }
 0xb79   : > { %v2171_v63 = vsel %vm2140_vm15, %v10203_v7, -inf }
 0xb7a   : > { %2172 = vmax.xlane.f32.xlu0 %v2171_v63  ;;  %v1842_v4 = vpop.f32.mrb[34].mxu1 }
 0xb7b   : > { %v10208_v55 = vadd.f32 %v1842_v4, %v10158_v60  ;;  %v7503_v9 = vpop.f32.mrb[35].mxu1 }
 0xb7d   : > { %v2174_v26 = vsel %vm2140_vm15, %v10208_v55, -inf }
 0xb7e   : > { %2175 = vmax.xlane.f32.xlu0 %v2174_v26  ;;  %v1847_v40 = vpop.f32.mrb[36].mxu1 }
 0xb7f   : > { %v10213_v56 = vadd.f32 %v1847_v40, %v10168_v21  ;;  %v7506_v28 = vpop.f32.mrb[37].mxu1 }
 0xb81   : > { %v2177_v43 = vsel %vm2140_vm15, %v10213_v56, -inf }
 0xb82   : > { %2178 = vmax.xlane.f32.xlu0 %v2177_v43  ;;  %v1852_v49 = vpop.f32.mrb[38].mxu1 }
 0xb83   : > { %v10218_v0 = vadd.f32 %v1852_v49, %v10178_v30  ;;  %v7509_v8 = vpop.f32.mrb[39].mxu1 }
 0xb85   : > { %v2180_v52 = vsel %vm2140_vm15, %v10218_v0, -inf }
 0xb86   : > { %2181 = vmax.xlane.f32.xlu0 %v2180_v52 }
 0xb88   : > { %v1964_v53 = vpop.f32.mrb[26].mxu0 }
 0xb89   : > { %v10223_v58 = vadd.f32 %v1964_v53, %v10120_v17  ;;  %v7526_v13 = vpop.f32.mrb[27].mxu0 }
 0xb8b   : > { %v2183_v15 = vsel %vm2140_vm15, %v10223_v58, -inf }
 0xb8c   : > { %v1969_v16 = vpop.f32.mrb[28].mxu0  ;;  %2184 = vmax.xlane.f32.xlu1 %v2183_v15  ;;  %v2106_v18 = vpop.f32.mrb[40].mxu1 }
 0xb8d   : > { %v10228_v47 = vadd.f32 %v1969_v16, %v10128_v25  ;;  %v10231_v59 = vadd.f32 %v2106_v18, %v10120_v17  ;;  %v7529_v32 = vpop.f32.mrb[29].mxu0  ;;  %v7561_v57 = vpop.f32.mrb[41].mxu1 }
 0xb8f   : > { %v2186_v22 = vsel %vm2140_vm15, %v10228_v47, -inf  ;;  %v2204_v63 = vsel %vm2140_vm15, %v10231_v59, -inf }
 0xb90   : > { %v1974_v4 = vpop.f32.mrb[30].mxu0  ;;  %2187 = vmax.xlane.f32.xlu1 %v2186_v22  ;;  %2205 = vmax.xlane.f32.xlu0 %v2204_v63  ;;  %v2111_v9 = vpop.f32.mrb[42].mxu1 }
 0xb91   : > { %v10238_v26 = vadd.f32 %v1974_v4, %v10138_v37  ;;  %v10241_v40 = vadd.f32 %v2111_v9, %v10128_v25  ;;  %v7532_v17 = vpop.f32.mrb[31].mxu0  ;;  %v7564_v28 = vpop.f32.mrb[43].mxu1 }
 0xb93   : > { %v2189_v43 = vsel %vm2140_vm15, %v10238_v26, -inf  ;;  %v2207_v49 = vsel %vm2140_vm15, %v10241_v40, -inf }
 0xb94   : > { %v1979_v8 = vpop.f32.mrb[32].mxu0  ;;  %2190 = vmax.xlane.f32.xlu1 %v2189_v43  ;;  %2208 = vmax.xlane.f32.xlu0 %v2207_v49  ;;  %v2116_v52 = vpop.f32.mrb[44].mxu1 }
 0xb95   : > { %v10248_v53 = vadd.f32 %v1979_v8, %v10148_v34  ;;  %v10251_v13 = vadd.f32 %v2116_v52, %v10138_v37  ;;  %v7535_v25 = vpop.f32.mrb[33].mxu0  ;;  %v7567_v15 = vpop.f32.mrb[45].mxu1 }
 0xb97   : > { %v2192_v16 = vsel %vm2140_vm15, %v10248_v53, -inf  ;;  %v2210_v18 = vsel %vm2140_vm15, %v10251_v13, -inf }
 0xb98   : > { %v1984_v32 = vpop.f32.mrb[34].mxu0  ;;  %2193 = vmax.xlane.f32.xlu1 %v2192_v16  ;;  %2211 = vmax.xlane.f32.xlu0 %v2210_v18  ;;  %v2121_v57 = vpop.f32.mrb[46].mxu1 }
 0xb99   : > { %v10258_v22 = vadd.f32 %v1984_v32, %v10158_v60  ;;  %v10261_v63 = vadd.f32 %v2121_v57, %v10148_v34  ;;  %v7538_v37 = vpop.f32.mrb[35].mxu0  ;;  %v7570_v4 = vpop.f32.mrb[47].mxu1 }
 0xb9b   : > { %v2195_v9 = vsel %vm2140_vm15, %v10258_v22, -inf  ;;  %v2213_v17 = vsel %vm2140_vm15, %v10261_v63, -inf }
 0xb9c   : > { %v1989_v28 = vpop.f32.mrb[36].mxu0  ;;  %2196 = vmax.xlane.f32.xlu1 %v2195_v9  ;;  %2214 = vmax.xlane.f32.xlu0 %v2213_v17  ;;  %v2126_v43 = vpop.f32.mrb[48].mxu1 }
 0xb9d   : > { %v10268_v49 = vadd.f32 %v1989_v28, %v10168_v21  ;;  %v10271_v8 = vadd.f32 %v2126_v43, %v10158_v60  ;;  %v7541_v34 = vpop.f32.mrb[37].mxu0  ;;  %v7573_v52 = vpop.f32.mrb[49].mxu1 }
 0xb9e   : > { %v10287_v17 = vpop.permute.xlu0 %8732 }
 0xb9f   : > { %v2198_v25 = vsel %vm2140_vm15, %v10268_v49, -inf  ;;  %v2216_v15 = vsel %vm2140_vm15, %v10271_v8, -inf }
 0xba0   : > { %v1994_v16 = vpop.f32.mrb[38].mxu0  ;;  %2199 = vmax.xlane.f32.xlu1 %v2198_v25  ;;  %2217 = vmax.xlane.f32.xlu0 %v2216_v15  ;;  %v2131_v18 = vpop.f32.mrb[50].mxu1 }
 0xba1   : > { %v10278_v32 = vadd.f32 %v1994_v16, %v10178_v30  ;;  %v10281_v57 = vadd.f32 %v2131_v18, %v10168_v21  ;;  %v7544_v60 = vpop.f32.mrb[39].mxu0  ;;  %v7576_v37 = vpop.f32.mrb[51].mxu1 }
 0xba3   : > { %v2201_v4 = vsel %vm2140_vm15, %v10278_v32, -inf  ;;  %v2219_v9 = vsel %vm2140_vm15, %v10281_v57, -inf }
 0xba4   : > { %2202 = vmax.xlane.f32.xlu1 %v2201_v4  ;;  %2220 = vmax.xlane.f32.xlu0 %v2219_v9  ;;  %v2136_v28 = vpop.f32.mrb[52].mxu1 }
 0xba5   : > { %v10290_v43 = vadd.f32 %v2136_v28, %v10178_v30  ;;  %v7579_v34 = vpop.f32.mrb[53].mxu1 }
 0xba7   : > { %v2222_v21 = vsel %vm2140_vm15, %v10290_v43, -inf }
 0xba8   : > { %v2143_v52 = vpop.xlane.xlu0 %2142  ;;  %2223 = vmax.xlane.f32.xlu0 %v2222_v21 }
 0xba9   : > { %v2225_v25 = vsub.f32 %v10123_v38, %v2143_v52 }
 0xbab   : > { %v2253_v15 = vmul.f32 1.442695, %v2225_v25 }
 0xbac   : > { %v2146_v16 = vpop.xlane.xlu0 %2145 }
 0xbad   : > { %8901 = vpow2.f32 %v2253_v15  ;;  %v2226_v18 = vsub.f32 %v10133_v35, %v2146_v16 }
 0xbaf   : > { %v2255_v60 = vmul.f32 1.442695, %v2226_v18 }
 0xbb0   : > { %v2149_v37 = vpop.xlane.xlu1 %2148 }
 0xbb1   : > { %8903 = vpow2.f32 %v2255_v60  ;;  %v2227_v4 = vsub.f32 %v10143_v51, %v2149_v37 }
 0xbb3   : > { %v2257_v30 = vmul.f32 1.442695, %v2227_v4 }
 0xbb4   : > { %v2152_v9 = vpop.xlane.xlu1 %2151 }
 0xbb5   : > { %8905 = vpow2.f32 %v2257_v30  ;;  %v2228_v28 = vsub.f32 %v10153_v62, %v2152_v9 }
 0xbb7   : > { %v10298_v34 = vpop.eup %8901  ;;  %v2259_v21 = vmul.f32 1.442695, %v2228_v28 }
 0xbb8   : > { %v2155_v44 = vpop.xlane.xlu1 %2154  ;;  %v2309_v38 = vsel %vm2140_vm15, %v10298_v34, 0.0 }
 0xbb9   : > { %8907 = vpow2.f32 %v2259_v21  ;;  %v2229_v35 = vsub.f32 %v10163_v45, %v2155_v44  ;;  %2310 = vadd.xlane.f32.xlu1 %v2309_v38 }
 0xbbb   : > { %v10303_v52 = vpop.eup %8903  ;;  %v2261_v25 = vmul.f32 1.442695, %v2229_v35 }
 0xbbc   : > { %v2158_v51 = vpop.xlane.xlu1 %2157  ;;  %v2312_v15 = vsel %vm2140_vm15, %v10303_v52, 0.0 }
 0xbbd   : > { %8909 = vpow2.f32 %v2261_v25  ;;  %v2230_v62 = vsub.f32 %v10173_v42, %v2158_v51  ;;  %2313 = vadd.xlane.f32.xlu1 %v2312_v15 }
 0xbbf   : > { %v10308_v16 = vpop.eup %8905  ;;  %v2263_v18 = vmul.f32 1.442695, %v2230_v62 }
 0xbc0   : > { %v2161_v60 = vpop.xlane.xlu1 %2160  ;;  %v2315_v37 = vsel %vm2140_vm15, %v10308_v16, 0.0 }
 0xbc1   : > { %8911 = vpow2.f32 %v2263_v18  ;;  %v2231_v44 = vsub.f32 %v10183_v50, %v2161_v60  ;;  %2316 = vadd.xlane.f32.xlu1 %v2315_v37 }
 0xbc3   : > { %v10313_v45 = vpop.eup %8907  ;;  %v2265_v4 = vmul.f32 1.442695, %v2231_v44 }
 0xbc4   : > { %v2318_v30 = vsel %vm2140_vm15, %v10313_v45, 0.0 }
 0xbc5   : > { %8913 = vpow2.f32 %v2265_v4  ;;  %2319 = vadd.xlane.f32.xlu1 %v2318_v30 }
 0xbc7   : > { %v10317_v42 = vpop.eup %8909 }
 0xbc8   : > { %v2321_v9 = vsel %vm2140_vm15, %v10317_v42, 0.0 }
 0xbc9   : > { %2322 = vadd.xlane.f32.xlu0 %v2321_v9 }
 0xbcb   : > { %v10321_v28 = vpop.eup %8911 }
 0xbcc   : > { %v2324_v50 = vsel %vm2140_vm15, %v10321_v28, 0.0 }
 0xbcd   : > { %2325 = vadd.xlane.f32.xlu1 %v2324_v50 }
 0xbcf   : > { %v10325_v21 = vpop.eup %8913 }
 0xbd0   : > { %v2327_v38 = vsel %vm2140_vm15, %v10325_v21, 0.0 }
 0xbd1   : > { %2328 = vadd.xlane.f32.xlu1 %v2327_v38 }
 0xbfb   : > { %v2164_v35 = vpop.xlane.xlu1 %2163 }
 0xbfc   : > { %v2232_v25 = vsub.f32 %v10188_v1, %v2164_v35 }
 0xbfe   : > { %v2267_v51 = vmul.f32 1.442695, %v2232_v25 }
 0xbff   : > { %v2167_v15 = vpop.xlane.xlu0 %2166 }
 0xc00   : > { %8915 = vpow2.f32 %v2267_v51  ;;  %v2233_v50 = vsub.f32 %v10193_v61, %v2167_v15 }
 0xc02   : > { %v2269_v25 = vmul.f32 1.442695, %v2233_v50 }
 0xc03   : > { %v2170_v62 = vpop.xlane.xlu0 %2169 }
 0xc07   : > { %v2173_v18 = vpop.xlane.xlu0 %2172 }
 0xc08   : > { %v2235_v60 = vsub.f32 %v10203_v7, %v2173_v18 }
 0xc0a   : > { %v10331_v37 = vpop.eup %8915  ;;  %v2273_v44 = vmul.f32 1.442695, %v2235_v60 }
 0xc0b   : > { %v2330_v4 = vsel %vm2140_vm15, %v10331_v37, 0.0  ;;  %v2176_v30 = vpop.xlane.xlu0 %2175 }
 0xc0c   : > { %8917 = vpow2.f32 %v2273_v44  ;;  %2331 = vadd.xlane.f32.xlu0 %v2330_v4  ;;  %v2234_v44 = vsub.f32 %v10198_v12, %v2170_v62  ;;  %v2236_v6 = vsub.f32 %v10208_v55, %v2176_v30 }
 0xc0e   : > { %v2271_v61 = vmul.f32 1.442695, %v2234_v44 }
 0xc0f   : > { %v2179_v35 = vpop.xlane.xlu0 %2178 }
 0xc13   : > { %v2182_v4 = vpop.xlane.xlu0 %2181 }
 0xc16   : > { %v10335_v9 = vpop.eup %8917 }
 0xc17   : > { %v2339_v1 = vsel %vm2140_vm15, %v10335_v9, 0.0 }
 0xc18   : > { %2340 = vadd.xlane.f32.xlu1 %v2339_v1 }
 0xc19   : > { %v2185_v38 = vpop.xlane.xlu1 %2184 }
 0xc1a   : > { %v2239_v7 = vsub.f32 %v10223_v58, %v2185_v38  ;;  %v2275_v38 = vmul.f32 1.442695, %v2236_v6  ;;  %v2237_v6 = vsub.f32 %v10213_v56, %v2179_v35 }
 0xc1c   : > { %v2281_v51 = vmul.f32 1.442695, %v2239_v7 }
 0xc1d   : > { %v2188_v18 = vpop.xlane.xlu1 %2187  ;;  %v2206_v15 = vpop.xlane.xlu0 %2205 }
 0xc1e   : > { %8919 = vpow2.f32 %v2281_v51  ;;  %v2240_v60 = vsub.f32 %v10228_v47, %v2188_v18  ;;  %v2246_v7 = vsub.f32 %v10231_v59, %v2206_v15 }
 0xc1f   : > { %8921 = vpow2.f32 %v2269_v25 }
 0xc20   : > { %v2283_v31 = vmul.f32 1.442695, %v2240_v60  ;;  %v2277_v60 = vmul.f32 1.442695, %v2237_v6 }
 0xc21   : > { %v2191_v24 = vpop.xlane.xlu1 %2190  ;;  %v2209_v44 = vpop.xlane.xlu0 %2208 }
 0xc22   : > { %8923 = vpow2.f32 %v2283_v31  ;;  %v2241_v1 = vsub.f32 %v10238_v26, %v2191_v24  ;;  %v2295_v31 = vmul.f32 1.442695, %v2246_v7 }
 0xc23   : > { %8925 = vpow2.f32 %v2271_v61 }
 0xc24   : > { %v2285_v12 = vmul.f32 1.442695, %v2241_v1 }
 0xc25   : > { %v2194_v58 = vpop.xlane.xlu1 %2193 }
 0xc26   : > { %v2242_v50 = vsub.f32 %v10248_v53, %v2194_v58 }
 0xc28   : > { %v10347_v47 = vpop.eup %8919  ;;  %v2287_v62 = vmul.f32 1.442695, %v2242_v50  ;;  %v2212_v50 = vpop.xlane.xlu0 %2211 }
 0xc29   : > { %v2197_v25 = vpop.xlane.xlu1 %2196  ;;  %v2351_v55 = vsel %vm2140_vm15, %v10347_v47, 0.0  ;;  %v10351_v30 = vpop.eup %8921 }
 0xc2a   : > { %8927 = vpow2.f32 %v2287_v62  ;;  %v2243_v24 = vsub.f32 %v10258_v22, %v2197_v25  ;;  %2352 = vadd.xlane.f32.xlu0 %v2351_v55  ;;  %v2333_v53 = vsel %vm2140_vm15, %v10351_v30, 0.0  ;;  %v2238_v22 = vsub.f32 %v10218_v0, %v2182_v4 }
 0xc2b   : > { %8929 = vpow2.f32 %v2275_v38 }
 0xc2c   : > { %8931 = vpow2.f32 %v2285_v12  ;;  %v2289_v59 = vmul.f32 1.442695, %v2243_v24  ;;  %v10357_v51 = vpop.eup %8923  ;;  %v2279_v1 = vmul.f32 1.442695, %v2238_v22  ;;  %v2248_v12 = vsub.f32 %v10251_v13, %v2212_v50 }
 0xc2d   : > { %v2200_v26 = vpop.xlane.xlu1 %2199  ;;  %8933 = vpow2.f32 %v2295_v31  ;;  %v2354_v56 = vsel %vm2140_vm15, %v10357_v51, 0.0  ;;  %v10363_v35 = vpop.eup %8925 }
 0xc2e   : > { %v2244_v18 = vsub.f32 %v10268_v49, %v2200_v26  ;;  %2334 = vadd.xlane.f32.xlu0 %v2333_v53  ;;  %8935 = vpow2.f32 %v2289_v59  ;;  %v2247_v49 = vsub.f32 %v10241_v40, %v2209_v44  ;;  %v2336_v4 = vsel %vm2140_vm15, %v10363_v35, 0.0  ;;  %v10393_v26 = vpop.xlane.xlu0 %2214 }
 0xc2f   : > { %8937 = vpow2.f32 %v2277_v60  ;;  %v2299_v24 = vmul.f32 1.442695, %v2248_v12 }
 0xc30   : > { %v2291_v61 = vmul.f32 1.442695, %v2244_v18  ;;  %v2297_v7 = vmul.f32 1.442695, %v2247_v49 }
 0xc31   : > { %v10401_v44 = vpop.xlane.xlu1 %2202 }
 0xc32   : > { %2355 = vadd.xlane.f32.xlu0 %v2354_v56  ;;  %8939 = vpow2.f32 %v2291_v61  ;;  %v10407_v56 = vpop.xlane.xlu0 %2217 }
 0xc33   : > { %8941 = vpow2.f32 %v2279_v1 }
 0xc34   : > { %v10365_v15 = vpop.eup %8927  ;;  %8943 = vpow2.f32 %v2297_v7 }
 0xc35   : > { %v10368_v58 = vpop.eup %8929  ;;  %v2360_v0 = vsel %vm2140_vm15, %v10365_v15, 0.0  ;;  %8945 = vpow2.f32 %v2299_v24 }
 0xc36   : > { %v10374_v38 = vpop.eup %8931  ;;  %2361 = vadd.xlane.f32.xlu1 %v2360_v0  ;;  %2337 = vadd.xlane.f32.xlu0 %v2336_v4  ;;  %v2342_v40 = vsel %vm2140_vm15, %v10368_v58, 0.0  ;;  %v2221_v4 = vpop.xlane.xlu0 %2220 }
 0xc37   : > { %v10377_v62 = vpop.eup %8933  ;;  %v2357_v25 = vsel %vm2140_vm15, %v10374_v38, 0.0 }
 0xc38   : > { %v10383_v55 = vpop.eup %8935  ;;  %v2372_v31 = vsel %vm2140_vm15, %v10377_v62, 0.0 }
 0xc39   : > { %v10385_v6 = vpop.eup %8937  ;;  %v2363_v13 = vsel %vm2140_vm15, %v10383_v55, 0.0 }
 0xc3a   : > { %2343 = vadd.xlane.f32.xlu1 %v2342_v40  ;;  %2358 = vadd.xlane.f32.xlu0 %v2357_v25  ;;  %v2345_v18 = vsel %vm2140_vm15, %v10385_v6, 0.0  ;;  %v8735_v40 = vunpack.i.h.bf16 %v10287_v17  ;;  %v8734_v25 = vunpack.i.l.bf16 %v10287_v17 }
 0xc3c   : > { %v10391_v59 = vpop.eup %8939 }
 0xc3d   : > { %v2366_v53 = vsel %vm2140_vm15, %v10391_v59, 0.0  ;;  %v10399_v60 = vpop.eup %8941 }
 0xc3e   : > { %2373 = vadd.xlane.f32.xlu1 %v2372_v31  ;;  %2364 = vadd.xlane.f32.xlu0 %v2363_v13  ;;  %v2348_v22 = vsel %vm2140_vm15, %v10399_v60, 0.0  ;;  %v10405_v61 = vpop.eup %8943  ;;  %v2224_v31 = vpop.xlane.xlu0 %2223 }
 0xc3f   : > { %v2375_v49 = vsel %vm2140_vm15, %v10405_v61, 0.0  ;;  %v10411_v50 = vpop.eup %8945 }
 0xc40   : > { %v2378_v7 = vsel %vm2140_vm15, %v10411_v50, 0.0 }
 0xc42   : > { %2367 = vadd.xlane.f32.xlu1 %v2366_v53  ;;  %2346 = vadd.xlane.f32.xlu0 %v2345_v18  ;;  %v8395_v18 = vpack.c.bf16 %v8735_v40, %v8734_v25 }
 0xc46   : > { %v2311_v1 = vpop.xlane.xlu1 %2310  ;;  %2349 = vadd.xlane.f32.xlu0 %v2348_v22  ;;  %v8745_v22 = vunpack.i.h.bf16 %v10088_v3 }
 0xc47   : > { %8947 = vrcp.f32 %v2311_v1  ;;  %v8744_v1 = vunpack.i.l.bf16 %v10088_v3 }
 0xc4a   : > { %v2314_v0 = vpop.xlane.xlu1 %2313  ;;  %2376 = vadd.xlane.f32.xlu0 %v2375_v49 }
 0xc4b   : > { %8949 = vrcp.f32 %v2314_v0  ;;  %v12306_v0 = vmov 0.0|0.0  }
 0xc4e   : > { %v2317_v12 = vpop.xlane.xlu1 %2316  ;;  %2379 = vadd.xlane.f32.xlu0 %v2378_v7  ;;  %v8398_v7 = vpack.c.bf16 %v8745_v22, %v8744_v1 }
 0xc4f   : > { %8951 = vrcp.f32 %v2317_v12 }
 0xc51   : > { %v8948_v24 = vpop.eup %8947 }
 0xc52   : > { %v2421_v13 = vmul.f32 %v8948_v24, %v10298_v34  ;;  %v2320_v53 = vpop.xlane.xlu1 %2319 }
 0xc53   : > { %8953 = vrcp.f32 %v2320_v53  ;;  %8752 = vrot.lane.b32.xlu1 %v9916_v48, %s12280_s21 }
 0xc54   : > { %7595 = vmatmul.mubr.msk.f32.vlgmr.msra.gmra.mrb[40].mxu0 %vm2140_vm15, %v2421_v13  ;;  %v2249_v13 = vsub.f32 %v10261_v63, %v10393_v26 }
 0xc55   : > { %v8950_v49 = vpop.eup %8949  ;;  %8396 = vmatpush3.bf16.msra.mxu0 %v8395_v18  ;;  %7597 = vmatprep.mubr.msk.f32.mxu0 %vm9288_vm10, %v12305_v54 }
 0xc56   : > { %v2323_v17 = vpop.xlane.xlu0 %2322  ;;  %8397 = vmatprep.subr.bf16.mxu0 %v12306_v0  ;;  %v2422_v34 = vmul.f32 %v8950_v49, %v10303_v52  ;;  %v2301_v18 = vmul.f32 1.442695, %v2249_v13 }
 0xc57   : > { %8955 = vrcp.f32 %v2323_v17 }
 0xc58   : > { %7598 = vmatmul.mubr.msk.f32.gmra.mrb[42].mxu0 %vm2140_vm15, %v2422_v34 }
 0xc59   : > { %v8952_v3 = vpop.eup %8951  ;;  %8399 = vmatpush3.bf16.msra.mxu0 %v8398_v7  ;;  %7600 = vmatprep.mubr.msk.f32.mxu0 %vm9288_vm10, %v12305_v54  ;;  %v8740_v7 = vunpack.i.h.bf16 %v10076_v5 }
 0xc5a   : > { %v2326_v48 = vpop.xlane.xlu1 %2325  ;;  %v2423_v12 = vmul.f32 %v8952_v3, %v10308_v16  ;;  %8400 = vmatprep.subr.bf16.mxu0 %v12306_v0  ;;  %v8739_v3 = vunpack.i.l.bf16 %v10076_v5 }
 0xc5b   : > { %8957 = vrcp.f32 %v2326_v48  ;;  %v2245_v48 = vsub.f32 %v10278_v32, %v10401_v44 }
 0xc5c   : > { %7601 = vmatmul.mubr.msk.f32.gmra.mrb[44].mxu0 %vm2140_vm15, %v2423_v12 }
 0xc5d   : > { %v8954_v40 = vpop.eup %8953  ;;  %7603 = vmatprep.mubr.msk.f32.mxu0 %vm9288_vm10, %v12305_v54 }
 0xc5e   : > { %v2329_v52 = vpop.xlane.xlu1 %2328  ;;  %v2424_v25 = vmul.f32 %v8954_v40, %v10313_v45  ;;  %v2250_v45 = vsub.f32 %v10271_v8, %v10407_v56  ;;  %v2251_v8 = vsub.f32 %v10281_v57, %v2221_v4 }
 0xc5f   : > { %8959 = vrcp.f32 %v2329_v52  ;;  %v8404_v52 = vpack.c.bf16 %v8740_v7, %v8739_v3 }
 0xc60   : > { %7604 = vmatmul.mubr.msk.f32.gmra.mrb[46].mxu0 %vm2140_vm15, %v2424_v25  ;;  %8961 = vpow2.f32 %v2301_v18  ;;  %v2305_v56 = vmul.f32 1.442695, %v2251_v8 }
 0xc61   : > { %v8956_v24 = vpop.eup %8955  ;;  %7606 = vmatprep.mubr.msk.f32.mxu0 %vm9288_vm10, %v12305_v54 }
 0xc62   : > { %v2425_v16 = vmul.f32 %v8956_v24, %v10317_v42  ;;  %v2303_v42 = vmul.f32 1.442695, %v2250_v45 }
 0xc64   : > { %8747 = vrot.lane.b32.xlu0 %v9906_v41, %s12280_s21  ;;  %7607 = vmatmul.mubr.msk.f32.gmra.mrb[48].mxu0 %vm2140_vm15, %v2425_v16  ;;  %8963 = vpow2.f32 %v2303_v42 }
 0xc65   : > { %v8958_v53 = vpop.eup %8957  ;;  %7609 = vmatprep.mubr.msk.f32.mxu0 %vm9288_vm10, %v12305_v54  ;;  %8965 = vpow2.f32 %v2305_v56 }
 0xc66   : > { %v2426_v63 = vmul.f32 %v8958_v53, %v10321_v28  ;;  %v2252_v28 = vsub.f32 %v10290_v43, %v2224_v31 }
 0xc68   : > { %7610 = vmatmul.mubr.msk.f32.gmra.mrb[50].mxu0 %vm2140_vm15, %v2426_v63  ;;  %v2307_v1 = vmul.f32 1.442695, %v2252_v28 }
 0xc69   : > { %v8960_v26 = vpop.eup %8959  ;;  %7612 = vmatprep.mubr.msk.f32.mxu0 %vm9288_vm10, %v12305_v54 }
 0xc6a   : > { %v2427_v41 = vmul.f32 %v8960_v26, %v10325_v21  ;;  %v10459_v22 = vpop.eup %8961  ;;  %8967 = vpow2.f32 %v2307_v1 }
 0xc6b   : > { %v2381_v49 = vsel %vm2140_vm15, %v10459_v22, 0.0 }
 0xc6c   : > { %7613 = vmatmul.mubr.msk.f32.gmra.mrb[52].mxu0 %vm2140_vm15, %v2427_v41 }
 0xc6d   : > { %7664 = vmatprep.mubr.msk.f32.mxu0 %vm9288_vm10, %v12305_v54 }
 0xc6e   : > { %v10463_v17 = vpop.eup %8963 }
 0xc6f   : > { %v2384_v57 = vsel %vm2140_vm15, %v10463_v17, 0.0  ;;  %v10467_v21 = vpop.eup %8965 }
 0xc70   : > { %v2387_v43 = vsel %vm2140_vm15, %v10467_v21, 0.0 }
 0xc74   : > { %v10471_v4 = vpop.eup %8967 }
 0xc75   : > { %v2390_v31 = vsel %vm2140_vm15, %v10471_v4, 0.0 }
 0xc77   : > { %2382 = vadd.xlane.f32.xlu1 %v2381_v49 }
 0xc7b   : > { %2385 = vadd.xlane.f32.xlu1 %v2384_v57 }
 0xc83   : > { %2388 = vadd.xlane.f32.xlu0 %v2387_v43 }
 0xc87   : > { %2391 = vadd.xlane.f32.xlu0 %v2390_v31 }
 0xc8c   : > { %8757 = vrot.lane.b32.xlu1 %v9925_v27, %s12280_s21  ;;  %v2293_v27 = vmul.f32 1.442695, %v2245_v48 }
 0xc90   : > { %2745 = vrot.lane.b32.xlu1 %v9871_v20, %s12280_s21 }
 0xc94   : > { %2887 = vrot.lane.b32.xlu1 %v9931_v36, %s12280_s21  ;;  %s12311_s21 = smov 120  }
 0xc99   : > { %v2332_v34 = vpop.xlane.xlu0 %2331 }
 0xc9a   : > { %8969 = vrcp.f32 %v2332_v34 }
 0xc9b   : > { %8971 = vpow2.f32 %v2293_v27 }
 0xca4   : > { %v8970_v12 = vpop.eup %8969 }
 0xca5   : > { %v2428_v40 = vmul.f32 %v8970_v12, %v10331_v37  ;;  %v10490_v20 = vpop.eup %8971  ;;  %v2341_v37 = vpop.xlane.xlu1 %2340 }
 0xca6   : > { %v2369_v5 = vsel %vm2140_vm15, %v10490_v20, 0.0 }
 0xca7   : > { %7630 = vmatmul.mubr.msk.f32.vlgmr.msra.gmra.mrb[54].mxu1 %vm2140_vm15, %v2428_v40 }
 0xca8   : > { %8405 = vmatpush3.bf16.msra.mxu1 %v8404_v52  ;;  %7632 = vmatprep.mubr.msk.f32.mxu1 %vm9288_vm10, %v12305_v54 }
 0xca9   : > { %8406 = vmatprep.subr.bf16.mxu1 %v12306_v0 }
 0xcb7   : > { %v2353_v36 = vpop.xlane.xlu0 %2352 }
 0xcb8   : > { %2370 = vadd.xlane.f32.xlu1 %v2369_v5 }
 0xcbb   : > { %v2335_v32 = vpop.xlane.xlu0 %2334 }
 0xcbc   : > { %8973 = vrcp.f32 %v2335_v32 }
 0xcbf   : > { %v2356_v44 = vpop.xlane.xlu0 %2355 }
 0xcc3   : > { %v2362_v25 = vpop.xlane.xlu1 %2361  ;;  %v2338_v24 = vpop.xlane.xlu0 %2337 }
 0xcc4   : > { %8975 = vrcp.f32 %v2338_v24 }
 0xcc5   : > { %8977 = vrcp.f32 %v2341_v37 }
 0xcc6   : > { %v8974_v13 = vpop.eup %8973 }
 0xcc7   : > { %v2344_v16 = vpop.xlane.xlu1 %2343  ;;  %v2359_v53 = vpop.xlane.xlu0 %2358  ;;  %v2429_v18 = vmul.f32 %v8974_v13, %v10351_v30 }
 0xcc8   : > { %8979 = vrcp.f32 %v2344_v16 }
 0xcc9   : > { %7633 = vmatmul.mubr.msk.f32.gmra.mrb[56].mxu1 %vm2140_vm15, %v2429_v18 }
 0xcca   : > { %7635 = vmatprep.mubr.msk.f32.mxu1 %vm9288_vm10, %v12305_v54 }
 0xccb   : > { %v2374_v45 = vpop.xlane.xlu1 %2373  ;;  %v2365_v63 = vpop.xlane.xlu0 %2364 }
 0xcce   : > { %v8976_v26 = vpop.eup %8975 }
 0xccf   : > { %v10498_v42 = vpop.xlane.xlu1 %2367  ;;  %v2347_v41 = vpop.xlane.xlu0 %2346  ;;  %v2430_v8 = vmul.f32 %v8976_v26, %v10363_v35 }
 0xcd0   : > { %v8978_v56 = vpop.eup %8977  ;;  %8981 = vrcp.f32 %v2347_v41 }
 0xcd1   : > { %7636 = vmatmul.mubr.msk.f32.gmra.mrb[58].mxu1 %vm2140_vm15, %v2430_v8  ;;  %v2431_v57 = vmul.f32 %v8978_v56, %v10335_v9 }
 0xcd2   : > { %7638 = vmatprep.mubr.msk.f32.mxu1 %vm9288_vm10, %v12305_v54  ;;  %v8980_v43 = vpop.eup %8979 }
 0xcd3   : > { %v8753_v28 = vpop.permute.xlu1 %8752  ;;  %v2350_v30 = vpop.xlane.xlu0 %2349  ;;  %v2432_v35 = vmul.f32 %v8980_v43, %v10368_v58 }
 0xcd4   : > { %v8755_v1 = vunpack.i.h.bf16 %v8753_v28  ;;  %v8754_v49 = vunpack.i.l.bf16 %v8753_v28  ;;  %8983 = vrcp.f32 %v2350_v30 }
 0xcd5   : > { %7639 = vmatmul.mubr.msk.f32.gmra.mrb[60].mxu1 %vm2140_vm15, %v2431_v57  ;;  %8985 = vrcp.f32 %v2353_v36 }
 0xcd6   : > { %v8401_v31 = vpack.c.bf16 %v8755_v1, %v8754_v49  ;;  %7641 = vmatprep.mubr.msk.f32.mxu1 %vm9288_vm10, %v12305_v54  ;;  %8987 = vrcp.f32 %v2356_v44 }
 0xcd7   : > { %v2377_v34 = vpop.xlane.xlu0 %2376  ;;  %8989 = vrcp.f32 %v2374_v45 }
 0xcd8   : > { %8402 = vmatpush3.bf16.msra.mxu0 %v8401_v31  ;;  %8991 = vrcp.f32 %v2359_v53 }
 0xcd9   : > { %7662 = vmatprep.subr.mxu0 %v12305_v54  ;;  %7642 = vmatmul.mubr.msk.f32.gmra.mrb[62].mxu1 %vm2140_vm15, %v2432_v35  ;;  %8993 = vrcp.f32 %v2377_v34 }
 0xcda   : > { %v8982_v7 = vpop.eup %8981  ;;  %7644 = vmatprep.mubr.msk.f32.mxu1 %vm9288_vm10, %v12305_v54  ;;  %8995 = vrcp.f32 %v2362_v25 }
 0xcdb   : > { %v2380_v3 = vpop.xlane.xlu0 %2379  ;;  %v2433_v9 = vmul.f32 %v8982_v7, %v10385_v6 }
 0xcdc   : > { %8997 = vrcp.f32 %v2380_v3 }
 0xcdd   : > { %7645 = vmatmul.mubr.msk.f32.gmra.mrb[64].mxu1 %vm2140_vm15, %v2433_v9  ;;  %8999 = vrcp.f32 %v2365_v63 }
 0xcde   : > { %v8984_v48 = vpop.eup %8983  ;;  %7647 = vmatprep.mubr.msk.f32.mxu1 %vm9288_vm10, %v12305_v54 }
 0xcdf   : > { %v8748_v12 = vpop.permute.xlu0 %8747  ;;  %v2434_v58 = vmul.f32 %v8984_v48, %v10399_v60  ;;  %v8986_v60 = vpop.eup %8985 }
 0xce0   : > { %v8750_v40 = vunpack.i.h.bf16 %v8748_v12  ;;  %v8749_v52 = vunpack.i.l.bf16 %v8748_v12  ;;  %v8988_v16 = vpop.eup %8987  ;;  %v2435_v18 = vmul.f32 %v8986_v60, %v10347_v47 }
 0xce1   : > { %7648 = vmatmul.mubr.msk.f32.gmra.mrb[66].mxu1 %vm2140_vm15, %v2434_v58  ;;  %v8990_v41 = vpop.eup %8989  ;;  %v2436_v47 = vmul.f32 %v8988_v16, %v10357_v51 }
 0xce2   : > { %v8407_v27 = vpack.c.bf16 %v8750_v40, %v8749_v52  ;;  %7699 = vmatprep.mubr.msk.f32.mxu1 %vm9288_vm10, %v12305_v54  ;;  %v8992_v36 = vpop.eup %8991  ;;  %v2442_v44 = vmul.f32 %v8990_v41, %v10377_v62 }
 0xce3   : > { %v8994_v53 = vpop.eup %8993  ;;  %v2437_v63 = vmul.f32 %v8992_v36, %v10374_v38 }
 0xce4   : > { %8408 = vmatpush3.bf16.msra.mxu1 %v8407_v27  ;;  %v8996_v62 = vpop.eup %8995  ;;  %v2443_v51 = vmul.f32 %v8994_v53, %v10405_v61  ;;  %v3123_v53 = vld [vmem:[%s12261_s10] sm:$0xff] }
 0xce5   : > { %8409 = vmatprep.subr.bf16.mxu1 %v12306_v0  ;;  %v2438_v38 = vmul.f32 %v8996_v62, %v10365_v15 }
 0xd04   : > { %v2383_v6 = vpop.xlane.xlu1 %2382 }
 0xd05   : > { %9001 = vrcp.f32 %v2383_v6 }
 0xd06   : > { %9003 = vrcp.f32 %v10498_v42  ;;  %v8998_v42 = vpop.eup %8997 }
 0xd07   : > { %v9000_v8 = vpop.eup %8999  ;;  %v2444_v61 = vmul.f32 %v8998_v42, %v10411_v50  ;;  %v3126_v42 = vld [vmem:[%s12261_s10 + $0x18] sm:$0xff] }
 0xd08   : > { %v2386_v5 = vpop.xlane.xlu1 %2385  ;;  %v2439_v1 = vmul.f32 %v9000_v8, %v10383_v55 }
 0xd09   : > { %9005 = vrcp.f32 %v2386_v5 }
 0xd0c   : > { %v8758_v32 = vpop.permute.xlu1 %8757 }
 0xd0d   : > { %v8760_v37 = vunpack.i.h.bf16 %v8758_v32  ;;  %v8759_v24 = vunpack.i.l.bf16 %v8758_v32 }
 0xd0f   : > { %v8410_v13 = vpack.c.bf16 %v8760_v37, %v8759_v24  ;;  %v9002_v28 = vpop.eup %9001 }
 0xd10   : > { %v2746_v26 = vpop.permute.xlu1 %2745  ;;  %v2389_v45 = vpop.xlane.xlu0 %2388  ;;  %v2445_v49 = vmul.f32 %v9002_v28, %v10459_v22 }
 0xd11   : > { %7663 = vmatpush3.msra.mxu0 %v2746_v26  ;;  %8411 = vmatpush3.bf16.msra.mxu1 %v8410_v13  ;;  %9007 = vrcp.f32 %v2389_v45  ;;  %v9004_v30 = vpop.eup %9003  ;;  %v3124_v45 = vld [vmem:[%s12261_s10 + $0x8] sm:$0xff] }
 0xd12   : > { %7665 = vmatmul.mubr.msk.f32.vlgmr.msra.gmra.mrb[54].mxu0 %vm2140_vm15, %v2435_v18  ;;  %7697 = vmatprep.subr.mxu1 %v12305_v54  ;;  %v2440_v50 = vmul.f32 %v9004_v30, %v10391_v59  ;;  %v8413_v62 = vpack.c.bf16 %v3124_v45, %v3123_v53 }
 0xd13   : > { %7667 = vmatprep.mubr.msk.f32.mxu0 %vm9288_vm10, %v12305_v54  ;;  %8412 = vmatprep.subr.bf16.mxu0 %v12306_v0  ;;  %v9006_v15 = vpop.eup %9005 }
 0xd14   : > { %v2888_v25 = vpop.permute.xlu1 %2887  ;;  %v2392_v56 = vpop.xlane.xlu0 %2391  ;;  %v2446_v57 = vmul.f32 %v9006_v15, %v10463_v17  ;;  %8414 = vmatpush3.bf16.msra.mxu0 %v8413_v62 }
 0xd15   : > { %7698 = vmatpush3.msra.mxu1 %v2888_v25  ;;  %9009 = vrcp.f32 %v2392_v56  ;;  %8415 = vmatprep.subr.bf16.mxu0 %v12306_v0 }
 0xd16   : > { %7668 = vmatmul.mubr.msk.f32.gmra.mrb[56].mxu0 %vm2140_vm15, %v2436_v47  ;;  %7700 = vmatmul.mubr.msk.f32.vlgmr.msra.gmra.mrb[68].mxu1 %vm2140_vm15, %v2442_v44 }
 0xd17   : > { %7670 = vmatprep.mubr.msk.f32.mxu0 %vm9288_vm10, %v12305_v54  ;;  %7702 = vmatprep.mubr.msk.f32.mxu1 %vm9288_vm10, %v12305_v54 }
 0xd18   : > { %8418 = vmatprep.subr.bf16.mxu1 %v12306_v0 }
 0xd1a   : > { %7671 = vmatmul.mubr.msk.f32.gmra.mrb[58].mxu0 %vm2140_vm15, %v2437_v63  ;;  %7703 = vmatmul.mubr.msk.f32.gmra.mrb[70].mxu1 %vm2140_vm15, %v2443_v51  ;;  %v3125_v51 = vld [vmem:[%s12261_s10 + $0x10] sm:$0xff] }
 0xd1b   : > { %7673 = vmatprep.mubr.msk.f32.mxu0 %vm9288_vm10, %v12305_v54  ;;  %7705 = vmatprep.mubr.msk.f32.mxu1 %vm9288_vm10, %v12305_v54  ;;  %v9008_v43 = vpop.eup %9007  ;;  %v8416_v56 = vpack.c.bf16 %v3126_v42, %v3125_v51 }
 0xd1c   : > { %v2447_v31 = vmul.f32 %v9008_v43, %v10467_v21 }
 0xd1d   : > { %8417 = vmatpush3.bf16.msra.mxu0 %v8416_v56 }
 0xd1e   : > { %7674 = vmatmul.mubr.msk.f32.gmra.mrb[60].mxu0 %vm2140_vm15, %v2438_v38  ;;  %7706 = vmatmul.mubr.msk.f32.gmra.mrb[72].mxu1 %vm2140_vm15, %v2444_v61 }
 0xd1f   : > { %7676 = vmatprep.mubr.msk.f32.mxu0 %vm9288_vm10, %v12305_v54  ;;  %7708 = vmatprep.mubr.msk.f32.mxu1 %vm9288_vm10, %v12305_v54  ;;  %v9010_v34 = vpop.eup %9009 }
 0xd20   : > { %v2448_v35 = vmul.f32 %v9010_v34, %v10471_v4  ;;  %8424 = vmatprep.subr.bf16.mxu0 %v12306_v0 }
 0xd22   : > { %7677 = vmatmul.mubr.msk.f32.gmra.mrb[62].mxu0 %vm2140_vm15, %v2439_v1  ;;  %7709 = vmatmul.mubr.msk.f32.gmra.mrb[74].mxu1 %vm2140_vm15, %v2445_v49 }
 0xd23   : > { %7679 = vmatprep.mubr.msk.f32.mxu0 %vm9288_vm10, %v12305_v54  ;;  %7711 = vmatprep.mubr.msk.f32.mxu1 %vm9288_vm10, %v12305_v54 }
 0xd26   : > { %7680 = vmatmul.mubr.msk.f32.gmra.mrb[64].mxu0 %vm2140_vm15, %v2440_v50  ;;  %7712 = vmatmul.mubr.msk.f32.gmra.mrb[76].mxu1 %vm2140_vm15, %v2446_v57 }
 0xd27   : > { %v10566_v55 = vpop.f32.mrb[40].mxu0  ;;  %7714 = vmatprep.mubr.msk.f32.mxu1 %vm9288_vm10, %v12305_v54  ;;  %7682 = vmatprep.mubr.msk.f32.mxu0 %vm9288_vm10, %v12305_v54 }
 0xd28   : > { %v7596_v22 = vpop.f32.mrb[41].mxu0 }
 0xd2a   : > { %7715 = vmatmul.mubr.msk.f32.gmra.mrb[78].mxu1 %vm2140_vm15, %v2447_v31 }
 0xd2b   : > { %v10574_v59 = vpop.f32.mrb[42].mxu0  ;;  %7717 = vmatprep.mubr.msk.f32.mxu1 %vm9288_vm10, %v12305_v54 }
 0xd2c   : > { %v7599_v17 = vpop.f32.mrb[43].mxu0 }
 0xd2e   : > { %7718 = vmatmul.mubr.msk.f32.gmra.mrb[80].mxu1 %vm2140_vm15, %v2448_v35 }
 0xd2f   : > { %v10580_v7 = vpop.f32.mrb[44].mxu0  ;;  %7757 = vmatprep.mubr.msk.f32.mxu1 %vm9288_vm10, %v12305_v54 }
 0xd30   : > { %v7602_v3 = vpop.f32.mrb[45].mxu0 }
 0xd33   : > { %v10584_v21 = vpop.f32.mrb[46].mxu0 }
 0xd34   : > { %v7605_v9 = vpop.f32.mrb[47].mxu0 }
 0xd37   : > { %v10586_v48 = vpop.f32.mrb[48].mxu0 }
 0xd38   : > { %v7608_v12 = vpop.f32.mrb[49].mxu0 }
 0xd3b   : > { %v10588_v58 = vpop.f32.mrb[50].mxu0 }
 0xd3c   : > { %v7611_v40 = vpop.f32.mrb[51].mxu0 }
 0xd3f   : > { %v10590_v52 = vpop.f32.mrb[52].mxu0 }
 0xd40   : > { %v7614_v4 = vpop.f32.mrb[53].mxu0 }
 0xd45   : > { %v2371_v27 = vpop.xlane.xlu1 %2370 }
 0xd46   : > { %9011 = vrcp.f32 %v2371_v27 }
 0xd50   : > { %v9012_v6 = vpop.eup %9011 }
 0xd51   : > { %v2441_v5 = vmul.f32 %v9012_v6, %v10490_v20 }
 0xd53   : > { %7683 = vmatmul.mubr.msk.f32.gmra.mrb[66].mxu0 %vm2140_vm15, %v2441_v5 }
 0xd54   : > { %7728 = vmatprep.mubr.msk.f32.mxu0 %vm9288_vm10, %v12305_v54 }
 0xd7a   : > { %v2699_v32 = vpop.f32.mrb[54].mxu1 }
 0xd7b   : > { %3024 = vrot.lane.b32.xlu0 %v2699_v32, %s12307_s22  ;;  %v7631_v60 = vpop.f32.mrb[55].mxu1 }
 0xd9c   : > { %v2704_v37 = vpop.f32.mrb[56].mxu1 }
 0xd9d   : > { %3026 = vrot.lane.b32.xlu0 %v2704_v37, %s12307_s22  ;;  %v7634_v24 = vpop.f32.mrb[57].mxu1 }
 0xda4   : > { %v2709_v13 = vpop.f32.mrb[58].mxu1 }
 0xda5   : > { %v7637_v16 = vpop.f32.mrb[59].mxu1 }
 0xda8   : > { %v2714_v18 = vpop.f32.mrb[60].mxu1 }
 0xda9   : > { %v7640_v26 = vpop.f32.mrb[61].mxu1 }
 0xdac   : > { %v2719_v41 = vpop.f32.mrb[62].mxu1 }
 0xdad   : > { %v7643_v36 = vpop.f32.mrb[63].mxu1 }
 0xdb0   : > { %v2724_v20 = vpop.f32.mrb[64].mxu1 }
 0xdb1   : > { %v7646_v44 = vpop.f32.mrb[65].mxu1 }
 0xdb4   : > { %v2729_v25 = vpop.f32.mrb[66].mxu1 }
 0xdb5   : > { %v7649_v47 = vpop.f32.mrb[67].mxu1 }
 0xde5   : > { %v2841_v63 = vpop.f32.mrb[54].mxu0 }
 0xde6   : > { %3052 = vrot.lane.b32.xlu1 %v2841_v63, %s9286_s16  ;;  %v7666_v8 = vpop.f32.mrb[55].mxu0 }
 0xde9   : > { %v2846_v38 = vpop.f32.mrb[56].mxu0  ;;  %v2983_v61 = vpop.f32.mrb[68].mxu1 }
 0xdea   : > { %v7669_v28 = vpop.f32.mrb[57].mxu0  ;;  %3054 = vrot.lane.b32.xlu0 %v2846_v38, %s9286_s16  ;;  %v7701_v30 = vpop.f32.mrb[69].mxu1 }
 0xded   : > { %v2851_v1 = vpop.f32.mrb[58].mxu0  ;;  %v2988_v49 = vpop.f32.mrb[70].mxu1 }
 0xdee   : > { %3056 = vrot.lane.b32.xlu1 %v2851_v1, %s9286_s16  ;;  %v7672_v15 = vpop.f32.mrb[59].mxu0  ;;  %3028 = vrot.lane.b32.xlu0 %v2709_v13, %s12307_s22  ;;  %v7704_v50 = vpop.f32.mrb[71].mxu1 }
 0xdef   : > { %v3025_v24 = vpop.permute.xlu0 %3024 }
 0xdf0   : > { %v3101_v44 = vsel %vm560_vm5, %v10566_v55, %v3025_v24 }
 0xdf1   : > { %v2856_v57 = vpop.f32.mrb[60].mxu0  ;;  %v2993_v43 = vpop.f32.mrb[72].mxu1 }
 0xdf2   : > { %v7675_v22 = vpop.f32.mrb[61].mxu0  ;;  %3058 = vrot.lane.b32.xlu0 %v2856_v57, %s9286_s16  ;;  %3030 = vrot.lane.b32.xlu1 %v2714_v18, %s12307_s22  ;;  %v7707_v31 = vpop.f32.mrb[73].mxu1 }
 0xdf5   : > { %v2861_v34 = vpop.f32.mrb[62].mxu0  ;;  %v2998_v17 = vpop.f32.mrb[74].mxu1 }
 0xdf6   : > { %v7678_v35 = vpop.f32.mrb[63].mxu0  ;;  %3060 = vrot.lane.b32.xlu1 %v2861_v34, %s9286_s16  ;;  %3080 = vrot.lane.b32.xlu0 %v2983_v61, %s12290_s24  ;;  %v7710_v3 = vpop.f32.mrb[75].mxu1 }
 0xdf9   : > { %v2866_v9 = vpop.f32.mrb[64].mxu0  ;;  %v3003_v12 = vpop.f32.mrb[76].mxu1 }
 0xdfa   : > { %v7681_v40 = vpop.f32.mrb[65].mxu0  ;;  %3082 = vrot.lane.b32.xlu0 %v2988_v49, %s12290_s24  ;;  %3086 = vrot.lane.b32.xlu1 %v2998_v17, %s12290_s24  ;;  %v7713_v4 = vpop.f32.mrb[77].mxu1 }
 0xdfb   : > { %v10684_v40 = vld [vmem:[%s12259_s8] sm:$0xff] }
 0xdfd   : > { %v3008_v27 = vpop.f32.mrb[78].mxu1 }
 0xdfe   : > { %3084 = vrot.lane.b32.xlu0 %v2993_v43, %s12290_s24  ;;  %3034 = vrot.lane.b32.xlu1 %v2724_v20, %s12307_s22  ;;  %v7716_v6 = vpop.f32.mrb[79].mxu1 }
 0xe01   : > { %v3013_v5 = vpop.f32.mrb[80].mxu1 }
 0xe02   : > { %3032 = vrot.lane.b32.xlu0 %v2719_v41, %s12307_s22  ;;  %3090 = vrot.lane.b32.xlu1 %v3008_v27, %s12290_s24  ;;  %v7719_v32 = vpop.f32.mrb[81].mxu1 }
 0xe06   : > { %3088 = vrot.lane.b32.xlu0 %v3003_v12, %s12290_s24  ;;  %v12293_v12 = vsub.s32 6, %v9518_v10 }
 0xe0a   : > { %3062 = vrot.lane.b32.xlu0 %v2866_v9, %s9286_s16 }
 0xe0e   : > { %3036 = vrot.lane.b32.xlu0 %v2729_v25, %s12307_s22 }
 0xe0f   : > { %v3027_v13 = vpop.permute.xlu0 %3026 }
 0xe10   : > { %v3102_v45 = vsel %vm560_vm5, %v10574_v59, %v3027_v13 }
 0xe12   : > { %3092 = vrot.lane.b32.xlu0 %v3013_v5, %s12290_s24  ;;  %s12317_s24 = smov 24  }
 0xe26   : > { %v2871_v60 = vpop.f32.mrb[66].mxu0 }
 0xe27   : > { %v7684_v37 = vpop.f32.mrb[67].mxu0  ;;  %3064 = vrot.lane.b32.xlu1 %v2871_v60, %s9286_s16 }
 0xe58   : > { %v3053_v16 = vpop.permute.xlu1 %3052 }
 0xe59   : > { %v3108_v25 = vsel %vm895_vm9, %v3101_v44, %v3053_v16 }
 0xe5c   : > { %v3055_v18 = vpop.permute.xlu0 %3054 }
 0xe5d   : > { %v3109_v63 = vsel %vm895_vm9, %v3102_v45, %v3055_v18 }
 0xe60   : > { %v3057_v26 = vpop.permute.xlu1 %3056  ;;  %v3029_v41 = vpop.permute.xlu0 %3028 }
 0xe61   : > { %v3103_v55 = vsel %vm560_vm5, %v10580_v7, %v3029_v41 }
 0xe62   : > { %v3110_v8 = vsel %vm895_vm9, %v3103_v55, %v3057_v26 }
 0xe64   : > { %v3059_v36 = vpop.permute.xlu0 %3058  ;;  %v3031_v20 = vpop.permute.xlu1 %3030 }
 0xe65   : > { %v3104_v56 = vsel %vm560_vm5, %v10584_v21, %v3031_v20 }
 0xe66   : > { %v3111_v7 = vsel %vm895_vm9, %v3104_v56, %v3059_v36 }
 0xe68   : > { %v3081_v47 = vpop.permute.xlu0 %3080  ;;  %v3061_v62 = vpop.permute.xlu1 %3060 }
 0xe69   : > { %v3116_v53 = vsel %vm3115_vm0, %v3108_v25, %v3081_v47 }
 0xe6a   : > { %7729 = vmatmul.mubr.msk.f32.vlgmr.msra.gmra.mrb[68].mxu0 %vm688_vm8, %v3116_v53 }
 0xe6b   : > { %7731 = vmatprep.mubr.msk.f32.mxu0 %vm9288_vm10, %v12305_v54 }
 0xe6c   : > { %v3083_v51 = vpop.permute.xlu0 %3082  ;;  %v3087_v38 = vpop.permute.xlu1 %3086 }
 0xe6d   : > { %v3117_v42 = vsel %vm3115_vm0, %v3109_v63, %v3083_v51  ;;  %v3119_v30 = vsel %vm3115_vm0, %v3111_v7, %v3087_v38 }
 0xe6e   : > { %7732 = vmatmul.mubr.msk.f32.gmra.mrb[70].mxu0 %vm688_vm8, %v3117_v42 }
 0xe6f   : > { %7734 = vmatprep.mubr.msk.f32.mxu0 %vm9288_vm10, %v12305_v54 }
 0xe70   : > { %v3085_v59 = vpop.permute.xlu0 %3084  ;;  %v3035_v49 = vpop.permute.xlu1 %3034 }
 0xe71   : > { %v3118_v61 = vsel %vm3115_vm0, %v3110_v8, %v3085_v59  ;;  %v3106_v57 = vsel %vm560_vm5, %v10588_v58, %v3035_v49 }
 0xe72   : > { %7735 = vmatmul.mubr.msk.f32.gmra.mrb[72].mxu0 %vm688_vm8, %v3118_v61 }
 0xe73   : > { %7737 = vmatprep.mubr.msk.f32.mxu0 %vm9288_vm10, %v12305_v54 }
 0xe74   : > { %v3033_v28 = vpop.permute.xlu0 %3032  ;;  %v3091_v43 = vpop.permute.xlu1 %3090 }
 0xe75   : > { %v3105_v1 = vsel %vm560_vm5, %v10586_v48, %v3033_v28 }
 0xe76   : > { %7738 = vmatmul.mubr.msk.f32.gmra.mrb[74].mxu0 %vm688_vm8, %v3119_v30  ;;  %v3112_v21 = vsel %vm895_vm9, %v3105_v1, %v3061_v62 }
 0xe77   : > { %7740 = vmatprep.mubr.msk.f32.mxu0 %vm9288_vm10, %v12305_v54 }
 0xe78   : > { %v3089_v15 = vpop.permute.xlu0 %3088 }
 0xe79   : > { %v3120_v50 = vsel %vm3115_vm0, %v3112_v21, %v3089_v15 }
 0xe7a   : > { %7741 = vmatmul.mubr.msk.f32.gmra.mrb[76].mxu0 %vm688_vm8, %v3120_v50 }
 0xe7b   : > { %7743 = vmatprep.mubr.msk.f32.mxu0 %vm9288_vm10, %v12305_v54 }
 0xe7c   : > { %v3063_v48 = vpop.permute.xlu0 %3062 }
 0xe7d   : > { %v3113_v22 = vsel %vm895_vm9, %v3106_v57, %v3063_v48 }
 0xe7e   : > { %v3121_v31 = vsel %vm3115_vm0, %v3113_v22, %v3091_v43 }
 0xe7f   : > { %7744 = vmatmul.mubr.msk.f32.gmra.mrb[78].mxu0 %vm688_vm8, %v3121_v31 }
 0xe80   : > { %7746 = vmatprep.mubr.msk.f32.mxu0 %vm9288_vm10, %v12305_v54  ;;  %v3037_v34 = vpop.permute.xlu0 %3036 }
 0xe81   : > { %v3107_v17 = vsel %vm560_vm5, %v10590_v52, %v3037_v34  ;;  %v3130_v52 = vrot.slane %v10684_v40, %v12293_v12 }
 0xe84   : > { %v3093_v3 = vpop.permute.xlu0 %3092 }
 0xe99   : > { %v3065_v35 = vpop.permute.xlu1 %3064 }
 0xe9a   : > { %v3114_v9 = vsel %vm895_vm9, %v3107_v17, %v3065_v35 }
 0xe9b   : > { %v3122_v58 = vsel %vm3115_vm0, %v3114_v9, %v3093_v3 }
 0xe9c   : > { %7747 = vmatmul.mubr.msk.f32.gmra.mrb[80].mxu0 %vm688_vm8, %v3122_v58 }
 0xe9d   : > { %7794 = vmatprep.mubr.msk.f32.mxu0 %vm9288_vm10, %v12305_v54 }
 0xf3d   : > { %v3218_v4 = vpop.f32.mrb[68].mxu0 }
 0xf3e   : > { %v3219_v27 = vadd.f32 %v3218_v4, %v3130_v52  ;;  %v7730_v6 = vpop.f32.mrb[69].mxu0 }
 0xf40   : > { %v3252_v5 = vadd.f32 %v3219_v27, %v9667_v2 }
 0xf41   : > { %v3223_v32 = vpop.f32.mrb[70].mxu0 }
 0xf42   : > { %v3224_v60 = vadd.f32 %v3223_v32, %v3130_v52  ;;  %v7733_v37 = vpop.f32.mrb[71].mxu0  ;;  %v3259_v24 = vsel %vm688_vm8, %v3252_v5, 0.0 }
 0xf43   : > { %3260 = vadd.xlane.f32.xlu1 %v3259_v24 }
 0xf44   : > { %v3253_v13 = vadd.f32 %v3224_v60, %v9708_v19 }
 0xf45   : > { %v3228_v16 = vpop.f32.mrb[72].mxu0 }
 0xf46   : > { %v3229_v18 = vadd.f32 %v3228_v16, %v3130_v52  ;;  %v7736_v26 = vpop.f32.mrb[73].mxu0  ;;  %v3262_v41 = vsel %vm688_vm8, %v3253_v13, 0.0  ;;  %v3373_v16 = vld [vmem:[%s12262_s11 + $0x8] sm:$0xff] }
 0xf47   : > { %3263 = vadd.xlane.f32.xlu0 %v3262_v41  ;;  %v3374_v26 = vld [vmem:[%s12262_s11 + $0x10] sm:$0xff]  ;;  %v3375_v41 = vld [vmem:[%s12262_s11 + $0x18] sm:$0xff] }
 0xf48   : > { %v3254_v36 = vadd.f32 %v3229_v18, %v9716_v23 }
 0xf49   : > { %v3233_v20 = vpop.f32.mrb[74].mxu0 }
 0xf4a   : > { %v3234_v44 = vadd.f32 %v3233_v20, %v3130_v52  ;;  %v7739_v25 = vpop.f32.mrb[75].mxu0  ;;  %v3265_v2 = vsel %vm688_vm8, %v3254_v36, 0.0 }
 0xf4b   : > { %3266 = vadd.xlane.f32.xlu0 %v3265_v2 }
 0xf4c   : > { %v3255_v47 = vadd.f32 %v3234_v44, %v9725_v29 }
 0xf4d   : > { %v3238_v53 = vpop.f32.mrb[76].mxu0 }
 0xf4e   : > { %v3239_v45 = vadd.f32 %v3238_v53, %v3130_v52  ;;  %v7742_v62 = vpop.f32.mrb[77].mxu0  ;;  %v3268_v19 = vsel %vm688_vm8, %v3255_v47, 0.0 }
 0xf4f   : > { %3269 = vadd.xlane.f32.xlu1 %v3268_v19 }
 0xf50   : > { %v3256_v63 = vadd.f32 %v3239_v45, %v9733_v14 }
 0xf52   : > { %v3243_v51 = vpop.f32.mrb[78].mxu0  ;;  %v3271_v55 = vsel %vm688_vm8, %v3256_v63, 0.0 }
 0xf53   : > { %v3244_v23 = vadd.f32 %v3243_v51, %v3130_v52  ;;  %v7745_v42 = vpop.f32.mrb[79].mxu0  ;;  %3272 = vadd.xlane.f32.xlu0 %v3271_v55 }
 0xf54   : > { %v12292_v42 = vsub.s32 7, %v9518_v10 }
 0xf55   : > { %v3257_v8 = vadd.f32 %v3244_v23, %v9741_v33 }
 0xf57   : > { %v3274_v59 = vsel %vm688_vm8, %v3257_v8, 0.0 }
 0xf58   : > { %3275 = vadd.xlane.f32.xlu1 %v3274_v59 }
 0xf6f   : > { %v3248_v29 = vpop.f32.mrb[80].mxu0 }
 0xf70   : > { %v3249_v56 = vadd.f32 %v3248_v29, %v3130_v52  ;;  %v7748_v38 = vpop.f32.mrb[81].mxu0  ;;  %v10756_v29 = vld [vmem:[%s12259_s8 + $0x8] sm:$0xff] }
 0xf71   : > { %v3353_v38 = vrot.slane %v10684_v40, %v12292_v42 }
 0xf72   : > { %v3258_v61 = vadd.f32 %v3249_v56, %v9749_v39 }
 0xf74   : > { %v3277_v7 = vsel %vm688_vm8, %v3258_v61, 0.0 }
 0xf75   : > { %3278 = vadd.xlane.f32.xlu0 %v3277_v7 }
 0xfd0   : > { %v3261_v14 = vpop.xlane.xlu1 %3260 }
 0xfd1   : > { %v3280_v28 = vmul.f32 0.03125, %v3261_v14  ;;  %v3364_v14 = vrot.slane %v10756_v29, %v9521_v11 }
 0xfd3   : > { %v10703_v30 = vsub.f32 %v3252_v5, %v3280_v28 }
 0xfd4   : > { %v3264_v1 = vpop.xlane.xlu0 %3263 }
 0xfd5   : > { %v3281_v49 = vmul.f32 0.03125, %v3264_v1  ;;  %v3294_v33 = vmul.f32 %v10703_v30, %v10703_v30 }
 0xfd7   : > { %v10707_v21 = vsub.f32 %v3253_v13, %v3281_v49  ;;  %v3301_v15 = vsel %vm688_vm8, %v3294_v33, 0.0  ;;  %v3372_v13 = vld [vmem:[%s12262_s11] sm:$0xff] }
 0xfd8   : > { %3302 = vadd.xlane.f32.xlu1 %v3301_v15  ;;  %v3267_v50 = vpop.xlane.xlu0 %3266  ;;  %v8419_v18 = vpack.c.bf16 %v3373_v16, %v3372_v13 }
 0xfd9   : > { %v3282_v57 = vmul.f32 0.03125, %v3267_v50  ;;  %v3295_v39 = vmul.f32 %v10707_v21, %v10707_v21 }
 0xfda   : > { %8420 = vmatpush3.bf16.msra.mxu1 %v8419_v18 }
 0xfdb   : > { %v10712_v48 = vsub.f32 %v3254_v36, %v3282_v57  ;;  %v3304_v43 = vsel %vm688_vm8, %v3295_v39, 0.0  ;;  %8421 = vmatprep.subr.bf16.mxu1 %v12306_v0  ;;  %v8422_v36 = vpack.c.bf16 %v3375_v41, %v3374_v26 }
 0xfdc   : > { %v3270_v22 = vpop.xlane.xlu1 %3269  ;;  %3305 = vadd.xlane.f32.xlu0 %v3304_v43 }
 0xfdd   : > { %v3283_v31 = vmul.f32 0.03125, %v3270_v22  ;;  %v3296_v34 = vmul.f32 %v10712_v48, %v10712_v48 }
 0xfde   : > { %8423 = vmatpush3.bf16.msra.mxu1 %v8422_v36 }
 0xfdf   : > { %v10717_v17 = vsub.f32 %v3255_v47, %v3283_v31  ;;  %v3307_v35 = vsel %vm688_vm8, %v3296_v34, 0.0  ;;  %8436 = vmatprep.subr.bf16.mxu1 %v12306_v0 }
 0xfe0   : > { %3308 = vadd.xlane.f32.xlu1 %v3307_v35  ;;  %v3273_v3 = vpop.xlane.xlu0 %3272 }
 0xfe1   : > { %v3284_v9 = vmul.f32 0.03125, %v3273_v3  ;;  %v3297_v58 = vmul.f32 %v10717_v17, %v10717_v17 }
 0xfe3   : > { %v10722_v52 = vsub.f32 %v3256_v63, %v3284_v9  ;;  %v3310_v4 = vsel %vm688_vm8, %v3297_v58, 0.0 }
 0xfe4   : > { %3311 = vadd.xlane.f32.xlu0 %v3310_v4 }
 0xfe5   : > { %v3276_v27 = vpop.xlane.xlu1 %3275  ;;  %v3298_v6 = vmul.f32 %v10722_v52, %v10722_v52 }
 0xfe6   : > { %v3285_v5 = vmul.f32 0.03125, %v3276_v27 }
 0xfe7   : > { %v3313_v32 = vsel %vm688_vm8, %v3298_v6, 0.0 }
 0xfe8   : > { %v10728_v60 = vsub.f32 %v3257_v8, %v3285_v5  ;;  %3314 = vadd.xlane.f32.xlu1 %v3313_v32 }
 0xfea   : > { %v3299_v37 = vmul.f32 %v10728_v60, %v10728_v60 }
 0xfec   : > { %v3316_v24 = vsel %vm688_vm8, %v3299_v37, 0.0 }
 0xfed   : > { %3317 = vadd.xlane.f32.xlu0 %v3316_v24 }
0x1002   : > { %v3279_v20 = vpop.xlane.xlu0 %3278 }
0x1003   : > { %v3286_v44 = vmul.f32 0.03125, %v3279_v20  ;;  %v3536_v20 = vld [vmem:[%s12263_s12] sm:$0xff] }
0x1005   : > { %v10747_v25 = vsub.f32 %v3258_v61, %v3286_v44  ;;  %v3537_v44 = vld [vmem:[%s12263_s12 + $0x8] sm:$0xff] }
0x1007   : > { %v3300_v2 = vmul.f32 %v10747_v25, %v10747_v25 }
0x1009   : > { %v3319_v47 = vsel %vm688_vm8, %v3300_v2, 0.0  ;;  %v8425_v2 = vpack.c.bf16 %v3537_v44, %v3536_v20 }
0x100a   : > { %3320 = vadd.xlane.f32.xlu1 %v3319_v47  ;;  %v3539_v47 = vld [vmem:[%s12263_s12 + $0x18] sm:$0xff] }
0x100b   : > { %8426 = vmatpush3.bf16.msra.mxu0 %v8425_v2 }
0x100c   : > { %8427 = vmatprep.subr.bf16.mxu0 %v12306_v0 }
0x1065   : > { %v3303_v53 = vpop.xlane.xlu1 %3302 }
0x1066   : > { %v3322_v45 = vmul.f32 0.03125, %v3303_v53 }
0x1068   : > { %v3329_v62 = vadd.f32 1e-06, %v3322_v45  ;;  %v3540_v45 = vld [vmem:[%s12263_s12 + $0x20] sm:$0xff] }
0x1069   : > { %v3306_v19 = vpop.xlane.xlu0 %3305 }
0x106a   : > { %9013 = vrsqrt.f32 %v3329_v62  ;;  %v3323_v63 = vmul.f32 0.03125, %v3306_v19  ;;  %v3541_v62 = vld [vmem:[%s12263_s12 + $0x28] sm:$0xff] }
0x106b   : > { %v8431_v19 = vpack.c.bf16 %v3541_v62, %v3540_v45 }
0x106c   : > { %v3330_v51 = vadd.f32 1e-06, %v3323_v63  ;;  %v3542_v63 = vld [vmem:[%s12263_s12 + $0x30] sm:$0xff] }
0x106d   : > { %v3309_v55 = vpop.xlane.xlu1 %3308 }
0x106e   : > { %9015 = vrsqrt.f32 %v3330_v51  ;;  %v3324_v23 = vmul.f32 0.03125, %v3309_v55  ;;  %v3543_v51 = vld [vmem:[%s12263_s12 + $0x38] sm:$0xff] }
0x106f   : > { %v8434_v55 = vpack.c.bf16 %v3543_v51, %v3542_v63 }
0x1070   : > { %v3331_v8 = vadd.f32 1e-06, %v3324_v23  ;;  %v10842_v23 = vrot.slane %v10756_v29, %v9572_v46 }
0x1071   : > { %v3312_v59 = vpop.xlane.xlu0 %3311 }
0x1072   : > { %9017 = vrsqrt.f32 %v3331_v8  ;;  %v3325_v56 = vmul.f32 0.03125, %v3312_v59 }
0x1074   : > { %v9014_v61 = vpop.eup %9013  ;;  %v3332_v7 = vadd.f32 1e-06, %v3325_v56 }
0x1075   : > { %v3343_v28 = vmul.f32 %v9014_v61, %v10703_v30  ;;  %v3315_v1 = vpop.xlane.xlu1 %3314 }
0x1076   : > { %9019 = vrsqrt.f32 %v3332_v7  ;;  %v3326_v49 = vmul.f32 0.03125, %v3315_v1 }
0x1077   : > { %v3354_v33 = vmul.f32 %v3353_v38, %v3343_v28 }
0x1078   : > { %v9016_v15 = vpop.eup %9015  ;;  %v3333_v50 = vadd.f32 1e-06, %v3326_v49 }
0x1079   : > { %v10764_v57 = vadd.f32 %v3364_v14, %v3354_v33  ;;  %v3344_v39 = vmul.f32 %v9016_v15, %v10707_v21 }
0x107a   : > { %9021 = vrsqrt.f32 %v3333_v50  ;;  %v3318_v43 = vpop.xlane.xlu0 %3317 }
0x107b   : > { %v3327_v40 = vmul.f32 0.03125, %v3318_v43  ;;  %7758 = vmatmul.mubr.msk.f32.vlgmr.msra.gmra.mrb[82].mxu1 %vm688_vm8, %v10764_v57  ;;  %v3355_v22 = vmul.f32 %v3353_v38, %v3344_v39 }
0x107c   : > { %v9018_v31 = vpop.eup %9017  ;;  %7760 = vmatprep.mubr.msk.f32.mxu1 %vm9288_vm10, %v12305_v54 }
0x107d   : > { %v3334_v30 = vadd.f32 1e-06, %v3327_v40  ;;  %v10771_v34 = vadd.f32 %v3364_v14, %v3355_v22  ;;  %v3345_v35 = vmul.f32 %v9018_v31, %v10712_v48 }
0x107f   : > { %9023 = vrsqrt.f32 %v3334_v30  ;;  %7761 = vmatmul.mubr.msk.f32.gmra.mrb[84].mxu1 %vm688_vm8, %v10771_v34  ;;  %v3356_v21 = vmul.f32 %v3353_v38, %v3345_v35 }
0x1080   : > { %v9020_v3 = vpop.eup %9019  ;;  %7763 = vmatprep.mubr.msk.f32.mxu1 %vm9288_vm10, %v12305_v54 }
0x1081   : > { %v10778_v9 = vadd.f32 %v3364_v14, %v3356_v21  ;;  %v3346_v58 = vmul.f32 %v9020_v3, %v10717_v17 }
0x1083   : > { %7764 = vmatmul.mubr.msk.f32.gmra.mrb[86].mxu1 %vm688_vm8, %v10778_v9  ;;  %v3357_v4 = vmul.f32 %v3353_v38, %v3346_v58 }
0x1084   : > { %v9022_v27 = vpop.eup %9021  ;;  %7766 = vmatprep.mubr.msk.f32.mxu1 %vm9288_vm10, %v12305_v54 }
0x1085   : > { %v10785_v48 = vadd.f32 %v3364_v14, %v3357_v4  ;;  %v3347_v6 = vmul.f32 %v9022_v27, %v10722_v52 }
0x1087   : > { %7767 = vmatmul.mubr.msk.f32.gmra.mrb[88].mxu1 %vm688_vm8, %v10785_v48  ;;  %v3358_v5 = vmul.f32 %v3353_v38, %v3347_v6 }
0x1088   : > { %7769 = vmatprep.mubr.msk.f32.mxu1 %vm9288_vm10, %v12305_v54 }
0x1089   : > { %v9024_v17 = vpop.eup %9023  ;;  %v10792_v32 = vadd.f32 %v3364_v14, %v3358_v5 }
0x108a   : > { %v3348_v37 = vmul.f32 %v9024_v17, %v10728_v60 }
0x108b   : > { %7770 = vmatmul.mubr.msk.f32.gmra.mrb[90].mxu1 %vm688_vm8, %v10792_v32 }
0x108c   : > { %7772 = vmatprep.mubr.msk.f32.mxu1 %vm9288_vm10, %v12305_v54  ;;  %v3359_v24 = vmul.f32 %v3353_v38, %v3348_v37 }
0x108e   : > { %v10799_v52 = vadd.f32 %v3364_v14, %v3359_v24 }
0x1090   : > { %7773 = vmatmul.mubr.msk.f32.gmra.mrb[92].mxu1 %vm688_vm8, %v10799_v52 }
0x1091   : > { %7775 = vmatprep.mubr.msk.f32.mxu1 %vm9288_vm10, %v12305_v54 }
0x1097   : > { %v3321_v13 = vpop.xlane.xlu1 %3320 }
0x1098   : > { %v3328_v16 = vmul.f32 0.03125, %v3321_v13 }
0x109a   : > { %v3335_v18 = vadd.f32 1e-06, %v3328_v16 }
0x109c   : > { %9025 = vrsqrt.f32 %v3335_v18 }
0x10a6   : > { %v9026_v60 = vpop.eup %9025 }
0x10a7   : > { %v3349_v26 = vmul.f32 %v9026_v60, %v10747_v25  ;;  %v3538_v25 = vld [vmem:[%s12263_s12 + $0x10] sm:$0xff] }
0x10a8   : > { %v8428_v53 = vpack.c.bf16 %v3539_v47, %v3538_v25 }
0x10a9   : > { %v3360_v41 = vmul.f32 %v3353_v38, %v3349_v26 }
0x10aa   : > { %8429 = vmatpush3.bf16.msra.mxu0 %v8428_v53 }
0x10ab   : > { %v10806_v36 = vadd.f32 %v3364_v14, %v3360_v41  ;;  %8430 = vmatprep.subr.bf16.mxu0 %v12306_v0 }
0x10ad   : > { %7776 = vmatmul.mubr.msk.f32.gmra.mrb[94].mxu1 %vm688_vm8, %v10806_v36 }
0x10ae   : > { %7823 = vmatprep.mubr.msk.f32.mxu1 %vm9288_vm10, %v12305_v54  ;;  %8432 = vmatpush3.bf16.msra.mxu0 %v8431_v19 }
0x10af   : > { %8433 = vmatprep.subr.bf16.mxu0 %v12306_v0 }
0x10b2   : > { %8435 = vmatpush3.bf16.msra.mxu0 %v8434_v55 }
0x10b3   : > { %8442 = vmatprep.subr.bf16.mxu0 %v12306_v0 }
0x114e   : > { %v3467_v8 = vpop.f32.mrb[82].mxu1 }
0x114f   : > { %v3468_v59 = vadd.f32 %v3467_v8, %v10842_v23  ;;  %v7759_v56 = vpop.f32.mrb[83].mxu1 }
0x1151   : > { %v3508_v38 = vmul.f32 0.70710677, %v3468_v59  ;;  %v3501_v31 = vmul.f32 0.5, %v3468_v59 }
0x1152   : > { %v3472_v61 = vpop.f32.mrb[84].mxu1 }
0x1153   : > { %9027 = verf.f32 %v3508_v38  ;;  %v3473_v7 = vadd.f32 %v3472_v61, %v10842_v23  ;;  %v7762_v14 = vpop.f32.mrb[85].mxu1 }
0x1155   : > { %v3509_v28 = vmul.f32 0.70710677, %v3473_v7  ;;  %v3502_v6 = vmul.f32 0.5, %v3473_v7 }
0x1156   : > { %v3477_v1 = vpop.f32.mrb[86].mxu1 }
0x1157   : > { %9029 = verf.f32 %v3509_v28  ;;  %v3478_v49 = vadd.f32 %v3477_v1, %v10842_v23  ;;  %v7765_v33 = vpop.f32.mrb[87].mxu1  ;;  %v12308_v1 = vld [vmem:[#allocation8_spill] sm:$0xff] }
0x1159   : > { %v3510_v15 = vmul.f32 0.70710677, %v3478_v49  ;;  %v3503_v18 = vmul.f32 0.5, %v3478_v49  ;;  %v3547_v49 = vrot.slane %v10756_v29, %v12308_v1 }
0x115a   : > { %v3482_v50 = vpop.f32.mrb[88].mxu1 }
0x115b   : > { %9031 = verf.f32 %v3510_v15  ;;  %v3483_v39 = vadd.f32 %v3482_v50, %v10842_v23  ;;  %v7768_v43 = vpop.f32.mrb[89].mxu1 }
0x115d   : > { %v9028_v40 = vpop.eup %9027  ;;  %v3511_v22 = vmul.f32 0.70710677, %v3483_v39  ;;  %v3504_v44 = vmul.f32 0.5, %v3483_v39 }
0x115e   : > { %v3522_v30 = vadd.f32 1.0, %v9028_v40  ;;  %v3487_v35 = vpop.f32.mrb[90].mxu1 }
0x115f   : > { %9033 = verf.f32 %v3511_v22  ;;  %v3488_v21 = vadd.f32 %v3487_v35, %v10842_v23  ;;  %v7771_v3 = vpop.f32.mrb[91].mxu1 }
0x1160   : > { %v3529_v58 = vmul.f32 %v3522_v30, %v3501_v31 }
0x1161   : > { %v9030_v4 = vpop.eup %9029  ;;  %v3512_v27 = vmul.f32 0.70710677, %v3488_v21  ;;  %v3505_v53 = vmul.f32 0.5, %v3488_v21 }
0x1162   : > { %v3523_v5 = vadd.f32 1.0, %v9030_v4  ;;  %7795 = vmatmul.mubr.msk.f32.vlgmr.msra.gmra.mrb[82].mxu0 %vm3548_vm1, %v3529_v58 }
0x1163   : > { %9035 = verf.f32 %v3512_v27  ;;  %v3492_v17 = vpop.f32.mrb[92].mxu1  ;;  %7797 = vmatprep.mubr.msk.f32.mxu0 %vm9288_vm10, %v12305_v54 }
0x1164   : > { %v3530_v37 = vmul.f32 %v3523_v5, %v3502_v6  ;;  %v3493_v24 = vadd.f32 %v3492_v17, %v10842_v23  ;;  %v7774_v13 = vpop.f32.mrb[93].mxu1 }
0x1165   : > { %v9032_v16 = vpop.eup %9031 }
0x1166   : > { %v3524_v60 = vadd.f32 1.0, %v9032_v16  ;;  %v3513_v26 = vmul.f32 0.70710677, %v3493_v24  ;;  %7798 = vmatmul.mubr.msk.f32.gmra.mrb[84].mxu0 %vm3548_vm1, %v3530_v37  ;;  %v3506_v63 = vmul.f32 0.5, %v3493_v24 }
0x1167   : > { %7800 = vmatprep.mubr.msk.f32.mxu0 %vm9288_vm10, %v12305_v54 }
0x1168   : > { %v3531_v41 = vmul.f32 %v3524_v60, %v3503_v18  ;;  %9037 = verf.f32 %v3513_v26 }
0x1169   : > { %v9034_v20 = vpop.eup %9033 }
0x116a   : > { %v3525_v2 = vadd.f32 1.0, %v9034_v20  ;;  %7801 = vmatmul.mubr.msk.f32.gmra.mrb[86].mxu0 %vm3548_vm1, %v3531_v41 }
0x116b   : > { %7803 = vmatprep.mubr.msk.f32.mxu0 %vm9288_vm10, %v12305_v54 }
0x116c   : > { %v3532_v25 = vmul.f32 %v3525_v2, %v3504_v44 }
0x116d   : > { %v9036_v47 = vpop.eup %9035 }
0x116e   : > { %v3526_v45 = vadd.f32 1.0, %v9036_v47  ;;  %7804 = vmatmul.mubr.msk.f32.gmra.mrb[88].mxu0 %vm3548_vm1, %v3532_v25 }
0x116f   : > { %7806 = vmatprep.mubr.msk.f32.mxu0 %vm9288_vm10, %v12305_v54 }
0x1170   : > { %v3533_v62 = vmul.f32 %v3526_v45, %v3505_v53 }
0x1172   : > { %v9038_v19 = vpop.eup %9037  ;;  %7807 = vmatmul.mubr.msk.f32.gmra.mrb[90].mxu0 %vm3548_vm1, %v3533_v62 }
0x1173   : > { %v3527_v51 = vadd.f32 1.0, %v9038_v19  ;;  %7809 = vmatprep.mubr.msk.f32.mxu0 %vm9288_vm10, %v12305_v54 }
0x1175   : > { %v3534_v55 = vmul.f32 %v3527_v51, %v3506_v63 }
0x1177   : > { %7810 = vmatmul.mubr.msk.f32.gmra.mrb[92].mxu0 %vm3548_vm1, %v3534_v55 }
0x1178   : > { %7812 = vmatprep.mubr.msk.f32.mxu0 %vm9288_vm10, %v12305_v54 }
0x1180   : > { %v3497_v8 = vpop.f32.mrb[94].mxu1 }
0x1181   : > { %v3498_v59 = vadd.f32 %v3497_v8, %v10842_v23  ;;  %v7777_v56 = vpop.f32.mrb[95].mxu1 }
0x1183   : > { %v3514_v38 = vmul.f32 0.70710677, %v3498_v59  ;;  %v3507_v7 = vmul.f32 0.5, %v3498_v59 }
0x1185   : > { %9039 = verf.f32 %v3514_v38 }
0x118f   : > { %v9040_v61 = vpop.eup %9039 }
0x1190   : > { %v3528_v14 = vadd.f32 1.0, %v9040_v61 }
0x1192   : > { %v3535_v28 = vmul.f32 %v3528_v14, %v3507_v7 }
0x1194   : > { %7813 = vmatmul.mubr.msk.f32.gmra.mrb[94].mxu0 %vm3548_vm1, %v3535_v28 }
0x1195   : > { %7858 = vmatprep.mubr.msk.f32.mxu0 %vm9288_vm10, %v12305_v54 }
0x1235   : > { %v3636_v33 = vpop.f32.mrb[82].mxu0 }
0x1236   : > { %v3637_v15 = vadd.f32 %v3636_v33, %v3547_v49  ;;  %v7796_v50 = vpop.f32.mrb[83].mxu0 }
0x1238   : > { %v3670_v23 = vadd.f32 %v3637_v15, %v10764_v57 }
0x1239   : > { %v3641_v39 = vpop.f32.mrb[84].mxu0 }
0x123a   : > { %v3642_v43 = vadd.f32 %v3641_v39, %v3547_v49  ;;  %v7799_v40 = vpop.f32.mrb[85].mxu0  ;;  %v3677_v22 = vsel %vm688_vm8, %v3670_v23, 0.0 }
0x123b   : > { %3678 = vadd.xlane.f32.xlu0 %v3677_v22 }
0x123c   : > { %v3671_v31 = vadd.f32 %v3642_v43, %v10771_v34 }
0x123d   : > { %v3646_v30 = vpop.f32.mrb[86].mxu0 }
0x123e   : > { %v3647_v35 = vadd.f32 %v3646_v30, %v3547_v49  ;;  %v7802_v21 = vpop.f32.mrb[87].mxu0  ;;  %v3680_v3 = vsel %vm688_vm8, %v3671_v31, 0.0 }
0x123f   : > { %3681 = vadd.xlane.f32.xlu1 %v3680_v3  ;;  %v6779_v21 = vld [vmem:[%s12260_s9 + $0x28] sm:$0xff] }
0x1240   : > { %v3672_v58 = vadd.f32 %v3647_v35, %v10778_v9  ;;  %v6778_v35 = vld [vmem:[%s12260_s9 + $0x20] sm:$0xff] }
0x1241   : > { %v3651_v4 = vpop.f32.mrb[88].mxu0  ;;  %v8437_v3 = vpack.c.bf16 %v6779_v21, %v6778_v35 }
0x1242   : > { %v3652_v27 = vadd.f32 %v3651_v4, %v3547_v49  ;;  %v7805_v6 = vpop.f32.mrb[89].mxu0  ;;  %v3683_v57 = vsel %vm688_vm8, %v3672_v58, 0.0  ;;  %v6781_v4 = vld [vmem:[%s12260_s9 + $0x38] sm:$0xff] }
0x1243   : > { %3684 = vadd.xlane.f32.xlu0 %v3683_v57  ;;  %8438 = vmatpush3.bf16.msra.mxu1 %v8437_v3 }
0x1244   : > { %v3673_v5 = vadd.f32 %v3652_v27, %v10785_v48  ;;  %8439 = vmatprep.subr.bf16.mxu1 %v12306_v0 }
0x1245   : > { %v3656_v17 = vpop.f32.mrb[90].mxu0 }
0x1246   : > { %v3657_v37 = vadd.f32 %v3656_v17, %v3547_v49  ;;  %v7808_v24 = vpop.f32.mrb[91].mxu0  ;;  %v3686_v34 = vsel %vm688_vm8, %v3673_v5, 0.0 }
0x1247   : > { %3687 = vadd.xlane.f32.xlu1 %v3686_v34 }
0x1248   : > { %v3674_v13 = vadd.f32 %v3657_v37, %v10792_v32 }
0x124a   : > { %v3661_v16 = vpop.f32.mrb[92].mxu0  ;;  %v3689_v18 = vsel %vm688_vm8, %v3674_v13, 0.0 }
0x124b   : > { %v3662_v9 = vadd.f32 %v3661_v16, %v3547_v49  ;;  %3690 = vadd.xlane.f32.xlu0 %v3689_v18  ;;  %v7811_v60 = vpop.f32.mrb[93].mxu0 }
0x124d   : > { %v3675_v26 = vadd.f32 %v3662_v9, %v10799_v52 }
0x124f   : > { %v3692_v41 = vsel %vm688_vm8, %v3675_v26, 0.0 }
0x1250   : > { %3693 = vadd.xlane.f32.xlu1 %v3692_v41 }
0x1267   : > { %v3666_v48 = vpop.f32.mrb[94].mxu0 }
0x1268   : > { %v3667_v20 = vadd.f32 %v3666_v48, %v3547_v49  ;;  %v7814_v44 = vpop.f32.mrb[95].mxu0 }
0x1269   : > { %v12309_v44 = vld [vmem:[#allocation7_spill] sm:$0xff] }
0x126a   : > { %v3676_v2 = vadd.f32 %v3667_v20, %v10806_v36 }
0x126c   : > { %v3695_v25 = vsel %vm688_vm8, %v3676_v2, 0.0 }
0x126d   : > { %3696 = vadd.xlane.f32.xlu0 %v3695_v25 }
0x12c8   : > { %v3679_v32 = vpop.xlane.xlu0 %3678 }
0x12c9   : > { %v3698_v47 = vmul.f32 0.03125, %v3679_v32 }
0x12cb   : > { %v10888_v53 = vsub.f32 %v3670_v23, %v3698_v47 }
0x12cc   : > { %v3682_v45 = vpop.xlane.xlu1 %3681 }
0x12cd   : > { %v3699_v62 = vmul.f32 0.03125, %v3682_v45  ;;  %v3712_v52 = vmul.f32 %v10888_v53, %v10888_v53 }
0x12cf   : > { %v10892_v19 = vsub.f32 %v3671_v31, %v3699_v62  ;;  %v3719_v63 = vsel %vm688_vm8, %v3712_v52, 0.0  ;;  %v12310_v62 = vsub.s32 4, %v9518_v10 }
0x12d0   : > { %v3685_v51 = vpop.xlane.xlu0 %3684  ;;  %3720 = vadd.xlane.f32.xlu1 %v3719_v63 }
0x12d1   : > { %v3700_v55 = vmul.f32 0.03125, %v3685_v51  ;;  %v3713_v36 = vmul.f32 %v10892_v19, %v10892_v19  ;;  %v3782_v52 = vrot.slane %v10756_v29, %v12310_v62 }
0x12d3   : > { %v10897_v8 = vsub.f32 %v3672_v58, %v3700_v55  ;;  %v3722_v59 = vsel %vm688_vm8, %v3713_v36, 0.0  ;;  %v6780_v58 = vld [vmem:[%s12260_s9 + $0x30] sm:$0xff] }
0x12d4   : > { %v3688_v56 = vpop.xlane.xlu1 %3687  ;;  %3723 = vadd.xlane.f32.xlu0 %v3722_v59  ;;  %v8440_v27 = vpack.c.bf16 %v6781_v4, %v6780_v58 }
0x12d5   : > { %v3701_v38 = vmul.f32 0.03125, %v3688_v56  ;;  %v3714_v61 = vmul.f32 %v10897_v8, %v10897_v8 }
0x12d6   : > { %8441 = vmatpush3.bf16.msra.mxu1 %v8440_v27 }
0x12d7   : > { %v10902_v7 = vsub.f32 %v3673_v5, %v3701_v38  ;;  %v3725_v14 = vsel %vm688_vm8, %v3714_v61, 0.0  ;;  %8454 = vmatprep.subr.bf16.mxu1 %v12306_v0 }
0x12d8   : > { %v3691_v28 = vpop.xlane.xlu0 %3690  ;;  %3726 = vadd.xlane.f32.xlu1 %v3725_v14 }
0x12d9   : > { %v3702_v49 = vmul.f32 0.03125, %v3691_v28  ;;  %v3715_v33 = vmul.f32 %v10902_v7, %v10902_v7 }
0x12db   : > { %v10907_v15 = vsub.f32 %v3674_v13, %v3702_v49  ;;  %v3728_v50 = vsel %vm688_vm8, %v3715_v33, 0.0 }
0x12dc   : > { %3729 = vadd.xlane.f32.xlu0 %v3728_v50 }
0x12dd   : > { %v3694_v23 = vpop.xlane.xlu1 %3693  ;;  %v3716_v39 = vmul.f32 %v10907_v15, %v10907_v15 }
0x12de   : > { %v3703_v43 = vmul.f32 0.03125, %v3694_v23 }
0x12df   : > { %v3731_v40 = vsel %vm688_vm8, %v3716_v39, 0.0 }
0x12e0   : > { %v10913_v22 = vsub.f32 %v3675_v26, %v3703_v43  ;;  %3732 = vadd.xlane.f32.xlu1 %v3731_v40 }
0x12e2   : > { %v3717_v31 = vmul.f32 %v10913_v22, %v10913_v22 }
0x12e4   : > { %v3734_v30 = vsel %vm688_vm8, %v3717_v31, 0.0 }
0x12e5   : > { %3735 = vadd.xlane.f32.xlu0 %v3734_v30 }
0x12fa   : > { %v3697_v6 = vpop.xlane.xlu0 %3696 }
0x12fb   : > { %v3704_v57 = vmul.f32 0.03125, %v3697_v6 }
0x12fd   : > { %v10932_v5 = vsub.f32 %v3676_v2, %v3704_v57  ;;  %v3771_v2 = vrot.slane %v10756_v29, %v12309_v44 }
0x12ff   : > { %v3718_v17 = vmul.f32 %v10932_v5, %v10932_v5 }
0x1301   : > { %v3737_v37 = vsel %vm688_vm8, %v3718_v17, 0.0 }
0x1302   : > { %3738 = vadd.xlane.f32.xlu1 %v3737_v37 }
0x135d   : > { %v3721_v24 = vpop.xlane.xlu1 %3720 }
0x135e   : > { %v3740_v34 = vmul.f32 0.03125, %v3721_v24 }
0x1360   : > { %v3747_v13 = vadd.f32 1e-06, %v3740_v34 }
0x1361   : > { %v3724_v16 = vpop.xlane.xlu0 %3723 }
0x1362   : > { %9041 = vrsqrt.f32 %v3747_v13  ;;  %v3741_v18 = vmul.f32 0.03125, %v3724_v16 }
0x1364   : > { %v3748_v9 = vadd.f32 1e-06, %v3741_v18 }
0x1365   : > { %v3727_v60 = vpop.xlane.xlu1 %3726 }
0x1366   : > { %9043 = vrsqrt.f32 %v3748_v9  ;;  %v3742_v26 = vmul.f32 0.03125, %v3727_v60 }
0x1368   : > { %v3749_v41 = vadd.f32 1e-06, %v3742_v26 }
0x1369   : > { %v3730_v48 = vpop.xlane.xlu0 %3729 }
0x136a   : > { %9045 = vrsqrt.f32 %v3749_v41  ;;  %v3743_v20 = vmul.f32 0.03125, %v3730_v48 }
0x136c   : > { %v9042_v25 = vpop.eup %9041  ;;  %v3750_v32 = vadd.f32 1e-06, %v3743_v20 }
0x136d   : > { %v3761_v47 = vmul.f32 %v9042_v25, %v10888_v53  ;;  %v3733_v45 = vpop.xlane.xlu1 %3732 }
0x136e   : > { %9047 = vrsqrt.f32 %v3750_v32  ;;  %v3744_v63 = vmul.f32 0.03125, %v3733_v45 }
0x136f   : > { %v3772_v51 = vmul.f32 %v3771_v2, %v3761_v47 }
0x1370   : > { %v9044_v55 = vpop.eup %9043  ;;  %v3751_v36 = vadd.f32 1e-06, %v3744_v63 }
0x1371   : > { %v10943_v59 = vadd.f32 %v3782_v52, %v3772_v51  ;;  %v3762_v56 = vmul.f32 %v9044_v55, %v10892_v19 }
0x1372   : > { %9049 = vrsqrt.f32 %v3751_v36  ;;  %v3736_v38 = vpop.xlane.xlu0 %3735 }
0x1373   : > { %v3745_v61 = vmul.f32 0.03125, %v3736_v38  ;;  %7824 = vmatmul.mubr.msk.f32.vlgmr.msra.gmra.mrb[96].mxu1 %vm688_vm8, %v10943_v59  ;;  %v3773_v53 = vmul.f32 %v3771_v2, %v3762_v56 }
0x1374   : > { %v9046_v14 = vpop.eup %9045  ;;  %7826 = vmatprep.mubr.msk.f32.mxu1 %vm9288_vm10, %v12305_v54 }
0x1375   : > { %v3752_v29 = vadd.f32 1e-06, %v3745_v61  ;;  %v10950_v28 = vadd.f32 %v3782_v52, %v3773_v53  ;;  %v3763_v49 = vmul.f32 %v9046_v14, %v10897_v8 }
0x1377   : > { %9051 = vrsqrt.f32 %v3752_v29  ;;  %7827 = vmatmul.mubr.msk.f32.gmra.mrb[98].mxu1 %vm688_vm8, %v10950_v28  ;;  %v3774_v19 = vmul.f32 %v3771_v2, %v3763_v49 }
0x1378   : > { %v9048_v33 = vpop.eup %9047  ;;  %7829 = vmatprep.mubr.msk.f32.mxu1 %vm9288_vm10, %v12305_v54 }
0x1379   : > { %v10957_v50 = vadd.f32 %v3782_v52, %v3774_v19  ;;  %v3764_v23 = vmul.f32 %v9048_v33, %v10902_v7 }
0x137b   : > { %7830 = vmatmul.mubr.msk.f32.gmra.mrb[100].mxu1 %vm688_vm8, %v10957_v50  ;;  %v3775_v39 = vmul.f32 %v3771_v2, %v3764_v23 }
0x137c   : > { %v9050_v43 = vpop.eup %9049  ;;  %7832 = vmatprep.mubr.msk.f32.mxu1 %vm9288_vm10, %v12305_v54 }
0x137d   : > { %v10964_v8 = vadd.f32 %v3782_v52, %v3775_v39  ;;  %v3765_v40 = vmul.f32 %v9050_v43, %v10907_v15 }
0x137f   : > { %7833 = vmatmul.mubr.msk.f32.gmra.mrb[102].mxu1 %vm688_vm8, %v10964_v8  ;;  %v3776_v31 = vmul.f32 %v3771_v2, %v3765_v40 }
0x1380   : > { %7835 = vmatprep.mubr.msk.f32.mxu1 %vm9288_vm10, %v12305_v54 }
0x1381   : > { %v9052_v7 = vpop.eup %9051  ;;  %v10971_v30 = vadd.f32 %v3782_v52, %v3776_v31 }
0x1382   : > { %v3766_v35 = vmul.f32 %v9052_v7, %v10913_v22 }
0x1383   : > { %7836 = vmatmul.mubr.msk.f32.gmra.mrb[104].mxu1 %vm688_vm8, %v10971_v30 }
0x1384   : > { %7838 = vmatprep.mubr.msk.f32.mxu1 %vm9288_vm10, %v12305_v54  ;;  %v3777_v21 = vmul.f32 %v3771_v2, %v3766_v35 }
0x1386   : > { %v10978_v15 = vadd.f32 %v3782_v52, %v3777_v21 }
0x1388   : > { %7839 = vmatmul.mubr.msk.f32.gmra.mrb[106].mxu1 %vm688_vm8, %v10978_v15 }
0x1389   : > { %7841 = vmatprep.mubr.msk.f32.mxu1 %vm9288_vm10, %v12305_v54 }
0x138f   : > { %v3739_v3 = vpop.xlane.xlu1 %3738 }
0x1390   : > { %v3746_v58 = vmul.f32 0.03125, %v3739_v3 }
0x1392   : > { %v3753_v4 = vadd.f32 1e-06, %v3746_v58 }
0x1394   : > { %9053 = vrsqrt.f32 %v3753_v4 }
0x139e   : > { %v9054_v22 = vpop.eup %9053 }
0x139f   : > { %v3767_v27 = vmul.f32 %v9054_v22, %v10932_v5 }
0x13a1   : > { %v3778_v6 = vmul.f32 %v3771_v2, %v3767_v27 }
0x13a3   : > { %v10985_v57 = vadd.f32 %v3782_v52, %v3778_v6 }
0x13a5   : > { %7842 = vmatmul.mubr.msk.f32.gmra.mrb[108].mxu1 %vm688_vm8, %v10985_v57 }
0x13a6   : > { %7893 = vmatprep.mubr.msk.f32.mxu1 %vm9288_vm10, %v12305_v54 }
0x1446   : > { %v10991_v17 = vpop.f32.mrb[96].mxu1 }
0x1447   : > { %3923 = vrot.lane.b32.xlu0 %v10991_v17, %s12311_s21  ;;  %v7825_v37 = vpop.f32.mrb[97].mxu1 }
0x144a   : > { %v10995_v24 = vpop.f32.mrb[98].mxu1 }
0x144b   : > { %3925 = vrot.lane.b32.xlu1 %v10995_v24, %s12311_s21  ;;  %v7828_v5 = vpop.f32.mrb[99].mxu1  ;;  %v11001_v34 = vpack.i.bf16 %v10995_v24, %v10991_v17 }
0x144e   : > { %v11003_v13 = vpop.f32.mrb[100].mxu1 }
0x144f   : > { %3927 = vrot.lane.b32.xlu1 %v11003_v13, %s12311_s21  ;;  %v7831_v16 = vpop.f32.mrb[101].mxu1 }
0x1452   : > { %v11007_v18 = vpop.f32.mrb[102].mxu1 }
0x1453   : > { %3929 = vrot.lane.b32.xlu0 %v11007_v18, %s12311_s21  ;;  %v7834_v9 = vpop.f32.mrb[103].mxu1  ;;  %v11013_v60 = vpack.i.bf16 %v11007_v18, %v11003_v13 }
0x1456   : > { %v11015_v26 = vpop.f32.mrb[104].mxu1 }
0x1457   : > { %3931 = vrot.lane.b32.xlu1 %v11015_v26, %s12311_s21  ;;  %v7837_v41 = vpop.f32.mrb[105].mxu1 }
0x145b   : > { %3939 = vrot.lane.b32.xlu1 %v10995_v24, %s12312_s23  ;;  %v11021_v48 = vpop.f32.mrb[106].mxu1 }
0x145c   : > { %3933 = vrot.lane.b32.xlu0 %v11021_v48, %s12311_s21  ;;  %v7840_v20 = vpop.f32.mrb[107].mxu1  ;;  %v11027_v2 = vpack.i.bf16 %v11021_v48, %v11015_v26 }
0x1460   : > { %3937 = vrot.lane.b32.xlu0 %v10991_v17, %s12312_s23 }
0x1464   : > { %3951 = vrot.lane.b32.xlu0 %v10991_v17, %s12313_s27 }
0x1468   : > { %3941 = vrot.lane.b32.xlu0 %v11003_v13, %s12312_s23 }
0x146c   : > { %3955 = vrot.lane.b32.xlu0 %v11003_v13, %s12313_s27 }
0x1470   : > { %3945 = vrot.lane.b32.xlu0 %v11015_v26, %s12312_s23 }
0x1474   : > { %3959 = vrot.lane.b32.xlu0 %v11015_v26, %s12313_s27 }
0x1478   : > { %v11041_v25 = vpop.f32.mrb[108].mxu1 }
0x1479   : > { %3949 = vrot.lane.b32.xlu0 %v11041_v25, %s12312_s23  ;;  %3935 = vrot.lane.b32.xlu1 %v11041_v25, %s12311_s21  ;;  %v7843_v32 = vpop.f32.mrb[109].mxu1 }
0x147d   : > { %8762 = vrot.lane.b32.xlu0 %v11001_v34, %s12314_s17  ;;  %3953 = vrot.lane.b32.xlu1 %v10995_v24, %s12313_s27 }
0x1481   : > { %8772 = vrot.lane.b32.xlu0 %v11013_v60, %s12314_s17  ;;  %3943 = vrot.lane.b32.xlu1 %v11007_v18, %s12312_s23 }
0x1485   : > { %8782 = vrot.lane.b32.xlu0 %v11027_v2, %s12314_s17  ;;  %3957 = vrot.lane.b32.xlu1 %v11007_v18, %s12313_s27 }
0x1489   : > { %3977 = vrot.lane.b32.xlu0 %v11041_v25, %s12314_s17  ;;  %3947 = vrot.lane.b32.xlu1 %v11021_v48, %s12312_s23 }
0x148d   : > { %3961 = vrot.lane.b32.xlu1 %v11021_v48, %s12313_s27 }
0x1491   : > { %3963 = vrot.lane.b32.xlu1 %v11041_v25, %s12313_s27  ;;  %s9296_s27 = smov 32  }
0x14b9   : > { %v11067_v47 = vpop.permute.xlu0 %3923 }
0x14bd   : > { %v11069_v45 = vpop.permute.xlu1 %3925 }
0x14be   : > { %v8766_v62 = vpack.i.bf16 %v11069_v45, %v11067_v47 }
0x14c0   : > { %8767 = vrot.lane.b32.xlu1 %v8766_v62, %s12314_s17 }
0x14c1   : > { %v11074_v52 = vpop.permute.xlu1 %3927 }
0x14c5   : > { %v11076_v63 = vpop.permute.xlu0 %3929 }
0x14c6   : > { %v8776_v51 = vpack.i.bf16 %v11076_v63, %v11074_v52 }
0x14c8   : > { %8777 = vrot.lane.b32.xlu1 %v8776_v51, %s12314_s17 }
0x14c9   : > { %v11081_v55 = vpop.permute.xlu1 %3931 }
0x14cd   : > { %v11091_v38 = vpop.permute.xlu1 %3939 }
0x14ce   : > { %v11083_v36 = vpop.permute.xlu0 %3933 }
0x14cf   : > { %v11087_v56 = vpack.i.bf16 %v11083_v36, %v11081_v55 }
0x14d1   : > { %8787 = vrot.lane.b32.xlu1 %v11087_v56, %s12314_s17 }
0x14d2   : > { %v11093_v61 = vpop.permute.xlu0 %3937 }
0x14d3   : > { %v8791_v53 = vpack.i.bf16 %v11091_v38, %v11093_v61 }
0x14d5   : > { %8792 = vrot.lane.b32.xlu0 %v8791_v53, %s12314_s17 }
0x14d6   : > { %v11098_v14 = vpop.permute.xlu0 %3951 }
0x14da   : > { %v11100_v29 = vpop.permute.xlu0 %3941 }
0x14de   : > { %v11102_v49 = vpop.permute.xlu0 %3955 }
0x14e2   : > { %v11104_v19 = vpop.permute.xlu0 %3945 }
0x14e6   : > { %v11106_v33 = vpop.permute.xlu0 %3959 }
0x14eb   : > { %v11108_v23 = vpop.permute.xlu0 %3949  ;;  %v11110_v39 = vpop.permute.xlu1 %3935 }
0x14ec   : > { %4119 = vrot.lane.b32.xlu1 %v11110_v39, %s12314_s17 }
0x14ef   : > { %v8763_v43 = vpop.permute.xlu0 %8762  ;;  %v11114_v40 = vpop.permute.xlu1 %3953 }
0x14f0   : > { %v8765_v31 = vunpack.i.h.bf16 %v8763_v43  ;;  %v8764_v7 = vunpack.i.l.bf16 %v8763_v43  ;;  %v8796_v35 = vpack.i.bf16 %v11114_v40, %v11098_v14 }
0x14f2   : > { %v8443_v21 = vpack.c.bf16 %v8765_v31, %v8764_v7  ;;  %8797 = vrot.lane.b32.xlu1 %v8796_v35, %s12314_s17 }
0x14f3   : > { %v8773_v3 = vpop.permute.xlu0 %8772  ;;  %v11119_v58 = vpop.permute.xlu1 %3943 }
0x14f4   : > { %v8801_v4 = vpack.i.bf16 %v11119_v58, %v11100_v29  ;;  %8445 = vmatpush3.bf16.xpose.msk.msra.mxu0 %vm9885_vm14, %v8443_v21  ;;  %v8775_v27 = vunpack.i.h.bf16 %v8773_v3  ;;  %v8774_v6 = vunpack.i.l.bf16 %v8773_v3 }
0x14f5   : > { %8446 = vmatprep.subr.bf16.mxu0 %v12306_v0 }
0x14f6   : > { %8802 = vrot.lane.b32.xlu0 %v8801_v4, %s12314_s17  ;;  %v8447_v16 = vpack.c.bf16 %v8775_v27, %v8774_v6 }
0x14f7   : > { %v11127_v37 = vpop.permute.xlu1 %3957  ;;  %v8783_v9 = vpop.permute.xlu0 %8782 }
0x14f8   : > { %v11131_v5 = vpack.i.bf16 %v11127_v37, %v11102_v49  ;;  %v8785_v32 = vunpack.i.h.bf16 %v8783_v9  ;;  %v8784_v43 = vunpack.i.l.bf16 %v8783_v9 }
0x14fa   : > { %8807 = vrot.lane.b32.xlu1 %v11131_v5, %s12314_s17  ;;  %v8451_v21 = vpack.c.bf16 %v8785_v32, %v8784_v43 }
0x14fb   : > { %v11135_v41 = vpop.permute.xlu1 %3947  ;;  %v3978_v27 = vpop.permute.xlu0 %3977 }
0x14fc   : > { %v11139_v20 = vpack.i.bf16 %v11135_v41, %v11104_v19  ;;  %8449 = vmatpush3.bf16.xpose.msk.msra.mxu0 %vm9885_vm14, %v8447_v16 }
0x14fd   : > { %8450 = vmatprep.subr.bf16.mxu0 %v12306_v0 }
0x14fe   : > { %8812 = vrot.lane.b32.xlu0 %v11139_v20, %s12314_s17 }
0x14ff   : > { %v11146_v31 = vpop.permute.xlu1 %3961 }
0x1500   : > { %v11150_v7 = vpack.i.bf16 %v11146_v31, %v11106_v33 }
0x1502   : > { %4261 = vrot.lane.b32.xlu0 %v11108_v23, %s12314_s17  ;;  %8817 = vrot.lane.b32.xlu1 %v11150_v7, %s12314_s17 }
0x1503   : > { %v11158_v3 = vpop.permute.xlu1 %3963 }
0x1504   : > { %8453 = vmatpush3.bf16.xpose.msk.msra.mxu0 %vm9885_vm14, %v8451_v21 }
0x1505   : > { %7856 = vmatprep.subr.mxu0 %v12305_v54 }
0x1506   : > { %8822 = vrot.lane.b32.xlu0 %v11001_v34, %s12316_s30  ;;  %4403 = vrot.lane.b32.xlu1 %v11158_v3, %s12314_s17  ;;  %s448_s17 = sand.u32 1, %s9272_s26  }
0x1507   : > { %s6629_s15 = sshll.u32 %s448_s17, 5  ;;  %s12209_s23 = scalar_lea.sflag [#allocation3], %s448_s17 }
0x150a   : > { %8837 = vrot.lane.b32.xlu0 %v8776_v51, %s12316_s30  ;;  %8827 = vrot.lane.b32.xlu1 %v8766_v62, %s12316_s30 }
0x150c   : > { %7857 = vmatpush3.xpose.msk.msra.mxu0 %vm560_vm5, %v3978_v27 }
0x150d   : > { %8466 = vmatprep.subr.bf16.mxu0 %v12306_v0 }
0x150e   : > { %4853 = vrot.lane.b32.xlu0 %v11041_v25, %s12316_s30  ;;  %8832 = vrot.lane.b32.xlu1 %v11013_v60, %s12316_s30 }
0x150f   : > { %7859 = vmatmul.mubr.msk.f32.vlgmr.msra.gmra.mrb[96].mxu0 %vm560_vm5, %v10991_v17 }
0x1510   : > { %7861 = vmatprep.mubr.msk.f32.mxu0 %vm9288_vm10, %v12305_v54 }
0x1512   : > { %8852 = vrot.lane.b32.xlu0 %v8791_v53, %s12316_s30  ;;  %8842 = vrot.lane.b32.xlu1 %v11027_v2, %s12316_s30 }
0x1513   : > { %7862 = vmatmul.mubr.msk.f32.gmra.mrb[98].mxu0 %vm560_vm5, %v10995_v24 }
0x1514   : > { %7864 = vmatprep.mubr.msk.f32.mxu0 %vm9288_vm10, %v12305_v54 }
0x1516   : > { %8847 = vrot.lane.b32.xlu1 %v11087_v56, %s12316_s30 }
0x1517   : > { %7865 = vmatmul.mubr.msk.f32.gmra.mrb[100].mxu0 %vm560_vm5, %v11003_v13 }
0x1518   : > { %7867 = vmatprep.mubr.msk.f32.mxu0 %vm9288_vm10, %v12305_v54 }
0x151a   : > { %8857 = vrot.lane.b32.xlu1 %v8796_v35, %s12316_s30 }
0x151b   : > { %7868 = vmatmul.mubr.msk.f32.gmra.mrb[102].mxu0 %vm560_vm5, %v11007_v18 }
0x151c   : > { %7870 = vmatprep.mubr.msk.f32.mxu0 %vm9288_vm10, %v12305_v54 }
0x151e   : > { %8862 = vrot.lane.b32.xlu1 %v8801_v4, %s12316_s30 }
0x151f   : > { %7871 = vmatmul.mubr.msk.f32.gmra.mrb[104].mxu0 %vm560_vm5, %v11015_v26 }
0x1520   : > { %7873 = vmatprep.mubr.msk.f32.mxu0 %vm9288_vm10, %v12305_v54 }
0x1522   : > { %4995 = vrot.lane.b32.xlu1 %v11110_v39, %s12316_s30 }
0x1523   : > { %7874 = vmatmul.mubr.msk.f32.gmra.mrb[106].mxu0 %vm560_vm5, %v11021_v48 }
0x1524   : > { %7876 = vmatprep.mubr.msk.f32.mxu0 %vm9288_vm10, %v12305_v54 }
0x1527   : > { %7877 = vmatmul.mubr.msk.f32.gmra.mrb[108].mxu0 %vm560_vm5, %v11041_v25 }
0x1528   : > { %7928 = vmatprep.mubr.msk.f32.mxu0 %vm9288_vm10, %v12305_v54 }
0x1532   : > { %v8768_v17 = vpop.permute.xlu1 %8767 }
0x1533   : > { %v8770_v24 = vunpack.i.h.bf16 %v8768_v17  ;;  %v8769_v34 = vunpack.i.l.bf16 %v8768_v17 }
0x1535   : > { %v8455_v13 = vpack.c.bf16 %v8770_v24, %v8769_v34 }
0x1537   : > { %8457 = vmatpush3.bf16.xpose.msk.msra.mxu1 %vm9885_vm14, %v8455_v13 }
0x1538   : > { %8458 = vmatprep.subr.bf16.mxu1 %v12306_v0 }
0x153a   : > { %v8778_v18 = vpop.permute.xlu1 %8777 }
0x153b   : > { %v8780_v60 = vunpack.i.h.bf16 %v8778_v18  ;;  %v8779_v26 = vunpack.i.l.bf16 %v8778_v18 }
0x153d   : > { %v8459_v48 = vpack.c.bf16 %v8780_v60, %v8779_v26 }
0x153f   : > { %8461 = vmatpush3.bf16.xpose.msk.msra.mxu1 %vm9885_vm14, %v8459_v48 }
0x1540   : > { %8462 = vmatprep.subr.bf16.mxu1 %v12306_v0 }
0x1543   : > { %v8788_v2 = vpop.permute.xlu1 %8787 }
0x1544   : > { %v8790_v25 = vunpack.i.h.bf16 %v8788_v2  ;;  %v8789_v62 = vunpack.i.l.bf16 %v8788_v2 }
0x1546   : > { %v8463_v51 = vpack.c.bf16 %v8790_v25, %v8789_v62 }
0x1547   : > { %v8793_v56 = vpop.permute.xlu0 %8792 }
0x1548   : > { %v8795_v53 = vunpack.i.h.bf16 %v8793_v56  ;;  %v8794_v35 = vunpack.i.l.bf16 %v8793_v56  ;;  %8465 = vmatpush3.bf16.xpose.msk.msra.mxu1 %vm9885_vm14, %v8463_v51 }
0x1549   : > { %7891 = vmatprep.subr.mxu1 %v12305_v54 }
0x154a   : > { %v8467_v4 = vpack.c.bf16 %v8795_v53, %v8794_v35 }
0x154c   : > { %8469 = vmatpush3.bf16.xpose.msk.msra.mxu0 %vm9885_vm14, %v8467_v4 }
0x154d   : > { %8470 = vmatprep.subr.bf16.mxu0 %v12306_v0 }
0x155e   : > { %v4120_v6 = vpop.permute.xlu1 %4119 }
0x155f   : > { %7892 = vmatpush3.xpose.msk.msra.mxu1 %vm560_vm5, %v4120_v6 }
0x1560   : > { %8478 = vmatprep.subr.bf16.mxu1 %v12306_v0 }
0x1562   : > { %7894 = vmatmul.mubr.msk.f32.vlgmr.msra.gmra.mrb[110].mxu1 %vm560_vm5, %v11067_v47 }
0x1563   : > { %7896 = vmatprep.mubr.msk.f32.mxu1 %vm9288_vm10, %v12305_v54 }
0x1564   : > { %v8798_v16 = vpop.permute.xlu1 %8797 }
0x1565   : > { %v8800_v9 = vunpack.i.h.bf16 %v8798_v16  ;;  %v8799_v32 = vunpack.i.l.bf16 %v8798_v16 }
0x1566   : > { %7897 = vmatmul.mubr.msk.f32.gmra.mrb[112].mxu1 %vm560_vm5, %v11069_v45 }
0x1567   : > { %v8479_v43 = vpack.c.bf16 %v8800_v9, %v8799_v32  ;;  %7899 = vmatprep.mubr.msk.f32.mxu1 %vm9288_vm10, %v12305_v54 }
0x1568   : > { %v8803_v21 = vpop.permute.xlu0 %8802 }
0x1569   : > { %v8805_v27 = vunpack.i.h.bf16 %v8803_v21  ;;  %v8804_v17 = vunpack.i.l.bf16 %v8803_v21  ;;  %8481 = vmatpush3.bf16.xpose.msk.msra.mxu1 %vm9885_vm14, %v8479_v43 }
0x156a   : > { %7900 = vmatmul.mubr.msk.f32.gmra.mrb[114].mxu1 %vm560_vm5, %v11074_v52  ;;  %8482 = vmatprep.subr.bf16.mxu1 %v12306_v0 }
0x156b   : > { %v8471_v47 = vpack.c.bf16 %v8805_v27, %v8804_v17  ;;  %7902 = vmatprep.mubr.msk.f32.mxu1 %vm9288_vm10, %v12305_v54 }
0x156c   : > { %v8808_v45 = vpop.permute.xlu1 %8807 }
0x156d   : > { %v8810_v24 = vunpack.i.h.bf16 %v8808_v45  ;;  %v8809_v34 = vunpack.i.l.bf16 %v8808_v45  ;;  %8473 = vmatpush3.bf16.xpose.msk.msra.mxu0 %vm9885_vm14, %v8471_v47 }
0x156e   : > { %7903 = vmatmul.mubr.msk.f32.gmra.mrb[116].mxu1 %vm560_vm5, %v11076_v63  ;;  %8474 = vmatprep.subr.bf16.mxu0 %v12306_v0 }
0x156f   : > { %v8483_v13 = vpack.c.bf16 %v8810_v24, %v8809_v34  ;;  %7905 = vmatprep.mubr.msk.f32.mxu1 %vm9288_vm10, %v12305_v54 }
0x1570   : > { %v8813_v52 = vpop.permute.xlu0 %8812 }
0x1571   : > { %v8815_v18 = vunpack.i.h.bf16 %v8813_v52  ;;  %v8814_v60 = vunpack.i.l.bf16 %v8813_v52  ;;  %8485 = vmatpush3.bf16.xpose.msk.msra.mxu1 %vm9885_vm14, %v8483_v13 }
0x1572   : > { %7906 = vmatmul.mubr.msk.f32.gmra.mrb[118].mxu1 %vm560_vm5, %v11081_v55  ;;  %8486 = vmatprep.subr.bf16.mxu1 %v12306_v0 }
0x1573   : > { %v8475_v26 = vpack.c.bf16 %v8815_v18, %v8814_v60  ;;  %7908 = vmatprep.mubr.msk.f32.mxu1 %vm9288_vm10, %v12305_v54  ;;  %v11352_v18 = vld [vmem:[%s12253_s2 + $0x8] sm:$0xff] }
0x1574   : > { %v4262_v63 = vpop.permute.xlu0 %4261  ;;  %v8818_v48 = vpop.permute.xlu1 %8817 }
0x1575   : > { %v8820_v2 = vunpack.i.h.bf16 %v8818_v48  ;;  %v8819_v25 = vunpack.i.l.bf16 %v8818_v48  ;;  %8477 = vmatpush3.bf16.xpose.msk.msra.mxu0 %vm9885_vm14, %v8475_v26 }
0x1576   : > { %7909 = vmatmul.mubr.msk.f32.gmra.mrb[120].mxu1 %vm560_vm5, %v11083_v36  ;;  %7926 = vmatprep.subr.mxu0 %v12305_v54 }
0x1577   : > { %v8487_v62 = vpack.c.bf16 %v8820_v2, %v8819_v25  ;;  %7911 = vmatprep.mubr.msk.f32.mxu1 %vm9288_vm10, %v12305_v54  ;;  %v11362_v2 = vld [vmem:[%s12253_s2 + $0x10] sm:$0xff] }
0x1578   : > { %v8823_v55 = vpop.permute.xlu0 %8822  ;;  %v4404_v51 = vpop.permute.xlu1 %4403 }
0x1579   : > { %8489 = vmatpush3.bf16.xpose.msk.msra.mxu1 %vm9885_vm14, %v8487_v62  ;;  %v8825_v56 = vunpack.i.h.bf16 %v8823_v55  ;;  %v8824_v53 = vunpack.i.l.bf16 %v8823_v55 }
0x157a   : > { %7912 = vmatmul.mubr.msk.f32.gmra.mrb[122].mxu1 %vm560_vm5, %v11110_v39  ;;  %7961 = vmatprep.subr.mxu1 %v12305_v54 }
0x157b   : > { %7963 = vmatprep.mubr.msk.f32.mxu1 %vm9288_vm10, %v12305_v54  ;;  %v8491_v35 = vpack.c.bf16 %v8825_v56, %v8824_v53  ;;  %v11372_v56 = vld [vmem:[%s12253_s2 + $0x18] sm:$0xff] }
0x157c   : > { %v8828_v36 = vpop.permute.xlu1 %8827  ;;  %v8838_v22 = vpop.permute.xlu0 %8837 }
0x157d   : > { %7927 = vmatpush3.xpose.msk.msra.mxu0 %vm560_vm5, %v4262_v63  ;;  %v8830_v4 = vunpack.i.h.bf16 %v8828_v36  ;;  %v8829_v6 = vunpack.i.l.bf16 %v8828_v36  ;;  %v8840_v32 = vunpack.i.h.bf16 %v8838_v22  ;;  %v8839_v43 = vunpack.i.l.bf16 %v8838_v22 }
0x157e   : > { %8490 = vmatprep.subr.bf16.mxu0 %v12306_v0 }
0x157f   : > { %v8500_v21 = vpack.c.bf16 %v8830_v4, %v8829_v6  ;;  %v8503_v45 = vpack.c.bf16 %v8840_v32, %v8839_v43  ;;  %v11382_v6 = vld [vmem:[%s12253_s2 + $0x20] sm:$0xff]  ;;  %v11392_v32 = vld [vmem:[%s12253_s2 + $0x28] sm:$0xff] }
0x1580   : > { %7929 = vmatmul.mubr.msk.f32.vlgmr.msra.gmra.mrb[110].mxu0 %vm560_vm5, %v11093_v61  ;;  %v8833_v39 = vpop.permute.xlu1 %8832 }
0x1581   : > { %v8835_v16 = vunpack.i.h.bf16 %v8833_v39  ;;  %v8834_v9 = vunpack.i.l.bf16 %v8833_v39  ;;  %7962 = vmatpush3.xpose.msk.msra.mxu1 %vm560_vm5, %v4404_v51  ;;  %8492 = vmatpush3.bf16.msra.mxu0 %v8491_v35 }
0x1582   : > { %7931 = vmatprep.mubr.msk.f32.mxu0 %vm9288_vm10, %v12305_v54  ;;  %8493 = vmatprep.subr.bf16.mxu0 %v12306_v0 }
0x1583   : > { %v8494_v27 = vpack.c.bf16 %v8835_v16, %v8834_v9  ;;  %8499 = vmatprep.subr.bf16.mxu1 %v12306_v0 }
0x1584   : > { %7932 = vmatmul.mubr.msk.f32.gmra.mrb[112].mxu0 %vm560_vm5, %v11091_v38  ;;  %v8843_v61 = vpop.permute.xlu1 %8842  ;;  %7964 = vmatmul.mubr.msk.f32.vlgmr.msra.gmra.mrb[124].mxu1 %vm560_vm5, %v11098_v14 }
0x1585   : > { %v8845_v17 = vunpack.i.h.bf16 %v8843_v61  ;;  %v8844_v47 = vunpack.i.l.bf16 %v8843_v61  ;;  %8495 = vmatpush3.bf16.msra.mxu0 %v8494_v27  ;;  %8501 = vmatpush3.bf16.msra.mxu1 %v8500_v21 }
0x1586   : > { %7934 = vmatprep.mubr.msk.f32.mxu0 %vm9288_vm10, %v12305_v54  ;;  %7966 = vmatprep.mubr.msk.f32.mxu1 %vm9288_vm10, %v12305_v54 }
0x1587   : > { %v8497_v24 = vpack.c.bf16 %v8845_v17, %v8844_v47  ;;  %8496 = vmatprep.subr.bf16.mxu0 %v12306_v0  ;;  %8502 = vmatprep.subr.bf16.mxu1 %v12306_v0  ;;  %v11402_v17 = vld [vmem:[%s12253_s2 + $0x30] sm:$0xff] }
0x1588   : > { %7935 = vmatmul.mubr.msk.f32.gmra.mrb[114].mxu0 %vm560_vm5, %v11100_v29  ;;  %v8848_v38 = vpop.permute.xlu1 %8847  ;;  %7967 = vmatmul.mubr.msk.f32.gmra.mrb[126].mxu1 %vm560_vm5, %v11114_v40  ;;  %v4854_v29 = vpop.permute.xlu0 %4853 }
0x1589   : > { %v8850_v14 = vunpack.i.h.bf16 %v8848_v38  ;;  %v8849_v34 = vunpack.i.l.bf16 %v8848_v38  ;;  %8498 = vmatpush3.bf16.msra.mxu0 %v8497_v24  ;;  %8504 = vmatpush3.bf16.msra.mxu1 %v8503_v45 }
0x158a   : > { %7937 = vmatprep.mubr.msk.f32.mxu0 %vm9288_vm10, %v12305_v54  ;;  %7969 = vmatprep.mubr.msk.f32.mxu1 %vm9288_vm10, %v12305_v54 }
0x158b   : > { %v8506_v13 = vpack.c.bf16 %v8850_v14, %v8849_v34  ;;  %7996 = vmatprep.subr.mxu0 %v12305_v54  ;;  %8505 = vmatprep.subr.bf16.mxu1 %v12306_v0 }
0x158c   : > { %7938 = vmatmul.mubr.msk.f32.gmra.mrb[116].mxu0 %vm560_vm5, %v11119_v58  ;;  %v11298_v40 = vpop.permute.xlu1 %8857  ;;  %7970 = vmatmul.mubr.msk.f32.gmra.mrb[128].mxu1 %vm560_vm5, %v11102_v49 }
0x158d   : > { %7997 = vmatpush3.msra.mxu0 %v4854_v29  ;;  %8507 = vmatpush3.bf16.msra.mxu1 %v8506_v13 }
0x158e   : > { %7940 = vmatprep.mubr.msk.f32.mxu0 %vm9288_vm10, %v12305_v54  ;;  %7972 = vmatprep.mubr.msk.f32.mxu1 %vm9288_vm10, %v12305_v54 }
0x158f   : > { %8031 = vmatprep.subr.mxu1 %v12305_v54  ;;  %8508 = vmatprep.subr.bf16.mxu0 %v12306_v0 }
0x1590   : > { %7941 = vmatmul.mubr.msk.f32.gmra.mrb[118].mxu0 %vm560_vm5, %v11104_v19  ;;  %v11310_v58 = vpop.permute.xlu1 %8862  ;;  %7973 = vmatmul.mubr.msk.f32.gmra.mrb[130].mxu1 %vm560_vm5, %v11127_v37 }
0x1591   : > { %7943 = vmatprep.mubr.msk.f32.mxu0 %vm9288_vm10, %v12305_v54  ;;  %7975 = vmatprep.mubr.msk.f32.mxu1 %vm9288_vm10, %v12305_v54 }
0x1594   : > { %7944 = vmatmul.mubr.msk.f32.gmra.mrb[120].mxu0 %vm560_vm5, %v11135_v41  ;;  %v4996_v49 = vpop.permute.xlu1 %4995  ;;  %7976 = vmatmul.mubr.msk.f32.gmra.mrb[132].mxu1 %vm560_vm5, %v11106_v33  ;;  %v11342_v33 = vld [vmem:[%s12253_s2] sm:$0xff] }
0x1595   : > { %8032 = vmatpush3.msra.mxu1 %v4996_v49  ;;  %7946 = vmatprep.mubr.msk.f32.mxu0 %vm9288_vm10, %v12305_v54 }
0x1596   : > { %7978 = vmatprep.mubr.msk.f32.mxu1 %vm9288_vm10, %v12305_v54  ;;  %8517 = vmatprep.subr.bf16.mxu1 %v12306_v0 }
0x1598   : > { %7947 = vmatmul.mubr.msk.f32.gmra.mrb[122].mxu0 %vm560_vm5, %v11108_v23  ;;  %7979 = vmatmul.mubr.msk.f32.gmra.mrb[134].mxu1 %vm560_vm5, %v11146_v31 }
0x1599   : > { %7981 = vmatprep.mubr.msk.f32.mxu1 %vm9288_vm10, %v12305_v54  ;;  %7998 = vmatprep.mubr.msk.f32.mxu0 %vm9288_vm10, %v12305_v54 }
0x159c   : > { %7982 = vmatmul.mubr.msk.f32.gmra.mrb[136].mxu1 %vm560_vm5, %v11158_v3 }
0x159d   : > { %8033 = vmatprep.mubr.msk.f32.mxu1 %vm9288_vm10, %v12305_v54 }
0x15e2   : > { %v4073_v19 = vpop.f32.mrb[96].mxu0 }
0x15e3   : > { %v11345_v37 = vadd.f32 %v11342_v33, %v4073_v19  ;;  %v7860_v41 = vpop.f32.mrb[97].mxu0 }
0x15e5   : > { %v4533_v31 = vsel %vm2140_vm15, %v11345_v37, -inf }
0x15e6   : > { %v4078_v52 = vpop.f32.mrb[98].mxu0  ;;  %4534 = vmax.xlane.f32.xlu0 %v4533_v31 }
0x15e7   : > { %v11355_v60 = vadd.f32 %v11352_v18, %v4078_v52  ;;  %v7863_v26 = vpop.f32.mrb[99].mxu0 }
0x15e9   : > { %v4536_v63 = vsel %vm2140_vm15, %v11355_v60, -inf }
0x15ea   : > { %v4083_v48 = vpop.f32.mrb[100].mxu0  ;;  %4537 = vmax.xlane.f32.xlu0 %v4536_v63 }
0x15eb   : > { %v11365_v25 = vadd.f32 %v11362_v2, %v4083_v48  ;;  %v7866_v62 = vpop.f32.mrb[101].mxu0 }
0x15ed   : > { %v4539_v55 = vsel %vm2140_vm15, %v11365_v25, -inf }
0x15ee   : > { %v4088_v51 = vpop.f32.mrb[102].mxu0  ;;  %4540 = vmax.xlane.f32.xlu1 %v4539_v55 }
0x15ef   : > { %v11375_v53 = vadd.f32 %v11372_v56, %v4088_v51  ;;  %v7869_v36 = vpop.f32.mrb[103].mxu0 }
0x15f1   : > { %v4542_v35 = vsel %vm2140_vm15, %v11375_v53, -inf }
0x15f2   : > { %v4093_v4 = vpop.f32.mrb[104].mxu0  ;;  %4543 = vmax.xlane.f32.xlu1 %v4542_v35 }
0x15f3   : > { %v11385_v22 = vadd.f32 %v11382_v6, %v4093_v4  ;;  %v7872_v39 = vpop.f32.mrb[105].mxu0 }
0x15f5   : > { %v4545_v16 = vsel %vm2140_vm15, %v11385_v22, -inf }
0x15f6   : > { %v4098_v9 = vpop.f32.mrb[106].mxu0  ;;  %4546 = vmax.xlane.f32.xlu1 %v4545_v16 }
0x15f7   : > { %v11395_v43 = vadd.f32 %v11392_v32, %v4098_v9  ;;  %v7875_v21 = vpop.f32.mrb[107].mxu0 }
0x15f9   : > { %v4548_v27 = vsel %vm2140_vm15, %v11395_v43, -inf }
0x15fa   : > { %v4103_v61 = vpop.f32.mrb[108].mxu0  ;;  %4549 = vmax.xlane.f32.xlu1 %v4548_v27 }
0x15fb   : > { %v11405_v47 = vadd.f32 %v11402_v17, %v4103_v61  ;;  %v7878_v45 = vpop.f32.mrb[109].mxu0 }
0x15fd   : > { %v4551_v24 = vsel %vm2140_vm15, %v11405_v47, -inf }
0x15fe   : > { %4552 = vmax.xlane.f32.xlu1 %v4551_v24 }
0x1635   : > { %v4215_v38 = vpop.f32.mrb[110].mxu1 }
0x1636   : > { %v11410_v14 = vadd.f32 %v11342_v33, %v4215_v38  ;;  %v7895_v34 = vpop.f32.mrb[111].mxu1 }
0x1638   : > { %v4554_v13 = vsel %vm2140_vm15, %v11410_v14, -inf }
0x1639   : > { %4555 = vmax.xlane.f32.xlu1 %v4554_v13  ;;  %v4220_v29 = vpop.f32.mrb[112].mxu1 }
0x163a   : > { %v11415_v49 = vadd.f32 %v11352_v18, %v4220_v29  ;;  %v7898_v19 = vpop.f32.mrb[113].mxu1 }
0x163c   : > { %v4557_v41 = vsel %vm2140_vm15, %v11415_v49, -inf }
0x163d   : > { %4558 = vmax.xlane.f32.xlu0 %v4557_v41  ;;  %v4225_v31 = vpop.f32.mrb[114].mxu1 }
0x163e   : > { %v11420_v52 = vadd.f32 %v11362_v2, %v4225_v31  ;;  %v7901_v26 = vpop.f32.mrb[115].mxu1 }
0x1640   : > { %v4560_v63 = vsel %vm2140_vm15, %v11420_v52, -inf }
0x1641   : > { %4561 = vmax.xlane.f32.xlu0 %v4560_v63  ;;  %v4230_v48 = vpop.f32.mrb[116].mxu1 }
0x1642   : > { %v11425_v62 = vadd.f32 %v11372_v56, %v4230_v48  ;;  %v7904_v55 = vpop.f32.mrb[117].mxu1 }
0x1644   : > { %v4563_v51 = vsel %vm2140_vm15, %v11425_v62, -inf }
0x1645   : > { %4564 = vmax.xlane.f32.xlu0 %v4563_v51  ;;  %v4235_v36 = vpop.f32.mrb[118].mxu1 }
0x1646   : > { %v11430_v35 = vadd.f32 %v11382_v6, %v4235_v36  ;;  %v7907_v4 = vpop.f32.mrb[119].mxu1 }
0x1648   : > { %v4566_v39 = vsel %vm2140_vm15, %v11430_v35, -inf }
0x1649   : > { %4567 = vmax.xlane.f32.xlu0 %v4566_v39  ;;  %v4240_v16 = vpop.f32.mrb[120].mxu1 }
0x164a   : > { %v11435_v9 = vadd.f32 %v11392_v32, %v4240_v16  ;;  %v7910_v21 = vpop.f32.mrb[121].mxu1 }
0x164c   : > { %v4569_v27 = vsel %vm2140_vm15, %v11435_v9, -inf }
0x164d   : > { %4570 = vmax.xlane.f32.xlu0 %v4569_v27  ;;  %v4245_v61 = vpop.f32.mrb[122].mxu1 }
0x164e   : > { %v11440_v45 = vadd.f32 %v11402_v17, %v4245_v61  ;;  %v7913_v24 = vpop.f32.mrb[123].mxu1 }
0x1650   : > { %v4572_v38 = vsel %vm2140_vm15, %v11440_v45, -inf }
0x1651   : > { %4573 = vmax.xlane.f32.xlu0 %v4572_v38 }
0x1653   : > { %v4357_v34 = vpop.f32.mrb[110].mxu0 }
0x1654   : > { %v11445_v13 = vadd.f32 %v11342_v33, %v4357_v34  ;;  %v7930_v29 = vpop.f32.mrb[111].mxu0 }
0x1656   : > { %v4575_v19 = vsel %vm2140_vm15, %v11445_v13, -inf }
0x1657   : > { %v4362_v41 = vpop.f32.mrb[112].mxu0  ;;  %4576 = vmax.xlane.f32.xlu1 %v4575_v19  ;;  %v4499_v31 = vpop.f32.mrb[124].mxu1 }
0x1658   : > { %v11450_v26 = vadd.f32 %v11352_v18, %v4362_v41  ;;  %v11453_v63 = vadd.f32 %v11342_v33, %v4499_v31  ;;  %v7933_v48 = vpop.f32.mrb[113].mxu0  ;;  %v7965_v55 = vpop.f32.mrb[125].mxu1 }
0x165a   : > { %v4578_v51 = vsel %vm2140_vm15, %v11450_v26, -inf  ;;  %v4596_v36 = vsel %vm2140_vm15, %v11453_v63, -inf }
0x165b   : > { %v4367_v4 = vpop.f32.mrb[114].mxu0  ;;  %4579 = vmax.xlane.f32.xlu1 %v4578_v51  ;;  %4597 = vmax.xlane.f32.xlu0 %v4596_v36  ;;  %v4504_v39 = vpop.f32.mrb[126].mxu1 }
0x165c   : > { %v11460_v16 = vadd.f32 %v11362_v2, %v4367_v4  ;;  %v11463_v21 = vadd.f32 %v11352_v18, %v4504_v39  ;;  %v7936_v33 = vpop.f32.mrb[115].mxu0  ;;  %v7968_v27 = vpop.f32.mrb[127].mxu1 }
0x165e   : > { %v4581_v61 = vsel %vm2140_vm15, %v11460_v16, -inf  ;;  %v4599_v24 = vsel %vm2140_vm15, %v11463_v21, -inf }
0x165f   : > { %v4372_v38 = vpop.f32.mrb[116].mxu0  ;;  %4582 = vmax.xlane.f32.xlu1 %v4581_v61  ;;  %4600 = vmax.xlane.f32.xlu0 %v4599_v24  ;;  %v4509_v34 = vpop.f32.mrb[128].mxu1 }
0x1660   : > { %v11470_v29 = vadd.f32 %v11372_v56, %v4372_v38  ;;  %v11473_v19 = vadd.f32 %v11362_v2, %v4509_v34  ;;  %v7939_v18 = vpop.f32.mrb[117].mxu0  ;;  %v7971_v41 = vpop.f32.mrb[129].mxu1 }
0x1662   : > { %v4584_v31 = vsel %vm2140_vm15, %v11470_v29, -inf  ;;  %v4602_v48 = vsel %vm2140_vm15, %v11473_v19, -inf }
0x1663   : > { %v4377_v55 = vpop.f32.mrb[118].mxu0  ;;  %4585 = vmax.xlane.f32.xlu1 %v4584_v31  ;;  %4603 = vmax.xlane.f32.xlu0 %v4602_v48  ;;  %v4514_v51 = vpop.f32.mrb[130].mxu1 }
0x1664   : > { %v11480_v36 = vadd.f32 %v11382_v6, %v4377_v55  ;;  %v11483_v4 = vadd.f32 %v11372_v56, %v4514_v51  ;;  %v7942_v2 = vpop.f32.mrb[119].mxu0  ;;  %v7974_v39 = vpop.f32.mrb[131].mxu1 }
0x1666   : > { %v4587_v33 = vsel %vm2140_vm15, %v11480_v36, -inf  ;;  %v4605_v27 = vsel %vm2140_vm15, %v11483_v4, -inf }
0x1667   : > { %v4382_v61 = vpop.f32.mrb[120].mxu0  ;;  %4588 = vmax.xlane.f32.xlu1 %v4587_v33  ;;  %4606 = vmax.xlane.f32.xlu0 %v4605_v27  ;;  %v4519_v24 = vpop.f32.mrb[132].mxu1 }
0x1668   : > { %v11490_v38 = vadd.f32 %v11392_v32, %v4382_v61  ;;  %v11493_v34 = vadd.f32 %v11382_v6, %v4519_v24  ;;  %v7945_v56 = vpop.f32.mrb[121].mxu0  ;;  %v7977_v18 = vpop.f32.mrb[133].mxu1 }
0x1669   : > { %v11509_v61 = vpop.permute.xlu0 %8852 }
0x166a   : > { %v4590_v41 = vsel %vm2140_vm15, %v11490_v38, -inf  ;;  %v4608_v31 = vsel %vm2140_vm15, %v11493_v34, -inf }
0x166b   : > { %v4387_v48 = vpop.f32.mrb[122].mxu0  ;;  %4591 = vmax.xlane.f32.xlu1 %v4590_v41  ;;  %4609 = vmax.xlane.f32.xlu0 %v4608_v31  ;;  %v4524_v55 = vpop.f32.mrb[134].mxu1 }
0x166c   : > { %v11500_v51 = vadd.f32 %v11402_v17, %v4387_v48  ;;  %v11503_v2 = vadd.f32 %v11392_v32, %v4524_v55  ;;  %v7948_v6 = vpop.f32.mrb[123].mxu0  ;;  %v7980_v39 = vpop.f32.mrb[135].mxu1 }
0x166e   : > { %v4593_v33 = vsel %vm2140_vm15, %v11500_v51, -inf  ;;  %v4611_v27 = vsel %vm2140_vm15, %v11503_v2, -inf }
0x166f   : > { %4594 = vmax.xlane.f32.xlu1 %v4593_v33  ;;  %4612 = vmax.xlane.f32.xlu0 %v4611_v27  ;;  %v4529_v24 = vpop.f32.mrb[136].mxu1 }
0x1670   : > { %v11512_v56 = vadd.f32 %v11402_v17, %v4529_v24  ;;  %v7983_v18 = vpop.f32.mrb[137].mxu1 }
0x1672   : > { %v4614_v32 = vsel %vm2140_vm15, %v11512_v56, -inf }
0x1673   : > { %v4535_v41 = vpop.xlane.xlu0 %4534  ;;  %4615 = vmax.xlane.f32.xlu0 %v4614_v32 }
0x1674   : > { %v4617_v31 = vsub.f32 %v11345_v37, %v4535_v41 }
0x1676   : > { %v4645_v48 = vmul.f32 1.442695, %v4617_v31 }
0x1677   : > { %v4538_v55 = vpop.xlane.xlu0 %4537 }
0x1678   : > { %9055 = vpow2.f32 %v4645_v48  ;;  %v4618_v6 = vsub.f32 %v11355_v60, %v4538_v55 }
0x167a   : > { %v4647_v39 = vmul.f32 1.442695, %v4618_v6 }
0x167b   : > { %v4541_v33 = vpop.xlane.xlu1 %4540 }
0x167c   : > { %9057 = vpow2.f32 %v4647_v39  ;;  %v4619_v27 = vsub.f32 %v11365_v25, %v4541_v33 }
0x167e   : > { %v4649_v17 = vmul.f32 1.442695, %v4619_v27 }
0x167f   : > { %v4544_v60 = vpop.xlane.xlu1 %4543 }
0x1680   : > { %9059 = vpow2.f32 %v4649_v17  ;;  %v4620_v33 = vsub.f32 %v11375_v53, %v4544_v60 }
0x1682   : > { %v11519_v24 = vpop.eup %9055  ;;  %v4651_v27 = vmul.f32 1.442695, %v4620_v33 }
0x1683   : > { %v4701_v18 = vsel %vm2140_vm15, %v11519_v24, 0.0  ;;  %v4547_v31 = vpop.xlane.xlu1 %4546 }
0x1684   : > { %4702 = vadd.xlane.f32.xlu1 %v4701_v18  ;;  %v4621_v48 = vsub.f32 %v11385_v22, %v4547_v31 }
0x1686   : > { %v11523_v32 = vpop.eup %9057  ;;  %v4653_v55 = vmul.f32 1.442695, %v4621_v48 }
0x1687   : > { %v4704_v37 = vsel %vm2140_vm15, %v11523_v32, 0.0  ;;  %v4550_v39 = vpop.xlane.xlu1 %4549 }
0x1688   : > { %4705 = vadd.xlane.f32.xlu1 %v4704_v37  ;;  %9061 = vpow2.f32 %v4653_v55  ;;  %v4622_v22 = vsub.f32 %v11395_v43, %v4550_v39 }
0x1689   : > { %8867 = vrot.lane.b32.xlu0 %v11131_v5, %s12316_s30  ;;  %9063 = vpow2.f32 %v4651_v27 }
0x168a   : > { %v11529_v41 = vpop.eup %9059  ;;  %v4655_v18 = vmul.f32 1.442695, %v4622_v22 }
0x168b   : > { %v4707_v25 = vsel %vm2140_vm15, %v11529_v41, 0.0  ;;  %v4553_v17 = vpop.xlane.xlu1 %4552 }
0x168c   : > { %4708 = vadd.xlane.f32.xlu1 %v4707_v25  ;;  %9065 = vpow2.f32 %v4655_v18 }
0x1692   : > { %v11538_v6 = vpop.eup %9061 }
0x1693   : > { %v4713_v5 = vsel %vm2140_vm15, %v11538_v6, 0.0 }
0x169d   : > { %8872 = vrot.lane.b32.xlu1 %v11139_v20, %s12316_s30  ;;  %v4623_v20 = vsub.f32 %v11405_v47, %v4553_v17 }
0x169f   : > { %v4657_v37 = vmul.f32 1.442695, %v4623_v20 }
0x16a1   : > { %8877 = vrot.lane.b32.xlu1 %v11150_v7, %s12316_s30  ;;  %9067 = vpow2.f32 %v4657_v37  ;;  %v11545_v7 = vpop.eup %9063 }
0x16a2   : > { %v4710_v25 = vsel %vm2140_vm15, %v11545_v7, 0.0  ;;  %v11549_v31 = vpop.eup %9065 }
0x16a3   : > { %v4716_v43 = vsel %vm2140_vm15, %v11549_v31, 0.0 }
0x16a8   : > { %4714 = vadd.xlane.f32.xlu0 %v4713_v5 }
0x16ab   : > { %v11554_v48 = vpop.eup %9067 }
0x16ac   : > { %v4719_v5 = vsel %vm2140_vm15, %v11554_v48, 0.0 }
0x16c5   : > { %4711 = vadd.xlane.f32.xlu1 %v4710_v25 }
0x16c6   : > { %v4556_v53 = vpop.xlane.xlu1 %4555 }
0x16c7   : > { %v4624_v60 = vsub.f32 %v11410_v14, %v4556_v53 }
0x16c9   : > { %v4659_v47 = vmul.f32 1.442695, %v4624_v60  ;;  %4717 = vadd.xlane.f32.xlu1 %v4716_v43 }
0x16ca   : > { %v4559_v55 = vpop.xlane.xlu0 %4558 }
0x16cb   : > { %9069 = vpow2.f32 %v4659_v47  ;;  %v4625_v53 = vsub.f32 %v11415_v49, %v4559_v55 }
0x16cd   : > { %4720 = vadd.xlane.f32.xlu1 %v4719_v5  ;;  %v4661_v47 = vmul.f32 1.442695, %v4625_v53 }
0x16ce   : > { %v4562_v39 = vpop.xlane.xlu0 %4561 }
0x16d2   : > { %v4565_v33 = vpop.xlane.xlu0 %4564 }
0x16d3   : > { %v4627_v27 = vsub.f32 %v11425_v62, %v4565_v33 }
0x16d5   : > { %v11559_v22 = vpop.eup %9069  ;;  %v4665_v14 = vmul.f32 1.442695, %v4627_v27 }
0x16d6   : > { %v4722_v17 = vsel %vm2140_vm15, %v11559_v22, 0.0  ;;  %v4568_v18 = vpop.xlane.xlu0 %4567 }
0x16d7   : > { %9071 = vpow2.f32 %v4665_v14  ;;  %4723 = vadd.xlane.f32.xlu0 %v4722_v17  ;;  %v4626_v17 = vsub.f32 %v11420_v52, %v4562_v39  ;;  %v4628_v49 = vsub.f32 %v11430_v35, %v4568_v18 }
0x16d9   : > { %v4663_v55 = vmul.f32 1.442695, %v4626_v17 }
0x16da   : > { %v4571_v20 = vpop.xlane.xlu0 %4570 }
0x16de   : > { %v4574_v60 = vpop.xlane.xlu0 %4573 }
0x16e1   : > { %v11563_v37 = vpop.eup %9071 }
0x16e2   : > { %v4731_v25 = vsel %vm2140_vm15, %v11563_v37, 0.0 }
0x16e3   : > { %4732 = vadd.xlane.f32.xlu1 %v4731_v25 }
0x16e4   : > { %v4577_v62 = vpop.xlane.xlu1 %4576 }
0x16e5   : > { %v4631_v43 = vsub.f32 %v11445_v13, %v4577_v62 }
0x16e7   : > { %v4673_v5 = vmul.f32 1.442695, %v4631_v43  ;;  %v4667_v43 = vmul.f32 1.442695, %v4628_v49 }
0x16e8   : > { %v4580_v33 = vpop.xlane.xlu1 %4579  ;;  %v4598_v27 = vpop.xlane.xlu0 %4597 }
0x16e9   : > { %9073 = vpow2.f32 %v4673_v5  ;;  %v4632_v14 = vsub.f32 %v11450_v26, %v4580_v33 }
0x16ea   : > { %9075 = vpow2.f32 %v4661_v47 }
0x16eb   : > { %v4675_v42 = vmul.f32 1.442695, %v4632_v14 }
0x16ec   : > { %v4583_v12 = vpop.xlane.xlu1 %4582  ;;  %v4601_v44 = vpop.xlane.xlu0 %4600 }
0x16ed   : > { %9077 = vpow2.f32 %v4675_v42  ;;  %v4633_v25 = vsub.f32 %v11460_v16, %v4583_v12  ;;  %v4629_v42 = vsub.f32 %v11435_v9, %v4571_v20 }
0x16ee   : > { %9079 = vpow2.f32 %v4663_v55  ;;  %v4630_v55 = vsub.f32 %v11440_v45, %v4574_v60 }
0x16ef   : > { %v4677_v26 = vmul.f32 1.442695, %v4633_v25  ;;  %v4669_v25 = vmul.f32 1.442695, %v4629_v42 }
0x16f0   : > { %v4586_v13 = vpop.xlane.xlu1 %4585  ;;  %v11573_v53 = vpop.xlane.xlu0 %4603 }
0x16f1   : > { %v4634_v62 = vsub.f32 %v11470_v29, %v4586_v13 }
0x16f3   : > { %v11576_v5 = vpop.eup %9073  ;;  %v4679_v52 = vmul.f32 1.442695, %v4634_v62 }
0x16f4   : > { %v4589_v39 = vpop.xlane.xlu1 %4588  ;;  %v4607_v47 = vpop.xlane.xlu0 %4606  ;;  %v4743_v35 = vsel %vm2140_vm15, %v11576_v5, 0.0 }
0x16f5   : > { %v11580_v18 = vpop.eup %9075  ;;  %9081 = vpow2.f32 %v4679_v52  ;;  %v4635_v12 = vsub.f32 %v11480_v36, %v4589_v39  ;;  %4744 = vadd.xlane.f32.xlu0 %v4743_v35  ;;  %v4638_v36 = vsub.f32 %v11453_v63, %v4598_v27  ;;  %v4641_v60 = vsub.f32 %v11483_v4, %v4607_v47 }
0x16f6   : > { %9083 = vpow2.f32 %v4667_v43  ;;  %v4725_v14 = vsel %vm2140_vm15, %v11580_v18, 0.0 }
0x16f7   : > { %9085 = vpow2.f32 %v4677_v26  ;;  %v4681_v16 = vmul.f32 1.442695, %v4635_v12  ;;  %v11586_v17 = vpop.eup %9077  ;;  %v4671_v26 = vmul.f32 1.442695, %v4630_v55  ;;  %v4687_v63 = vmul.f32 1.442695, %v4638_v36 }
0x16f8   : > { %v4592_v29 = vpop.xlane.xlu1 %4591  ;;  %v4610_v33 = vpop.xlane.xlu0 %4609  ;;  %v4746_v20 = vsel %vm2140_vm15, %v11586_v17, 0.0  ;;  %v4693_v4 = vmul.f32 1.442695, %v4641_v60 }
0x16f9   : > { %v4636_v49 = vsub.f32 %v11490_v38, %v4592_v29  ;;  %4726 = vadd.xlane.f32.xlu0 %v4725_v14  ;;  %9087 = vpow2.f32 %v4681_v16  ;;  %v11593_v62 = vpop.eup %9079  ;;  %v4639_v38 = vsub.f32 %v11463_v21, %v4601_v44  ;;  %v4640_v21 = vsub.f32 %v11473_v19, %v11573_v53 }
0x16fa   : > { %v4642_v47 = vsub.f32 %v11493_v34, %v4610_v33 }
0x16fb   : > { %v4683_v13 = vmul.f32 1.442695, %v4636_v49  ;;  %v4689_v44 = vmul.f32 1.442695, %v4639_v38  ;;  %v4691_v49 = vmul.f32 1.442695, %v4640_v21 }
0x16fc   : > { %v4595_v9 = vpop.xlane.xlu1 %4594  ;;  %v4613_v52 = vpop.xlane.xlu0 %4612  ;;  %v4695_v53 = vmul.f32 1.442695, %v4642_v47 }
0x16fd   : > { %9089 = vpow2.f32 %v4683_v13  ;;  %v4637_v43 = vsub.f32 %v11500_v51, %v4595_v9  ;;  %4747 = vadd.xlane.f32.xlu0 %v4746_v20  ;;  %v4728_v51 = vsel %vm2140_vm15, %v11593_v62, 0.0  ;;  %v4643_v55 = vsub.f32 %v11503_v2, %v4613_v52 }
0x16fe   : > { %9091 = vpow2.f32 %v4669_v25 }
0x16ff   : > { %v11597_v45 = vpop.eup %9081  ;;  %v4685_v27 = vmul.f32 1.442695, %v4637_v43  ;;  %v4697_v13 = vmul.f32 1.442695, %v4643_v55  ;;  %v8855_v55 = vunpack.i.h.bf16 %v11509_v61 }
0x1700   : > { %v11600_v39 = vpop.eup %9083  ;;  %v4752_v35 = vsel %vm2140_vm15, %v11597_v45, 0.0  ;;  %v4616_v42 = vpop.xlane.xlu0 %4615 }
0x1701   : > { %v11606_v12 = vpop.eup %9085  ;;  %9093 = vpow2.f32 %v4685_v27  ;;  %4753 = vadd.xlane.f32.xlu1 %v4752_v35  ;;  %4729 = vadd.xlane.f32.xlu0 %v4728_v51  ;;  %v4734_v16 = vsel %vm2140_vm15, %v11600_v39, 0.0  ;;  %v4644_v34 = vsub.f32 %v11512_v56, %v4616_v42 }
0x1702   : > { %9095 = vpow2.f32 %v4671_v26  ;;  %v4749_v29 = vsel %vm2140_vm15, %v11606_v12, 0.0 }
0x1703   : > { %9097 = vpow2.f32 %v4687_v63  ;;  %v11615_v14 = vpop.eup %9087  ;;  %v4699_v2 = vmul.f32 1.442695, %v4644_v34 }
0x1704   : > { %9099 = vpow2.f32 %v4689_v44  ;;  %v4755_v25 = vsel %vm2140_vm15, %v11615_v14, 0.0 }
0x1705   : > { %4735 = vadd.xlane.f32.xlu1 %v4734_v16  ;;  %4750 = vadd.xlane.f32.xlu0 %v4749_v29  ;;  %9101 = vpow2.f32 %v4693_v4 }
0x1706   : > { %9103 = vpow2.f32 %v4691_v49 }
0x1707   : > { %v11618_v19 = vpop.eup %9089  ;;  %9105 = vpow2.f32 %v4695_v53  ;;  %v8854_v53 = vunpack.i.l.bf16 %v11509_v61 }
0x1708   : > { %v4758_v33 = vsel %vm2140_vm15, %v11618_v19, 0.0  ;;  %v11625_v36 = vpop.eup %9091  ;;  %9107 = vpow2.f32 %v4697_v13 }
0x1709   : > { %4759 = vadd.xlane.f32.xlu1 %v4758_v33  ;;  %4756 = vadd.xlane.f32.xlu0 %v4755_v25  ;;  %v4737_v43 = vsel %vm2140_vm15, %v11625_v36, 0.0  ;;  %9109 = vpow2.f32 %v4699_v2  ;;  %v8509_v2 = vpack.c.bf16 %v8855_v55, %v8854_v53 }
0x170b   : > { %v11627_v9 = vpop.eup %9093 }
0x170c   : > { %v11629_v20 = vpop.eup %9095  ;;  %v4761_v56 = vsel %vm2140_vm15, %v11627_v9, 0.0 }
0x170d   : > { %v11635_v26 = vpop.eup %9097  ;;  %4762 = vadd.xlane.f32.xlu1 %v4761_v56  ;;  %4738 = vadd.xlane.f32.xlu0 %v4737_v43  ;;  %v4740_v63 = vsel %vm2140_vm15, %v11629_v20, 0.0  ;;  %v8865_v56 = vunpack.i.h.bf16 %v11310_v58  ;;  %v8864_v43 = vunpack.i.l.bf16 %v11310_v58 }
0x170e   : > { %v11637_v38 = vpop.eup %9099  ;;  %v4764_v52 = vsel %vm2140_vm15, %v11635_v26, 0.0 }
0x170f   : > { %v11643_v60 = vpop.eup %9101  ;;  %v4767_v44 = vsel %vm2140_vm15, %v11637_v38, 0.0 }
0x1710   : > { %v11645_v35 = vpop.eup %9103  ;;  %v4773_v51 = vsel %vm2140_vm15, %v11643_v60, 0.0 }
0x1711   : > { %v4703_v27 = vpop.xlane.xlu1 %4702  ;;  %4765 = vadd.xlane.f32.xlu1 %v4764_v52  ;;  %4741 = vadd.xlane.f32.xlu0 %v4740_v63  ;;  %v11651_v21 = vpop.eup %9105  ;;  %v4770_v16 = vsel %vm2140_vm15, %v11645_v35, 0.0 }
0x1712   : > { %9111 = vrcp.f32 %v4703_v27  ;;  %v11653_v47 = vpop.eup %9107  ;;  %v4776_v42 = vsel %vm2140_vm15, %v11651_v21, 0.0 }
0x1713   : > { %v11659_v29 = vpop.eup %9109  ;;  %v4779_v33 = vsel %vm2140_vm15, %v11653_v47, 0.0 }
0x1714   : > { %v4782_v25 = vsel %vm2140_vm15, %v11659_v29, 0.0 }
0x1715   : > { %v4706_v4 = vpop.xlane.xlu1 %4705  ;;  %4774 = vadd.xlane.f32.xlu1 %v4773_v51  ;;  %4768 = vadd.xlane.f32.xlu0 %v4767_v44 }
0x1716   : > { %9113 = vrcp.f32 %v4706_v4 }
0x1719   : > { %v4709_v49 = vpop.xlane.xlu1 %4708  ;;  %4777 = vadd.xlane.f32.xlu1 %v4776_v42  ;;  %4771 = vadd.xlane.f32.xlu0 %v4770_v16 }
0x171a   : > { %9115 = vrcp.f32 %v4709_v49 }
0x171c   : > { %v9112_v34 = vpop.eup %9111 }
0x171d   : > { %v4813_v13 = vmul.f32 %v9112_v34, %v11519_v24  ;;  %4780 = vadd.xlane.f32.xlu0 %v4779_v33  ;;  %4783 = vadd.xlane.f32.xlu1 %v4782_v25  ;;  %v8873_v52 = vpop.permute.xlu1 %8872  ;;  %v8512_v24 = vpack.c.bf16 %v8865_v56, %v8864_v43  ;;  %v8859_v56 = vunpack.i.l.bf16 %v11298_v40 }
0x171e   : > { %v8875_v27 = vunpack.i.h.bf16 %v8873_v52  ;;  %v8874_v51 = vunpack.i.l.bf16 %v8873_v52 }
0x171f   : > { %7999 = vmatmul.mubr.msk.f32.vlgmr.msra.gmra.mrb[124].mxu0 %vm2140_vm15, %v4813_v13 }
0x1720   : > { %v9114_v61 = vpop.eup %9113  ;;  %8510 = vmatpush3.bf16.msra.mxu0 %v8509_v2  ;;  %8001 = vmatprep.mubr.msk.f32.mxu0 %vm9288_vm10, %v12305_v54  ;;  %v8515_v4 = vpack.c.bf16 %v8875_v27, %v8874_v51 }
0x1721   : > { %8511 = vmatprep.subr.bf16.mxu0 %v12306_v0  ;;  %v4814_v63 = vmul.f32 %v9114_v61, %v11523_v32  ;;  %v8868_v32 = vpop.permute.xlu0 %8867  ;;  %v8878_v42 = vpop.permute.xlu1 %8877 }
0x1722   : > { %v8870_v61 = vunpack.i.h.bf16 %v8868_v32 }
0x1723   : > { %8002 = vmatmul.mubr.msk.f32.gmra.mrb[126].mxu0 %vm2140_vm15, %v4814_v63  ;;  %v8869_v63 = vunpack.i.l.bf16 %v8868_v32 }
0x1724   : > { %v9116_v44 = vpop.eup %9115  ;;  %8513 = vmatpush3.bf16.msra.mxu0 %v8512_v24  ;;  %8004 = vmatprep.mubr.msk.f32.mxu0 %vm9288_vm10, %v12305_v54  ;;  %v8880_v24 = vunpack.i.h.bf16 %v8878_v42 }
0x1725   : > { %8514 = vmatprep.subr.bf16.mxu0 %v12306_v0  ;;  %v4815_v58 = vmul.f32 %v9116_v44, %v11529_v41 }
0x1727   : > { %8005 = vmatmul.mubr.msk.f32.gmra.mrb[128].mxu0 %vm2140_vm15, %v4815_v58 }
0x1728   : > { %8516 = vmatpush3.bf16.msra.mxu0 %v8515_v4  ;;  %8007 = vmatprep.mubr.msk.f32.mxu0 %vm9288_vm10, %v12305_v54 }
0x1729   : > { %8066 = vmatprep.subr.mxu0 %v12305_v54 }
0x172e   : > { %5279 = vrot.lane.b32.xlu1 %v11158_v3, %s12316_s30 }
0x1733   : > { %5137 = vrot.lane.b32.xlu0 %v11108_v23, %s12316_s30 }
0x1735   : > { %v4715_v16 = vpop.xlane.xlu0 %4714 }
0x1752   : > { %v4712_v49 = vpop.xlane.xlu1 %4711 }
0x1753   : > { %9117 = vrcp.f32 %v4712_v49 }
0x1754   : > { %9119 = vrcp.f32 %v4715_v16 }
0x1756   : > { %v4718_v41 = vpop.xlane.xlu1 %4717 }
0x1757   : > { %9121 = vrcp.f32 %v4718_v41 }
0x175a   : > { %v4721_v55 = vpop.xlane.xlu1 %4720 }
0x175b   : > { %9123 = vrcp.f32 %v4721_v55 }
0x175d   : > { %v9118_v53 = vpop.eup %9117 }
0x175e   : > { %v4816_v34 = vmul.f32 %v9118_v53, %v11545_v7  ;;  %v9120_v33 = vpop.eup %9119 }
0x175f   : > { %v4817_v23 = vmul.f32 %v9120_v33, %v11538_v6  ;;  %v8860_v6 = vunpack.i.h.bf16 %v11298_v40  ;;  %v8879_v40 = vunpack.i.l.bf16 %v8878_v42 }
0x1760   : > { %8008 = vmatmul.mubr.msk.f32.gmra.mrb[130].mxu0 %vm2140_vm15, %v4816_v34 }
0x1761   : > { %8010 = vmatprep.mubr.msk.f32.mxu0 %vm9288_vm10, %v12305_v54  ;;  %v9122_v3 = vpop.eup %9121  ;;  %v8518_v52 = vpack.c.bf16 %v8860_v6, %v8859_v56  ;;  %v8524_v27 = vpack.c.bf16 %v8880_v24, %v8879_v40 }
0x1762   : > { %v4818_v13 = vmul.f32 %v9122_v3, %v11549_v31 }
0x1764   : > { %8011 = vmatmul.mubr.msk.f32.gmra.mrb[132].mxu0 %vm2140_vm15, %v4817_v23  ;;  %v4724_v25 = vpop.xlane.xlu0 %4723 }
0x1765   : > { %9125 = vrcp.f32 %v4724_v25  ;;  %8013 = vmatprep.mubr.msk.f32.mxu0 %vm9288_vm10, %v12305_v54  ;;  %v9124_v2 = vpop.eup %9123 }
0x1766   : > { %v4819_v7 = vmul.f32 %v9124_v2, %v11554_v48  ;;  %v8521_v48 = vpack.c.bf16 %v8870_v61, %v8869_v63 }
0x1768   : > { %8014 = vmatmul.mubr.msk.f32.gmra.mrb[134].mxu0 %vm2140_vm15, %v4818_v13 }
0x1769   : > { %8016 = vmatprep.mubr.msk.f32.mxu0 %vm9288_vm10, %v12305_v54 }
0x176c   : > { %8017 = vmatmul.mubr.msk.f32.gmra.mrb[136].mxu0 %vm2140_vm15, %v4819_v7 }
0x176d   : > { %8068 = vmatprep.mubr.msk.f32.mxu0 %vm9288_vm10, %v12305_v54 }
0x176f   : > { %v9126_v43 = vpop.eup %9125 }
0x1770   : > { %v4820_v31 = vmul.f32 %v9126_v43, %v11559_v22  ;;  %v4733_v44 = vpop.xlane.xlu1 %4732 }
0x1772   : > { %8034 = vmatmul.mubr.msk.f32.vlgmr.msra.gmra.mrb[138].mxu1 %vm2140_vm15, %v4820_v31 }
0x1773   : > { %8519 = vmatpush3.bf16.msra.mxu1 %v8518_v52  ;;  %8036 = vmatprep.mubr.msk.f32.mxu1 %vm9288_vm10, %v12305_v54 }
0x1774   : > { %8520 = vmatprep.subr.bf16.mxu1 %v12306_v0 }
0x1777   : > { %8522 = vmatpush3.bf16.msra.mxu1 %v8521_v48 }
0x1778   : > { %8523 = vmatprep.subr.bf16.mxu1 %v12306_v0 }
0x177b   : > { %8525 = vmatpush3.bf16.msra.mxu1 %v8524_v27 }
0x177c   : > { %8101 = vmatprep.subr.mxu1 %v12305_v54 }
0x1782   : > { %v4745_v22 = vpop.xlane.xlu0 %4744 }
0x1786   : > { %v4727_v51 = vpop.xlane.xlu0 %4726 }
0x1787   : > { %9127 = vrcp.f32 %v4727_v51 }
0x178a   : > { %v4748_v58 = vpop.xlane.xlu0 %4747 }
0x178e   : > { %v4754_v4 = vpop.xlane.xlu1 %4753  ;;  %v4730_v32 = vpop.xlane.xlu0 %4729 }
0x178f   : > { %9129 = vrcp.f32 %v4730_v32 }
0x1790   : > { %9131 = vrcp.f32 %v4733_v44 }
0x1791   : > { %v9128_v16 = vpop.eup %9127 }
0x1792   : > { %v4736_v49 = vpop.xlane.xlu1 %4735  ;;  %v4751_v41 = vpop.xlane.xlu0 %4750  ;;  %v4821_v42 = vmul.f32 %v9128_v16, %v11580_v18 }
0x1793   : > { %9133 = vrcp.f32 %v4736_v49 }
0x1794   : > { %8037 = vmatmul.mubr.msk.f32.gmra.mrb[140].mxu1 %vm2140_vm15, %v4821_v42 }
0x1795   : > { %8039 = vmatprep.mubr.msk.f32.mxu1 %vm9288_vm10, %v12305_v54 }
0x1796   : > { %v11717_v55 = vpop.xlane.xlu1 %4759  ;;  %v4757_v53 = vpop.xlane.xlu0 %4756 }
0x1799   : > { %v9130_v34 = vpop.eup %9129 }
0x179a   : > { %v11719_v33 = vpop.xlane.xlu1 %4762  ;;  %v4739_v23 = vpop.xlane.xlu0 %4738  ;;  %v4822_v3 = vmul.f32 %v9130_v34, %v11593_v62 }
0x179b   : > { %v9132_v25 = vpop.eup %9131  ;;  %9135 = vrcp.f32 %v4739_v23 }
0x179c   : > { %8040 = vmatmul.mubr.msk.f32.gmra.mrb[142].mxu1 %vm2140_vm15, %v4822_v3  ;;  %v4823_v2 = vmul.f32 %v9132_v25, %v11563_v37 }
0x179d   : > { %8042 = vmatprep.mubr.msk.f32.mxu1 %vm9288_vm10, %v12305_v54  ;;  %v9134_v7 = vpop.eup %9133 }
0x179e   : > { %v4766_v18 = vpop.xlane.xlu1 %4765  ;;  %v4742_v13 = vpop.xlane.xlu0 %4741  ;;  %v4824_v62 = vmul.f32 %v9134_v7, %v11600_v39 }
0x179f   : > { %9137 = vrcp.f32 %v4742_v13 }
0x17a0   : > { %9139 = vrcp.f32 %v4745_v22  ;;  %8043 = vmatmul.mubr.msk.f32.gmra.mrb[144].mxu1 %vm2140_vm15, %v4823_v2 }
0x17a1   : > { %9141 = vrcp.f32 %v4766_v18  ;;  %8045 = vmatprep.mubr.msk.f32.mxu1 %vm9288_vm10, %v12305_v54 }
0x17a2   : > { %v4775_v6 = vpop.xlane.xlu1 %4774  ;;  %v4769_v56 = vpop.xlane.xlu0 %4768  ;;  %9143 = vrcp.f32 %v4748_v58 }
0x17a3   : > { %9145 = vrcp.f32 %v4769_v56  ;;  %v6874_v56 = vld [vmem:[%s12261_s10 + $0x28] sm:$0xff] }
0x17a4   : > { %8046 = vmatmul.mubr.msk.f32.gmra.mrb[146].mxu1 %vm2140_vm15, %v4824_v62  ;;  %9147 = vrcp.f32 %v4751_v41 }
0x17a5   : > { %v9136_v43 = vpop.eup %9135  ;;  %8048 = vmatprep.mubr.msk.f32.mxu1 %vm9288_vm10, %v12305_v54 }
0x17a6   : > { %v4778_v31 = vpop.xlane.xlu1 %4777  ;;  %v4772_v37 = vpop.xlane.xlu0 %4771  ;;  %v4825_v52 = vmul.f32 %v9136_v43, %v11625_v36 }
0x17a7   : > { %9149 = vrcp.f32 %v4772_v37 }
0x17a8   : > { %8049 = vmatmul.mubr.msk.f32.gmra.mrb[148].mxu1 %vm2140_vm15, %v4825_v52  ;;  %9151 = vrcp.f32 %v4754_v4 }
0x17a9   : > { %v9138_v61 = vpop.eup %9137  ;;  %8051 = vmatprep.mubr.msk.f32.mxu1 %vm9288_vm10, %v12305_v54  ;;  %9153 = vrcp.f32 %v4775_v6  ;;  %v6873_v6 = vld [vmem:[%s12261_s10 + $0x20] sm:$0xff] }
0x17aa   : > { %v4784_v63 = vpop.xlane.xlu1 %4783  ;;  %v4781_v48 = vpop.xlane.xlu0 %4780  ;;  %v4826_v24 = vmul.f32 %v9138_v61, %v11629_v20  ;;  %9155 = vrcp.f32 %v4757_v53  ;;  %v8527_v62 = vpack.c.bf16 %v6874_v56, %v6873_v6 }
0x17ab   : > { %v9140_v39 = vpop.eup %9139  ;;  %9157 = vrcp.f32 %v4778_v31 }
0x17ac   : > { %v9142_v40 = vpop.eup %9141  ;;  %8052 = vmatmul.mubr.msk.f32.gmra.mrb[150].mxu1 %vm2140_vm15, %v4826_v24  ;;  %v4827_v27 = vmul.f32 %v9140_v39, %v11576_v5  ;;  %9159 = vrcp.f32 %v11717_v55 }
0x17ad   : > { %8103 = vmatprep.mubr.msk.f32.mxu1 %vm9288_vm10, %v12305_v54  ;;  %v9144_v51 = vpop.eup %9143  ;;  %v4834_v44 = vmul.f32 %v9142_v40, %v11635_v26  ;;  %9161 = vrcp.f32 %v4781_v48 }
0x17ae   : > { %v5280_v36 = vpop.permute.xlu1 %5279  ;;  %v5138_v22 = vpop.permute.xlu0 %5137  ;;  %v4828_v5 = vmul.f32 %v9144_v51, %v11586_v17  ;;  %9163 = vrcp.f32 %v11719_v33 }
0x17af   : > { %8067 = vmatpush3.msra.mxu0 %v5138_v22  ;;  %8102 = vmatpush3.msra.mxu1 %v5280_v36  ;;  %v9146_v58 = vpop.eup %9145  ;;  %9165 = vrcp.f32 %v4784_v63 }
0x17b0   : > { %8069 = vmatmul.mubr.msk.f32.vlgmr.msra.gmra.mrb[138].mxu0 %vm2140_vm15, %v4827_v27  ;;  %8526 = vmatprep.subr.bf16.mxu0 %v12306_v0  ;;  %v9148_v20 = vpop.eup %9147  ;;  %v4835_v26 = vmul.f32 %v9146_v58, %v11637_v38 }
0x17b1   : > { %8104 = vmatmul.mubr.msk.f32.vlgmr.msra.gmra.mrb[152].mxu1 %vm2140_vm15, %v4834_v44  ;;  %8071 = vmatprep.mubr.msk.f32.mxu0 %vm9288_vm10, %v12305_v54  ;;  %v9150_v4 = vpop.eup %9149  ;;  %v4829_v17 = vmul.f32 %v9148_v20, %v11606_v12 }
0x17b2   : > { %8106 = vmatprep.mubr.msk.f32.mxu1 %vm9288_vm10, %v12305_v54  ;;  %8532 = vmatprep.subr.bf16.mxu1 %v12306_v0  ;;  %v9152_v32 = vpop.eup %9151  ;;  %v4836_v16 = vmul.f32 %v9150_v4, %v11645_v35  ;;  %v6875_v4 = vld [vmem:[%s12261_s10 + $0x30] sm:$0xff] }
0x17b3   : > { %v9154_v38 = vpop.eup %9153  ;;  %v4830_v49 = vmul.f32 %v9152_v32, %v11597_v45  ;;  %8528 = vmatpush3.bf16.msra.mxu0 %v8527_v62 }
0x17b4   : > { %8072 = vmatmul.mubr.msk.f32.gmra.mrb[140].mxu0 %vm2140_vm15, %v4828_v5  ;;  %v9156_v12 = vpop.eup %9155  ;;  %v4837_v41 = vmul.f32 %v9154_v38, %v11643_v60  ;;  %8529 = vmatprep.subr.bf16.mxu0 %v12306_v0 }
0x17b5   : > { %8107 = vmatmul.mubr.msk.f32.gmra.mrb[154].mxu1 %vm2140_vm15, %v4835_v26  ;;  %8074 = vmatprep.mubr.msk.f32.mxu0 %vm9288_vm10, %v12305_v54  ;;  %v9158_v35 = vpop.eup %9157  ;;  %v4831_v42 = vmul.f32 %v9156_v12, %v11615_v14 }
0x17b6   : > { %8109 = vmatprep.mubr.msk.f32.mxu1 %vm9288_vm10, %v12305_v54  ;;  %v9160_v55 = vpop.eup %9159  ;;  %v4838_v53 = vmul.f32 %v9158_v35, %v11651_v21 }
0x17b7   : > { %v9162_v45 = vpop.eup %9161  ;;  %v4832_v60 = vmul.f32 %v9160_v55, %v11618_v19 }
0x17b8   : > { %8075 = vmatmul.mubr.msk.f32.gmra.mrb[142].mxu0 %vm2140_vm15, %v4829_v17  ;;  %v9164_v34 = vpop.eup %9163  ;;  %v4839_v33 = vmul.f32 %v9162_v45, %v11653_v47  ;;  %v6876_v17 = vld [vmem:[%s12261_s10 + $0x38] sm:$0xff] }
0x17b9   : > { %8110 = vmatmul.mubr.msk.f32.gmra.mrb[156].mxu1 %vm2140_vm15, %v4836_v16  ;;  %8077 = vmatprep.mubr.msk.f32.mxu0 %vm9288_vm10, %v12305_v54  ;;  %v9166_v14 = vpop.eup %9165  ;;  %v4833_v21 = vmul.f32 %v9164_v34, %v11627_v9  ;;  %v8530_v38 = vpack.c.bf16 %v6876_v17, %v6875_v4 }
0x17ba   : > { %8112 = vmatprep.mubr.msk.f32.mxu1 %vm9288_vm10, %v12305_v54  ;;  %v4840_v23 = vmul.f32 %v9166_v14, %v11659_v29 }
0x17bb   : > { %8531 = vmatpush3.bf16.msra.mxu0 %v8530_v38 }
0x17bc   : > { %8078 = vmatmul.mubr.msk.f32.gmra.mrb[144].mxu0 %vm2140_vm15, %v4830_v49  ;;  %8538 = vmatprep.subr.bf16.mxu0 %v12306_v0 }
0x17bd   : > { %8113 = vmatmul.mubr.msk.f32.gmra.mrb[158].mxu1 %vm2140_vm15, %v4837_v41  ;;  %8080 = vmatprep.mubr.msk.f32.mxu0 %vm9288_vm10, %v12305_v54 }
0x17be   : > { %8115 = vmatprep.mubr.msk.f32.mxu1 %vm9288_vm10, %v12305_v54 }
0x17c0   : > { %8081 = vmatmul.mubr.msk.f32.gmra.mrb[146].mxu0 %vm2140_vm15, %v4831_v42 }
0x17c1   : > { %8116 = vmatmul.mubr.msk.f32.gmra.mrb[160].mxu1 %vm2140_vm15, %v4838_v53  ;;  %8083 = vmatprep.mubr.msk.f32.mxu0 %vm9288_vm10, %v12305_v54 }
0x17c2   : > { %8118 = vmatprep.mubr.msk.f32.mxu1 %vm9288_vm10, %v12305_v54 }
0x17c4   : > { %8084 = vmatmul.mubr.msk.f32.gmra.mrb[148].mxu0 %vm2140_vm15, %v4832_v60 }
0x17c5   : > { %8119 = vmatmul.mubr.msk.f32.gmra.mrb[162].mxu1 %vm2140_vm15, %v4839_v33  ;;  %8086 = vmatprep.mubr.msk.f32.mxu0 %vm9288_vm10, %v12305_v54 }
0x17c6   : > { %8121 = vmatprep.mubr.msk.f32.mxu1 %vm9288_vm10, %v12305_v54 }
0x17c8   : > { %8087 = vmatmul.mubr.msk.f32.gmra.mrb[150].mxu0 %vm2140_vm15, %v4833_v21 }
0x17c9   : > { %8122 = vmatmul.mubr.msk.f32.gmra.mrb[164].mxu1 %vm2140_vm15, %v4840_v23  ;;  %8132 = vmatprep.mubr.msk.f32.mxu0 %vm9288_vm10, %v12305_v54 }
0x17ca   : > { %8161 = vmatprep.mubr.msk.f32.mxu1 %vm9288_vm10, %v12305_v54 }
0x17f2   : > { %v11801_v19 = vpop.f32.mrb[124].mxu0 }
0x17f3   : > { %v8000_v47 = vpop.f32.mrb[125].mxu0 }
0x17f6   : > { %v11803_v3 = vpop.f32.mrb[126].mxu0 }
0x17f7   : > { %v8003_v25 = vpop.f32.mrb[127].mxu0 }
0x17fa   : > { %v11805_v18 = vpop.f32.mrb[128].mxu0 }
0x17fb   : > { %v8006_v9 = vpop.f32.mrb[129].mxu0 }
0x1833   : > { %v11807_v29 = vpop.f32.mrb[130].mxu0 }
0x1834   : > { %v8009_v13 = vpop.f32.mrb[131].mxu0 }
0x1837   : > { %v11809_v2 = vpop.f32.mrb[132].mxu0 }
0x1838   : > { %v8012_v7 = vpop.f32.mrb[133].mxu0 }
0x183b   : > { %v11817_v43 = vpop.f32.mrb[134].mxu0 }
0x183c   : > { %v8015_v31 = vpop.f32.mrb[135].mxu0 }
0x183f   : > { %v11820_v37 = vpop.f32.mrb[136].mxu0 }
0x1840   : > { %v8018_v52 = vpop.f32.mrb[137].mxu0 }
0x1845   : > { %v5091_v61 = vpop.f32.mrb[138].mxu1 }
0x1846   : > { %5416 = vrot.lane.b32.xlu0 %v5091_v61, %s12307_s22  ;;  %v8035_v63 = vpop.f32.mrb[139].mxu1 }
0x1867   : > { %v5096_v48 = vpop.f32.mrb[140].mxu1 }
0x1868   : > { %v8038_v39 = vpop.f32.mrb[141].mxu1 }
0x186f   : > { %v5101_v24 = vpop.f32.mrb[142].mxu1 }
0x1870   : > { %v8041_v40 = vpop.f32.mrb[143].mxu1 }
0x1873   : > { %v5106_v27 = vpop.f32.mrb[144].mxu1 }
0x1874   : > { %v8044_v36 = vpop.f32.mrb[145].mxu1 }
0x1877   : > { %v5111_v22 = vpop.f32.mrb[146].mxu1 }
0x1878   : > { %v8047_v51 = vpop.f32.mrb[147].mxu1 }
0x187b   : > { %v5116_v44 = vpop.f32.mrb[148].mxu1 }
0x187c   : > { %v8050_v58 = vpop.f32.mrb[149].mxu1 }
0x187f   : > { %v5121_v5 = vpop.f32.mrb[150].mxu1 }
0x1880   : > { %v8053_v20 = vpop.f32.mrb[151].mxu1 }
0x1883   : > { %v5233_v26 = vpop.f32.mrb[138].mxu0 }
0x1884   : > { %v5375_v32 = vpop.f32.mrb[152].mxu1  ;;  %v8070_v16 = vpop.f32.mrb[139].mxu0  ;;  %5444 = vrot.lane.b32.xlu0 %v5233_v26, %s9286_s16 }
0x1885   : > { %v8105_v49 = vpop.f32.mrb[153].mxu1 }
0x1887   : > { %v5238_v12 = vpop.f32.mrb[140].mxu0 }
0x1888   : > { %v5380_v41 = vpop.f32.mrb[154].mxu1  ;;  %v8073_v35 = vpop.f32.mrb[141].mxu0  ;;  %5418 = vrot.lane.b32.xlu0 %v5096_v48, %s12307_s22 }
0x1889   : > { %v8108_v42 = vpop.f32.mrb[155].mxu1 }
0x188b   : > { %v5243_v55 = vpop.f32.mrb[142].mxu0 }
0x188c   : > { %v5385_v53 = vpop.f32.mrb[156].mxu1  ;;  %5448 = vrot.lane.b32.xlu1 %v5243_v55, %s9286_s16  ;;  %v8076_v45 = vpop.f32.mrb[143].mxu0  ;;  %5446 = vrot.lane.b32.xlu0 %v5238_v12, %s9286_s16 }
0x188d   : > { %v8111_v60 = vpop.f32.mrb[157].mxu1 }
0x188f   : > { %v5248_v34 = vpop.f32.mrb[144].mxu0 }
0x1890   : > { %v5390_v33 = vpop.f32.mrb[158].mxu1  ;;  %v8079_v14 = vpop.f32.mrb[145].mxu0  ;;  %5420 = vrot.lane.b32.xlu0 %v5101_v24, %s12307_s22  ;;  %5422 = vrot.lane.b32.xlu1 %v5106_v27, %s12307_s22 }
0x1891   : > { %v8114_v21 = vpop.f32.mrb[159].mxu1 }
0x1893   : > { %v5253_v23 = vpop.f32.mrb[146].mxu0 }
0x1894   : > { %v5395_v47 = vpop.f32.mrb[160].mxu1  ;;  %v8082_v25 = vpop.f32.mrb[147].mxu0  ;;  %5472 = vrot.lane.b32.xlu0 %v5375_v32, %s12317_s24  ;;  %5474 = vrot.lane.b32.xlu1 %v5380_v41, %s12317_s24 }
0x1895   : > { %v8117_v9 = vpop.f32.mrb[161].mxu1 }
0x1897   : > { %v5258_v13 = vpop.f32.mrb[148].mxu0 }
0x1898   : > { %v5400_v7 = vpop.f32.mrb[162].mxu1  ;;  %v8085_v6 = vpop.f32.mrb[149].mxu0  ;;  %5450 = vrot.lane.b32.xlu0 %v5248_v34, %s9286_s16  ;;  %5452 = vrot.lane.b32.xlu1 %v5253_v23, %s9286_s16 }
0x1899   : > { %v8120_v56 = vpop.f32.mrb[163].mxu1 }
0x189b   : > { %v5263_v62 = vpop.f32.mrb[150].mxu0 }
0x189c   : > { %v5405_v31 = vpop.f32.mrb[164].mxu1  ;;  %v8088_v52 = vpop.f32.mrb[151].mxu0  ;;  %5476 = vrot.lane.b32.xlu0 %v5385_v53, %s12317_s24  ;;  %5478 = vrot.lane.b32.xlu1 %v5390_v33, %s12317_s24 }
0x189d   : > { %v8123_v61 = vpop.f32.mrb[165].mxu1 }
0x18a0   : > { %5424 = vrot.lane.b32.xlu0 %v5111_v22, %s12307_s22  ;;  %5426 = vrot.lane.b32.xlu1 %v5116_v44, %s12307_s22 }
0x18a4   : > { %5480 = vrot.lane.b32.xlu0 %v5395_v47, %s12317_s24  ;;  %5482 = vrot.lane.b32.xlu1 %v5400_v7, %s12317_s24  ;;  %v12318_v7 = vsub.s32 5, %v9518_v10 }
0x18a8   : > { %5454 = vrot.lane.b32.xlu0 %v5258_v13, %s9286_s16  ;;  %5456 = vrot.lane.b32.xlu1 %v5263_v62, %s9286_s16  ;;  %v11902_v13 = vld [vmem:[%s12259_s8 + $0x8] sm:$0xff]  ;;  %s6935_s16 = sshll.u32 %s9390_s29, 9 }
0x18a9   : > { %s12203_s29 = scalar_lea.hbm %s12264_s13, %s6935_s16 }
0x18ac   : > { %5428 = vrot.lane.b32.xlu0 %v5121_v5, %s12307_s22 }
0x18b0   : > { %5484 = vrot.lane.b32.xlu0 %v5405_v31, %s12317_s24 }
0x18b8   : > { %v5417_v63 = vpop.permute.xlu0 %5416 }
0x18b9   : > { %v5493_v22 = vsel %vm560_vm5, %v11801_v19, %v5417_v63 }
0x18f6   : > { %v5445_v48 = vpop.permute.xlu0 %5444 }
0x18f7   : > { %v5500_v51 = vsel %vm895_vm9, %v5493_v22, %v5445_v48 }
0x18fa   : > { %v5419_v39 = vpop.permute.xlu0 %5418 }
0x18fb   : > { %v5494_v5 = vsel %vm560_vm5, %v11803_v3, %v5419_v39 }
0x18fe   : > { %v5449_v24 = vpop.permute.xlu1 %5448  ;;  %v5447_v40 = vpop.permute.xlu0 %5446 }
0x18ff   : > { %v5501_v26 = vsel %vm895_vm9, %v5494_v5, %v5447_v40 }
0x1902   : > { %v5421_v27 = vpop.permute.xlu0 %5420  ;;  %v5423_v36 = vpop.permute.xlu1 %5422 }
0x1903   : > { %v5495_v19 = vsel %vm560_vm5, %v11805_v18, %v5421_v27  ;;  %v5496_v12 = vsel %vm560_vm5, %v11807_v29, %v5423_v36 }
0x1904   : > { %v5502_v16 = vsel %vm895_vm9, %v5495_v19, %v5449_v24 }
0x1906   : > { %v5473_v44 = vpop.permute.xlu0 %5472  ;;  %v5475_v58 = vpop.permute.xlu1 %5474 }
0x1907   : > { %v5507_v20 = vsel %vm3115_vm0, %v5500_v51, %v5473_v44  ;;  %v5508_v32 = vsel %vm3115_vm0, %v5501_v26, %v5475_v58 }
0x1908   : > { %8133 = vmatmul.mubr.msk.f32.vlgmr.msra.gmra.mrb[152].mxu0 %vm688_vm8, %v5507_v20 }
0x1909   : > { %8135 = vmatprep.mubr.msk.f32.mxu0 %vm9288_vm10, %v12305_v54 }
0x190a   : > { %v5451_v4 = vpop.permute.xlu0 %5450  ;;  %v5453_v17 = vpop.permute.xlu1 %5452 }
0x190b   : > { %v5503_v18 = vsel %vm895_vm9, %v5496_v12, %v5451_v4 }
0x190c   : > { %8136 = vmatmul.mubr.msk.f32.gmra.mrb[154].mxu0 %vm688_vm8, %v5508_v32 }
0x190d   : > { %8138 = vmatprep.mubr.msk.f32.mxu0 %vm9288_vm10, %v12305_v54 }
0x190e   : > { %v5477_v3 = vpop.permute.xlu0 %5476  ;;  %v5479_v49 = vpop.permute.xlu1 %5478 }
0x190f   : > { %v5509_v38 = vsel %vm3115_vm0, %v5502_v16, %v5477_v3  ;;  %v5510_v35 = vsel %vm3115_vm0, %v5503_v18, %v5479_v49 }
0x1910   : > { %8139 = vmatmul.mubr.msk.f32.gmra.mrb[156].mxu0 %vm688_vm8, %v5509_v38 }
0x1911   : > { %8141 = vmatprep.mubr.msk.f32.mxu0 %vm9288_vm10, %v12305_v54 }
0x1912   : > { %v5425_v41 = vpop.permute.xlu0 %5424  ;;  %v5427_v55 = vpop.permute.xlu1 %5426 }
0x1913   : > { %v5497_v42 = vsel %vm560_vm5, %v11809_v2, %v5425_v41  ;;  %v5498_v60 = vsel %vm560_vm5, %v11817_v43, %v5427_v55 }
0x1914   : > { %8142 = vmatmul.mubr.msk.f32.gmra.mrb[158].mxu0 %vm688_vm8, %v5510_v35  ;;  %v5504_v53 = vsel %vm895_vm9, %v5497_v42, %v5453_v17 }
0x1915   : > { %8144 = vmatprep.mubr.msk.f32.mxu0 %vm9288_vm10, %v12305_v54 }
0x1916   : > { %v5481_v29 = vpop.permute.xlu0 %5480  ;;  %v5483_v34 = vpop.permute.xlu1 %5482 }
0x1917   : > { %v5511_v45 = vsel %vm3115_vm0, %v5504_v53, %v5481_v29 }
0x1918   : > { %8145 = vmatmul.mubr.msk.f32.gmra.mrb[160].mxu0 %vm688_vm8, %v5511_v45 }
0x1919   : > { %8147 = vmatprep.mubr.msk.f32.mxu0 %vm9288_vm10, %v12305_v54 }
0x191a   : > { %v5455_v2 = vpop.permute.xlu0 %5454  ;;  %v5457_v47 = vpop.permute.xlu1 %5456 }
0x191b   : > { %v5505_v33 = vsel %vm895_vm9, %v5498_v60, %v5455_v2 }
0x191c   : > { %v5512_v14 = vsel %vm3115_vm0, %v5505_v33, %v5483_v34 }
0x191d   : > { %8148 = vmatmul.mubr.msk.f32.gmra.mrb[162].mxu0 %vm688_vm8, %v5512_v14 }
0x191e   : > { %v5429_v21 = vpop.permute.xlu0 %5428  ;;  %8150 = vmatprep.mubr.msk.f32.mxu0 %vm9288_vm10, %v12305_v54 }
0x191f   : > { %v5499_v23 = vsel %vm560_vm5, %v11820_v37, %v5429_v21  ;;  %v5522_v37 = vrot.slane %v11902_v13, %v12318_v7 }
0x1920   : > { %v5506_v25 = vsel %vm895_vm9, %v5499_v23, %v5457_v47 }
0x1922   : > { %v5485_v9 = vpop.permute.xlu0 %5484 }
0x1923   : > { %v5513_v43 = vsel %vm3115_vm0, %v5506_v25, %v5485_v9 }
0x1924   : > { %8151 = vmatmul.mubr.msk.f32.gmra.mrb[164].mxu0 %vm688_vm8, %v5513_v43 }
0x1925   : > { %8198 = vmatprep.mubr.msk.f32.mxu0 %vm9288_vm10, %v12305_v54 }
0x19db   : > { %v5610_v6 = vpop.f32.mrb[152].mxu0 }
0x19dc   : > { %v5611_v56 = vadd.f32 %v5610_v6, %v5522_v37  ;;  %v8134_v62 = vpop.f32.mrb[153].mxu0 }
0x19de   : > { %v5644_v31 = vadd.f32 %v5611_v56, %v10943_v59 }
0x19df   : > { %v5615_v52 = vpop.f32.mrb[154].mxu0 }
0x19e0   : > { %v5616_v61 = vadd.f32 %v5615_v52, %v5522_v37  ;;  %v8137_v63 = vpop.f32.mrb[155].mxu0  ;;  %v5651_v48 = vsel %vm688_vm8, %v5644_v31, 0.0 }
0x19e1   : > { %5652 = vadd.xlane.f32.xlu1 %v5651_v48 }
0x19e2   : > { %v5645_v39 = vadd.f32 %v5616_v61, %v10950_v28 }
0x19e3   : > { %v5620_v24 = vpop.f32.mrb[156].mxu0 }
0x19e4   : > { %v5621_v40 = vadd.f32 %v5620_v24, %v5522_v37  ;;  %v8140_v27 = vpop.f32.mrb[157].mxu0  ;;  %v5654_v36 = vsel %vm688_vm8, %v5645_v39, 0.0 }
0x19e5   : > { %5655 = vadd.xlane.f32.xlu0 %v5654_v36  ;;  %v6884_v36 = vld [vmem:[%s12262_s11 + $0x20] sm:$0xff] }
0x19e6   : > { %v5646_v22 = vadd.f32 %v5621_v40, %v10957_v50 }
0x19e7   : > { %v5625_v51 = vpop.f32.mrb[158].mxu0 }
0x19e8   : > { %v5626_v44 = vadd.f32 %v5625_v51, %v5522_v37  ;;  %v8143_v58 = vpop.f32.mrb[159].mxu0  ;;  %v5657_v59 = vsel %vm688_vm8, %v5646_v22, 0.0 }
0x19e9   : > { %5658 = vadd.xlane.f32.xlu0 %v5657_v59  ;;  %v6886_v58 = vld [vmem:[%s12262_s11 + $0x30] sm:$0xff]  ;;  %v6887_v59 = vld [vmem:[%s12262_s11 + $0x38] sm:$0xff] }
0x19ea   : > { %v5647_v20 = vadd.f32 %v5626_v44, %v10964_v8 }
0x19eb   : > { %v5630_v5 = vpop.f32.mrb[160].mxu0 }
0x19ec   : > { %v5631_v26 = vadd.f32 %v5630_v5, %v5522_v37  ;;  %v8146_v4 = vpop.f32.mrb[161].mxu0  ;;  %v5660_v28 = vsel %vm688_vm8, %v5647_v20, 0.0 }
0x19ed   : > { %5661 = vadd.xlane.f32.xlu1 %v5660_v28 }
0x19ee   : > { %v5648_v17 = vadd.f32 %v5631_v26, %v10971_v30 }
0x19f0   : > { %v5635_v19 = vpop.f32.mrb[162].mxu0  ;;  %v5663_v32 = vsel %vm688_vm8, %v5648_v17, 0.0 }
0x19f1   : > { %v5636_v50 = vadd.f32 %v5635_v19, %v5522_v37  ;;  %v8149_v16 = vpop.f32.mrb[163].mxu0  ;;  %5664 = vadd.xlane.f32.xlu0 %v5663_v32 }
0x19f3   : > { %v5649_v3 = vadd.f32 %v5636_v50, %v10978_v15 }
0x19f5   : > { %v5666_v38 = vsel %vm688_vm8, %v5649_v3, 0.0 }
0x19f6   : > { %5667 = vadd.xlane.f32.xlu1 %v5666_v38 }
0x19f7   : > { %v5640_v8 = vpop.f32.mrb[164].mxu0 }
0x19f8   : > { %v5641_v49 = vadd.f32 %v5640_v8, %v5522_v37  ;;  %v8152_v12 = vpop.f32.mrb[165].mxu0  ;;  %v12319_v8 = vsub.s32 6, %v9518_v10 }
0x19fa   : > { %v5650_v18 = vadd.f32 %v5641_v49, %v10985_v57  ;;  %v5745_v49 = vrot.slane %v11902_v13, %v12319_v8 }
0x19fc   : > { %v5669_v41 = vsel %vm688_vm8, %v5650_v18, 0.0 }
0x19fd   : > { %5670 = vadd.xlane.f32.xlu0 %v5669_v41  ;;  %v12320_v41 = vsub.s32 7, %v9518_v10 }
0x1a6e   : > { %v5653_v30 = vpop.xlane.xlu1 %5652 }
0x1a6f   : > { %v5672_v35 = vmul.f32 0.03125, %v5653_v30  ;;  %v5756_v30 = vrot.slane %v11902_v13, %v12320_v41 }
0x1a71   : > { %v11921_v42 = vsub.f32 %v5644_v31, %v5672_v35 }
0x1a72   : > { %v5656_v55 = vpop.xlane.xlu0 %5655 }
0x1a73   : > { %v5673_v53 = vmul.f32 0.03125, %v5656_v55  ;;  %v5686_v15 = vmul.f32 %v11921_v42, %v11921_v42 }
0x1a75   : > { %v11925_v29 = vsub.f32 %v5645_v39, %v5673_v53  ;;  %v5693_v45 = vsel %vm688_vm8, %v5686_v15, 0.0 }
0x1a76   : > { %5694 = vadd.xlane.f32.xlu1 %v5693_v45  ;;  %v5659_v60 = vpop.xlane.xlu0 %5658 }
0x1a77   : > { %v5674_v2 = vmul.f32 0.03125, %v5659_v60  ;;  %v5687_v57 = vmul.f32 %v11925_v29, %v11925_v29 }
0x1a79   : > { %v11930_v34 = vsub.f32 %v5646_v22, %v5674_v2  ;;  %v5696_v33 = vsel %vm688_vm8, %v5687_v57, 0.0  ;;  %v6885_v22 = vld [vmem:[%s12262_s11 + $0x28] sm:$0xff] }
0x1a7a   : > { %v5662_v14 = vpop.xlane.xlu1 %5661  ;;  %5697 = vadd.xlane.f32.xlu0 %v5696_v33  ;;  %v8533_v44 = vpack.c.bf16 %v6885_v22, %v6884_v36 }
0x1a7b   : > { %v5675_v21 = vmul.f32 0.03125, %v5662_v14  ;;  %v5688_v23 = vmul.f32 %v11930_v34, %v11930_v34 }
0x1a7c   : > { %8534 = vmatpush3.bf16.msra.mxu1 %v8533_v44  ;;  %v6896_v44 = vld [vmem:[%s12263_s12 + $0x48] sm:$0xff] }
0x1a7d   : > { %v11935_v47 = vsub.f32 %v5647_v20, %v5675_v21  ;;  %v5699_v25 = vsel %vm688_vm8, %v5688_v23, 0.0  ;;  %8535 = vmatprep.subr.bf16.mxu1 %v12306_v0  ;;  %v8536_v20 = vpack.c.bf16 %v6887_v59, %v6886_v58  ;;  %v6898_v59 = vld [vmem:[%s12263_s12 + $0x58] sm:$0xff] }
0x1a7e   : > { %5700 = vadd.xlane.f32.xlu1 %v5699_v25  ;;  %v5665_v9 = vpop.xlane.xlu0 %5664 }
0x1a7f   : > { %v5676_v43 = vmul.f32 0.03125, %v5665_v9  ;;  %v5689_v7 = vmul.f32 %v11935_v47, %v11935_v47 }
0x1a80   : > { %8537 = vmatpush3.bf16.msra.mxu1 %v8536_v20 }
0x1a81   : > { %v11940_v37 = vsub.f32 %v5648_v17, %v5676_v43  ;;  %v5702_v6 = vsel %vm688_vm8, %v5689_v7, 0.0 }
0x1a82   : > { %5703 = vadd.xlane.f32.xlu0 %v5702_v6 }
0x1a83   : > { %v5668_v56 = vpop.xlane.xlu1 %5667  ;;  %v5690_v62 = vmul.f32 %v11940_v37, %v11940_v37 }
0x1a84   : > { %v5677_v31 = vmul.f32 0.03125, %v5668_v56 }
0x1a85   : > { %v5705_v52 = vsel %vm688_vm8, %v5690_v62, 0.0 }
0x1a86   : > { %v11946_v61 = vsub.f32 %v5649_v3, %v5677_v31  ;;  %5706 = vadd.xlane.f32.xlu1 %v5705_v52 }
0x1a88   : > { %v5691_v63 = vmul.f32 %v11946_v61, %v11946_v61 }
0x1a8a   : > { %v5671_v48 = vpop.xlane.xlu0 %5670  ;;  %v5708_v39 = vsel %vm688_vm8, %v5691_v63, 0.0 }
0x1a8b   : > { %v5678_v24 = vmul.f32 0.03125, %v5671_v48  ;;  %5709 = vadd.xlane.f32.xlu0 %v5708_v39 }
0x1a8d   : > { %v11951_v40 = vsub.f32 %v5650_v18, %v5678_v24 }
0x1a8f   : > { %v5692_v27 = vmul.f32 %v11951_v40, %v11951_v40 }
0x1a91   : > { %v5711_v51 = vsel %vm688_vm8, %v5692_v27, 0.0 }
0x1a92   : > { %5712 = vadd.xlane.f32.xlu1 %v5711_v51  ;;  %v6895_v51 = vld [vmem:[%s12263_s12 + $0x40] sm:$0xff] }
0x1a93   : > { %v8539_v58 = vpack.c.bf16 %v6896_v44, %v6895_v51 }
0x1a95   : > { %8540 = vmatpush3.bf16.msra.mxu0 %v8539_v58 }
0x1a96   : > { %8541 = vmatprep.subr.bf16.mxu0 %v12306_v0 }
0x1b03   : > { %v5695_v5 = vpop.xlane.xlu1 %5694 }
0x1b04   : > { %v5714_v26 = vmul.f32 0.03125, %v5695_v5  ;;  %v6899_v5 = vld [vmem:[%s12263_s12 + $0x60] sm:$0xff] }
0x1b06   : > { %v5721_v4 = vadd.f32 1e-06, %v5714_v26  ;;  %v6900_v26 = vld [vmem:[%s12263_s12 + $0x68] sm:$0xff] }
0x1b07   : > { %v5698_v28 = vpop.xlane.xlu0 %5697 }
0x1b08   : > { %9167 = vrsqrt.f32 %v5721_v4  ;;  %v5715_v17 = vmul.f32 0.03125, %v5698_v28  ;;  %v8545_v4 = vpack.c.bf16 %v6900_v26, %v6899_v5  ;;  %v6901_v28 = vld [vmem:[%s12263_s12 + $0x70] sm:$0xff] }
0x1b0a   : > { %v5722_v19 = vadd.f32 1e-06, %v5715_v17  ;;  %v6902_v17 = vld [vmem:[%s12263_s12 + $0x78] sm:$0xff] }
0x1b0b   : > { %v5701_v32 = vpop.xlane.xlu1 %5700 }
0x1b0c   : > { %9169 = vrsqrt.f32 %v5722_v19  ;;  %v5716_v50 = vmul.f32 0.03125, %v5701_v32  ;;  %v8548_v19 = vpack.c.bf16 %v6902_v17, %v6901_v28  ;;  %v12052_v32 = vld [vmem:[%s12259_s8 + $0x10] sm:$0xf] }
0x1b0e   : > { %v5723_v16 = vadd.f32 1e-06, %v5716_v50  ;;  %v5772_v50 = vrot.slane %v12052_v32, %v9521_v11 }
0x1b0f   : > { %v5704_v3 = vpop.xlane.xlu0 %5703 }
0x1b10   : > { %9171 = vrsqrt.f32 %v5723_v16  ;;  %v5717_v38 = vmul.f32 0.03125, %v5704_v3 }
0x1b12   : > { %v9168_v12 = vpop.eup %9167  ;;  %v5724_v18 = vadd.f32 1e-06, %v5717_v38 }
0x1b13   : > { %v5735_v35 = vmul.f32 %v9168_v12, %v11921_v42  ;;  %v5707_v55 = vpop.xlane.xlu1 %5706 }
0x1b14   : > { %9173 = vrsqrt.f32 %v5724_v18  ;;  %v5718_v53 = vmul.f32 0.03125, %v5707_v55 }
0x1b15   : > { %v5746_v15 = vmul.f32 %v5745_v49, %v5735_v35 }
0x1b16   : > { %v9170_v45 = vpop.eup %9169  ;;  %v5725_v60 = vadd.f32 1e-06, %v5718_v53 }
0x1b17   : > { %v11976_v2 = vadd.f32 %v5756_v30, %v5746_v15  ;;  %v5736_v57 = vmul.f32 %v9170_v45, %v11925_v29 }
0x1b18   : > { %9175 = vrsqrt.f32 %v5725_v60  ;;  %v5710_v33 = vpop.xlane.xlu0 %5709 }
0x1b19   : > { %v5719_v14 = vmul.f32 0.03125, %v5710_v33  ;;  %8162 = vmatmul.mubr.msk.f32.vlgmr.msra.gmra.mrb[166].mxu1 %vm688_vm8, %v11976_v2  ;;  %v5747_v10 = vmul.f32 %v5745_v49, %v5736_v57 }
0x1b1a   : > { %v9172_v13 = vpop.eup %9171  ;;  %8164 = vmatprep.mubr.msk.f32.mxu1 %vm9288_vm10, %v12305_v54 }
0x1b1b   : > { %v5726_v42 = vadd.f32 1e-06, %v5719_v14  ;;  %v11983_v21 = vadd.f32 %v5756_v30, %v5747_v10  ;;  %v5737_v23 = vmul.f32 %v9172_v13, %v11930_v34 }
0x1b1d   : > { %9177 = vrsqrt.f32 %v5726_v42  ;;  %8165 = vmatmul.mubr.msk.f32.gmra.mrb[168].mxu1 %vm688_vm8, %v11983_v21  ;;  %v5748_v29 = vmul.f32 %v5745_v49, %v5737_v23 }
0x1b1e   : > { %v9174_v25 = vpop.eup %9173  ;;  %8167 = vmatprep.mubr.msk.f32.mxu1 %vm9288_vm10, %v12305_v54 }
0x1b1f   : > { %v5713_v9 = vpop.xlane.xlu1 %5712  ;;  %v11990_v43 = vadd.f32 %v5756_v30, %v5748_v29  ;;  %v5738_v7 = vmul.f32 %v9174_v25, %v11935_v47 }
0x1b20   : > { %v5720_v6 = vmul.f32 0.03125, %v5713_v9 }
0x1b21   : > { %8168 = vmatmul.mubr.msk.f32.gmra.mrb[170].mxu1 %vm688_vm8, %v11990_v43  ;;  %v5749_v56 = vmul.f32 %v5745_v49, %v5738_v7 }
0x1b22   : > { %v9176_v34 = vpop.eup %9175  ;;  %v5727_v62 = vadd.f32 1e-06, %v5720_v6  ;;  %8170 = vmatprep.mubr.msk.f32.mxu1 %vm9288_vm10, %v12305_v54 }
0x1b23   : > { %v11997_v31 = vadd.f32 %v5756_v30, %v5749_v56  ;;  %v5739_v52 = vmul.f32 %v9176_v34, %v11940_v37 }
0x1b24   : > { %9179 = vrsqrt.f32 %v5727_v62 }
0x1b25   : > { %8171 = vmatmul.mubr.msk.f32.gmra.mrb[172].mxu1 %vm688_vm8, %v11997_v31  ;;  %v5750_v63 = vmul.f32 %v5745_v49, %v5739_v52 }
0x1b26   : > { %8173 = vmatprep.mubr.msk.f32.mxu1 %vm9288_vm10, %v12305_v54 }
0x1b27   : > { %v9178_v47 = vpop.eup %9177  ;;  %v12004_v48 = vadd.f32 %v5756_v30, %v5750_v63 }
0x1b28   : > { %v5740_v39 = vmul.f32 %v9178_v47, %v11946_v61 }
0x1b29   : > { %8174 = vmatmul.mubr.msk.f32.gmra.mrb[174].mxu1 %vm688_vm8, %v12004_v48 }
0x1b2a   : > { %8176 = vmatprep.mubr.msk.f32.mxu1 %vm9288_vm10, %v12305_v54  ;;  %v5751_v37 = vmul.f32 %v5745_v49, %v5740_v39 }
0x1b2c   : > { %v12011_v24 = vadd.f32 %v5756_v30, %v5751_v37 }
0x1b2e   : > { %v9180_v27 = vpop.eup %9179  ;;  %8177 = vmatmul.mubr.msk.f32.gmra.mrb[176].mxu1 %vm688_vm8, %v12011_v24 }
0x1b2f   : > { %8179 = vmatprep.mubr.msk.f32.mxu1 %vm9288_vm10, %v12305_v54  ;;  %v5741_v36 = vmul.f32 %v9180_v27, %v11951_v40  ;;  %v6897_v40 = vld [vmem:[%s12263_s12 + $0x50] sm:$0xff] }
0x1b30   : > { %v8542_v20 = vpack.c.bf16 %v6898_v59, %v6897_v40 }
0x1b31   : > { %v5752_v22 = vmul.f32 %v5745_v49, %v5741_v36 }
0x1b32   : > { %8543 = vmatpush3.bf16.msra.mxu0 %v8542_v20 }
0x1b33   : > { %v12018_v61 = vadd.f32 %v5756_v30, %v5752_v22  ;;  %8544 = vmatprep.subr.bf16.mxu0 %v12306_v0 }
0x1b35   : > { %8180 = vmatmul.mubr.msk.f32.gmra.mrb[178].mxu1 %vm688_vm8, %v12018_v61 }
0x1b36   : > { %8546 = vmatpush3.bf16.msra.mxu0 %v8545_v4 }
0x1b37   : > { %8547 = vmatprep.subr.bf16.mxu0 %v12306_v0 }
0x1b3a   : > { %8549 = vmatpush3.bf16.msra.mxu0 %v8548_v19 }
0x1bec   : > { %v5860_v16 = vpop.f32.mrb[166].mxu1 }
0x1bed   : > { %v5861_v0 = vadd.f32 %v5860_v16, %v5772_v50  ;;  %v8163_v3 = vpop.f32.mrb[167].mxu1 }
0x1bef   : > { %v5901_v38 = vmul.f32 0.70710677, %v5861_v0  ;;  %v5894_v57 = vmul.f32 0.5, %v5861_v0 }
0x1bf0   : > { %v5865_v8 = vpop.f32.mrb[168].mxu1 }
0x1bf1   : > { %9181 = verf.f32 %v5901_v38  ;;  %v5866_v49 = vadd.f32 %v5865_v8, %v5772_v50  ;;  %v8166_v12 = vpop.f32.mrb[169].mxu1  ;;  %v5941_v38 = vrot.slane %v12052_v32, %v9572_v46 }
0x1bf3   : > { %v5902_v18 = vmul.f32 0.70710677, %v5866_v49  ;;  %v5895_v25 = vmul.f32 0.5, %v5866_v49 }
0x1bf4   : > { %v5870_v41 = vpop.f32.mrb[170].mxu1 }
0x1bf5   : > { %9183 = verf.f32 %v5902_v18  ;;  %v5871_v30 = vadd.f32 %v5870_v41, %v5772_v50  ;;  %v8169_v35 = vpop.f32.mrb[171].mxu1 }
0x1bf7   : > { %v5903_v55 = vmul.f32 0.70710677, %v5871_v30  ;;  %v5896_v52 = vmul.f32 0.5, %v5871_v30 }
0x1bf8   : > { %v5875_v53 = vpop.f32.mrb[172].mxu1 }
0x1bf9   : > { %9185 = verf.f32 %v5903_v55  ;;  %v5876_v15 = vadd.f32 %v5875_v53, %v5772_v50  ;;  %v8172_v45 = vpop.f32.mrb[173].mxu1 }
0x1bfb   : > { %v9182_v60 = vpop.eup %9181  ;;  %v5904_v11 = vmul.f32 0.70710677, %v5876_v15  ;;  %v5897_v27 = vmul.f32 0.5, %v5876_v15 }
0x1bfc   : > { %v5915_v33 = vadd.f32 1.0, %v9182_v60  ;;  %v5880_v14 = vpop.f32.mrb[174].mxu1 }
0x1bfd   : > { %9187 = verf.f32 %v5904_v11  ;;  %v5881_v10 = vadd.f32 %v5880_v14, %v5772_v50  ;;  %v8175_v13 = vpop.f32.mrb[175].mxu1 }
0x1bfe   : > { %v5922_v42 = vmul.f32 %v5915_v33, %v5894_v57 }
0x1bff   : > { %v9184_v23 = vpop.eup %9183  ;;  %v5905_v29 = vmul.f32 0.70710677, %v5881_v10  ;;  %v5898_v20 = vmul.f32 0.5, %v5881_v10 }
0x1c00   : > { %v5916_v9 = vadd.f32 1.0, %v9184_v23  ;;  %8199 = vmatmul.mubr.msk.f32.vlgmr.msra.gmra.mrb[166].mxu0 %vm3548_vm1, %v5922_v42 }
0x1c01   : > { %9189 = verf.f32 %v5905_v29  ;;  %v5885_v7 = vpop.f32.mrb[176].mxu1  ;;  %8201 = vmatprep.mubr.msk.f32.mxu0 %vm9288_vm10, %v12305_v54 }
0x1c02   : > { %v5923_v6 = vmul.f32 %v5916_v9, %v5895_v25  ;;  %v5886_v56 = vadd.f32 %v5885_v7, %v5772_v50  ;;  %v8178_v34 = vpop.f32.mrb[177].mxu1 }
0x1c03   : > { %v9186_v62 = vpop.eup %9185 }
0x1c04   : > { %v5917_v63 = vadd.f32 1.0, %v9186_v62  ;;  %v5906_v47 = vmul.f32 0.70710677, %v5886_v56  ;;  %8202 = vmatmul.mubr.msk.f32.gmra.mrb[168].mxu0 %vm3548_vm1, %v5923_v6  ;;  %v5899_v28 = vmul.f32 0.5, %v5886_v56 }
0x1c05   : > { %8204 = vmatprep.mubr.msk.f32.mxu0 %vm9288_vm10, %v12305_v54 }
0x1c06   : > { %v5924_v39 = vmul.f32 %v5917_v63, %v5896_v52  ;;  %9191 = verf.f32 %v5906_v47 }
0x1c07   : > { %v9188_v37 = vpop.eup %9187 }
0x1c08   : > { %v5918_v36 = vadd.f32 1.0, %v9188_v37  ;;  %v5890_v22 = vpop.f32.mrb[178].mxu1  ;;  %8205 = vmatmul.mubr.msk.f32.gmra.mrb[170].mxu0 %vm3548_vm1, %v5924_v39 }
0x1c09   : > { %v5891_v51 = vadd.f32 %v5890_v22, %v5772_v50  ;;  %v8181_v44 = vpop.f32.mrb[179].mxu1  ;;  %8207 = vmatprep.mubr.msk.f32.mxu0 %vm9288_vm10, %v12305_v54 }
0x1c0a   : > { %v5925_v58 = vmul.f32 %v5918_v36, %v5897_v27 }
0x1c0b   : > { %v9190_v40 = vpop.eup %9189  ;;  %v5907_v59 = vmul.f32 0.70710677, %v5891_v51  ;;  %v5900_v16 = vmul.f32 0.5, %v5891_v51 }
0x1c0c   : > { %v5919_v5 = vadd.f32 1.0, %v9190_v40  ;;  %8208 = vmatmul.mubr.msk.f32.gmra.mrb[172].mxu0 %vm3548_vm1, %v5925_v58 }
0x1c0d   : > { %9193 = verf.f32 %v5907_v59  ;;  %8210 = vmatprep.mubr.msk.f32.mxu0 %vm9288_vm10, %v12305_v54 }
0x1c0e   : > { %v5926_v26 = vmul.f32 %v5919_v5, %v5898_v20 }
0x1c10   : > { %v9192_v4 = vpop.eup %9191  ;;  %8211 = vmatmul.mubr.msk.f32.gmra.mrb[174].mxu0 %vm3548_vm1, %v5926_v26 }
0x1c11   : > { %v5920_v17 = vadd.f32 1.0, %v9192_v4  ;;  %8213 = vmatprep.mubr.msk.f32.mxu0 %vm9288_vm10, %v12305_v54 }
0x1c13   : > { %v5927_v19 = vmul.f32 %v5920_v17, %v5899_v28 }
0x1c15   : > { %8214 = vmatmul.mubr.msk.f32.gmra.mrb[176].mxu0 %vm3548_vm1, %v5927_v19 }
0x1c16   : > { %8216 = vmatprep.mubr.msk.f32.mxu0 %vm9288_vm10, %v12305_v54 }
0x1c17   : > { %v9194_v50 = vpop.eup %9193 }
0x1c18   : > { %v5921_v0 = vadd.f32 1.0, %v9194_v50 }
0x1c1a   : > { %v5928_v3 = vmul.f32 %v5921_v0, %v5900_v16 }
0x1c1c   : > { %8217 = vmatmul.mubr.msk.f32.gmra.mrb[178].mxu0 %vm3548_vm1, %v5928_v3 }
0x1cd3   : > { %v6029_v8 = vpop.f32.mrb[166].mxu0 }
0x1cd4   : > { %v6030_v49 = vadd.f32 %v6029_v8, %v5941_v38  ;;  %v8200_v12 = vpop.f32.mrb[167].mxu0 }
0x1cd6   : > { %v6063_v18 = vadd.f32 %v6030_v49, %v11976_v2 }
0x1cd7   : > { %v6034_v41 = vpop.f32.mrb[168].mxu0 }
0x1cd8   : > { %v6035_v30 = vadd.f32 %v6034_v41, %v5941_v38  ;;  %v8203_v35 = vpop.f32.mrb[169].mxu0  ;;  %v6070_v55 = vsel %vm688_vm8, %v6063_v18, 0.0 }
0x1cd9   : > { %6071 = vadd.xlane.f32.xlu0 %v6070_v55 }
0x1cda   : > { %v6064_v54 = vadd.f32 %v6035_v30, %v11983_v21 }
0x1cdb   : > { %v6039_v53 = vpop.f32.mrb[170].mxu0 }
0x1cdc   : > { %v6040_v15 = vadd.f32 %v6039_v53, %v5941_v38  ;;  %v8206_v45 = vpop.f32.mrb[171].mxu0  ;;  %v6073_v60 = vsel %vm688_vm8, %v6064_v54, 0.0  ;;  %v6922_v53 = vld [vmem:[%s12254_s3 + $0x40] sm:$0xff] }
0x1cdd   : > { %6074 = vadd.xlane.f32.xlu1 %v6073_v60  ;;  %8273 = vmatprep.mubr.msk.f32.mxu0 %vm2140_vm15, %v6922_v53  ;;  %v6916_v53 = vld [vmem:[%s12254_s3 + $0x30] sm:$0xff] }
0x1cde   : > { %v6065_v46 = vadd.f32 %v6040_v15, %v11990_v43 }
0x1cdf   : > { %v6044_v11 = vpop.f32.mrb[172].mxu0 }
0x1ce0   : > { %v6045_v57 = vadd.f32 %v6044_v11, %v5941_v38  ;;  %v8209_v33 = vpop.f32.mrb[173].mxu0  ;;  %v6076_v2 = vsel %vm688_vm8, %v6065_v46, 0.0 }
0x1ce1   : > { %6077 = vadd.xlane.f32.xlu0 %v6076_v2 }
0x1ce2   : > { %v6066_v14 = vadd.f32 %v6045_v57, %v11997_v31 }
0x1ce3   : > { %v6049_v10 = vpop.f32.mrb[174].mxu0 }
0x1ce4   : > { %v6050_v13 = vadd.f32 %v6049_v10, %v5941_v38  ;;  %v8212_v42 = vpop.f32.mrb[175].mxu0  ;;  %v6079_v21 = vsel %vm688_vm8, %v6066_v14, 0.0 }
0x1ce5   : > { %6080 = vadd.xlane.f32.xlu1 %v6079_v21  ;;  %v6164_v42 = vrot.slane %v12052_v32, %v12308_v1 }
0x1ce6   : > { %v6067_v23 = vadd.f32 %v6050_v13, %v12004_v48 }
0x1ce8   : > { %v6054_v29 = vpop.f32.mrb[176].mxu0  ;;  %v6082_v25 = vsel %vm688_vm8, %v6067_v23, 0.0 }
0x1ce9   : > { %v6055_v43 = vadd.f32 %v6054_v29, %v5941_v38  ;;  %6083 = vadd.xlane.f32.xlu0 %v6082_v25  ;;  %v8215_v9 = vpop.f32.mrb[177].mxu0  ;;  %v12321_v29 = vld [vmem:[#allocation7_spill] sm:$0xff] }
0x1cea   : > { %v6175_v25 = vrot.slane %v12052_v32, %v12321_v29 }
0x1ceb   : > { %v6068_v7 = vadd.f32 %v6055_v43, %v12011_v24 }
0x1ced   : > { %v6085_v6 = vsel %vm688_vm8, %v6068_v7, 0.0 }
0x1cee   : > { %6086 = vadd.xlane.f32.xlu1 %v6085_v6 }
0x1cef   : > { %v6059_v31 = vpop.f32.mrb[178].mxu0 }
0x1cf0   : > { %v6060_v56 = vadd.f32 %v6059_v31, %v5941_v38  ;;  %v8218_v34 = vpop.f32.mrb[179].mxu0 }
0x1cf2   : > { %v6069_v62 = vadd.f32 %v6060_v56, %v12018_v61 }
0x1cf4   : > { %v6088_v52 = vsel %vm688_vm8, %v6069_v62, 0.0 }
0x1cf5   : > { %6089 = vadd.xlane.f32.xlu0 %v6088_v52 }
0x1d66   : > { %v6072_v48 = vpop.xlane.xlu0 %6071 }
0x1d67   : > { %v6091_v63 = vmul.f32 0.03125, %v6072_v48 }
0x1d69   : > { %v6098_v47 = vsub.f32 %v6063_v18, %v6091_v63 }
0x1d6a   : > { %v6075_v39 = vpop.xlane.xlu1 %6074 }
0x1d6b   : > { %v6092_v37 = vmul.f32 0.03125, %v6075_v39  ;;  %v6105_v27 = vmul.f32 %v6098_v47, %v6098_v47 }
0x1d6d   : > { %v12091_v36 = vsub.f32 %v6064_v54, %v6092_v37  ;;  %v6112_v24 = vsel %vm688_vm8, %v6105_v27, 0.0  ;;  %v6183_v54 = vld [vmem:[%s12254_s3] sm:$0xff] }
0x1d6e   : > { %v6078_v22 = vpop.xlane.xlu0 %6077  ;;  %6113 = vadd.xlane.f32.xlu1 %v6112_v24  ;;  %8233 = vmatprep.mubr.msk.f32.mxu1 %vm2140_vm15, %v6183_v54  ;;  %v6915_v54 = vld [vmem:[%s12254_s3 + $0x28] sm:$0xff] }
0x1d6f   : > { %v6093_v51 = vmul.f32 0.03125, %v6078_v22  ;;  %v6106_v44 = vmul.f32 %v12091_v36, %v12091_v36 }
0x1d71   : > { %v12096_v61 = vsub.f32 %v6065_v46, %v6093_v51  ;;  %v6115_v58 = vsel %vm688_vm8, %v6106_v44, 0.0 }
0x1d72   : > { %v6081_v40 = vpop.xlane.xlu1 %6080  ;;  %6116 = vadd.xlane.f32.xlu0 %v6115_v58 }
0x1d73   : > { %v6094_v59 = vmul.f32 0.03125, %v6081_v40  ;;  %v6107_v20 = vmul.f32 %v12096_v61, %v12096_v61 }
0x1d75   : > { %v12101_v5 = vsub.f32 %v6066_v14, %v6094_v59  ;;  %v6118_v26 = vsel %vm688_vm8, %v6107_v20, 0.0 }
0x1d76   : > { %v6084_v4 = vpop.xlane.xlu0 %6083  ;;  %6119 = vadd.xlane.f32.xlu1 %v6118_v26 }
0x1d77   : > { %v6095_v28 = vmul.f32 0.03125, %v6084_v4  ;;  %v6108_v17 = vmul.f32 %v12101_v5, %v12101_v5 }
0x1d79   : > { %v12106_v19 = vsub.f32 %v6067_v23, %v6095_v28  ;;  %v6121_v50 = vsel %vm688_vm8, %v6108_v17, 0.0 }
0x1d7a   : > { %6122 = vadd.xlane.f32.xlu0 %v6121_v50 }
0x1d7b   : > { %v6087_v16 = vpop.xlane.xlu1 %6086  ;;  %v6109_v0 = vmul.f32 %v12106_v19, %v12106_v19 }
0x1d7c   : > { %v6096_v3 = vmul.f32 0.03125, %v6087_v16 }
0x1d7d   : > { %v6124_v38 = vsel %vm688_vm8, %v6109_v0, 0.0 }
0x1d7e   : > { %v12112_v8 = vsub.f32 %v6068_v7, %v6096_v3  ;;  %6125 = vadd.xlane.f32.xlu1 %v6124_v38 }
0x1d80   : > { %v6110_v49 = vmul.f32 %v12112_v8, %v12112_v8 }
0x1d82   : > { %v6090_v12 = vpop.xlane.xlu0 %6089  ;;  %v6127_v18 = vsel %vm688_vm8, %v6110_v49, 0.0 }
0x1d83   : > { %v6097_v41 = vmul.f32 0.03125, %v6090_v12  ;;  %6128 = vadd.xlane.f32.xlu0 %v6127_v18  ;;  %v6184_v12 = vld [vmem:[%s12254_s3 + $0x8] sm:$0xff] }
0x1d84   : > { %v6923_v18 = vld [vmem:[%s12254_s3 + $0x48] sm:$0xff] }
0x1d85   : > { %v12117_v30 = vsub.f32 %v6069_v62, %v6097_v41  ;;  %v6924_v41 = vld [vmem:[%s12254_s3 + $0x50] sm:$0xff] }
0x1d87   : > { %v6111_v35 = vmul.f32 %v12117_v30, %v12117_v30 }
0x1d89   : > { %v6130_v55 = vsel %vm688_vm8, %v6111_v35, 0.0  ;;  %v6914_v35 = vld [vmem:[%s12254_s3 + $0x20] sm:$0xff] }
0x1d8a   : > { %6131 = vadd.xlane.f32.xlu1 %v6130_v55  ;;  %v6925_v55 = vld [vmem:[%s12254_s3 + $0x58] sm:$0xff] }
0x1dfb   : > { %v6114_v15 = vpop.xlane.xlu1 %6113 }
0x1dfc   : > { %v6133_v45 = vmul.f32 0.03125, %v6114_v15  ;;  %v6917_v15 = vld [vmem:[%s12254_s3 + $0x38] sm:$0xff] }
0x1dfe   : > { %v6140_v60 = vadd.f32 1e-06, %v6133_v45 }
0x1dff   : > { %v6117_v46 = vpop.xlane.xlu0 %6116 }
0x1e00   : > { %9195 = vrsqrt.f32 %v6140_v60  ;;  %v6134_v11 = vmul.f32 0.03125, %v6117_v46 }
0x1e02   : > { %v6141_v57 = vadd.f32 1e-06, %v6134_v11 }
0x1e03   : > { %v6120_v33 = vpop.xlane.xlu1 %6119 }
0x1e04   : > { %9197 = vrsqrt.f32 %v6141_v57  ;;  %v6135_v2 = vmul.f32 0.03125, %v6120_v33 }
0x1e06   : > { %v6142_v14 = vadd.f32 1e-06, %v6135_v2 }
0x1e07   : > { %v6123_v10 = vpop.xlane.xlu0 %6122 }
0x1e08   : > { %9199 = vrsqrt.f32 %v6142_v14  ;;  %v6136_v13 = vmul.f32 0.03125, %v6123_v10 }
0x1e0a   : > { %v9196_v21 = vpop.eup %9195  ;;  %v6143_v23 = vadd.f32 1e-06, %v6136_v13 }
0x1e0b   : > { %v6154_v43 = vmul.f32 %v9196_v21, %v6098_v47  ;;  %v6126_v9 = vpop.xlane.xlu1 %6125 }
0x1e0c   : > { %9201 = vrsqrt.f32 %v6143_v23  ;;  %v6137_v7 = vmul.f32 0.03125, %v6126_v9 }
0x1e0d   : > { %v6165_v6 = vmul.f32 %v6164_v42, %v6154_v43 }
0x1e0e   : > { %v9198_v31 = vpop.eup %9197  ;;  %v6144_v56 = vadd.f32 1e-06, %v6137_v7 }
0x1e0f   : > { %v6176_v34 = vadd.f32 %v6175_v25, %v6165_v6  ;;  %v6155_v62 = vmul.f32 %v9198_v31, %v12091_v36 }
0x1e10   : > { %9203 = vrsqrt.f32 %v6144_v56  ;;  %v6129_v52 = vpop.xlane.xlu0 %6128 }
0x1e11   : > { %v6166_v48 = vmul.f32 %v6164_v42, %v6155_v62  ;;  %v6138_v63 = vmul.f32 0.03125, %v6129_v52 }
0x1e12   : > { %v9200_v1 = vpop.eup %9199 }
0x1e13   : > { %v6177_v39 = vadd.f32 %v6175_v25, %v6166_v48  ;;  %v6156_v37 = vmul.f32 %v9200_v1, %v12096_v61  ;;  %v6145_v27 = vadd.f32 1e-06, %v6138_v63 }
0x1e15   : > { %v6167_v32 = vmul.f32 %v6164_v42, %v6156_v37  ;;  %9205 = vrsqrt.f32 %v6145_v27  ;;  %v8550_v47 = vpack.c.bf16 %v6177_v39, %v6176_v34 }
0x1e16   : > { %v9202_v24 = vpop.eup %9201 }
0x1e17   : > { %v6178_v22 = vadd.f32 %v6175_v25, %v6167_v32  ;;  %v6157_v51 = vmul.f32 %v9202_v24, %v12101_v5  ;;  %v6132_v44 = vpop.xlane.xlu1 %6131  ;;  %8551 = vmatprep.subr.bf16.mxu1 %v8550_v47  ;;  %8575 = vmatprep.subr.bf16.mxu0 %v8550_v47 }
0x1e18   : > { %v6139_v36 = vmul.f32 0.03125, %v6132_v44  ;;  %8553 = vmatpush3.bf16.msra.mxu1 %v8550_v47  ;;  %8577 = vmatpush3.bf16.msra.mxu0 %v8550_v47 }
0x1e19   : > { %v6168_v58 = vmul.f32 %v6164_v42, %v6157_v51 }
0x1e1a   : > { %v9204_v40 = vpop.eup %9203  ;;  %v6146_v59 = vadd.f32 1e-06, %v6139_v36 }
0x1e1b   : > { %v6179_v20 = vadd.f32 %v6175_v25, %v6168_v58  ;;  %v6158_v61 = vmul.f32 %v9204_v40, %v12106_v19 }
0x1e1c   : > { %9207 = vrsqrt.f32 %v6146_v59 }
0x1e1d   : > { %v6169_v26 = vmul.f32 %v6164_v42, %v6158_v61  ;;  %v8554_v4 = vpack.c.bf16 %v6179_v20, %v6178_v22 }
0x1e1f   : > { %v9206_v28 = vpop.eup %9205  ;;  %v6180_v17 = vadd.f32 %v6175_v25, %v6169_v26  ;;  %8555 = vmatprep.subr.bf16.mxu1 %v8554_v4  ;;  %8579 = vmatprep.subr.bf16.mxu0 %v8554_v4 }
0x1e20   : > { %v6159_v5 = vmul.f32 %v9206_v28, %v12112_v8  ;;  %8557 = vmatpush3.bf16.msra.mxu1 %v8554_v4  ;;  %8581 = vmatpush3.bf16.msra.mxu0 %v8554_v4  ;;  %v6185_v8 = vld [vmem:[%s12254_s3 + $0x10] sm:$0xff] }
0x1e22   : > { %v6170_v50 = vmul.f32 %v6164_v42, %v6159_v5 }
0x1e24   : > { %v6181_v16 = vadd.f32 %v6175_v25, %v6170_v50 }
0x1e26   : > { %v9208_v0 = vpop.eup %9207  ;;  %v8558_v3 = vpack.c.bf16 %v6181_v16, %v6180_v17 }
0x1e27   : > { %v6160_v38 = vmul.f32 %v9208_v0, %v12117_v30  ;;  %v6186_v30 = vld [vmem:[%s12254_s3 + $0x18] sm:$0xff] }
0x1e28   : > { %8559 = vmatprep.subr.bf16.mxu1 %v8558_v3  ;;  %8583 = vmatprep.subr.bf16.mxu0 %v8558_v3 }
0x1e29   : > { %v6171_v19 = vmul.f32 %v6164_v42, %v6160_v38  ;;  %8561 = vmatpush3.bf16.msra.mxu1 %v8558_v3  ;;  %8585 = vmatpush3.bf16.msra.mxu0 %v8558_v3 }
0x1e2b   : > { %v6182_v49 = vadd.f32 %v6175_v25, %v6171_v19 }
0x1e2d   : > { %8231 = vmatprep.subr.mxu1 %v6182_v49  ;;  %8271 = vmatprep.subr.mxu0 %v6182_v49 }
0x1e2e   : > { %8232 = vmatpush3.msra.mxu1 %v6182_v49  ;;  %8272 = vmatpush3.msra.mxu0 %v6182_v49 }
0x1e2f   : > { %8563 = vmatprep.subr.bf16.mxu1 %v8550_v47  ;;  %8234 = vmatmul.mubr.msk.f32.vlgmr.msra.gmra.mrb[180].mxu1 %vm2140_vm15, %v6184_v12 }
0x1e30   : > { %8565 = vmatpush3.bf16.msra.mxu1 %v8550_v47  ;;  %8236 = vmatprep.mubr.msk.f32.mxu1 %vm2140_vm15, %v6185_v8 }
0x1e31   : > { %8567 = vmatprep.subr.bf16.mxu1 %v8554_v4  ;;  %8274 = vmatmul.mubr.msk.f32.vlgmr.msra.gmra.mrb[180].mxu0 %vm2140_vm15, %v6923_v18 }
0x1e32   : > { %8276 = vmatprep.mubr.msk.f32.mxu0 %vm2140_vm15, %v6924_v41 }
0x1e33   : > { %8237 = vmatmul.mubr.msk.f32.gmra.mrb[182].mxu1 %vm2140_vm15, %v6186_v30 }
0x1e34   : > { %8569 = vmatpush3.bf16.msra.mxu1 %v8554_v4  ;;  %8253 = vmatprep.mubr.msk.f32.mxu1 %vm2140_vm15, %v6914_v35 }
0x1e35   : > { %8571 = vmatprep.subr.bf16.mxu1 %v8558_v3  ;;  %8277 = vmatmul.mubr.msk.f32.gmra.mrb[182].mxu0 %vm2140_vm15, %v6925_v55 }
0x1e38   : > { %8573 = vmatpush3.bf16.msra.mxu1 %v8558_v3 }
0x1e39   : > { %8251 = vmatprep.subr.mxu1 %v6182_v49 }
0x1e3c   : > { %8252 = vmatpush3.msra.mxu1 %v6182_v49 }
0x1e3d   : > { %8254 = vmatmul.mubr.msk.f32.vlgmr.msra.gmra.mrb[184].mxu1 %vm2140_vm15, %v6915_v54 }
0x1e3e   : > { %8256 = vmatprep.mubr.msk.f32.mxu1 %vm2140_vm15, %v6916_v53 }
0x1e41   : > { %8257 = vmatmul.mubr.msk.f32.gmra.mrb[186].mxu1 %vm2140_vm15, %v6917_v15 }
0x1f02   : > { %v8235_v45 = vpop.f32.mrb[180].mxu1 }
0x1f03   : > { %v6265_v60 = vpop.f32.mrb[181].mxu1 }
0x1f04   : > { %v8275_v46 = vpop.f32.mrb[180].mxu0 }
0x1f05   : > { %v6469_v11 = vpop.f32.mrb[181].mxu0  ;;  %6510 = vrot.lane.b32.xlu0 %v8275_v46, %s12316_s30 }
0x1f06   : > { %6508 = vrot.lane.b32.xlu1 %v6469_v11, %s12316_s30  ;;  %v8238_v57 = vpop.f32.mrb[182].mxu1 }
0x1f07   : > { %v6275_v33 = vpop.f32.mrb[183].mxu1 }
0x1f08   : > { %v8278_v2 = vpop.f32.mrb[182].mxu0 }
0x1f09   : > { %v6479_v14 = vpop.f32.mrb[183].mxu0 }
0x1f10   : > { %v8255_v10 = vpop.f32.mrb[184].mxu1 }
0x1f11   : > { %6494 = vrot.lane.b32.xlu1 %v8255_v10, %s9296_s27  ;;  %v6367_v13 = vpop.f32.mrb[185].mxu1 }
0x1f12   : > { %6492 = vrot.lane.b32.xlu0 %v6367_v13, %s9296_s27 }
0x1f14   : > { %v8258_v42 = vpop.f32.mrb[186].mxu1 }
0x1f15   : > { %v6377_v21 = vpop.f32.mrb[187].mxu1 }
0x1f16   : > { %6498 = vrot.lane.b32.xlu0 %v8258_v42, %s9296_s27  ;;  %6496 = vrot.lane.b32.xlu1 %v6377_v21, %s9296_s27 }
0x1f1a   : > { %6514 = vrot.lane.b32.xlu0 %v8278_v2, %s12316_s30  ;;  %6512 = vrot.lane.b32.xlu1 %v6479_v14, %s12316_s30  ;;  %s450_s30 = scalar_lea.vmem [#allocation2], %s6629_s15  ;;  %s9297_s15 = smov [#allocation2]  }
0x1f1b   : > { %s6551_s24 = sshll.u32 %s450_s30, 4  ;;  %s9222_s0 = sshll.u32 %s9297_s15, 4  ;;  %s12194_s24 = int_to_ptr.vmem [resolvable:$true] %s6551_s24  ;;  %s9223_s0 = int_to_ptr.vmem [resolvable:$false] %s9222_s0 }
0x1f1c   : > { %s9218_s27 = scalar_lea.vmem %s12194_s24, 512  ;;  %s9224_s20 = scalar_lea.vmem %s9223_s0, 1024 }
0x1f1d   : > { %p9219_p11 = scmp.ne.s32.totalorder %s12194_s24, %s9218_s27  ;;  %p9225_p0 = scmp.lt.s32.totalorder %s12194_s24, %s9223_s0 }
0x1f1e   : > { %p9226_p1 = scmp.lt.s32.totalorder %s9224_s20, %s9218_s27 }
0x1f1f   : > { %p9220_p12 = pnand %p9219_p11, %p9407_p5 }
0x1f20   : > { %p9227_p2 = por %p9226_p1, %p9225_p0 }
0x1f21   : > { %p9221_p13 = pneg %p9220_p12 }
0x1f23   : > { %p9228_p3 = pnand %p9227_p2, %p9221_p13 }
0x1f77   : > { %v6511_v29 = vpop.permute.xlu0 %6510 }
0x1f78   : > { %v6509_v23 = vpop.permute.xlu1 %6508 }
0x1f83   : > { %v6495_v25 = vpop.permute.xlu1 %6494 }
0x1f84   : > { %v6521_v43 = vsel %vm688_vm8, %v8235_v45, %v6495_v25  ;;  %v6493_v9 = vpop.permute.xlu0 %6492 }
0x1f85   : > { %v6525_v7 = vsel %vm3548_vm1, %v6521_v43, %v6511_v29  ;;  %v6520_v6 = vsel %vm688_vm8, %v6265_v60, %v6493_v9 }
0x1f86   : > { %v6530_v31 = vsel %vm6528_vm2, %v6525_v7, 0.0  ;;  %v6524_v56 = vsel %vm3548_vm1, %v6520_v6, %v6509_v23 }
0x1f87   : > { %6534 = vst [vmem:[%s450_s30 + $0x8] sm:$0xff] %v6530_v31  ;;  %v6529_v34 = vsel %vm6528_vm2, %v6524_v56, 0.0 }
0x1f88   : > { %6533 = vst [vmem:[%s450_s30] sm:$0xff] %v6529_v34  ;;  %v6499_v62 = vpop.permute.xlu0 %6498  ;;  %v6497_v52 = vpop.permute.xlu1 %6496 }
0x1f89   : > { %v6523_v48 = vsel %vm688_vm8, %v8238_v57, %v6499_v62  ;;  %v6522_v63 = vsel %vm688_vm8, %v6275_v33, %v6497_v52 }
0x1f8c   : > { %v6515_v1 = vpop.permute.xlu0 %6514  ;;  %v6513_v39 = vpop.permute.xlu1 %6512 }
0x1f8d   : > { %v6527_v37 = vsel %vm3548_vm1, %v6523_v48, %v6515_v1  ;;  %v6526_v27 = vsel %vm3548_vm1, %v6522_v63, %v6513_v39 }
0x1f8e   : > { %v6532_v32 = vsel %vm6528_vm2, %v6527_v37, 0.0  ;;  %v6531_v47 = vsel %vm6528_vm2, %v6526_v27, 0.0 }
0x1f8f   : > { %6536 = vst [vmem:[%s450_s30 + $0x18] sm:$0xff] %v6532_v32  ;;  %6535 = vst [vmem:[%s450_s30 + $0x10] sm:$0xff] %v6531_v47 }
0x1f90   : > { %9231 = shalt.err (!%p9228_p3)
}
0x1f91   : > { %s9232_s17 = scalar_lea.hbm %s12203_s29, 512  ;;  %s9236_s21 = scalar_lea.hbm %s12264_s13, 1024 }
0x1f92   : > { %p9233_p4 = scmp.ne.s32.totalorder %s12203_s29, %s9232_s17  ;;  %p9237_p9 = scmp.lt.u32.totalorder %s12203_s29, %s12264_s13 }
0x1f93   : > { %p9238_p10 = scmp.lt.u32.totalorder %s9236_s21, %s9232_s17  ;;  %p9240_p12 = scmp.lt.u32.totalorder %s9232_s17, %s12203_s29 }
0x1f94   : > { %p9234_p7 = pnand %p9233_p4, %p9407_p5 }
0x1f95   : > { %p9239_p11 = por %p9238_p10, %p9237_p9 }
0x1f96   : > { %p9235_p8 = pneg %p9234_p7 }
0x1f97   : > { %p9241_p13 = por %p9240_p12, %p9239_p11 }
0x1f99   : > { %p9242_p0 = pnand %p9241_p13, %p9235_p8 }
0x1f9b   : > { %9245 = shalt.err (!%p9242_p0)
}
0x1f9c   : > { %s9298_s27 = smov 128  }
0x1f9d   : > { %8586 = dma.vmem_to_hbm [thread:$0]  (%p9407_p5), %s12194_s24, 512, %s12203_s29, %s12209_s23, %s9298_s27, %s9298_s27, %s12307_s22  }
0x1f9e PF: > { %p8592_p1 = scmp.ge.s32.totalorder %s9280_s28, 2  ;;  %s6566_s20 = sand.u32 1, %s9268_s25  }
0x1f9f   : > { %s6567_s17 = scalar_lea.sflag [#allocation3], %s6566_s20 }
0x1fa0   : > { %p8589_p2 = pnand %p8592_p1, %p9411_p6 }
0x1fa2   : > { %9263 = dma.done.wait (!%p8589_p2), %s6567_s17, 512  }
0x1fa3   : > { %9265 = vsyncadd (!%p8589_p2), %s6567_s17, 4294966784  ;;  %s12322_s30 = sld [smem:[#allocation5_spill]]  ;;  %s12323_s27 = sld [smem:[#allocation6_spill]] }
0x1fa4   : > { %p23_p3 = scmp.ge.s32.totalorder %s9394_s14, 4   ;;  %s12324_s25 = smov %s9272_s26 }
0x1fa5   : > { %s12326_s28 = smov %s9394_s14 }
0x1fa6   :  { %25 = sbr.rel (!%p23_p3) target bundleno = 5 (0x5), region = 118 }
0x1fa9   : > { %s12325_s26 = smov %s12322_s30 }
0x1fad   :  { %6572 = vsyncpa [#allocation3], 1 }
0x1fae   :  { %6574 = vsyncpa [#allocation3 + $0x1], 1 }

</bundles_post_ra>
